<compile_context>
chip_gen: v6e
topology: v6e:2x2x1
jax: 0.10.0
libtpu: 0.0.40
codegen_flags: <defaults>
</compile_context>

<pallas_src>
import numpy as np
import jax
import jax.numpy as jnp
from jax import lax
from jax.experimental import pallas as pl
from jax.experimental.pallas import tpu as pltpu

K_PART = 4          # MixedOp.k: partial-channel factor == channel_shuffle groups
BN_EPS = 1e-5       # BatchNorm2d eps

# Horizontal tap offsets (columns) that can wrap a row in the flattened layout
# and therefore need a validity mask.
_DJ_LIST = (-4, -2, -1, 1, 2, 4)
_DJ_IDX = {dj: i for i, dj in enumerate(_DJ_LIST)}


def _pick_block_n(n, cq, cap=8):
    """Largest batch block Nb<=cap with N % Nb == 0 and (Nb*Cq) % 8 == 0."""
    for nb in range(min(n, cap), 0, -1):
        if n % nb == 0 and (nb * cq) % 8 == 0:
            return nb
    return n            # whole batch in one block (block == full dim is always legal)


def _pack_dw(ws, nb):
    """[(Cq,1,k,k)] torch-layout depthwise weights -> (len, k, k, nb*Cq, 1) taps."""
    stk = jnp.stack([jnp.transpose(w[:, 0], (1, 2, 0)) for w in ws])   # (n,k,k,Cq)
    return jnp.tile(stk, (1, 1, 1, nb))[..., None]                      # (n,k,k,nb*Cq,1)


def mixed_op_forward(x_nchw, arch_w, params, block_n_cap=8):
    """PC-DARTS MixedOp forward (stride=1).  x_nchw: (N,C,H,W); arch_w: (8,)."""
    N, C, H, W = x_nchw.shape
    assert C % K_PART == 0, "C must be divisible by k=4"
    Cq = C // K_PART
    HW = H * W
    Nb = _pick_block_n(N, Cq, block_n_cap)
    G = N // Nb
    NbCq = Nb * Cq
    bn = float(1.0 / np.sqrt(1.0 + BN_EPS))

    # flat interior offset (>= 4*W+4 and 128-aligned so the interior writes are
    # lane-aligned dense stores); buffers hold [halo | H*W image | halo]
    IOFF = ((4 * W + 4 + 127) // 128) * 128
    LA = IOFF + HW + 4 * W + 4        # zero-halo buffers (convs / avg pool)
    LC = IOFF + HW + W + 1            # -inf-halo buffer (max pool)

    x_f32 = x_nchw.astype(jnp.float32)
    xt_flat = x_f32[:, :Cq].reshape(N * Cq, HW)      # partial channels, lane-dense

    # ---- parameter packing (tiny tensors; bn + arch weights folded in) ----
    dw3p = _pack_dw([params['sep3_dw1'], params['sep3_dw2'], params['dil3_dw']], Nb)
    dw5p = _pack_dw([params['sep5_dw1'], params['sep5_dw2'], params['dil5_dw']], Nb)

    pw = lambda p: p[:, :, 0, 0]                      # (Co,Ci,1,1) -> (Co,Ci)
    eye_nb = jnp.eye(Nb, dtype=jnp.float32)
    bd = lambda m: jnp.kron(eye_nb, m)                # block-diag over the Nb images

    # fused pointwise #1: [sep3_pw1 | sep5_pw1 | (w6*dil3_pw, w7*dil5_pw)] (+bn)
    w1m = jnp.zeros((3 * NbCq, 4 * NbCq), jnp.float32)
    w1m = w1m.at[:NbCq, :NbCq].set(bd(bn * pw(params['sep3_pw1'])))
    w1m = w1m.at[NbCq:2 * NbCq, NbCq:2 * NbCq].set(bd(bn * pw(params['sep5_pw1'])))
    w1m = w1m.at[2 * NbCq:, 2 * NbCq:3 * NbCq].set(
        bd((arch_w[6] * bn) * pw(params['dil3_pw'])))
    w1m = w1m.at[2 * NbCq:, 3 * NbCq:].set(
        bd((arch_w[7] * bn) * pw(params['dil5_pw'])))

    # fused pointwise #2: second sep pw convs + skip_connect + scaled max-pool
    eye_nbcq = jnp.eye(NbCq, dtype=jnp.float32)
    w2m = jnp.concatenate([
        bd((arch_w[4] * bn) * pw(params['sep3_pw2'])),
        bd((arch_w[5] * bn) * pw(params['sep5_pw2'])),
        arch_w[3] * eye_nbcq,                        # skip_connect (Identity)
        (arch_w[1] * bn) * eye_nbcq,                 # max_pool_3x3 + BN
    ], axis=1)                                       # (NbCq, 4*NbCq)

    # avg-pool divisor (count_include_pad=False), with w[2]*bn folded in
    rc = 1.0 + (np.arange(H) > 0) + (np.arange(H) < H - 1)
    cc = 1.0 + (np.arange(W) > 0) + (np.arange(W) < W - 1)
    invcnt = jnp.asarray((1.0 / np.outer(rc, cc)).reshape(1, HW), jnp.float32)
    invcnt = invcnt * (arch_w[2] * bn)

    # column-validity masks for horizontally shifted taps in the flat layout
    col = np.arange(HW) % W
    cmnp = np.stack([((col + dj >= 0) & (col + dj < W)).astype(np.float32)
                     for dj in _DJ_LIST]).reshape(len(_DJ_LIST), 1, HW)
    colmasks = jnp.asarray(cmnp)

    def kernel(x_ref, invcnt_ref, cm_ref, dw3_ref, dw5_ref, w1_ref, w2_ref,
               out_ref, pad_a, pad_b, pad_c):
        neg_inf = float('-inf')

        # -- halo init every step: cheap (halo strips only) and "parallel"-safe --
        pad_a[:, 0:IOFF] = jnp.zeros((NbCq, IOFF), jnp.float32)
        pad_a[:, IOFF + HW:] = jnp.zeros((NbCq, LA - IOFF - HW), jnp.float32)
        pad_b[:, 0:IOFF] = jnp.zeros((NbCq, IOFF), jnp.float32)
        pad_b[:, IOFF + HW:] = jnp.zeros((NbCq, LA - IOFF - HW), jnp.float32)
        pad_c[:, 0:IOFF] = jnp.full((NbCq, IOFF), neg_inf, jnp.float32)
        pad_c[:, IOFF + HW:] = jnp.full((NbCq, LC - IOFF - HW), neg_inf, jnp.float32)

        x = x_ref[...]                                   # (NbCq, HW)
        pad_a[:, IOFF:IOFF + HW] = jnp.maximum(x, 0.0)   # relu(x), zero halo
        pad_b[:, IOFF:IOFF + HW] = x                     # raw x,   zero halo
        pad_c[:, IOFF:IOFF + HW] = x                     # raw x,   -inf halo

        def cmask(dj):
            return cm_ref[_DJ_IDX[dj]]                   # (1, HW) in {0,1}

        # ---- op1: max_pool_3x3 (pad=1, implicit -inf padding) ----
        mp = None
        for i in range(3):
            for j in range(3):
                s = IOFF + (i - 1) * W + (j - 1)
                sl = pad_c[:, s:s + HW]
                if j != 1:
                    sl = jnp.where(cmask(j - 1) > 0.5, sl, neg_inf)
                mp = sl if mp is None else jnp.maximum(mp, sl)

        # ---- op2: avg_pool_3x3 (count_include_pad=False; w2*bn is in invcnt) ----
        ap = None
        for i in range(3):
            for j in range(3):
                s = IOFF + (i - 1) * W + (j - 1)
                sl = pad_b[:, s:s + HW]
                if j != 1:
                    sl = sl * cmask(j - 1)
                ap = sl if ap is None else ap + sl
        acc = ap * invcnt_ref[...]

        # ---- depthwise conv helper (flat layout; horizontal wrap masked) ----
        def dwconv(src, wref, idx, k, dil, pad):
            r = None
            for i in range(k):
                for j in range(k):
                    dj = j * dil - pad
                    s = IOFF + (i * dil - pad) * W + dj
                    sl = src[:, s:s + HW]
                    if dj != 0:
                        sl = sl * cmask(dj)
                    term = sl * wref[idx, i, j]          # tap vector: (NbCq, 1)
                    r = term if r is None else r + term
            return r

        # ---- first depthwise stage of ops 4..7 (input = relu(x)) ----
        d_s3 = dwconv(pad_a, dw3_ref, 0, 3, 1, 1)        # sep_conv_3x3 dw #1
        d_s5 = dwconv(pad_a, dw5_ref, 0, 5, 1, 2)        # sep_conv_5x5 dw #1
        d_d3 = dwconv(pad_a, dw3_ref, 2, 3, 2, 2)        # dil_conv_3x3 dw (d=2,p=2)
        d_d5 = dwconv(pad_a, dw5_ref, 2, 5, 2, 4)        # dil_conv_5x5 dw (d=2,p=4)

        # ---- fused pointwise matmul #1 (bn, w6, w7 folded into w1_ref) ----
        y1 = jnp.dot(w1_ref[...],
                     jnp.concatenate([d_s3, d_s5, d_d3, d_d5], axis=0),
                     preferred_element_type=jnp.float32)          # (3*NbCq, HW)
        acc = acc + y1[2 * NbCq:]               # dil_conv_3x3 + dil_conv_5x5 done

        # ---- second depthwise stage of the sep convs (zero halo via pad_b) ----
        pad_b[:, IOFF:IOFF + HW] = jnp.maximum(y1[:NbCq], 0.0)
        d_s3b = dwconv(pad_b, dw3_ref, 1, 3, 1, 1)
        pad_b[:, IOFF:IOFF + HW] = jnp.maximum(y1[NbCq:2 * NbCq], 0.0)
        d_s5b = dwconv(pad_b, dw5_ref, 1, 5, 1, 2)

        # ---- fused pointwise matmul #2 (+ skip_connect + max_pool, folded) ----
        acc = acc + jnp.dot(w2_ref[...],
                            jnp.concatenate([d_s3b, d_s5b, x, mp], axis=0),
                            preferred_element_type=jnp.float32)
        out_ref[...] = acc                              # dense (NbCq, HW) store

    out_flat = pl.pallas_call(
        kernel,
        out_shape=jax.ShapeDtypeStruct((N * Cq, HW), jnp.float32),
        grid=(G,),
        in_specs=[
            pl.BlockSpec((NbCq, HW), lambda g: (g, 0)),                   # partial x
            pl.BlockSpec((1, HW), lambda g: (0, 0)),                      # avg divisor
            pl.BlockSpec((len(_DJ_LIST), 1, HW), lambda g: (0, 0, 0)),    # col masks
            pl.BlockSpec((3, 3, 3, NbCq, 1), lambda g: (0, 0, 0, 0, 0)),  # dw 3x3 taps
            pl.BlockSpec((3, 5, 5, NbCq, 1), lambda g: (0, 0, 0, 0, 0)),  # dw 5x5 taps
            pl.BlockSpec((3 * NbCq, 4 * NbCq), lambda g: (0, 0)),         # fused pw #1
            pl.BlockSpec((NbCq, 4 * NbCq), lambda g: (0, 0)),             # fused pw #2
        ],
        out_specs=pl.BlockSpec((NbCq, HW), lambda g: (g, 0)),
        scratch_shapes=[
            pltpu.VMEM((NbCq, LA), jnp.float32),    # relu(x), zero halo
            pltpu.VMEM((NbCq, LA), jnp.float32),    # raw x / sep intermediates, zero halo
            pltpu.VMEM((NbCq, LC), jnp.float32),    # raw x, -inf halo (max pool)
        ],
        compiler_params=pltpu.CompilerParams(
            dimension_semantics=("parallel",)),     # independent batch blocks
    )(xt_flat, invcnt, colmasks, dw3p, dw5p, w1m, w2m)

    # ---- concat with untouched channels + channel_shuffle(groups=4), in the wrapper ----
    temp1 = out_flat.reshape(N, Cq, H, W)
    ans = jnp.concatenate([temp1, x_f32[:, Cq:]], axis=1)
    ans = ans.reshape(N, K_PART, C // K_PART, H, W)
    ans = jnp.transpose(ans, (0, 2, 1, 3, 4)).reshape(N, C, H, W)
    return ans


def init_params(key, C):
    """Deterministic synthetic conv weights in PyTorch layouts."""
    Cq = C // K_PART
    ks = jax.random.split(key, 12)
    w = lambda k, shape: 0.2 * jax.random.normal(k, shape, jnp.float32)
    return dict(
        sep3_dw1=w(ks[0], (Cq, 1, 3, 3)), sep3_pw1=w(ks[1], (Cq, Cq, 1, 1)),
        sep3_dw2=w(ks[2], (Cq, 1, 3, 3)), sep3_pw2=w(ks[3], (Cq, Cq, 1, 1)),
        sep5_dw1=w(ks[4], (Cq, 1, 5, 5)), sep5_pw1=w(ks[5], (Cq, Cq, 1, 1)),
        sep5_dw2=w(ks[6], (Cq, 1, 5, 5)), sep5_pw2=w(ks[7], (Cq, Cq, 1, 1)),
        dil3_dw=w(ks[8], (Cq, 1, 3, 3)),  dil3_pw=w(ks[9], (Cq, Cq, 1, 1)),
        dil5_dw=w(ks[10], (Cq, 1, 5, 5)), dil5_pw=w(ks[11], (Cq, Cq, 1, 1)),
    )


def mixed_op_reference(x, arch_w, tp):
    """Pure-JAX reference matching the PyTorch forward (stride=1, eval-mode BN)."""
    N, C, H, W = x.shape
    Cq = C // K_PART
    xt, xt2 = x[:, :Cq], x[:, Cq:]
    bn = 1.0 / float(np.sqrt(1.0 + BN_EPS))
    relu = lambda a: jnp.maximum(a, 0.0)

    def dwconv(t, wgt, dil, pad):
        return lax.conv_general_dilated(
            t, wgt, (1, 1), [(pad, pad), (pad, pad)], rhs_dilation=(dil, dil),
            dimension_numbers=('NCHW', 'OIHW', 'NCHW'),
            feature_group_count=Cq, precision=lax.Precision.HIGHEST)

    def pwconv(t, wgt):
        return lax.conv_general_dilated(
            t, wgt, (1, 1), [(0, 0), (0, 0)],
            dimension_numbers=('NCHW', 'OIHW', 'NCHW'),
            precision=lax.Precision.HIGHEST)

    def sep(t, dw1, pw1, dw2, pw2, pad):
        t = pwconv(dwconv(relu(t), dw1, 1, pad), pw1) * bn
        t = pwconv(dwconv(relu(t), dw2, 1, pad), pw2) * bn
        return t

    def dil(t, dw, pwm, dilat, pad):
        return pwconv(dwconv(relu(t), dw, dilat, pad), pwm) * bn

    pad4d = [(0, 0), (0, 0), (1, 1), (1, 1)]
    mp = lax.reduce_window(xt, -jnp.inf, lax.max, (1, 1, 3, 3), (1, 1, 1, 1), pad4d)
    s = lax.reduce_window(xt, 0.0, lax.add, (1, 1, 3, 3), (1, 1, 1, 1), pad4d)
    c = lax.reduce_window(jnp.ones_like(xt), 0.0, lax.add,
                          (1, 1, 3, 3), (1, 1, 1, 1), pad4d)
    outs = [
        jnp.zeros_like(xt),
        mp * bn,
        (s / c) * bn,
        xt,
        sep(xt, tp['sep3_dw1'], tp['sep3_pw1'], tp['sep3_dw2'], tp['sep3_pw2'], 1),
        sep(xt, tp['sep5_dw1'], tp['sep5_pw1'], tp['sep5_dw2'], tp['sep5_pw2'], 2),
        dil(xt, tp['dil3_dw'], tp['dil3_pw'], 2, 2),
        dil(xt, tp['dil5_dw'], tp['dil5_pw'], 2, 4),
    ]
    temp1 = sum(arch_w[i] * o for i, o in enumerate(outs))
    ans = jnp.concatenate([temp1, xt2], axis=1)
    ans = ans.reshape(N, K_PART, C // K_PART, H, W)
    ans = jnp.transpose(ans, (0, 2, 1, 3, 4)).reshape(N, C, H, W)
    return ans


if __name__ == "__main__":
    N, C, H, W = 2, 16, 16, 16            # NCHW input, C divisible by k=4
    key = jax.random.PRNGKey(0)
    kx, ka, kp = jax.random.split(key, 3)
    x = jax.random.normal(kx, (N, C, H, W), jnp.float32)
    arch_w = jax.nn.softmax(jax.random.normal(ka, (8,), jnp.float32))
    torch_params = init_params(kp, C)

    fwd = jax.jit(lambda xx, ww: mixed_op_forward(xx, ww, torch_params))
    out = jax.block_until_ready(fwd(x, arch_w))

    ref = jax.block_until_ready(mixed_op_reference(x, arch_w, torch_params))
    assert out.shape == (N, C, H, W)
    if not np.allclose(np.asarray(out), np.asarray(ref), rtol=1e-2, atol=1e-2):
        err = float(np.max(np.abs(np.asarray(out) - np.asarray(ref))))
        raise AssertionError(f"Pallas kernel mismatch vs reference, max|err|={err}")
    print("KERNEL_OK")
</pallas_src>

<mosaic_0001>
module attributes {stable_mosaic.version = 11 : i64} {
  func.func @kernel(%arg0: i32, %arg1: memref<8x256xf32, #tpu.memory_space<vmem>>, %arg2: memref<1x256xf32, #tpu.memory_space<vmem>>, %arg3: memref<6x1x256xf32, #tpu.memory_space<vmem>>, %arg4: memref<3x3x3x8x1xf32, #tpu.memory_space<vmem>>, %arg5: memref<3x5x5x8x1xf32, #tpu.memory_space<vmem>>, %arg6: memref<24x32xf32, #tpu.memory_space<vmem>>, %arg7: memref<8x32xf32, #tpu.memory_space<vmem>>, %arg8: memref<8x256xf32, #tpu.memory_space<vmem>>, %arg9: memref<8x452xf32, #tpu.memory_space<vmem>>, %arg10: memref<8x452xf32, #tpu.memory_space<vmem>>, %arg11: memref<8x401xf32, #tpu.memory_space<vmem>>) attributes {dimension_semantics = [#tpu.dimension_semantics<parallel>], iteration_bounds = array<i64: 1>, scalar_prefetch = 0 : i64, scratch_operands = 3 : i64, tpu.core_type = #tpu.core_type<tc>, window_params = [{transform_indices = @transform_0, window_bounds = array<i64: 8, 256>}, {pipeline_mode = #tpu.pipeline_mode<synchronous>, transform_indices = @transform_1, window_bounds = array<i64: 1, 256>}, {pipeline_mode = #tpu.pipeline_mode<synchronous>, transform_indices = @transform_2, window_bounds = array<i64: 6, 1, 256>}, {pipeline_mode = #tpu.pipeline_mode<synchronous>, transform_indices = @transform_3, window_bounds = array<i64: 3, 3, 3, 8, 1>}, {pipeline_mode = #tpu.pipeline_mode<synchronous>, transform_indices = @transform_4, window_bounds = array<i64: 3, 5, 5, 8, 1>}, {pipeline_mode = #tpu.pipeline_mode<synchronous>, transform_indices = @transform_5, window_bounds = array<i64: 24, 32>}, {pipeline_mode = #tpu.pipeline_mode<synchronous>, transform_indices = @transform_6, window_bounds = array<i64: 8, 32>}, {transform_indices = @transform_7, window_bounds = array<i64: 8, 256>}]} {
    %cst = arith.constant 0.000000e+00 : f32
    %0 = vector.broadcast %cst : f32 to vector<8x128xf32>
    %c0 = arith.constant 0 : index
    %c0_0 = arith.constant 0 : index
    %1 = vector.load %arg9[%c0, %c0_0] : memref<8x452xf32, #tpu.memory_space<vmem>>, vector<8x128xf32>
    tpu.vector_store %arg9[%c0, %c0_0], %0 {strides = array<i32>} : memref<8x452xf32, #tpu.memory_space<vmem>>, vector<8x128xf32>,
    %cst_1 = arith.constant 0.000000e+00 : f32
    %2 = vector.broadcast %cst_1 : f32 to vector<8x68xf32>
    %c0_2 = arith.constant 0 : index
    %c384 = arith.constant 384 : index
    %3 = vector.load %arg9[%c0_2, %c384] : memref<8x452xf32, #tpu.memory_space<vmem>>, vector<8x68xf32>
    tpu.vector_store %arg9[%c0_2, %c384], %2 {strides = array<i32>} : memref<8x452xf32, #tpu.memory_space<vmem>>, vector<8x68xf32>,
    %cst_3 = arith.constant 0.000000e+00 : f32
    %4 = vector.broadcast %cst_3 : f32 to vector<8x128xf32>
    %c0_4 = arith.constant 0 : index
    %c0_5 = arith.constant 0 : index
    %5 = vector.load %arg10[%c0_4, %c0_5] : memref<8x452xf32, #tpu.memory_space<vmem>>, vector<8x128xf32>
    tpu.vector_store %arg10[%c0_4, %c0_5], %4 {strides = array<i32>} : memref<8x452xf32, #tpu.memory_space<vmem>>, vector<8x128xf32>,
    %cst_6 = arith.constant 0.000000e+00 : f32
    %6 = vector.broadcast %cst_6 : f32 to vector<8x68xf32>
    %c0_7 = arith.constant 0 : index
    %c384_8 = arith.constant 384 : index
    %7 = vector.load %arg10[%c0_7, %c384_8] : memref<8x452xf32, #tpu.memory_space<vmem>>, vector<8x68xf32>
    tpu.vector_store %arg10[%c0_7, %c384_8], %6 {strides = array<i32>} : memref<8x452xf32, #tpu.memory_space<vmem>>, vector<8x68xf32>,
    %cst_9 = arith.constant 0xFF800000 : f32
    %8 = vector.broadcast %cst_9 : f32 to vector<8x128xf32>
    %c0_10 = arith.constant 0 : index
    %c0_11 = arith.constant 0 : index
    %9 = vector.load %arg11[%c0_10, %c0_11] : memref<8x401xf32, #tpu.memory_space<vmem>>, vector<8x128xf32>
    tpu.vector_store %arg11[%c0_10, %c0_11], %8 {strides = array<i32>} : memref<8x401xf32, #tpu.memory_space<vmem>>, vector<8x128xf32>,
    %cst_12 = arith.constant 0xFF800000 : f32
    %10 = vector.broadcast %cst_12 : f32 to vector<8x17xf32>
    %c0_13 = arith.constant 0 : index
    %c384_14 = arith.constant 384 : index
    %11 = vector.load %arg11[%c0_13, %c384_14] : memref<8x401xf32, #tpu.memory_space<vmem>>, vector<8x17xf32>
    tpu.vector_store %arg11[%c0_13, %c384_14], %10 {strides = array<i32>} : memref<8x401xf32, #tpu.memory_space<vmem>>, vector<8x17xf32>,
    %c0_15 = arith.constant 0 : index
    %c0_16 = arith.constant 0 : index
    %12 = vector.load %arg1[%c0_15, %c0_16] : memref<8x256xf32, #tpu.memory_space<vmem>>, vector<8x256xf32>
    %cst_17 = arith.constant 0.000000e+00 : f32
    %13 = vector.broadcast %cst_17 : f32 to vector<8x256xf32>
    %14 = arith.maximumf %12, %13 : vector<8x256xf32>
    %c0_18 = arith.constant 0 : index
    %c128 = arith.constant 128 : index
    %15 = vector.load %arg9[%c0_18, %c128] : memref<8x452xf32, #tpu.memory_space<vmem>>, vector<8x256xf32>
    tpu.vector_store %arg9[%c0_18, %c128], %14 {strides = array<i32>} : memref<8x452xf32, #tpu.memory_space<vmem>>, vector<8x256xf32>,
    %c0_19 = arith.constant 0 : index
    %c128_20 = arith.constant 128 : index
    %16 = vector.load %arg10[%c0_19, %c128_20] : memref<8x452xf32, #tpu.memory_space<vmem>>, vector<8x256xf32>
    tpu.vector_store %arg10[%c0_19, %c128_20], %12 {strides = array<i32>} : memref<8x452xf32, #tpu.memory_space<vmem>>, vector<8x256xf32>,
    %c0_21 = arith.constant 0 : index
    %c128_22 = arith.constant 128 : index
    %17 = vector.load %arg11[%c0_21, %c128_22] : memref<8x401xf32, #tpu.memory_space<vmem>>, vector<8x256xf32>
    tpu.vector_store %arg11[%c0_21, %c128_22], %12 {strides = array<i32>} : memref<8x401xf32, #tpu.memory_space<vmem>>, vector<8x256xf32>,
    %c0_23 = arith.constant 0 : index
    %c111 = arith.constant 111 : index
    %18 = vector.load %arg11[%c0_23, %c111] : memref<8x401xf32, #tpu.memory_space<vmem>>, vector<8x256xf32>
    %c2 = arith.constant 2 : index
    %c0_24 = arith.constant 0 : index
    %c0_25 = arith.constant 0 : index
    %19 = vector.load %arg3[%c2, %c0_24, %c0_25] : memref<6x1x256xf32, #tpu.memory_space<vmem>>, vector<1x1x256xf32>
    %20 = vector.shape_cast %19 : vector<1x1x256xf32> to vector<1x256xf32>
    %cst_26 = arith.constant 5.000000e-01 : f32
    %21 = vector.broadcast %cst_26 : f32 to vector<1x256xf32>
    %22 = arith.cmpf ogt, %20, %21 : vector<1x256xf32>
    %cst_27 = arith.constant 0xFF800000 : f32
    %23 = vector.shape_cast %22 : vector<1x256xi1> to vector<1x256xi1>
    %24 = vector.broadcast %23 : vector<1x256xi1> to vector<8x256xi1>
    %25 = vector.broadcast %cst_27 : f32 to vector<8x256xf32>
    %26 = arith.select %24, %18, %25 : vector<8x256xi1>, vector<8x256xf32>
    %c0_28 = arith.constant 0 : index
    %c112 = arith.constant 112 : index
    %27 = vector.load %arg11[%c0_28, %c112] : memref<8x401xf32, #tpu.memory_space<vmem>>, vector<8x256xf32>
    %28 = arith.maximumf %26, %27 : vector<8x256xf32>
    %c0_29 = arith.constant 0 : index
    %c113 = arith.constant 113 : index
    %29 = vector.load %arg11[%c0_29, %c113] : memref<8x401xf32, #tpu.memory_space<vmem>>, vector<8x256xf32>
    %c3 = arith.constant 3 : index
    %c0_30 = arith.constant 0 : index
    %c0_31 = arith.constant 0 : index
    %30 = vector.load %arg3[%c3, %c0_30, %c0_31] : memref<6x1x256xf32, #tpu.memory_space<vmem>>, vector<1x1x256xf32>
    %31 = vector.shape_cast %30 : vector<1x1x256xf32> to vector<1x256xf32>
    %cst_32 = arith.constant 5.000000e-01 : f32
    %32 = vector.broadcast %cst_32 : f32 to vector<1x256xf32>
    %33 = arith.cmpf ogt, %31, %32 : vector<1x256xf32>
    %cst_33 = arith.constant 0xFF800000 : f32
    %34 = vector.shape_cast %33 : vector<1x256xi1> to vector<1x256xi1>
    %35 = vector.broadcast %34 : vector<1x256xi1> to vector<8x256xi1>
    %36 = vector.broadcast %cst_33 : f32 to vector<8x256xf32>
    %37 = arith.select %35, %29, %36 : vector<8x256xi1>, vector<8x256xf32>
    %38 = arith.maximumf %28, %37 : vector<8x256xf32>
    %c0_34 = arith.constant 0 : index
    %c127 = arith.constant 127 : index
    %39 = vector.load %arg11[%c0_34, %c127] : memref<8x401xf32, #tpu.memory_space<vmem>>, vector<8x256xf32>
    %c2_35 = arith.constant 2 : index
    %c0_36 = arith.constant 0 : index
    %c0_37 = arith.constant 0 : index
    %40 = vector.load %arg3[%c2_35, %c0_36, %c0_37] : memref<6x1x256xf32, #tpu.memory_space<vmem>>, vector<1x1x256xf32>
    %41 = vector.shape_cast %40 : vector<1x1x256xf32> to vector<1x256xf32>
    %cst_38 = arith.constant 5.000000e-01 : f32
    %42 = vector.broadcast %cst_38 : f32 to vector<1x256xf32>
    %43 = arith.cmpf ogt, %41, %42 : vector<1x256xf32>
    %cst_39 = arith.constant 0xFF800000 : f32
    %44 = vector.shape_cast %43 : vector<1x256xi1> to vector<1x256xi1>
    %45 = vector.broadcast %44 : vector<1x256xi1> to vector<8x256xi1>
    %46 = vector.broadcast %cst_39 : f32 to vector<8x256xf32>
    %47 = arith.select %45, %39, %46 : vector<8x256xi1>, vector<8x256xf32>
    %48 = arith.maximumf %38, %47 : vector<8x256xf32>
    %c0_40 = arith.constant 0 : index
    %c128_41 = arith.constant 128 : index
    %49 = vector.load %arg11[%c0_40, %c128_41] : memref<8x401xf32, #tpu.memory_space<vmem>>, vector<8x256xf32>
    %50 = arith.maximumf %48, %49 : vector<8x256xf32>
    %c0_42 = arith.constant 0 : index
    %c129 = arith.constant 129 : index
    %51 = vector.load %arg11[%c0_42, %c129] : memref<8x401xf32, #tpu.memory_space<vmem>>, vector<8x256xf32>
    %c3_43 = arith.constant 3 : index
    %c0_44 = arith.constant 0 : index
    %c0_45 = arith.constant 0 : index
    %52 = vector.load %arg3[%c3_43, %c0_44, %c0_45] : memref<6x1x256xf32, #tpu.memory_space<vmem>>, vector<1x1x256xf32>
    %53 = vector.shape_cast %52 : vector<1x1x256xf32> to vector<1x256xf32>
    %cst_46 = arith.constant 5.000000e-01 : f32
    %54 = vector.broadcast %cst_46 : f32 to vector<1x256xf32>
    %55 = arith.cmpf ogt, %53, %54 : vector<1x256xf32>
    %cst_47 = arith.constant 0xFF800000 : f32
    %56 = vector.shape_cast %55 : vector<1x256xi1> to vector<1x256xi1>
    %57 = vector.broadcast %56 : vector<1x256xi1> to vector<8x256xi1>
    %58 = vector.broadcast %cst_47 : f32 to vector<8x256xf32>
    %59 = arith.select %57, %51, %58 : vector<8x256xi1>, vector<8x256xf32>
    %60 = arith.maximumf %50, %59 : vector<8x256xf32>
    %c0_48 = arith.constant 0 : index
    %c143 = arith.constant 143 : index
    %61 = vector.load %arg11[%c0_48, %c143] : memref<8x401xf32, #tpu.memory_space<vmem>>, vector<8x256xf32>
    %c2_49 = arith.constant 2 : index
    %c0_50 = arith.constant 0 : index
    %c0_51 = arith.constant 0 : index
    %62 = vector.load %arg3[%c2_49, %c0_50, %c0_51] : memref<6x1x256xf32, #tpu.memory_space<vmem>>, vector<1x1x256xf32>
    %63 = vector.shape_cast %62 : vector<1x1x256xf32> to vector<1x256xf32>
    %cst_52 = arith.constant 5.000000e-01 : f32
    %64 = vector.broadcast %cst_52 : f32 to vector<1x256xf32>
    %65 = arith.cmpf ogt, %63, %64 : vector<1x256xf32>
    %cst_53 = arith.constant 0xFF800000 : f32
    %66 = vector.shape_cast %65 : vector<1x256xi1> to vector<1x256xi1>
    %67 = vector.broadcast %66 : vector<1x256xi1> to vector<8x256xi1>
    %68 = vector.broadcast %cst_53 : f32 to vector<8x256xf32>
    %69 = arith.select %67, %61, %68 : vector<8x256xi1>, vector<8x256xf32>
    %70 = arith.maximumf %60, %69 : vector<8x256xf32>
    %c0_54 = arith.constant 0 : index
    %c144 = arith.constant 144 : index
    %71 = vector.load %arg11[%c0_54, %c144] : memref<8x401xf32, #tpu.memory_space<vmem>>, vector<8x256xf32>
    %72 = arith.maximumf %70, %71 : vector<8x256xf32>
    %c0_55 = arith.constant 0 : index
    %c145 = arith.constant 145 : index
    %73 = vector.load %arg11[%c0_55, %c145] : memref<8x401xf32, #tpu.memory_space<vmem>>, vector<8x256xf32>
    %c3_56 = arith.constant 3 : index
    %c0_57 = arith.constant 0 : index
    %c0_58 = arith.constant 0 : index
    %74 = vector.load %arg3[%c3_56, %c0_57, %c0_58] : memref<6x1x256xf32, #tpu.memory_space<vmem>>, vector<1x1x256xf32>
    %75 = vector.shape_cast %74 : vector<1x1x256xf32> to vector<1x256xf32>
    %cst_59 = arith.constant 5.000000e-01 : f32
    %76 = vector.broadcast %cst_59 : f32 to vector<1x256xf32>
    %77 = arith.cmpf ogt, %75, %76 : vector<1x256xf32>
    %cst_60 = arith.constant 0xFF800000 : f32
    %78 = vector.shape_cast %77 : vector<1x256xi1> to vector<1x256xi1>
    %79 = vector.broadcast %78 : vector<1x256xi1> to vector<8x256xi1>
    %80 = vector.broadcast %cst_60 : f32 to vector<8x256xf32>
    %81 = arith.select %79, %73, %80 : vector<8x256xi1>, vector<8x256xf32>
    %82 = arith.maximumf %72, %81 : vector<8x256xf32>
    %c0_61 = arith.constant 0 : index
    %c111_62 = arith.constant 111 : index
    %83 = vector.load %arg10[%c0_61, %c111_62] : memref<8x452xf32, #tpu.memory_space<vmem>>, vector<8x256xf32>
    %c2_63 = arith.constant 2 : index
    %c0_64 = arith.constant 0 : index
    %c0_65 = arith.constant 0 : index
    %84 = vector.load %arg3[%c2_63, %c0_64, %c0_65] : memref<6x1x256xf32, #tpu.memory_space<vmem>>, vector<1x1x256xf32>
    %85 = vector.shape_cast %84 : vector<1x1x256xf32> to vector<1x256xf32>
    %86 = vector.broadcast %85 : vector<1x256xf32> to vector<8x256xf32>
    %87 = arith.mulf %83, %86 : vector<8x256xf32>
    %c0_66 = arith.constant 0 : index
    %c112_67 = arith.constant 112 : index
    %88 = vector.load %arg10[%c0_66, %c112_67] : memref<8x452xf32, #tpu.memory_space<vmem>>, vector<8x256xf32>
    %89 = arith.addf %87, %88 : vector<8x256xf32>
    %c0_68 = arith.constant 0 : index
    %c113_69 = arith.constant 113 : index
    %90 = vector.load %arg10[%c0_68, %c113_69] : memref<8x452xf32, #tpu.memory_space<vmem>>, vector<8x256xf32>
    %c3_70 = arith.constant 3 : index
    %c0_71 = arith.constant 0 : index
    %c0_72 = arith.constant 0 : index
    %91 = vector.load %arg3[%c3_70, %c0_71, %c0_72] : memref<6x1x256xf32, #tpu.memory_space<vmem>>, vector<1x1x256xf32>
    %92 = vector.shape_cast %91 : vector<1x1x256xf32> to vector<1x256xf32>
    %93 = vector.broadcast %92 : vector<1x256xf32> to vector<8x256xf32>
    %94 = arith.mulf %90, %93 : vector<8x256xf32>
    %95 = arith.addf %89, %94 : vector<8x256xf32>
    %c0_73 = arith.constant 0 : index
    %c127_74 = arith.constant 127 : index
    %96 = vector.load %arg10[%c0_73, %c127_74] : memref<8x452xf32, #tpu.memory_space<vmem>>, vector<8x256xf32>
    %c2_75 = arith.constant 2 : index
    %c0_76 = arith.constant 0 : index
    %c0_77 = arith.constant 0 : index
    %97 = vector.load %arg3[%c2_75, %c0_76, %c0_77] : memref<6x1x256xf32, #tpu.memory_space<vmem>>, vector<1x1x256xf32>
    %98 = vector.shape_cast %97 : vector<1x1x256xf32> to vector<1x256xf32>
    %99 = vector.broadcast %98 : vector<1x256xf32> to vector<8x256xf32>
    %100 = arith.mulf %96, %99 : vector<8x256xf32>
    %101 = arith.addf %95, %100 : vector<8x256xf32>
    %c0_78 = arith.constant 0 : index
    %c128_79 = arith.constant 128 : index
    %102 = vector.load %arg10[%c0_78, %c128_79] : memref<8x452xf32, #tpu.memory_space<vmem>>, vector<8x256xf32>
    %103 = arith.addf %101, %102 : vector<8x256xf32>
    %c0_80 = arith.constant 0 : index
    %c129_81 = arith.constant 129 : index
    %104 = vector.load %arg10[%c0_80, %c129_81] : memref<8x452xf32, #tpu.memory_space<vmem>>, vector<8x256xf32>
    %c3_82 = arith.constant 3 : index
    %c0_83 = arith.constant 0 : index
    %c0_84 = arith.constant 0 : index
    %105 = vector.load %arg3[%c3_82, %c0_83, %c0_84] : memref<6x1x256xf32, #tpu.memory_space<vmem>>, vector<1x1x256xf32>
    %106 = vector.shape_cast %105 : vector<1x1x256xf32> to vector<1x256xf32>
    %107 = vector.broadcast %106 : vector<1x256xf32> to vector<8x256xf32>
    %108 = arith.mulf %104, %107 : vector<8x256xf32>
    %109 = arith.addf %103, %108 : vector<8x256xf32>
    %c0_85 = arith.constant 0 : index
    %c143_86 = arith.constant 143 : index
    %110 = vector.load %arg10[%c0_85, %c143_86] : memref<8x452xf32, #tpu.memory_space<vmem>>, vector<8x256xf32>
    %c2_87 = arith.constant 2 : index
    %c0_88 = arith.constant 0 : index
    %c0_89 = arith.constant 0 : index
    %111 = vector.load %arg3[%c2_87, %c0_88, %c0_89] : memref<6x1x256xf32, #tpu.memory_space<vmem>>, vector<1x1x256xf32>
    %112 = vector.shape_cast %111 : vector<1x1x256xf32> to vector<1x256xf32>
    %113 = vector.broadcast %112 : vector<1x256xf32> to vector<8x256xf32>
    %114 = arith.mulf %110, %113 : vector<8x256xf32>
    %115 = arith.addf %109, %114 : vector<8x256xf32>
    %c0_90 = arith.constant 0 : index
    %c144_91 = arith.constant 144 : index
    %116 = vector.load %arg10[%c0_90, %c144_91] : memref<8x452xf32, #tpu.memory_space<vmem>>, vector<8x256xf32>
    %117 = arith.addf %115, %116 : vector<8x256xf32>
    %c0_92 = arith.constant 0 : index
    %c145_93 = arith.constant 145 : index
    %118 = vector.load %arg10[%c0_92, %c145_93] : memref<8x452xf32, #tpu.memory_space<vmem>>, vector<8x256xf32>
    %c3_94 = arith.constant 3 : index
    %c0_95 = arith.constant 0 : index
    %c0_96 = arith.constant 0 : index
    %119 = vector.load %arg3[%c3_94, %c0_95, %c0_96] : memref<6x1x256xf32, #tpu.memory_space<vmem>>, vector<1x1x256xf32>
    %120 = vector.shape_cast %119 : vector<1x1x256xf32> to vector<1x256xf32>
    %121 = vector.broadcast %120 : vector<1x256xf32> to vector<8x256xf32>
    %122 = arith.mulf %118, %121 : vector<8x256xf32>
    %123 = arith.addf %117, %122 : vector<8x256xf32>
    %c0_97 = arith.constant 0 : index
    %c0_98 = arith.constant 0 : index
    %124 = vector.load %arg2[%c0_97, %c0_98] : memref<1x256xf32, #tpu.memory_space<vmem>>, vector<1x256xf32>
    %125 = vector.broadcast %124 : vector<1x256xf32> to vector<8x256xf32>
    %126 = arith.mulf %123, %125 : vector<8x256xf32>
    %c0_99 = arith.constant 0 : index
    %c111_100 = arith.constant 111 : index
    %127 = vector.load %arg9[%c0_99, %c111_100] : memref<8x452xf32, #tpu.memory_space<vmem>>, vector<8x256xf32>
    %c2_101 = arith.constant 2 : index
    %c0_102 = arith.constant 0 : index
    %c0_103 = arith.constant 0 : index
    %128 = vector.load %arg3[%c2_101, %c0_102, %c0_103] : memref<6x1x256xf32, #tpu.memory_space<vmem>>, vector<1x1x256xf32>
    %129 = vector.shape_cast %128 : vector<1x1x256xf32> to vector<1x256xf32>
    %130 = vector.broadcast %129 : vector<1x256xf32> to vector<8x256xf32>
    %131 = arith.mulf %127, %130 : vector<8x256xf32>
    %c0_104 = arith.constant 0 : index
    %c0_105 = arith.constant 0 : index
    %c0_106 = arith.constant 0 : index
    %c0_107 = arith.constant 0 : index
    %c0_108 = arith.constant 0 : index
    %132 = vector.load %arg4[%c0_104, %c0_105, %c0_106, %c0_107, %c0_108] : memref<3x3x3x8x1xf32, #tpu.memory_space<vmem>>, vector<1x1x1x8x1xf32>
    %133 = vector.shape_cast %132 : vector<1x1x1x8x1xf32> to vector<8x1xf32>
    %134 = vector.broadcast %133 : vector<8x1xf32> to vector<8x256xf32>
    %135 = arith.mulf %131, %134 : vector<8x256xf32>
    %c0_109 = arith.constant 0 : index
    %c112_110 = arith.constant 112 : index
    %136 = vector.load %arg9[%c0_109, %c112_110] : memref<8x452xf32, #tpu.memory_space<vmem>>, vector<8x256xf32>
    %c0_111 = arith.constant 0 : index
    %c0_112 = arith.constant 0 : index
    %c1 = arith.constant 1 : index
    %c0_113 = arith.constant 0 : index
    %c0_114 = arith.constant 0 : index
    %137 = vector.load %arg4[%c0_111, %c0_112, %c1, %c0_113, %c0_114] : memref<3x3x3x8x1xf32, #tpu.memory_space<vmem>>, vector<1x1x1x8x1xf32>
    %138 = vector.shape_cast %137 : vector<1x1x1x8x1xf32> to vector<8x1xf32>
    %139 = vector.broadcast %138 : vector<8x1xf32> to vector<8x256xf32>
    %140 = arith.mulf %136, %139 : vector<8x256xf32>
    %141 = arith.addf %135, %140 : vector<8x256xf32>
    %c0_115 = arith.constant 0 : index
    %c113_116 = arith.constant 113 : index
    %142 = vector.load %arg9[%c0_115, %c113_116] : memref<8x452xf32, #tpu.memory_space<vmem>>, vector<8x256xf32>
    %c3_117 = arith.constant 3 : index
    %c0_118 = arith.constant 0 : index
    %c0_119 = arith.constant 0 : index
    %143 = vector.load %arg3[%c3_117, %c0_118, %c0_119] : memref<6x1x256xf32, #tpu.memory_space<vmem>>, vector<1x1x256xf32>
    %144 = vector.shape_cast %143 : vector<1x1x256xf32> to vector<1x256xf32>
    %145 = vector.broadcast %144 : vector<1x256xf32> to vector<8x256xf32>
    %146 = arith.mulf %142, %145 : vector<8x256xf32>
    %c0_120 = arith.constant 0 : index
    %c0_121 = arith.constant 0 : index
    %c2_122 = arith.constant 2 : index
    %c0_123 = arith.constant 0 : index
    %c0_124 = arith.constant 0 : index
    %147 = vector.load %arg4[%c0_120, %c0_121, %c2_122, %c0_123, %c0_124] : memref<3x3x3x8x1xf32, #tpu.memory_space<vmem>>, vector<1x1x1x8x1xf32>
    %148 = vector.shape_cast %147 : vector<1x1x1x8x1xf32> to vector<8x1xf32>
    %149 = vector.broadcast %148 : vector<8x1xf32> to vector<8x256xf32>
    %150 = arith.mulf %146, %149 : vector<8x256xf32>
    %151 = arith.addf %141, %150 : vector<8x256xf32>
    %c0_125 = arith.constant 0 : index
    %c127_126 = arith.constant 127 : index
    %152 = vector.load %arg9[%c0_125, %c127_126] : memref<8x452xf32, #tpu.memory_space<vmem>>, vector<8x256xf32>
    %c2_127 = arith.constant 2 : index
    %c0_128 = arith.constant 0 : index
    %c0_129 = arith.constant 0 : index
    %153 = vector.load %arg3[%c2_127, %c0_128, %c0_129] : memref<6x1x256xf32, #tpu.memory_space<vmem>>, vector<1x1x256xf32>
    %154 = vector.shape_cast %153 : vector<1x1x256xf32> to vector<1x256xf32>
    %155 = vector.broadcast %154 : vector<1x256xf32> to vector<8x256xf32>
    %156 = arith.mulf %152, %155 : vector<8x256xf32>
    %c0_130 = arith.constant 0 : index
    %c1_131 = arith.constant 1 : index
    %c0_132 = arith.constant 0 : index
    %c0_133 = arith.constant 0 : index
    %c0_134 = arith.constant 0 : index
    %157 = vector.load %arg4[%c0_130, %c1_131, %c0_132, %c0_133, %c0_134] : memref<3x3x3x8x1xf32, #tpu.memory_space<vmem>>, vector<1x1x1x8x1xf32>
    %158 = vector.shape_cast %157 : vector<1x1x1x8x1xf32> to vector<8x1xf32>
    %159 = vector.broadcast %158 : vector<8x1xf32> to vector<8x256xf32>
    %160 = arith.mulf %156, %159 : vector<8x256xf32>
    %161 = arith.addf %151, %160 : vector<8x256xf32>
    %c0_135 = arith.constant 0 : index
    %c128_136 = arith.constant 128 : index
    %162 = vector.load %arg9[%c0_135, %c128_136] : memref<8x452xf32, #tpu.memory_space<vmem>>, vector<8x256xf32>
    %c0_137 = arith.constant 0 : index
    %c1_138 = arith.constant 1 : index
    %c1_139 = arith.constant 1 : index
    %c0_140 = arith.constant 0 : index
    %c0_141 = arith.constant 0 : index
    %163 = vector.load %arg4[%c0_137, %c1_138, %c1_139, %c0_140, %c0_141] : memref<3x3x3x8x1xf32, #tpu.memory_space<vmem>>, vector<1x1x1x8x1xf32>
    %164 = vector.shape_cast %163 : vector<1x1x1x8x1xf32> to vector<8x1xf32>
    %165 = vector.broadcast %164 : vector<8x1xf32> to vector<8x256xf32>
    %166 = arith.mulf %162, %165 : vector<8x256xf32>
    %167 = arith.addf %161, %166 : vector<8x256xf32>
    %c0_142 = arith.constant 0 : index
    %c129_143 = arith.constant 129 : index
    %168 = vector.load %arg9[%c0_142, %c129_143] : memref<8x452xf32, #tpu.memory_space<vmem>>, vector<8x256xf32>
    %c3_144 = arith.constant 3 : index
    %c0_145 = arith.constant 0 : index
    %c0_146 = arith.constant 0 : index
    %169 = vector.load %arg3[%c3_144, %c0_145, %c0_146] : memref<6x1x256xf32, #tpu.memory_space<vmem>>, vector<1x1x256xf32>
    %170 = vector.shape_cast %169 : vector<1x1x256xf32> to vector<1x256xf32>
    %171 = vector.broadcast %170 : vector<1x256xf32> to vector<8x256xf32>
    %172 = arith.mulf %168, %171 : vector<8x256xf32>
    %c0_147 = arith.constant 0 : index
    %c1_148 = arith.constant 1 : index
    %c2_149 = arith.constant 2 : index
    %c0_150 = arith.constant 0 : index
    %c0_151 = arith.constant 0 : index
    %173 = vector.load %arg4[%c0_147, %c1_148, %c2_149, %c0_150, %c0_151] : memref<3x3x3x8x1xf32, #tpu.memory_space<vmem>>, vector<1x1x1x8x1xf32>
    %174 = vector.shape_cast %173 : vector<1x1x1x8x1xf32> to vector<8x1xf32>
    %175 = vector.broadcast %174 : vector<8x1xf32> to vector<8x256xf32>
    %176 = arith.mulf %172, %175 : vector<8x256xf32>
    %177 = arith.addf %167, %176 : vector<8x256xf32>
    %c0_152 = arith.constant 0 : index
    %c143_153 = arith.constant 143 : index
    %178 = vector.load %arg9[%c0_152, %c143_153] : memref<8x452xf32, #tpu.memory_space<vmem>>, vector<8x256xf32>
    %c2_154 = arith.constant 2 : index
    %c0_155 = arith.constant 0 : index
    %c0_156 = arith.constant 0 : index
    %179 = vector.load %arg3[%c2_154, %c0_155, %c0_156] : memref<6x1x256xf32, #tpu.memory_space<vmem>>, vector<1x1x256xf32>
    %180 = vector.shape_cast %179 : vector<1x1x256xf32> to vector<1x256xf32>
    %181 = vector.broadcast %180 : vector<1x256xf32> to vector<8x256xf32>
    %182 = arith.mulf %178, %181 : vector<8x256xf32>
    %c0_157 = arith.constant 0 : index
    %c2_158 = arith.constant 2 : index
    %c0_159 = arith.constant 0 : index
    %c0_160 = arith.constant 0 : index
    %c0_161 = arith.constant 0 : index
    %183 = vector.load %arg4[%c0_157, %c2_158, %c0_159, %c0_160, %c0_161] : memref<3x3x3x8x1xf32, #tpu.memory_space<vmem>>, vector<1x1x1x8x1xf32>
    %184 = vector.shape_cast %183 : vector<1x1x1x8x1xf32> to vector<8x1xf32>
    %185 = vector.broadcast %184 : vector<8x1xf32> to vector<8x256xf32>
    %186 = arith.mulf %182, %185 : vector<8x256xf32>
    %187 = arith.addf %177, %186 : vector<8x256xf32>
    %c0_162 = arith.constant 0 : index
    %c144_163 = arith.constant 144 : index
    %188 = vector.load %arg9[%c0_162, %c144_163] : memref<8x452xf32, #tpu.memory_space<vmem>>, vector<8x256xf32>
    %c0_164 = arith.constant 0 : index
    %c2_165 = arith.constant 2 : index
    %c1_166 = arith.constant 1 : index
    %c0_167 = arith.constant 0 : index
    %c0_168 = arith.constant 0 : index
    %189 = vector.load %arg4[%c0_164, %c2_165, %c1_166, %c0_167, %c0_168] : memref<3x3x3x8x1xf32, #tpu.memory_space<vmem>>, vector<1x1x1x8x1xf32>
    %190 = vector.shape_cast %189 : vector<1x1x1x8x1xf32> to vector<8x1xf32>
    %191 = vector.broadcast %190 : vector<8x1xf32> to vector<8x256xf32>
    %192 = arith.mulf %188, %191 : vector<8x256xf32>
    %193 = arith.addf %187, %192 : vector<8x256xf32>
    %c0_169 = arith.constant 0 : index
    %c145_170 = arith.constant 145 : index
    %194 = vector.load %arg9[%c0_169, %c145_170] : memref<8x452xf32, #tpu.memory_space<vmem>>, vector<8x256xf32>
    %c3_171 = arith.constant 3 : index
    %c0_172 = arith.constant 0 : index
    %c0_173 = arith.constant 0 : index
    %195 = vector.load %arg3[%c3_171, %c0_172, %c0_173] : memref<6x1x256xf32, #tpu.memory_space<vmem>>, vector<1x1x256xf32>
    %196 = vector.shape_cast %195 : vector<1x1x256xf32> to vector<1x256xf32>
    %197 = vector.broadcast %196 : vector<1x256xf32> to vector<8x256xf32>
    %198 = arith.mulf %194, %197 : vector<8x256xf32>
    %c0_174 = arith.constant 0 : index
    %c2_175 = arith.constant 2 : index
    %c2_176 = arith.constant 2 : index
    %c0_177 = arith.constant 0 : index
    %c0_178 = arith.constant 0 : index
    %199 = vector.load %arg4[%c0_174, %c2_175, %c2_176, %c0_177, %c0_178] : memref<3x3x3x8x1xf32, #tpu.memory_space<vmem>>, vector<1x1x1x8x1xf32>
    %200 = vector.shape_cast %199 : vector<1x1x1x8x1xf32> to vector<8x1xf32>
    %201 = vector.broadcast %200 : vector<8x1xf32> to vector<8x256xf32>
    %202 = arith.mulf %198, %201 : vector<8x256xf32>
    %203 = arith.addf %193, %202 : vector<8x256xf32>
    %c0_179 = arith.constant 0 : index
    %c94 = arith.constant 94 : index
    %204 = vector.load %arg9[%c0_179, %c94] : memref<8x452xf32, #tpu.memory_space<vmem>>, vector<8x256xf32>
    %c1_180 = arith.constant 1 : index
    %c0_181 = arith.constant 0 : index
    %c0_182 = arith.constant 0 : index
    %205 = vector.load %arg3[%c1_180, %c0_181, %c0_182] : memref<6x1x256xf32, #tpu.memory_space<vmem>>, vector<1x1x256xf32>
    %206 = vector.shape_cast %205 : vector<1x1x256xf32> to vector<1x256xf32>
    %207 = vector.broadcast %206 : vector<1x256xf32> to vector<8x256xf32>
    %208 = arith.mulf %204, %207 : vector<8x256xf32>
    %c0_183 = arith.constant 0 : index
    %c0_184 = arith.constant 0 : index
    %c0_185 = arith.constant 0 : index
    %c0_186 = arith.constant 0 : index
    %c0_187 = arith.constant 0 : index
    %209 = vector.load %arg5[%c0_183, %c0_184, %c0_185, %c0_186, %c0_187] : memref<3x5x5x8x1xf32, #tpu.memory_space<vmem>>, vector<1x1x1x8x1xf32>
    %210 = vector.shape_cast %209 : vector<1x1x1x8x1xf32> to vector<8x1xf32>
    %211 = vector.broadcast %210 : vector<8x1xf32> to vector<8x256xf32>
    %212 = arith.mulf %208, %211 : vector<8x256xf32>
    %c0_188 = arith.constant 0 : index
    %c95 = arith.constant 95 : index
    %213 = vector.load %arg9[%c0_188, %c95] : memref<8x452xf32, #tpu.memory_space<vmem>>, vector<8x256xf32>
    %c2_189 = arith.constant 2 : index
    %c0_190 = arith.constant 0 : index
    %c0_191 = arith.constant 0 : index
    %214 = vector.load %arg3[%c2_189, %c0_190, %c0_191] : memref<6x1x256xf32, #tpu.memory_space<vmem>>, vector<1x1x256xf32>
    %215 = vector.shape_cast %214 : vector<1x1x256xf32> to vector<1x256xf32>
    %216 = vector.broadcast %215 : vector<1x256xf32> to vector<8x256xf32>
    %217 = arith.mulf %213, %216 : vector<8x256xf32>
    %c0_192 = arith.constant 0 : index
    %c0_193 = arith.constant 0 : index
    %c1_194 = arith.constant 1 : index
    %c0_195 = arith.constant 0 : index
    %c0_196 = arith.constant 0 : index
    %218 = vector.load %arg5[%c0_192, %c0_193, %c1_194, %c0_195, %c0_196] : memref<3x5x5x8x1xf32, #tpu.memory_space<vmem>>, vector<1x1x1x8x1xf32>
    %219 = vector.shape_cast %218 : vector<1x1x1x8x1xf32> to vector<8x1xf32>
    %220 = vector.broadcast %219 : vector<8x1xf32> to vector<8x256xf32>
    %221 = arith.mulf %217, %220 : vector<8x256xf32>
    %222 = arith.addf %212, %221 : vector<8x256xf32>
    %c0_197 = arith.constant 0 : index
    %c96 = arith.constant 96 : index
    %223 = vector.load %arg9[%c0_197, %c96] : memref<8x452xf32, #tpu.memory_space<vmem>>, vector<8x256xf32>
    %c0_198 = arith.constant 0 : index
    %c0_199 = arith.constant 0 : index
    %c2_200 = arith.constant 2 : index
    %c0_201 = arith.constant 0 : index
    %c0_202 = arith.constant 0 : index
    %224 = vector.load %arg5[%c0_198, %c0_199, %c2_200, %c0_201, %c0_202] : memref<3x5x5x8x1xf32, #tpu.memory_space<vmem>>, vector<1x1x1x8x1xf32>
    %225 = vector.shape_cast %224 : vector<1x1x1x8x1xf32> to vector<8x1xf32>
    %226 = vector.broadcast %225 : vector<8x1xf32> to vector<8x256xf32>
    %227 = arith.mulf %223, %226 : vector<8x256xf32>
    %228 = arith.addf %222, %227 : vector<8x256xf32>
    %c0_203 = arith.constant 0 : index
    %c97 = arith.constant 97 : index
    %229 = vector.load %arg9[%c0_203, %c97] : memref<8x452xf32, #tpu.memory_space<vmem>>, vector<8x256xf32>
    %c3_204 = arith.constant 3 : index
    %c0_205 = arith.constant 0 : index
    %c0_206 = arith.constant 0 : index
    %230 = vector.load %arg3[%c3_204, %c0_205, %c0_206] : memref<6x1x256xf32, #tpu.memory_space<vmem>>, vector<1x1x256xf32>
    %231 = vector.shape_cast %230 : vector<1x1x256xf32> to vector<1x256xf32>
    %232 = vector.broadcast %231 : vector<1x256xf32> to vector<8x256xf32>
    %233 = arith.mulf %229, %232 : vector<8x256xf32>
    %c0_207 = arith.constant 0 : index
    %c0_208 = arith.constant 0 : index
    %c3_209 = arith.constant 3 : index
    %c0_210 = arith.constant 0 : index
    %c0_211 = arith.constant 0 : index
    %234 = vector.load %arg5[%c0_207, %c0_208, %c3_209, %c0_210, %c0_211] : memref<3x5x5x8x1xf32, #tpu.memory_space<vmem>>, vector<1x1x1x8x1xf32>
    %235 = vector.shape_cast %234 : vector<1x1x1x8x1xf32> to vector<8x1xf32>
    %236 = vector.broadcast %235 : vector<8x1xf32> to vector<8x256xf32>
    %237 = arith.mulf %233, %236 : vector<8x256xf32>
    %238 = arith.addf %228, %237 : vector<8x256xf32>
    %c0_212 = arith.constant 0 : index
    %c98 = arith.constant 98 : index
    %239 = vector.load %arg9[%c0_212, %c98] : memref<8x452xf32, #tpu.memory_space<vmem>>, vector<8x256xf32>
    %c4 = arith.constant 4 : index
    %c0_213 = arith.constant 0 : index
    %c0_214 = arith.constant 0 : index
    %240 = vector.load %arg3[%c4, %c0_213, %c0_214] : memref<6x1x256xf32, #tpu.memory_space<vmem>>, vector<1x1x256xf32>
    %241 = vector.shape_cast %240 : vector<1x1x256xf32> to vector<1x256xf32>
    %242 = vector.broadcast %241 : vector<1x256xf32> to vector<8x256xf32>
    %243 = arith.mulf %239, %242 : vector<8x256xf32>
    %c0_215 = arith.constant 0 : index
    %c0_216 = arith.constant 0 : index
    %c4_217 = arith.constant 4 : index
    %c0_218 = arith.constant 0 : index
    %c0_219 = arith.constant 0 : index
    %244 = vector.load %arg5[%c0_215, %c0_216, %c4_217, %c0_218, %c0_219] : memref<3x5x5x8x1xf32, #tpu.memory_space<vmem>>, vector<1x1x1x8x1xf32>
    %245 = vector.shape_cast %244 : vector<1x1x1x8x1xf32> to vector<8x1xf32>
    %246 = vector.broadcast %245 : vector<8x1xf32> to vector<8x256xf32>
    %247 = arith.mulf %243, %246 : vector<8x256xf32>
    %248 = arith.addf %238, %247 : vector<8x256xf32>
    %c0_220 = arith.constant 0 : index
    %c110 = arith.constant 110 : index
    %249 = vector.load %arg9[%c0_220, %c110] : memref<8x452xf32, #tpu.memory_space<vmem>>, vector<8x256xf32>
    %c1_221 = arith.constant 1 : index
    %c0_222 = arith.constant 0 : index
    %c0_223 = arith.constant 0 : index
    %250 = vector.load %arg3[%c1_221, %c0_222, %c0_223] : memref<6x1x256xf32, #tpu.memory_space<vmem>>, vector<1x1x256xf32>
    %251 = vector.shape_cast %250 : vector<1x1x256xf32> to vector<1x256xf32>
    %252 = vector.broadcast %251 : vector<1x256xf32> to vector<8x256xf32>
    %253 = arith.mulf %249, %252 : vector<8x256xf32>
    %c0_224 = arith.constant 0 : index
    %c1_225 = arith.constant 1 : index
    %c0_226 = arith.constant 0 : index
    %c0_227 = arith.constant 0 : index
    %c0_228 = arith.constant 0 : index
    %254 = vector.load %arg5[%c0_224, %c1_225, %c0_226, %c0_227, %c0_228] : memref<3x5x5x8x1xf32, #tpu.memory_space<vmem>>, vector<1x1x1x8x1xf32>
    %255 = vector.shape_cast %254 : vector<1x1x1x8x1xf32> to vector<8x1xf32>
    %256 = vector.broadcast %255 : vector<8x1xf32> to vector<8x256xf32>
    %257 = arith.mulf %253, %256 : vector<8x256xf32>
    %258 = arith.addf %248, %257 : vector<8x256xf32>
    %c0_229 = arith.constant 0 : index
    %c111_230 = arith.constant 111 : index
    %259 = vector.load %arg9[%c0_229, %c111_230] : memref<8x452xf32, #tpu.memory_space<vmem>>, vector<8x256xf32>
    %c2_231 = arith.constant 2 : index
    %c0_232 = arith.constant 0 : index
    %c0_233 = arith.constant 0 : index
    %260 = vector.load %arg3[%c2_231, %c0_232, %c0_233] : memref<6x1x256xf32, #tpu.memory_space<vmem>>, vector<1x1x256xf32>
    %261 = vector.shape_cast %260 : vector<1x1x256xf32> to vector<1x256xf32>
    %262 = vector.broadcast %261 : vector<1x256xf32> to vector<8x256xf32>
    %263 = arith.mulf %259, %262 : vector<8x256xf32>
    %c0_234 = arith.constant 0 : index
    %c1_235 = arith.constant 1 : index
    %c1_236 = arith.constant 1 : index
    %c0_237 = arith.constant 0 : index
    %c0_238 = arith.constant 0 : index
    %264 = vector.load %arg5[%c0_234, %c1_235, %c1_236, %c0_237, %c0_238] : memref<3x5x5x8x1xf32, #tpu.memory_space<vmem>>, vector<1x1x1x8x1xf32>
    %265 = vector.shape_cast %264 : vector<1x1x1x8x1xf32> to vector<8x1xf32>
    %266 = vector.broadcast %265 : vector<8x1xf32> to vector<8x256xf32>
    %267 = arith.mulf %263, %266 : vector<8x256xf32>
    %268 = arith.addf %258, %267 : vector<8x256xf32>
    %c0_239 = arith.constant 0 : index
    %c112_240 = arith.constant 112 : index
    %269 = vector.load %arg9[%c0_239, %c112_240] : memref<8x452xf32, #tpu.memory_space<vmem>>, vector<8x256xf32>
    %c0_241 = arith.constant 0 : index
    %c1_242 = arith.constant 1 : index
    %c2_243 = arith.constant 2 : index
    %c0_244 = arith.constant 0 : index
    %c0_245 = arith.constant 0 : index
    %270 = vector.load %arg5[%c0_241, %c1_242, %c2_243, %c0_244, %c0_245] : memref<3x5x5x8x1xf32, #tpu.memory_space<vmem>>, vector<1x1x1x8x1xf32>
    %271 = vector.shape_cast %270 : vector<1x1x1x8x1xf32> to vector<8x1xf32>
    %272 = vector.broadcast %271 : vector<8x1xf32> to vector<8x256xf32>
    %273 = arith.mulf %269, %272 : vector<8x256xf32>
    %274 = arith.addf %268, %273 : vector<8x256xf32>
    %c0_246 = arith.constant 0 : index
    %c113_247 = arith.constant 113 : index
    %275 = vector.load %arg9[%c0_246, %c113_247] : memref<8x452xf32, #tpu.memory_space<vmem>>, vector<8x256xf32>
    %c3_248 = arith.constant 3 : index
    %c0_249 = arith.constant 0 : index
    %c0_250 = arith.constant 0 : index
    %276 = vector.load %arg3[%c3_248, %c0_249, %c0_250] : memref<6x1x256xf32, #tpu.memory_space<vmem>>, vector<1x1x256xf32>
    %277 = vector.shape_cast %276 : vector<1x1x256xf32> to vector<1x256xf32>
    %278 = vector.broadcast %277 : vector<1x256xf32> to vector<8x256xf32>
    %279 = arith.mulf %275, %278 : vector<8x256xf32>
    %c0_251 = arith.constant 0 : index
    %c1_252 = arith.constant 1 : index
    %c3_253 = arith.constant 3 : index
    %c0_254 = arith.constant 0 : index
    %c0_255 = arith.constant 0 : index
    %280 = vector.load %arg5[%c0_251, %c1_252, %c3_253, %c0_254, %c0_255] : memref<3x5x5x8x1xf32, #tpu.memory_space<vmem>>, vector<1x1x1x8x1xf32>
    %281 = vector.shape_cast %280 : vector<1x1x1x8x1xf32> to vector<8x1xf32>
    %282 = vector.broadcast %281 : vector<8x1xf32> to vector<8x256xf32>
    %283 = arith.mulf %279, %282 : vector<8x256xf32>
    %284 = arith.addf %274, %283 : vector<8x256xf32>
    %c0_256 = arith.constant 0 : index
    %c114 = arith.constant 114 : index
    %285 = vector.load %arg9[%c0_256, %c114] : memref<8x452xf32, #tpu.memory_space<vmem>>, vector<8x256xf32>
    %c4_257 = arith.constant 4 : index
    %c0_258 = arith.constant 0 : index
    %c0_259 = arith.constant 0 : index
    %286 = vector.load %arg3[%c4_257, %c0_258, %c0_259] : memref<6x1x256xf32, #tpu.memory_space<vmem>>, vector<1x1x256xf32>
    %287 = vector.shape_cast %286 : vector<1x1x256xf32> to vector<1x256xf32>
    %288 = vector.broadcast %287 : vector<1x256xf32> to vector<8x256xf32>
    %289 = arith.mulf %285, %288 : vector<8x256xf32>
    %c0_260 = arith.constant 0 : index
    %c1_261 = arith.constant 1 : index
    %c4_262 = arith.constant 4 : index
    %c0_263 = arith.constant 0 : index
    %c0_264 = arith.constant 0 : index
    %290 = vector.load %arg5[%c0_260, %c1_261, %c4_262, %c0_263, %c0_264] : memref<3x5x5x8x1xf32, #tpu.memory_space<vmem>>, vector<1x1x1x8x1xf32>
    %291 = vector.shape_cast %290 : vector<1x1x1x8x1xf32> to vector<8x1xf32>
    %292 = vector.broadcast %291 : vector<8x1xf32> to vector<8x256xf32>
    %293 = arith.mulf %289, %292 : vector<8x256xf32>
    %294 = arith.addf %284, %293 : vector<8x256xf32>
    %c0_265 = arith.constant 0 : index
    %c126 = arith.constant 126 : index
    %295 = vector.load %arg9[%c0_265, %c126] : memref<8x452xf32, #tpu.memory_space<vmem>>, vector<8x256xf32>
    %c1_266 = arith.constant 1 : index
    %c0_267 = arith.constant 0 : index
    %c0_268 = arith.constant 0 : index
    %296 = vector.load %arg3[%c1_266, %c0_267, %c0_268] : memref<6x1x256xf32, #tpu.memory_space<vmem>>, vector<1x1x256xf32>
    %297 = vector.shape_cast %296 : vector<1x1x256xf32> to vector<1x256xf32>
    %298 = vector.broadcast %297 : vector<1x256xf32> to vector<8x256xf32>
    %299 = arith.mulf %295, %298 : vector<8x256xf32>
    %c0_269 = arith.constant 0 : index
    %c2_270 = arith.constant 2 : index
    %c0_271 = arith.constant 0 : index
    %c0_272 = arith.constant 0 : index
    %c0_273 = arith.constant 0 : index
    %300 = vector.load %arg5[%c0_269, %c2_270, %c0_271, %c0_272, %c0_273] : memref<3x5x5x8x1xf32, #tpu.memory_space<vmem>>, vector<1x1x1x8x1xf32>
    %301 = vector.shape_cast %300 : vector<1x1x1x8x1xf32> to vector<8x1xf32>
    %302 = vector.broadcast %301 : vector<8x1xf32> to vector<8x256xf32>
    %303 = arith.mulf %299, %302 : vector<8x256xf32>
    %304 = arith.addf %294, %303 : vector<8x256xf32>
    %c0_274 = arith.constant 0 : index
    %c127_275 = arith.constant 127 : index
    %305 = vector.load %arg9[%c0_274, %c127_275] : memref<8x452xf32, #tpu.memory_space<vmem>>, vector<8x256xf32>
    %c2_276 = arith.constant 2 : index
    %c0_277 = arith.constant 0 : index
    %c0_278 = arith.constant 0 : index
    %306 = vector.load %arg3[%c2_276, %c0_277, %c0_278] : memref<6x1x256xf32, #tpu.memory_space<vmem>>, vector<1x1x256xf32>
    %307 = vector.shape_cast %306 : vector<1x1x256xf32> to vector<1x256xf32>
    %308 = vector.broadcast %307 : vector<1x256xf32> to vector<8x256xf32>
    %309 = arith.mulf %305, %308 : vector<8x256xf32>
    %c0_279 = arith.constant 0 : index
    %c2_280 = arith.constant 2 : index
    %c1_281 = arith.constant 1 : index
    %c0_282 = arith.constant 0 : index
    %c0_283 = arith.constant 0 : index
    %310 = vector.load %arg5[%c0_279, %c2_280, %c1_281, %c0_282, %c0_283] : memref<3x5x5x8x1xf32, #tpu.memory_space<vmem>>, vector<1x1x1x8x1xf32>
    %311 = vector.shape_cast %310 : vector<1x1x1x8x1xf32> to vector<8x1xf32>
    %312 = vector.broadcast %311 : vector<8x1xf32> to vector<8x256xf32>
    %313 = arith.mulf %309, %312 : vector<8x256xf32>
    %314 = arith.addf %304, %313 : vector<8x256xf32>
    %c0_284 = arith.constant 0 : index
    %c128_285 = arith.constant 128 : index
    %315 = vector.load %arg9[%c0_284, %c128_285] : memref<8x452xf32, #tpu.memory_space<vmem>>, vector<8x256xf32>
    %c0_286 = arith.constant 0 : index
    %c2_287 = arith.constant 2 : index
    %c2_288 = arith.constant 2 : index
    %c0_289 = arith.constant 0 : index
    %c0_290 = arith.constant 0 : index
    %316 = vector.load %arg5[%c0_286, %c2_287, %c2_288, %c0_289, %c0_290] : memref<3x5x5x8x1xf32, #tpu.memory_space<vmem>>, vector<1x1x1x8x1xf32>
    %317 = vector.shape_cast %316 : vector<1x1x1x8x1xf32> to vector<8x1xf32>
    %318 = vector.broadcast %317 : vector<8x1xf32> to vector<8x256xf32>
    %319 = arith.mulf %315, %318 : vector<8x256xf32>
    %320 = arith.addf %314, %319 : vector<8x256xf32>
    %c0_291 = arith.constant 0 : index
    %c129_292 = arith.constant 129 : index
    %321 = vector.load %arg9[%c0_291, %c129_292] : memref<8x452xf32, #tpu.memory_space<vmem>>, vector<8x256xf32>
    %c3_293 = arith.constant 3 : index
    %c0_294 = arith.constant 0 : index
    %c0_295 = arith.constant 0 : index
    %322 = vector.load %arg3[%c3_293, %c0_294, %c0_295] : memref<6x1x256xf32, #tpu.memory_space<vmem>>, vector<1x1x256xf32>
    %323 = vector.shape_cast %322 : vector<1x1x256xf32> to vector<1x256xf32>
    %324 = vector.broadcast %323 : vector<1x256xf32> to vector<8x256xf32>
    %325 = arith.mulf %321, %324 : vector<8x256xf32>
    %c0_296 = arith.constant 0 : index
    %c2_297 = arith.constant 2 : index
    %c3_298 = arith.constant 3 : index
    %c0_299 = arith.constant 0 : index
    %c0_300 = arith.constant 0 : index
    %326 = vector.load %arg5[%c0_296, %c2_297, %c3_298, %c0_299, %c0_300] : memref<3x5x5x8x1xf32, #tpu.memory_space<vmem>>, vector<1x1x1x8x1xf32>
    %327 = vector.shape_cast %326 : vector<1x1x1x8x1xf32> to vector<8x1xf32>
    %328 = vector.broadcast %327 : vector<8x1xf32> to vector<8x256xf32>
    %329 = arith.mulf %325, %328 : vector<8x256xf32>
    %330 = arith.addf %320, %329 : vector<8x256xf32>
    %c0_301 = arith.constant 0 : index
    %c130 = arith.constant 130 : index
    %331 = vector.load %arg9[%c0_301, %c130] : memref<8x452xf32, #tpu.memory_space<vmem>>, vector<8x256xf32>
    %c4_302 = arith.constant 4 : index
    %c0_303 = arith.constant 0 : index
    %c0_304 = arith.constant 0 : index
    %332 = vector.load %arg3[%c4_302, %c0_303, %c0_304] : memref<6x1x256xf32, #tpu.memory_space<vmem>>, vector<1x1x256xf32>
    %333 = vector.shape_cast %332 : vector<1x1x256xf32> to vector<1x256xf32>
    %334 = vector.broadcast %333 : vector<1x256xf32> to vector<8x256xf32>
    %335 = arith.mulf %331, %334 : vector<8x256xf32>
    %c0_305 = arith.constant 0 : index
    %c2_306 = arith.constant 2 : index
    %c4_307 = arith.constant 4 : index
    %c0_308 = arith.constant 0 : index
    %c0_309 = arith.constant 0 : index
    %336 = vector.load %arg5[%c0_305, %c2_306, %c4_307, %c0_308, %c0_309] : memref<3x5x5x8x1xf32, #tpu.memory_space<vmem>>, vector<1x1x1x8x1xf32>
    %337 = vector.shape_cast %336 : vector<1x1x1x8x1xf32> to vector<8x1xf32>
    %338 = vector.broadcast %337 : vector<8x1xf32> to vector<8x256xf32>
    %339 = arith.mulf %335, %338 : vector<8x256xf32>
    %340 = arith.addf %330, %339 : vector<8x256xf32>
    %c0_310 = arith.constant 0 : index
    %c142 = arith.constant 142 : index
    %341 = vector.load %arg9[%c0_310, %c142] : memref<8x452xf32, #tpu.memory_space<vmem>>, vector<8x256xf32>
    %c1_311 = arith.constant 1 : index
    %c0_312 = arith.constant 0 : index
    %c0_313 = arith.constant 0 : index
    %342 = vector.load %arg3[%c1_311, %c0_312, %c0_313] : memref<6x1x256xf32, #tpu.memory_space<vmem>>, vector<1x1x256xf32>
    %343 = vector.shape_cast %342 : vector<1x1x256xf32> to vector<1x256xf32>
    %344 = vector.broadcast %343 : vector<1x256xf32> to vector<8x256xf32>
    %345 = arith.mulf %341, %344 : vector<8x256xf32>
    %c0_314 = arith.constant 0 : index
    %c3_315 = arith.constant 3 : index
    %c0_316 = arith.constant 0 : index
    %c0_317 = arith.constant 0 : index
    %c0_318 = arith.constant 0 : index
    %346 = vector.load %arg5[%c0_314, %c3_315, %c0_316, %c0_317, %c0_318] : memref<3x5x5x8x1xf32, #tpu.memory_space<vmem>>, vector<1x1x1x8x1xf32>
    %347 = vector.shape_cast %346 : vector<1x1x1x8x1xf32> to vector<8x1xf32>
    %348 = vector.broadcast %347 : vector<8x1xf32> to vector<8x256xf32>
    %349 = arith.mulf %345, %348 : vector<8x256xf32>
    %350 = arith.addf %340, %349 : vector<8x256xf32>
    %c0_319 = arith.constant 0 : index
    %c143_320 = arith.constant 143 : index
    %351 = vector.load %arg9[%c0_319, %c143_320] : memref<8x452xf32, #tpu.memory_space<vmem>>, vector<8x256xf32>
    %c2_321 = arith.constant 2 : index
    %c0_322 = arith.constant 0 : index
    %c0_323 = arith.constant 0 : index
    %352 = vector.load %arg3[%c2_321, %c0_322, %c0_323] : memref<6x1x256xf32, #tpu.memory_space<vmem>>, vector<1x1x256xf32>
    %353 = vector.shape_cast %352 : vector<1x1x256xf32> to vector<1x256xf32>
    %354 = vector.broadcast %353 : vector<1x256xf32> to vector<8x256xf32>
    %355 = arith.mulf %351, %354 : vector<8x256xf32>
    %c0_324 = arith.constant 0 : index
    %c3_325 = arith.constant 3 : index
    %c1_326 = arith.constant 1 : index
    %c0_327 = arith.constant 0 : index
    %c0_328 = arith.constant 0 : index
    %356 = vector.load %arg5[%c0_324, %c3_325, %c1_326, %c0_327, %c0_328] : memref<3x5x5x8x1xf32, #tpu.memory_space<vmem>>, vector<1x1x1x8x1xf32>
    %357 = vector.shape_cast %356 : vector<1x1x1x8x1xf32> to vector<8x1xf32>
    %358 = vector.broadcast %357 : vector<8x1xf32> to vector<8x256xf32>
    %359 = arith.mulf %355, %358 : vector<8x256xf32>
    %360 = arith.addf %350, %359 : vector<8x256xf32>
    %c0_329 = arith.constant 0 : index
    %c144_330 = arith.constant 144 : index
    %361 = vector.load %arg9[%c0_329, %c144_330] : memref<8x452xf32, #tpu.memory_space<vmem>>, vector<8x256xf32>
    %c0_331 = arith.constant 0 : index
    %c3_332 = arith.constant 3 : index
    %c2_333 = arith.constant 2 : index
    %c0_334 = arith.constant 0 : index
    %c0_335 = arith.constant 0 : index
    %362 = vector.load %arg5[%c0_331, %c3_332, %c2_333, %c0_334, %c0_335] : memref<3x5x5x8x1xf32, #tpu.memory_space<vmem>>, vector<1x1x1x8x1xf32>
    %363 = vector.shape_cast %362 : vector<1x1x1x8x1xf32> to vector<8x1xf32>
    %364 = vector.broadcast %363 : vector<8x1xf32> to vector<8x256xf32>
    %365 = arith.mulf %361, %364 : vector<8x256xf32>
    %366 = arith.addf %360, %365 : vector<8x256xf32>
    %c0_336 = arith.constant 0 : index
    %c145_337 = arith.constant 145 : index
    %367 = vector.load %arg9[%c0_336, %c145_337] : memref<8x452xf32, #tpu.memory_space<vmem>>, vector<8x256xf32>
    %c3_338 = arith.constant 3 : index
    %c0_339 = arith.constant 0 : index
    %c0_340 = arith.constant 0 : index
    %368 = vector.load %arg3[%c3_338, %c0_339, %c0_340] : memref<6x1x256xf32, #tpu.memory_space<vmem>>, vector<1x1x256xf32>
    %369 = vector.shape_cast %368 : vector<1x1x256xf32> to vector<1x256xf32>
    %370 = vector.broadcast %369 : vector<1x256xf32> to vector<8x256xf32>
    %371 = arith.mulf %367, %370 : vector<8x256xf32>
    %c0_341 = arith.constant 0 : index
    %c3_342 = arith.constant 3 : index
    %c3_343 = arith.constant 3 : index
    %c0_344 = arith.constant 0 : index
    %c0_345 = arith.constant 0 : index
    %372 = vector.load %arg5[%c0_341, %c3_342, %c3_343, %c0_344, %c0_345] : memref<3x5x5x8x1xf32, #tpu.memory_space<vmem>>, vector<1x1x1x8x1xf32>
    %373 = vector.shape_cast %372 : vector<1x1x1x8x1xf32> to vector<8x1xf32>
    %374 = vector.broadcast %373 : vector<8x1xf32> to vector<8x256xf32>
    %375 = arith.mulf %371, %374 : vector<8x256xf32>
    %376 = arith.addf %366, %375 : vector<8x256xf32>
    %c0_346 = arith.constant 0 : index
    %c146 = arith.constant 146 : index
    %377 = vector.load %arg9[%c0_346, %c146] : memref<8x452xf32, #tpu.memory_space<vmem>>, vector<8x256xf32>
    %c4_347 = arith.constant 4 : index
    %c0_348 = arith.constant 0 : index
    %c0_349 = arith.constant 0 : index
    %378 = vector.load %arg3[%c4_347, %c0_348, %c0_349] : memref<6x1x256xf32, #tpu.memory_space<vmem>>, vector<1x1x256xf32>
    %379 = vector.shape_cast %378 : vector<1x1x256xf32> to vector<1x256xf32>
    %380 = vector.broadcast %379 : vector<1x256xf32> to vector<8x256xf32>
    %381 = arith.mulf %377, %380 : vector<8x256xf32>
    %c0_350 = arith.constant 0 : index
    %c3_351 = arith.constant 3 : index
    %c4_352 = arith.constant 4 : index
    %c0_353 = arith.constant 0 : index
    %c0_354 = arith.constant 0 : index
    %382 = vector.load %arg5[%c0_350, %c3_351, %c4_352, %c0_353, %c0_354] : memref<3x5x5x8x1xf32, #tpu.memory_space<vmem>>, vector<1x1x1x8x1xf32>
    %383 = vector.shape_cast %382 : vector<1x1x1x8x1xf32> to vector<8x1xf32>
    %384 = vector.broadcast %383 : vector<8x1xf32> to vector<8x256xf32>
    %385 = arith.mulf %381, %384 : vector<8x256xf32>
    %386 = arith.addf %376, %385 : vector<8x256xf32>
    %c0_355 = arith.constant 0 : index
    %c158 = arith.constant 158 : index
    %387 = vector.load %arg9[%c0_355, %c158] : memref<8x452xf32, #tpu.memory_space<vmem>>, vector<8x256xf32>
    %c1_356 = arith.constant 1 : index
    %c0_357 = arith.constant 0 : index
    %c0_358 = arith.constant 0 : index
    %388 = vector.load %arg3[%c1_356, %c0_357, %c0_358] : memref<6x1x256xf32, #tpu.memory_space<vmem>>, vector<1x1x256xf32>
    %389 = vector.shape_cast %388 : vector<1x1x256xf32> to vector<1x256xf32>
    %390 = vector.broadcast %389 : vector<1x256xf32> to vector<8x256xf32>
    %391 = arith.mulf %387, %390 : vector<8x256xf32>
    %c0_359 = arith.constant 0 : index
    %c4_360 = arith.constant 4 : index
    %c0_361 = arith.constant 0 : index
    %c0_362 = arith.constant 0 : index
    %c0_363 = arith.constant 0 : index
    %392 = vector.load %arg5[%c0_359, %c4_360, %c0_361, %c0_362, %c0_363] : memref<3x5x5x8x1xf32, #tpu.memory_space<vmem>>, vector<1x1x1x8x1xf32>
    %393 = vector.shape_cast %392 : vector<1x1x1x8x1xf32> to vector<8x1xf32>
    %394 = vector.broadcast %393 : vector<8x1xf32> to vector<8x256xf32>
    %395 = arith.mulf %391, %394 : vector<8x256xf32>
    %396 = arith.addf %386, %395 : vector<8x256xf32>
    %c0_364 = arith.constant 0 : index
    %c159 = arith.constant 159 : index
    %397 = vector.load %arg9[%c0_364, %c159] : memref<8x452xf32, #tpu.memory_space<vmem>>, vector<8x256xf32>
    %c2_365 = arith.constant 2 : index
    %c0_366 = arith.constant 0 : index
    %c0_367 = arith.constant 0 : index
    %398 = vector.load %arg3[%c2_365, %c0_366, %c0_367] : memref<6x1x256xf32, #tpu.memory_space<vmem>>, vector<1x1x256xf32>
    %399 = vector.shape_cast %398 : vector<1x1x256xf32> to vector<1x256xf32>
    %400 = vector.broadcast %399 : vector<1x256xf32> to vector<8x256xf32>
    %401 = arith.mulf %397, %400 : vector<8x256xf32>
    %c0_368 = arith.constant 0 : index
    %c4_369 = arith.constant 4 : index
    %c1_370 = arith.constant 1 : index
    %c0_371 = arith.constant 0 : index
    %c0_372 = arith.constant 0 : index
    %402 = vector.load %arg5[%c0_368, %c4_369, %c1_370, %c0_371, %c0_372] : memref<3x5x5x8x1xf32, #tpu.memory_space<vmem>>, vector<1x1x1x8x1xf32>
    %403 = vector.shape_cast %402 : vector<1x1x1x8x1xf32> to vector<8x1xf32>
    %404 = vector.broadcast %403 : vector<8x1xf32> to vector<8x256xf32>
    %405 = arith.mulf %401, %404 : vector<8x256xf32>
    %406 = arith.addf %396, %405 : vector<8x256xf32>
    %c0_373 = arith.constant 0 : index
    %c160 = arith.constant 160 : index
    %407 = vector.load %arg9[%c0_373, %c160] : memref<8x452xf32, #tpu.memory_space<vmem>>, vector<8x256xf32>
    %c0_374 = arith.constant 0 : index
    %c4_375 = arith.constant 4 : index
    %c2_376 = arith.constant 2 : index
    %c0_377 = arith.constant 0 : index
    %c0_378 = arith.constant 0 : index
    %408 = vector.load %arg5[%c0_374, %c4_375, %c2_376, %c0_377, %c0_378] : memref<3x5x5x8x1xf32, #tpu.memory_space<vmem>>, vector<1x1x1x8x1xf32>
    %409 = vector.shape_cast %408 : vector<1x1x1x8x1xf32> to vector<8x1xf32>
    %410 = vector.broadcast %409 : vector<8x1xf32> to vector<8x256xf32>
    %411 = arith.mulf %407, %410 : vector<8x256xf32>
    %412 = arith.addf %406, %411 : vector<8x256xf32>
    %c0_379 = arith.constant 0 : index
    %c161 = arith.constant 161 : index
    %413 = vector.load %arg9[%c0_379, %c161] : memref<8x452xf32, #tpu.memory_space<vmem>>, vector<8x256xf32>
    %c3_380 = arith.constant 3 : index
    %c0_381 = arith.constant 0 : index
    %c0_382 = arith.constant 0 : index
    %414 = vector.load %arg3[%c3_380, %c0_381, %c0_382] : memref<6x1x256xf32, #tpu.memory_space<vmem>>, vector<1x1x256xf32>
    %415 = vector.shape_cast %414 : vector<1x1x256xf32> to vector<1x256xf32>
    %416 = vector.broadcast %415 : vector<1x256xf32> to vector<8x256xf32>
    %417 = arith.mulf %413, %416 : vector<8x256xf32>
    %c0_383 = arith.constant 0 : index
    %c4_384 = arith.constant 4 : index
    %c3_385 = arith.constant 3 : index
    %c0_386 = arith.constant 0 : index
    %c0_387 = arith.constant 0 : index
    %418 = vector.load %arg5[%c0_383, %c4_384, %c3_385, %c0_386, %c0_387] : memref<3x5x5x8x1xf32, #tpu.memory_space<vmem>>, vector<1x1x1x8x1xf32>
    %419 = vector.shape_cast %418 : vector<1x1x1x8x1xf32> to vector<8x1xf32>
    %420 = vector.broadcast %419 : vector<8x1xf32> to vector<8x256xf32>
    %421 = arith.mulf %417, %420 : vector<8x256xf32>
    %422 = arith.addf %412, %421 : vector<8x256xf32>
    %c0_388 = arith.constant 0 : index
    %c162 = arith.constant 162 : index
    %423 = vector.load %arg9[%c0_388, %c162] : memref<8x452xf32, #tpu.memory_space<vmem>>, vector<8x256xf32>
    %c4_389 = arith.constant 4 : index
    %c0_390 = arith.constant 0 : index
    %c0_391 = arith.constant 0 : index
    %424 = vector.load %arg3[%c4_389, %c0_390, %c0_391] : memref<6x1x256xf32, #tpu.memory_space<vmem>>, vector<1x1x256xf32>
    %425 = vector.shape_cast %424 : vector<1x1x256xf32> to vector<1x256xf32>
    %426 = vector.broadcast %425 : vector<1x256xf32> to vector<8x256xf32>
    %427 = arith.mulf %423, %426 : vector<8x256xf32>
    %c0_392 = arith.constant 0 : index
    %c4_393 = arith.constant 4 : index
    %c4_394 = arith.constant 4 : index
    %c0_395 = arith.constant 0 : index
    %c0_396 = arith.constant 0 : index
    %428 = vector.load %arg5[%c0_392, %c4_393, %c4_394, %c0_395, %c0_396] : memref<3x5x5x8x1xf32, #tpu.memory_space<vmem>>, vector<1x1x1x8x1xf32>
    %429 = vector.shape_cast %428 : vector<1x1x1x8x1xf32> to vector<8x1xf32>
    %430 = vector.broadcast %429 : vector<8x1xf32> to vector<8x256xf32>
    %431 = arith.mulf %427, %430 : vector<8x256xf32>
    %432 = arith.addf %422, %431 : vector<8x256xf32>
    %c0_397 = arith.constant 0 : index
    %c94_398 = arith.constant 94 : index
    %433 = vector.load %arg9[%c0_397, %c94_398] : memref<8x452xf32, #tpu.memory_space<vmem>>, vector<8x256xf32>
    %c1_399 = arith.constant 1 : index
    %c0_400 = arith.constant 0 : index
    %c0_401 = arith.constant 0 : index
    %434 = vector.load %arg3[%c1_399, %c0_400, %c0_401] : memref<6x1x256xf32, #tpu.memory_space<vmem>>, vector<1x1x256xf32>
    %435 = vector.shape_cast %434 : vector<1x1x256xf32> to vector<1x256xf32>
    %436 = vector.broadcast %435 : vector<1x256xf32> to vector<8x256xf32>
    %437 = arith.mulf %433, %436 : vector<8x256xf32>
    %c2_402 = arith.constant 2 : index
    %c0_403 = arith.constant 0 : index
    %c0_404 = arith.constant 0 : index
    %c0_405 = arith.constant 0 : index
    %c0_406 = arith.constant 0 : index
    %438 = vector.load %arg4[%c2_402, %c0_403, %c0_404, %c0_405, %c0_406] : memref<3x3x3x8x1xf32, #tpu.memory_space<vmem>>, vector<1x1x1x8x1xf32>
    %439 = vector.shape_cast %438 : vector<1x1x1x8x1xf32> to vector<8x1xf32>
    %440 = vector.broadcast %439 : vector<8x1xf32> to vector<8x256xf32>
    %441 = arith.mulf %437, %440 : vector<8x256xf32>
    %c0_407 = arith.constant 0 : index
    %c96_408 = arith.constant 96 : index
    %442 = vector.load %arg9[%c0_407, %c96_408] : memref<8x452xf32, #tpu.memory_space<vmem>>, vector<8x256xf32>
    %c2_409 = arith.constant 2 : index
    %c0_410 = arith.constant 0 : index
    %c1_411 = arith.constant 1 : index
    %c0_412 = arith.constant 0 : index
    %c0_413 = arith.constant 0 : index
    %443 = vector.load %arg4[%c2_409, %c0_410, %c1_411, %c0_412, %c0_413] : memref<3x3x3x8x1xf32, #tpu.memory_space<vmem>>, vector<1x1x1x8x1xf32>
    %444 = vector.shape_cast %443 : vector<1x1x1x8x1xf32> to vector<8x1xf32>
    %445 = vector.broadcast %444 : vector<8x1xf32> to vector<8x256xf32>
    %446 = arith.mulf %442, %445 : vector<8x256xf32>
    %447 = arith.addf %441, %446 : vector<8x256xf32>
    %c0_414 = arith.constant 0 : index
    %c98_415 = arith.constant 98 : index
    %448 = vector.load %arg9[%c0_414, %c98_415] : memref<8x452xf32, #tpu.memory_space<vmem>>, vector<8x256xf32>
    %c4_416 = arith.constant 4 : index
    %c0_417 = arith.constant 0 : index
    %c0_418 = arith.constant 0 : index
    %449 = vector.load %arg3[%c4_416, %c0_417, %c0_418] : memref<6x1x256xf32, #tpu.memory_space<vmem>>, vector<1x1x256xf32>
    %450 = vector.shape_cast %449 : vector<1x1x256xf32> to vector<1x256xf32>
    %451 = vector.broadcast %450 : vector<1x256xf32> to vector<8x256xf32>
    %452 = arith.mulf %448, %451 : vector<8x256xf32>
    %c2_419 = arith.constant 2 : index
    %c0_420 = arith.constant 0 : index
    %c2_421 = arith.constant 2 : index
    %c0_422 = arith.constant 0 : index
    %c0_423 = arith.constant 0 : index
    %453 = vector.load %arg4[%c2_419, %c0_420, %c2_421, %c0_422, %c0_423] : memref<3x3x3x8x1xf32, #tpu.memory_space<vmem>>, vector<1x1x1x8x1xf32>
    %454 = vector.shape_cast %453 : vector<1x1x1x8x1xf32> to vector<8x1xf32>
    %455 = vector.broadcast %454 : vector<8x1xf32> to vector<8x256xf32>
    %456 = arith.mulf %452, %455 : vector<8x256xf32>
    %457 = arith.addf %447, %456 : vector<8x256xf32>
    %c0_424 = arith.constant 0 : index
    %c126_425 = arith.constant 126 : index
    %458 = vector.load %arg9[%c0_424, %c126_425] : memref<8x452xf32, #tpu.memory_space<vmem>>, vector<8x256xf32>
    %c1_426 = arith.constant 1 : index
    %c0_427 = arith.constant 0 : index
    %c0_428 = arith.constant 0 : index
    %459 = vector.load %arg3[%c1_426, %c0_427, %c0_428] : memref<6x1x256xf32, #tpu.memory_space<vmem>>, vector<1x1x256xf32>
    %460 = vector.shape_cast %459 : vector<1x1x256xf32> to vector<1x256xf32>
    %461 = vector.broadcast %460 : vector<1x256xf32> to vector<8x256xf32>
    %462 = arith.mulf %458, %461 : vector<8x256xf32>
    %c2_429 = arith.constant 2 : index
    %c1_430 = arith.constant 1 : index
    %c0_431 = arith.constant 0 : index
    %c0_432 = arith.constant 0 : index
    %c0_433 = arith.constant 0 : index
    %463 = vector.load %arg4[%c2_429, %c1_430, %c0_431, %c0_432, %c0_433] : memref<3x3x3x8x1xf32, #tpu.memory_space<vmem>>, vector<1x1x1x8x1xf32>
    %464 = vector.shape_cast %463 : vector<1x1x1x8x1xf32> to vector<8x1xf32>
    %465 = vector.broadcast %464 : vector<8x1xf32> to vector<8x256xf32>
    %466 = arith.mulf %462, %465 : vector<8x256xf32>
    %467 = arith.addf %457, %466 : vector<8x256xf32>
    %c0_434 = arith.constant 0 : index
    %c128_435 = arith.constant 128 : index
    %468 = vector.load %arg9[%c0_434, %c128_435] : memref<8x452xf32, #tpu.memory_space<vmem>>, vector<8x256xf32>
    %c2_436 = arith.constant 2 : index
    %c1_437 = arith.constant 1 : index
    %c1_438 = arith.constant 1 : index
    %c0_439 = arith.constant 0 : index
    %c0_440 = arith.constant 0 : index
    %469 = vector.load %arg4[%c2_436, %c1_437, %c1_438, %c0_439, %c0_440] : memref<3x3x3x8x1xf32, #tpu.memory_space<vmem>>, vector<1x1x1x8x1xf32>
    %470 = vector.shape_cast %469 : vector<1x1x1x8x1xf32> to vector<8x1xf32>
    %471 = vector.broadcast %470 : vector<8x1xf32> to vector<8x256xf32>
    %472 = arith.mulf %468, %471 : vector<8x256xf32>
    %473 = arith.addf %467, %472 : vector<8x256xf32>
    %c0_441 = arith.constant 0 : index
    %c130_442 = arith.constant 130 : index
    %474 = vector.load %arg9[%c0_441, %c130_442] : memref<8x452xf32, #tpu.memory_space<vmem>>, vector<8x256xf32>
    %c4_443 = arith.constant 4 : index
    %c0_444 = arith.constant 0 : index
    %c0_445 = arith.constant 0 : index
    %475 = vector.load %arg3[%c4_443, %c0_444, %c0_445] : memref<6x1x256xf32, #tpu.memory_space<vmem>>, vector<1x1x256xf32>
    %476 = vector.shape_cast %475 : vector<1x1x256xf32> to vector<1x256xf32>
    %477 = vector.broadcast %476 : vector<1x256xf32> to vector<8x256xf32>
    %478 = arith.mulf %474, %477 : vector<8x256xf32>
    %c2_446 = arith.constant 2 : index
    %c1_447 = arith.constant 1 : index
    %c2_448 = arith.constant 2 : index
    %c0_449 = arith.constant 0 : index
    %c0_450 = arith.constant 0 : index
    %479 = vector.load %arg4[%c2_446, %c1_447, %c2_448, %c0_449, %c0_450] : memref<3x3x3x8x1xf32, #tpu.memory_space<vmem>>, vector<1x1x1x8x1xf32>
    %480 = vector.shape_cast %479 : vector<1x1x1x8x1xf32> to vector<8x1xf32>
    %481 = vector.broadcast %480 : vector<8x1xf32> to vector<8x256xf32>
    %482 = arith.mulf %478, %481 : vector<8x256xf32>
    %483 = arith.addf %473, %482 : vector<8x256xf32>
    %c0_451 = arith.constant 0 : index
    %c158_452 = arith.constant 158 : index
    %484 = vector.load %arg9[%c0_451, %c158_452] : memref<8x452xf32, #tpu.memory_space<vmem>>, vector<8x256xf32>
    %c1_453 = arith.constant 1 : index
    %c0_454 = arith.constant 0 : index
    %c0_455 = arith.constant 0 : index
    %485 = vector.load %arg3[%c1_453, %c0_454, %c0_455] : memref<6x1x256xf32, #tpu.memory_space<vmem>>, vector<1x1x256xf32>
    %486 = vector.shape_cast %485 : vector<1x1x256xf32> to vector<1x256xf32>
    %487 = vector.broadcast %486 : vector<1x256xf32> to vector<8x256xf32>
    %488 = arith.mulf %484, %487 : vector<8x256xf32>
    %c2_456 = arith.constant 2 : index
    %c2_457 = arith.constant 2 : index
    %c0_458 = arith.constant 0 : index
    %c0_459 = arith.constant 0 : index
    %c0_460 = arith.constant 0 : index
    %489 = vector.load %arg4[%c2_456, %c2_457, %c0_458, %c0_459, %c0_460] : memref<3x3x3x8x1xf32, #tpu.memory_space<vmem>>, vector<1x1x1x8x1xf32>
    %490 = vector.shape_cast %489 : vector<1x1x1x8x1xf32> to vector<8x1xf32>
    %491 = vector.broadcast %490 : vector<8x1xf32> to vector<8x256xf32>
    %492 = arith.mulf %488, %491 : vector<8x256xf32>
    %493 = arith.addf %483, %492 : vector<8x256xf32>
    %c0_461 = arith.constant 0 : index
    %c160_462 = arith.constant 160 : index
    %494 = vector.load %arg9[%c0_461, %c160_462] : memref<8x452xf32, #tpu.memory_space<vmem>>, vector<8x256xf32>
    %c2_463 = arith.constant 2 : index
    %c2_464 = arith.constant 2 : index
    %c1_465 = arith.constant 1 : index
    %c0_466 = arith.constant 0 : index
    %c0_467 = arith.constant 0 : index
    %495 = vector.load %arg4[%c2_463, %c2_464, %c1_465, %c0_466, %c0_467] : memref<3x3x3x8x1xf32, #tpu.memory_space<vmem>>, vector<1x1x1x8x1xf32>
    %496 = vector.shape_cast %495 : vector<1x1x1x8x1xf32> to vector<8x1xf32>
    %497 = vector.broadcast %496 : vector<8x1xf32> to vector<8x256xf32>
    %498 = arith.mulf %494, %497 : vector<8x256xf32>
    %499 = arith.addf %493, %498 : vector<8x256xf32>
    %c0_468 = arith.constant 0 : index
    %c162_469 = arith.constant 162 : index
    %500 = vector.load %arg9[%c0_468, %c162_469] : memref<8x452xf32, #tpu.memory_space<vmem>>, vector<8x256xf32>
    %c4_470 = arith.constant 4 : index
    %c0_471 = arith.constant 0 : index
    %c0_472 = arith.constant 0 : index
    %501 = vector.load %arg3[%c4_470, %c0_471, %c0_472] : memref<6x1x256xf32, #tpu.memory_space<vmem>>, vector<1x1x256xf32>
    %502 = vector.shape_cast %501 : vector<1x1x256xf32> to vector<1x256xf32>
    %503 = vector.broadcast %502 : vector<1x256xf32> to vector<8x256xf32>
    %504 = arith.mulf %500, %503 : vector<8x256xf32>
    %c2_473 = arith.constant 2 : index
    %c2_474 = arith.constant 2 : index
    %c2_475 = arith.constant 2 : index
    %c0_476 = arith.constant 0 : index
    %c0_477 = arith.constant 0 : index
    %505 = vector.load %arg4[%c2_473, %c2_474, %c2_475, %c0_476, %c0_477] : memref<3x3x3x8x1xf32, #tpu.memory_space<vmem>>, vector<1x1x1x8x1xf32>
    %506 = vector.shape_cast %505 : vector<1x1x1x8x1xf32> to vector<8x1xf32>
    %507 = vector.broadcast %506 : vector<8x1xf32> to vector<8x256xf32>
    %508 = arith.mulf %504, %507 : vector<8x256xf32>
    %509 = arith.addf %499, %508 : vector<8x256xf32>
    %c0_478 = arith.constant 0 : index
    %c60 = arith.constant 60 : index
    %510 = vector.load %arg9[%c0_478, %c60] : memref<8x452xf32, #tpu.memory_space<vmem>>, vector<8x256xf32>
    %c0_479 = arith.constant 0 : index
    %c0_480 = arith.constant 0 : index
    %c0_481 = arith.constant 0 : index
    %511 = vector.load %arg3[%c0_479, %c0_480, %c0_481] : memref<6x1x256xf32, #tpu.memory_space<vmem>>, vector<1x1x256xf32>
    %512 = vector.shape_cast %511 : vector<1x1x256xf32> to vector<1x256xf32>
    %513 = vector.broadcast %512 : vector<1x256xf32> to vector<8x256xf32>
    %514 = arith.mulf %510, %513 : vector<8x256xf32>
    %c2_482 = arith.constant 2 : index
    %c0_483 = arith.constant 0 : index
    %c0_484 = arith.constant 0 : index
    %c0_485 = arith.constant 0 : index
    %c0_486 = arith.constant 0 : index
    %515 = vector.load %arg5[%c2_482, %c0_483, %c0_484, %c0_485, %c0_486] : memref<3x5x5x8x1xf32, #tpu.memory_space<vmem>>, vector<1x1x1x8x1xf32>
    %516 = vector.shape_cast %515 : vector<1x1x1x8x1xf32> to vector<8x1xf32>
    %517 = vector.broadcast %516 : vector<8x1xf32> to vector<8x256xf32>
    %518 = arith.mulf %514, %517 : vector<8x256xf32>
    %c0_487 = arith.constant 0 : index
    %c62 = arith.constant 62 : index
    %519 = vector.load %arg9[%c0_487, %c62] : memref<8x452xf32, #tpu.memory_space<vmem>>, vector<8x256xf32>
    %c1_488 = arith.constant 1 : index
    %c0_489 = arith.constant 0 : index
    %c0_490 = arith.constant 0 : index
    %520 = vector.load %arg3[%c1_488, %c0_489, %c0_490] : memref<6x1x256xf32, #tpu.memory_space<vmem>>, vector<1x1x256xf32>
    %521 = vector.shape_cast %520 : vector<1x1x256xf32> to vector<1x256xf32>
    %522 = vector.broadcast %521 : vector<1x256xf32> to vector<8x256xf32>
    %523 = arith.mulf %519, %522 : vector<8x256xf32>
    %c2_491 = arith.constant 2 : index
    %c0_492 = arith.constant 0 : index
    %c1_493 = arith.constant 1 : index
    %c0_494 = arith.constant 0 : index
    %c0_495 = arith.constant 0 : index
    %524 = vector.load %arg5[%c2_491, %c0_492, %c1_493, %c0_494, %c0_495] : memref<3x5x5x8x1xf32, #tpu.memory_space<vmem>>, vector<1x1x1x8x1xf32>
    %525 = vector.shape_cast %524 : vector<1x1x1x8x1xf32> to vector<8x1xf32>
    %526 = vector.broadcast %525 : vector<8x1xf32> to vector<8x256xf32>
    %527 = arith.mulf %523, %526 : vector<8x256xf32>
    %528 = arith.addf %518, %527 : vector<8x256xf32>
    %c0_496 = arith.constant 0 : index
    %c64 = arith.constant 64 : index
    %529 = vector.load %arg9[%c0_496, %c64] : memref<8x452xf32, #tpu.memory_space<vmem>>, vector<8x256xf32>
    %c2_497 = arith.constant 2 : index
    %c0_498 = arith.constant 0 : index
    %c2_499 = arith.constant 2 : index
    %c0_500 = arith.constant 0 : index
    %c0_501 = arith.constant 0 : index
    %530 = vector.load %arg5[%c2_497, %c0_498, %c2_499, %c0_500, %c0_501] : memref<3x5x5x8x1xf32, #tpu.memory_space<vmem>>, vector<1x1x1x8x1xf32>
    %531 = vector.shape_cast %530 : vector<1x1x1x8x1xf32> to vector<8x1xf32>
    %532 = vector.broadcast %531 : vector<8x1xf32> to vector<8x256xf32>
    %533 = arith.mulf %529, %532 : vector<8x256xf32>
    %534 = arith.addf %528, %533 : vector<8x256xf32>
    %c0_502 = arith.constant 0 : index
    %c66 = arith.constant 66 : index
    %535 = vector.load %arg9[%c0_502, %c66] : memref<8x452xf32, #tpu.memory_space<vmem>>, vector<8x256xf32>
    %c4_503 = arith.constant 4 : index
    %c0_504 = arith.constant 0 : index
    %c0_505 = arith.constant 0 : index
    %536 = vector.load %arg3[%c4_503, %c0_504, %c0_505] : memref<6x1x256xf32, #tpu.memory_space<vmem>>, vector<1x1x256xf32>
    %537 = vector.shape_cast %536 : vector<1x1x256xf32> to vector<1x256xf32>
    %538 = vector.broadcast %537 : vector<1x256xf32> to vector<8x256xf32>
    %539 = arith.mulf %535, %538 : vector<8x256xf32>
    %c2_506 = arith.constant 2 : index
    %c0_507 = arith.constant 0 : index
    %c3_508 = arith.constant 3 : index
    %c0_509 = arith.constant 0 : index
    %c0_510 = arith.constant 0 : index
    %540 = vector.load %arg5[%c2_506, %c0_507, %c3_508, %c0_509, %c0_510] : memref<3x5x5x8x1xf32, #tpu.memory_space<vmem>>, vector<1x1x1x8x1xf32>
    %541 = vector.shape_cast %540 : vector<1x1x1x8x1xf32> to vector<8x1xf32>
    %542 = vector.broadcast %541 : vector<8x1xf32> to vector<8x256xf32>
    %543 = arith.mulf %539, %542 : vector<8x256xf32>
    %544 = arith.addf %534, %543 : vector<8x256xf32>
    %c0_511 = arith.constant 0 : index
    %c68 = arith.constant 68 : index
    %545 = vector.load %arg9[%c0_511, %c68] : memref<8x452xf32, #tpu.memory_space<vmem>>, vector<8x256xf32>
    %c5 = arith.constant 5 : index
    %c0_512 = arith.constant 0 : index
    %c0_513 = arith.constant 0 : index
    %546 = vector.load %arg3[%c5, %c0_512, %c0_513] : memref<6x1x256xf32, #tpu.memory_space<vmem>>, vector<1x1x256xf32>
    %547 = vector.shape_cast %546 : vector<1x1x256xf32> to vector<1x256xf32>
    %548 = vector.broadcast %547 : vector<1x256xf32> to vector<8x256xf32>
    %549 = arith.mulf %545, %548 : vector<8x256xf32>
    %c2_514 = arith.constant 2 : index
    %c0_515 = arith.constant 0 : index
    %c4_516 = arith.constant 4 : index
    %c0_517 = arith.constant 0 : index
    %c0_518 = arith.constant 0 : index
    %550 = vector.load %arg5[%c2_514, %c0_515, %c4_516, %c0_517, %c0_518] : memref<3x5x5x8x1xf32, #tpu.memory_space<vmem>>, vector<1x1x1x8x1xf32>
    %551 = vector.shape_cast %550 : vector<1x1x1x8x1xf32> to vector<8x1xf32>
    %552 = vector.broadcast %551 : vector<8x1xf32> to vector<8x256xf32>
    %553 = arith.mulf %549, %552 : vector<8x256xf32>
    %554 = arith.addf %544, %553 : vector<8x256xf32>
    %c0_519 = arith.constant 0 : index
    %c92 = arith.constant 92 : index
    %555 = vector.load %arg9[%c0_519, %c92] : memref<8x452xf32, #tpu.memory_space<vmem>>, vector<8x256xf32>
    %c0_520 = arith.constant 0 : index
    %c0_521 = arith.constant 0 : index
    %c0_522 = arith.constant 0 : index
    %556 = vector.load %arg3[%c0_520, %c0_521, %c0_522] : memref<6x1x256xf32, #tpu.memory_space<vmem>>, vector<1x1x256xf32>
    %557 = vector.shape_cast %556 : vector<1x1x256xf32> to vector<1x256xf32>
    %558 = vector.broadcast %557 : vector<1x256xf32> to vector<8x256xf32>
    %559 = arith.mulf %555, %558 : vector<8x256xf32>
    %c2_523 = arith.constant 2 : index
    %c1_524 = arith.constant 1 : index
    %c0_525 = arith.constant 0 : index
    %c0_526 = arith.constant 0 : index
    %c0_527 = arith.constant 0 : index
    %560 = vector.load %arg5[%c2_523, %c1_524, %c0_525, %c0_526, %c0_527] : memref<3x5x5x8x1xf32, #tpu.memory_space<vmem>>, vector<1x1x1x8x1xf32>
    %561 = vector.shape_cast %560 : vector<1x1x1x8x1xf32> to vector<8x1xf32>
    %562 = vector.broadcast %561 : vector<8x1xf32> to vector<8x256xf32>
    %563 = arith.mulf %559, %562 : vector<8x256xf32>
    %564 = arith.addf %554, %563 : vector<8x256xf32>
    %c0_528 = arith.constant 0 : index
    %c94_529 = arith.constant 94 : index
    %565 = vector.load %arg9[%c0_528, %c94_529] : memref<8x452xf32, #tpu.memory_space<vmem>>, vector<8x256xf32>
    %c1_530 = arith.constant 1 : index
    %c0_531 = arith.constant 0 : index
    %c0_532 = arith.constant 0 : index
    %566 = vector.load %arg3[%c1_530, %c0_531, %c0_532] : memref<6x1x256xf32, #tpu.memory_space<vmem>>, vector<1x1x256xf32>
    %567 = vector.shape_cast %566 : vector<1x1x256xf32> to vector<1x256xf32>
    %568 = vector.broadcast %567 : vector<1x256xf32> to vector<8x256xf32>
    %569 = arith.mulf %565, %568 : vector<8x256xf32>
    %c2_533 = arith.constant 2 : index
    %c1_534 = arith.constant 1 : index
    %c1_535 = arith.constant 1 : index
    %c0_536 = arith.constant 0 : index
    %c0_537 = arith.constant 0 : index
    %570 = vector.load %arg5[%c2_533, %c1_534, %c1_535, %c0_536, %c0_537] : memref<3x5x5x8x1xf32, #tpu.memory_space<vmem>>, vector<1x1x1x8x1xf32>
    %571 = vector.shape_cast %570 : vector<1x1x1x8x1xf32> to vector<8x1xf32>
    %572 = vector.broadcast %571 : vector<8x1xf32> to vector<8x256xf32>
    %573 = arith.mulf %569, %572 : vector<8x256xf32>
    %574 = arith.addf %564, %573 : vector<8x256xf32>
    %c0_538 = arith.constant 0 : index
    %c96_539 = arith.constant 96 : index
    %575 = vector.load %arg9[%c0_538, %c96_539] : memref<8x452xf32, #tpu.memory_space<vmem>>, vector<8x256xf32>
    %c2_540 = arith.constant 2 : index
    %c1_541 = arith.constant 1 : index
    %c2_542 = arith.constant 2 : index
    %c0_543 = arith.constant 0 : index
    %c0_544 = arith.constant 0 : index
    %576 = vector.load %arg5[%c2_540, %c1_541, %c2_542, %c0_543, %c0_544] : memref<3x5x5x8x1xf32, #tpu.memory_space<vmem>>, vector<1x1x1x8x1xf32>
    %577 = vector.shape_cast %576 : vector<1x1x1x8x1xf32> to vector<8x1xf32>
    %578 = vector.broadcast %577 : vector<8x1xf32> to vector<8x256xf32>
    %579 = arith.mulf %575, %578 : vector<8x256xf32>
    %580 = arith.addf %574, %579 : vector<8x256xf32>
    %c0_545 = arith.constant 0 : index
    %c98_546 = arith.constant 98 : index
    %581 = vector.load %arg9[%c0_545, %c98_546] : memref<8x452xf32, #tpu.memory_space<vmem>>, vector<8x256xf32>
    %c4_547 = arith.constant 4 : index
    %c0_548 = arith.constant 0 : index
    %c0_549 = arith.constant 0 : index
    %582 = vector.load %arg3[%c4_547, %c0_548, %c0_549] : memref<6x1x256xf32, #tpu.memory_space<vmem>>, vector<1x1x256xf32>
    %583 = vector.shape_cast %582 : vector<1x1x256xf32> to vector<1x256xf32>
    %584 = vector.broadcast %583 : vector<1x256xf32> to vector<8x256xf32>
    %585 = arith.mulf %581, %584 : vector<8x256xf32>
    %c2_550 = arith.constant 2 : index
    %c1_551 = arith.constant 1 : index
    %c3_552 = arith.constant 3 : index
    %c0_553 = arith.constant 0 : index
    %c0_554 = arith.constant 0 : index
    %586 = vector.load %arg5[%c2_550, %c1_551, %c3_552, %c0_553, %c0_554] : memref<3x5x5x8x1xf32, #tpu.memory_space<vmem>>, vector<1x1x1x8x1xf32>
    %587 = vector.shape_cast %586 : vector<1x1x1x8x1xf32> to vector<8x1xf32>
    %588 = vector.broadcast %587 : vector<8x1xf32> to vector<8x256xf32>
    %589 = arith.mulf %585, %588 : vector<8x256xf32>
    %590 = arith.addf %580, %589 : vector<8x256xf32>
    %c0_555 = arith.constant 0 : index
    %c100 = arith.constant 100 : index
    %591 = vector.load %arg9[%c0_555, %c100] : memref<8x452xf32, #tpu.memory_space<vmem>>, vector<8x256xf32>
    %c5_556 = arith.constant 5 : index
    %c0_557 = arith.constant 0 : index
    %c0_558 = arith.constant 0 : index
    %592 = vector.load %arg3[%c5_556, %c0_557, %c0_558] : memref<6x1x256xf32, #tpu.memory_space<vmem>>, vector<1x1x256xf32>
    %593 = vector.shape_cast %592 : vector<1x1x256xf32> to vector<1x256xf32>
    %594 = vector.broadcast %593 : vector<1x256xf32> to vector<8x256xf32>
    %595 = arith.mulf %591, %594 : vector<8x256xf32>
    %c2_559 = arith.constant 2 : index
    %c1_560 = arith.constant 1 : index
    %c4_561 = arith.constant 4 : index
    %c0_562 = arith.constant 0 : index
    %c0_563 = arith.constant 0 : index
    %596 = vector.load %arg5[%c2_559, %c1_560, %c4_561, %c0_562, %c0_563] : memref<3x5x5x8x1xf32, #tpu.memory_space<vmem>>, vector<1x1x1x8x1xf32>
    %597 = vector.shape_cast %596 : vector<1x1x1x8x1xf32> to vector<8x1xf32>
    %598 = vector.broadcast %597 : vector<8x1xf32> to vector<8x256xf32>
    %599 = arith.mulf %595, %598 : vector<8x256xf32>
    %600 = arith.addf %590, %599 : vector<8x256xf32>
    %c0_564 = arith.constant 0 : index
    %c124 = arith.constant 124 : index
    %601 = vector.load %arg9[%c0_564, %c124] : memref<8x452xf32, #tpu.memory_space<vmem>>, vector<8x256xf32>
    %c0_565 = arith.constant 0 : index
    %c0_566 = arith.constant 0 : index
    %c0_567 = arith.constant 0 : index
    %602 = vector.load %arg3[%c0_565, %c0_566, %c0_567] : memref<6x1x256xf32, #tpu.memory_space<vmem>>, vector<1x1x256xf32>
    %603 = vector.shape_cast %602 : vector<1x1x256xf32> to vector<1x256xf32>
    %604 = vector.broadcast %603 : vector<1x256xf32> to vector<8x256xf32>
    %605 = arith.mulf %601, %604 : vector<8x256xf32>
    %c2_568 = arith.constant 2 : index
    %c2_569 = arith.constant 2 : index
    %c0_570 = arith.constant 0 : index
    %c0_571 = arith.constant 0 : index
    %c0_572 = arith.constant 0 : index
    %606 = vector.load %arg5[%c2_568, %c2_569, %c0_570, %c0_571, %c0_572] : memref<3x5x5x8x1xf32, #tpu.memory_space<vmem>>, vector<1x1x1x8x1xf32>
    %607 = vector.shape_cast %606 : vector<1x1x1x8x1xf32> to vector<8x1xf32>
    %608 = vector.broadcast %607 : vector<8x1xf32> to vector<8x256xf32>
    %609 = arith.mulf %605, %608 : vector<8x256xf32>
    %610 = arith.addf %600, %609 : vector<8x256xf32>
    %c0_573 = arith.constant 0 : index
    %c126_574 = arith.constant 126 : index
    %611 = vector.load %arg9[%c0_573, %c126_574] : memref<8x452xf32, #tpu.memory_space<vmem>>, vector<8x256xf32>
    %c1_575 = arith.constant 1 : index
    %c0_576 = arith.constant 0 : index
    %c0_577 = arith.constant 0 : index
    %612 = vector.load %arg3[%c1_575, %c0_576, %c0_577] : memref<6x1x256xf32, #tpu.memory_space<vmem>>, vector<1x1x256xf32>
    %613 = vector.shape_cast %612 : vector<1x1x256xf32> to vector<1x256xf32>
    %614 = vector.broadcast %613 : vector<1x256xf32> to vector<8x256xf32>
    %615 = arith.mulf %611, %614 : vector<8x256xf32>
    %c2_578 = arith.constant 2 : index
    %c2_579 = arith.constant 2 : index
    %c1_580 = arith.constant 1 : index
    %c0_581 = arith.constant 0 : index
    %c0_582 = arith.constant 0 : index
    %616 = vector.load %arg5[%c2_578, %c2_579, %c1_580, %c0_581, %c0_582] : memref<3x5x5x8x1xf32, #tpu.memory_space<vmem>>, vector<1x1x1x8x1xf32>
    %617 = vector.shape_cast %616 : vector<1x1x1x8x1xf32> to vector<8x1xf32>
    %618 = vector.broadcast %617 : vector<8x1xf32> to vector<8x256xf32>
    %619 = arith.mulf %615, %618 : vector<8x256xf32>
    %620 = arith.addf %610, %619 : vector<8x256xf32>
    %c0_583 = arith.constant 0 : index
    %c128_584 = arith.constant 128 : index
    %621 = vector.load %arg9[%c0_583, %c128_584] : memref<8x452xf32, #tpu.memory_space<vmem>>, vector<8x256xf32>
    %c2_585 = arith.constant 2 : index
    %c2_586 = arith.constant 2 : index
    %c2_587 = arith.constant 2 : index
    %c0_588 = arith.constant 0 : index
    %c0_589 = arith.constant 0 : index
    %622 = vector.load %arg5[%c2_585, %c2_586, %c2_587, %c0_588, %c0_589] : memref<3x5x5x8x1xf32, #tpu.memory_space<vmem>>, vector<1x1x1x8x1xf32>
    %623 = vector.shape_cast %622 : vector<1x1x1x8x1xf32> to vector<8x1xf32>
    %624 = vector.broadcast %623 : vector<8x1xf32> to vector<8x256xf32>
    %625 = arith.mulf %621, %624 : vector<8x256xf32>
    %626 = arith.addf %620, %625 : vector<8x256xf32>
    %c0_590 = arith.constant 0 : index
    %c130_591 = arith.constant 130 : index
    %627 = vector.load %arg9[%c0_590, %c130_591] : memref<8x452xf32, #tpu.memory_space<vmem>>, vector<8x256xf32>
    %c4_592 = arith.constant 4 : index
    %c0_593 = arith.constant 0 : index
    %c0_594 = arith.constant 0 : index
    %628 = vector.load %arg3[%c4_592, %c0_593, %c0_594] : memref<6x1x256xf32, #tpu.memory_space<vmem>>, vector<1x1x256xf32>
    %629 = vector.shape_cast %628 : vector<1x1x256xf32> to vector<1x256xf32>
    %630 = vector.broadcast %629 : vector<1x256xf32> to vector<8x256xf32>
    %631 = arith.mulf %627, %630 : vector<8x256xf32>
    %c2_595 = arith.constant 2 : index
    %c2_596 = arith.constant 2 : index
    %c3_597 = arith.constant 3 : index
    %c0_598 = arith.constant 0 : index
    %c0_599 = arith.constant 0 : index
    %632 = vector.load %arg5[%c2_595, %c2_596, %c3_597, %c0_598, %c0_599] : memref<3x5x5x8x1xf32, #tpu.memory_space<vmem>>, vector<1x1x1x8x1xf32>
    %633 = vector.shape_cast %632 : vector<1x1x1x8x1xf32> to vector<8x1xf32>
    %634 = vector.broadcast %633 : vector<8x1xf32> to vector<8x256xf32>
    %635 = arith.mulf %631, %634 : vector<8x256xf32>
    %636 = arith.addf %626, %635 : vector<8x256xf32>
    %c0_600 = arith.constant 0 : index
    %c132 = arith.constant 132 : index
    %637 = vector.load %arg9[%c0_600, %c132] : memref<8x452xf32, #tpu.memory_space<vmem>>, vector<8x256xf32>
    %c5_601 = arith.constant 5 : index
    %c0_602 = arith.constant 0 : index
    %c0_603 = arith.constant 0 : index
    %638 = vector.load %arg3[%c5_601, %c0_602, %c0_603] : memref<6x1x256xf32, #tpu.memory_space<vmem>>, vector<1x1x256xf32>
    %639 = vector.shape_cast %638 : vector<1x1x256xf32> to vector<1x256xf32>
    %640 = vector.broadcast %639 : vector<1x256xf32> to vector<8x256xf32>
    %641 = arith.mulf %637, %640 : vector<8x256xf32>
    %c2_604 = arith.constant 2 : index
    %c2_605 = arith.constant 2 : index
    %c4_606 = arith.constant 4 : index
    %c0_607 = arith.constant 0 : index
    %c0_608 = arith.constant 0 : index
    %642 = vector.load %arg5[%c2_604, %c2_605, %c4_606, %c0_607, %c0_608] : memref<3x5x5x8x1xf32, #tpu.memory_space<vmem>>, vector<1x1x1x8x1xf32>
    %643 = vector.shape_cast %642 : vector<1x1x1x8x1xf32> to vector<8x1xf32>
    %644 = vector.broadcast %643 : vector<8x1xf32> to vector<8x256xf32>
    %645 = arith.mulf %641, %644 : vector<8x256xf32>
    %646 = arith.addf %636, %645 : vector<8x256xf32>
    %c0_609 = arith.constant 0 : index
    %c156 = arith.constant 156 : index
    %647 = vector.load %arg9[%c0_609, %c156] : memref<8x452xf32, #tpu.memory_space<vmem>>, vector<8x256xf32>
    %c0_610 = arith.constant 0 : index
    %c0_611 = arith.constant 0 : index
    %c0_612 = arith.constant 0 : index
    %648 = vector.load %arg3[%c0_610, %c0_611, %c0_612] : memref<6x1x256xf32, #tpu.memory_space<vmem>>, vector<1x1x256xf32>
    %649 = vector.shape_cast %648 : vector<1x1x256xf32> to vector<1x256xf32>
    %650 = vector.broadcast %649 : vector<1x256xf32> to vector<8x256xf32>
    %651 = arith.mulf %647, %650 : vector<8x256xf32>
    %c2_613 = arith.constant 2 : index
    %c3_614 = arith.constant 3 : index
    %c0_615 = arith.constant 0 : index
    %c0_616 = arith.constant 0 : index
    %c0_617 = arith.constant 0 : index
    %652 = vector.load %arg5[%c2_613, %c3_614, %c0_615, %c0_616, %c0_617] : memref<3x5x5x8x1xf32, #tpu.memory_space<vmem>>, vector<1x1x1x8x1xf32>
    %653 = vector.shape_cast %652 : vector<1x1x1x8x1xf32> to vector<8x1xf32>
    %654 = vector.broadcast %653 : vector<8x1xf32> to vector<8x256xf32>
    %655 = arith.mulf %651, %654 : vector<8x256xf32>
    %656 = arith.addf %646, %655 : vector<8x256xf32>
    %c0_618 = arith.constant 0 : index
    %c158_619 = arith.constant 158 : index
    %657 = vector.load %arg9[%c0_618, %c158_619] : memref<8x452xf32, #tpu.memory_space<vmem>>, vector<8x256xf32>
    %c1_620 = arith.constant 1 : index
    %c0_621 = arith.constant 0 : index
    %c0_622 = arith.constant 0 : index
    %658 = vector.load %arg3[%c1_620, %c0_621, %c0_622] : memref<6x1x256xf32, #tpu.memory_space<vmem>>, vector<1x1x256xf32>
    %659 = vector.shape_cast %658 : vector<1x1x256xf32> to vector<1x256xf32>
    %660 = vector.broadcast %659 : vector<1x256xf32> to vector<8x256xf32>
    %661 = arith.mulf %657, %660 : vector<8x256xf32>
    %c2_623 = arith.constant 2 : index
    %c3_624 = arith.constant 3 : index
    %c1_625 = arith.constant 1 : index
    %c0_626 = arith.constant 0 : index
    %c0_627 = arith.constant 0 : index
    %662 = vector.load %arg5[%c2_623, %c3_624, %c1_625, %c0_626, %c0_627] : memref<3x5x5x8x1xf32, #tpu.memory_space<vmem>>, vector<1x1x1x8x1xf32>
    %663 = vector.shape_cast %662 : vector<1x1x1x8x1xf32> to vector<8x1xf32>
    %664 = vector.broadcast %663 : vector<8x1xf32> to vector<8x256xf32>
    %665 = arith.mulf %661, %664 : vector<8x256xf32>
    %666 = arith.addf %656, %665 : vector<8x256xf32>
    %c0_628 = arith.constant 0 : index
    %c160_629 = arith.constant 160 : index
    %667 = vector.load %arg9[%c0_628, %c160_629] : memref<8x452xf32, #tpu.memory_space<vmem>>, vector<8x256xf32>
    %c2_630 = arith.constant 2 : index
    %c3_631 = arith.constant 3 : index
    %c2_632 = arith.constant 2 : index
    %c0_633 = arith.constant 0 : index
    %c0_634 = arith.constant 0 : index
    %668 = vector.load %arg5[%c2_630, %c3_631, %c2_632, %c0_633, %c0_634] : memref<3x5x5x8x1xf32, #tpu.memory_space<vmem>>, vector<1x1x1x8x1xf32>
    %669 = vector.shape_cast %668 : vector<1x1x1x8x1xf32> to vector<8x1xf32>
    %670 = vector.broadcast %669 : vector<8x1xf32> to vector<8x256xf32>
    %671 = arith.mulf %667, %670 : vector<8x256xf32>
    %672 = arith.addf %666, %671 : vector<8x256xf32>
    %c0_635 = arith.constant 0 : index
    %c162_636 = arith.constant 162 : index
    %673 = vector.load %arg9[%c0_635, %c162_636] : memref<8x452xf32, #tpu.memory_space<vmem>>, vector<8x256xf32>
    %c4_637 = arith.constant 4 : index
    %c0_638 = arith.constant 0 : index
    %c0_639 = arith.constant 0 : index
    %674 = vector.load %arg3[%c4_637, %c0_638, %c0_639] : memref<6x1x256xf32, #tpu.memory_space<vmem>>, vector<1x1x256xf32>
    %675 = vector.shape_cast %674 : vector<1x1x256xf32> to vector<1x256xf32>
    %676 = vector.broadcast %675 : vector<1x256xf32> to vector<8x256xf32>
    %677 = arith.mulf %673, %676 : vector<8x256xf32>
    %c2_640 = arith.constant 2 : index
    %c3_641 = arith.constant 3 : index
    %c3_642 = arith.constant 3 : index
    %c0_643 = arith.constant 0 : index
    %c0_644 = arith.constant 0 : index
    %678 = vector.load %arg5[%c2_640, %c3_641, %c3_642, %c0_643, %c0_644] : memref<3x5x5x8x1xf32, #tpu.memory_space<vmem>>, vector<1x1x1x8x1xf32>
    %679 = vector.shape_cast %678 : vector<1x1x1x8x1xf32> to vector<8x1xf32>
    %680 = vector.broadcast %679 : vector<8x1xf32> to vector<8x256xf32>
    %681 = arith.mulf %677, %680 : vector<8x256xf32>
    %682 = arith.addf %672, %681 : vector<8x256xf32>
    %c0_645 = arith.constant 0 : index
    %c164 = arith.constant 164 : index
    %683 = vector.load %arg9[%c0_645, %c164] : memref<8x452xf32, #tpu.memory_space<vmem>>, vector<8x256xf32>
    %c5_646 = arith.constant 5 : index
    %c0_647 = arith.constant 0 : index
    %c0_648 = arith.constant 0 : index
    %684 = vector.load %arg3[%c5_646, %c0_647, %c0_648] : memref<6x1x256xf32, #tpu.memory_space<vmem>>, vector<1x1x256xf32>
    %685 = vector.shape_cast %684 : vector<1x1x256xf32> to vector<1x256xf32>
    %686 = vector.broadcast %685 : vector<1x256xf32> to vector<8x256xf32>
    %687 = arith.mulf %683, %686 : vector<8x256xf32>
    %c2_649 = arith.constant 2 : index
    %c3_650 = arith.constant 3 : index
    %c4_651 = arith.constant 4 : index
    %c0_652 = arith.constant 0 : index
    %c0_653 = arith.constant 0 : index
    %688 = vector.load %arg5[%c2_649, %c3_650, %c4_651, %c0_652, %c0_653] : memref<3x5x5x8x1xf32, #tpu.memory_space<vmem>>, vector<1x1x1x8x1xf32>
    %689 = vector.shape_cast %688 : vector<1x1x1x8x1xf32> to vector<8x1xf32>
    %690 = vector.broadcast %689 : vector<8x1xf32> to vector<8x256xf32>
    %691 = arith.mulf %687, %690 : vector<8x256xf32>
    %692 = arith.addf %682, %691 : vector<8x256xf32>
    %c0_654 = arith.constant 0 : index
    %c188 = arith.constant 188 : index
    %693 = vector.load %arg9[%c0_654, %c188] : memref<8x452xf32, #tpu.memory_space<vmem>>, vector<8x256xf32>
    %c0_655 = arith.constant 0 : index
    %c0_656 = arith.constant 0 : index
    %c0_657 = arith.constant 0 : index
    %694 = vector.load %arg3[%c0_655, %c0_656, %c0_657] : memref<6x1x256xf32, #tpu.memory_space<vmem>>, vector<1x1x256xf32>
    %695 = vector.shape_cast %694 : vector<1x1x256xf32> to vector<1x256xf32>
    %696 = vector.broadcast %695 : vector<1x256xf32> to vector<8x256xf32>
    %697 = arith.mulf %693, %696 : vector<8x256xf32>
    %c2_658 = arith.constant 2 : index
    %c4_659 = arith.constant 4 : index
    %c0_660 = arith.constant 0 : index
    %c0_661 = arith.constant 0 : index
    %c0_662 = arith.constant 0 : index
    %698 = vector.load %arg5[%c2_658, %c4_659, %c0_660, %c0_661, %c0_662] : memref<3x5x5x8x1xf32, #tpu.memory_space<vmem>>, vector<1x1x1x8x1xf32>
    %699 = vector.shape_cast %698 : vector<1x1x1x8x1xf32> to vector<8x1xf32>
    %700 = vector.broadcast %699 : vector<8x1xf32> to vector<8x256xf32>
    %701 = arith.mulf %697, %700 : vector<8x256xf32>
    %702 = arith.addf %692, %701 : vector<8x256xf32>
    %c0_663 = arith.constant 0 : index
    %c190 = arith.constant 190 : index
    %703 = vector.load %arg9[%c0_663, %c190] : memref<8x452xf32, #tpu.memory_space<vmem>>, vector<8x256xf32>
    %c1_664 = arith.constant 1 : index
    %c0_665 = arith.constant 0 : index
    %c0_666 = arith.constant 0 : index
    %704 = vector.load %arg3[%c1_664, %c0_665, %c0_666] : memref<6x1x256xf32, #tpu.memory_space<vmem>>, vector<1x1x256xf32>
    %705 = vector.shape_cast %704 : vector<1x1x256xf32> to vector<1x256xf32>
    %706 = vector.broadcast %705 : vector<1x256xf32> to vector<8x256xf32>
    %707 = arith.mulf %703, %706 : vector<8x256xf32>
    %c2_667 = arith.constant 2 : index
    %c4_668 = arith.constant 4 : index
    %c1_669 = arith.constant 1 : index
    %c0_670 = arith.constant 0 : index
    %c0_671 = arith.constant 0 : index
    %708 = vector.load %arg5[%c2_667, %c4_668, %c1_669, %c0_670, %c0_671] : memref<3x5x5x8x1xf32, #tpu.memory_space<vmem>>, vector<1x1x1x8x1xf32>
    %709 = vector.shape_cast %708 : vector<1x1x1x8x1xf32> to vector<8x1xf32>
    %710 = vector.broadcast %709 : vector<8x1xf32> to vector<8x256xf32>
    %711 = arith.mulf %707, %710 : vector<8x256xf32>
    %712 = arith.addf %702, %711 : vector<8x256xf32>
    %c0_672 = arith.constant 0 : index
    %c192 = arith.constant 192 : index
    %713 = vector.load %arg9[%c0_672, %c192] : memref<8x452xf32, #tpu.memory_space<vmem>>, vector<8x256xf32>
    %c2_673 = arith.constant 2 : index
    %c4_674 = arith.constant 4 : index
    %c2_675 = arith.constant 2 : index
    %c0_676 = arith.constant 0 : index
    %c0_677 = arith.constant 0 : index
    %714 = vector.load %arg5[%c2_673, %c4_674, %c2_675, %c0_676, %c0_677] : memref<3x5x5x8x1xf32, #tpu.memory_space<vmem>>, vector<1x1x1x8x1xf32>
    %715 = vector.shape_cast %714 : vector<1x1x1x8x1xf32> to vector<8x1xf32>
    %716 = vector.broadcast %715 : vector<8x1xf32> to vector<8x256xf32>
    %717 = arith.mulf %713, %716 : vector<8x256xf32>
    %718 = arith.addf %712, %717 : vector<8x256xf32>
    %c0_678 = arith.constant 0 : index
    %c194 = arith.constant 194 : index
    %719 = vector.load %arg9[%c0_678, %c194] : memref<8x452xf32, #tpu.memory_space<vmem>>, vector<8x256xf32>
    %c4_679 = arith.constant 4 : index
    %c0_680 = arith.constant 0 : index
    %c0_681 = arith.constant 0 : index
    %720 = vector.load %arg3[%c4_679, %c0_680, %c0_681] : memref<6x1x256xf32, #tpu.memory_space<vmem>>, vector<1x1x256xf32>
    %721 = vector.shape_cast %720 : vector<1x1x256xf32> to vector<1x256xf32>
    %722 = vector.broadcast %721 : vector<1x256xf32> to vector<8x256xf32>
    %723 = arith.mulf %719, %722 : vector<8x256xf32>
    %c2_682 = arith.constant 2 : index
    %c4_683 = arith.constant 4 : index
    %c3_684 = arith.constant 3 : index
    %c0_685 = arith.constant 0 : index
    %c0_686 = arith.constant 0 : index
    %724 = vector.load %arg5[%c2_682, %c4_683, %c3_684, %c0_685, %c0_686] : memref<3x5x5x8x1xf32, #tpu.memory_space<vmem>>, vector<1x1x1x8x1xf32>
    %725 = vector.shape_cast %724 : vector<1x1x1x8x1xf32> to vector<8x1xf32>
    %726 = vector.broadcast %725 : vector<8x1xf32> to vector<8x256xf32>
    %727 = arith.mulf %723, %726 : vector<8x256xf32>
    %728 = arith.addf %718, %727 : vector<8x256xf32>
    %c0_687 = arith.constant 0 : index
    %c196 = arith.constant 196 : index
    %729 = vector.load %arg9[%c0_687, %c196] : memref<8x452xf32, #tpu.memory_space<vmem>>, vector<8x256xf32>
    %c5_688 = arith.constant 5 : index
    %c0_689 = arith.constant 0 : index
    %c0_690 = arith.constant 0 : index
    %730 = vector.load %arg3[%c5_688, %c0_689, %c0_690] : memref<6x1x256xf32, #tpu.memory_space<vmem>>, vector<1x1x256xf32>
    %731 = vector.shape_cast %730 : vector<1x1x256xf32> to vector<1x256xf32>
    %732 = vector.broadcast %731 : vector<1x256xf32> to vector<8x256xf32>
    %733 = arith.mulf %729, %732 : vector<8x256xf32>
    %c2_691 = arith.constant 2 : index
    %c4_692 = arith.constant 4 : index
    %c4_693 = arith.constant 4 : index
    %c0_694 = arith.constant 0 : index
    %c0_695 = arith.constant 0 : index
    %734 = vector.load %arg5[%c2_691, %c4_692, %c4_693, %c0_694, %c0_695] : memref<3x5x5x8x1xf32, #tpu.memory_space<vmem>>, vector<1x1x1x8x1xf32>
    %735 = vector.shape_cast %734 : vector<1x1x1x8x1xf32> to vector<8x1xf32>
    %736 = vector.broadcast %735 : vector<8x1xf32> to vector<8x256xf32>
    %737 = arith.mulf %733, %736 : vector<8x256xf32>
    %738 = arith.addf %728, %737 : vector<8x256xf32>
    %c0_696 = arith.constant 0 : index
    %c0_697 = arith.constant 0 : index
    %739 = vector.load %arg6[%c0_696, %c0_697] : memref<24x32xf32, #tpu.memory_space<vmem>>, vector<24x32xf32>
    %740 = tpu.concatenate %203, %432, %509, %738 in 0 : vector<8x256xf32>, vector<8x256xf32>, vector<8x256xf32>, vector<8x256xf32> -> vector<32x256xf32>
    %cst_698 = arith.constant dense<0.000000e+00> : vector<24x256xf32>
    %741 = tpu.matmul %739, %740, %cst_698 {dimension_numbers = #tpu.dot_dimension_numbers<[1], [0], [0], [1], [0, 0, 1, 1], [], []>} : vector<24x32xf32>, vector<32x256xf32>, vector<24x256xf32> -> vector<24x256xf32>
    %742 = vector.extract_strided_slice %741 {offsets = [16, 0], sizes = [8, 256], strides = [1, 1]} : vector<24x256xf32> to vector<8x256xf32>
    %743 = arith.addf %126, %742 : vector<8x256xf32>
    %744 = vector.extract_strided_slice %741 {offsets = [0, 0], sizes = [8, 256], strides = [1, 1]} : vector<24x256xf32> to vector<8x256xf32>
    %cst_699 = arith.constant 0.000000e+00 : f32
    %745 = vector.broadcast %cst_699 : f32 to vector<8x256xf32>
    %746 = arith.maximumf %744, %745 : vector<8x256xf32>
    %c0_700 = arith.constant 0 : index
    %c128_701 = arith.constant 128 : index
    %747 = vector.load %arg10[%c0_700, %c128_701] : memref<8x452xf32, #tpu.memory_space<vmem>>, vector<8x256xf32>
    tpu.vector_store %arg10[%c0_700, %c128_701], %746 {strides = array<i32>} : memref<8x452xf32, #tpu.memory_space<vmem>>, vector<8x256xf32>,
    %c0_702 = arith.constant 0 : index
    %c111_703 = arith.constant 111 : index
    %748 = vector.load %arg10[%c0_702, %c111_703] : memref<8x452xf32, #tpu.memory_space<vmem>>, vector<8x256xf32>
    %c2_704 = arith.constant 2 : index
    %c0_705 = arith.constant 0 : index
    %c0_706 = arith.constant 0 : index
    %749 = vector.load %arg3[%c2_704, %c0_705, %c0_706] : memref<6x1x256xf32, #tpu.memory_space<vmem>>, vector<1x1x256xf32>
    %750 = vector.shape_cast %749 : vector<1x1x256xf32> to vector<1x256xf32>
    %751 = vector.broadcast %750 : vector<1x256xf32> to vector<8x256xf32>
    %752 = arith.mulf %748, %751 : vector<8x256xf32>
    %c1_707 = arith.constant 1 : index
    %c0_708 = arith.constant 0 : index
    %c0_709 = arith.constant 0 : index
    %c0_710 = arith.constant 0 : index
    %c0_711 = arith.constant 0 : index
    %753 = vector.load %arg4[%c1_707, %c0_708, %c0_709, %c0_710, %c0_711] : memref<3x3x3x8x1xf32, #tpu.memory_space<vmem>>, vector<1x1x1x8x1xf32>
    %754 = vector.shape_cast %753 : vector<1x1x1x8x1xf32> to vector<8x1xf32>
    %755 = vector.broadcast %754 : vector<8x1xf32> to vector<8x256xf32>
    %756 = arith.mulf %752, %755 : vector<8x256xf32>
    %c0_712 = arith.constant 0 : index
    %c112_713 = arith.constant 112 : index
    %757 = vector.load %arg10[%c0_712, %c112_713] : memref<8x452xf32, #tpu.memory_space<vmem>>, vector<8x256xf32>
    %c1_714 = arith.constant 1 : index
    %c0_715 = arith.constant 0 : index
    %c1_716 = arith.constant 1 : index
    %c0_717 = arith.constant 0 : index
    %c0_718 = arith.constant 0 : index
    %758 = vector.load %arg4[%c1_714, %c0_715, %c1_716, %c0_717, %c0_718] : memref<3x3x3x8x1xf32, #tpu.memory_space<vmem>>, vector<1x1x1x8x1xf32>
    %759 = vector.shape_cast %758 : vector<1x1x1x8x1xf32> to vector<8x1xf32>
    %760 = vector.broadcast %759 : vector<8x1xf32> to vector<8x256xf32>
    %761 = arith.mulf %757, %760 : vector<8x256xf32>
    %762 = arith.addf %756, %761 : vector<8x256xf32>
    %c0_719 = arith.constant 0 : index
    %c113_720 = arith.constant 113 : index
    %763 = vector.load %arg10[%c0_719, %c113_720] : memref<8x452xf32, #tpu.memory_space<vmem>>, vector<8x256xf32>
    %c3_721 = arith.constant 3 : index
    %c0_722 = arith.constant 0 : index
    %c0_723 = arith.constant 0 : index
    %764 = vector.load %arg3[%c3_721, %c0_722, %c0_723] : memref<6x1x256xf32, #tpu.memory_space<vmem>>, vector<1x1x256xf32>
    %765 = vector.shape_cast %764 : vector<1x1x256xf32> to vector<1x256xf32>
    %766 = vector.broadcast %765 : vector<1x256xf32> to vector<8x256xf32>
    %767 = arith.mulf %763, %766 : vector<8x256xf32>
    %c1_724 = arith.constant 1 : index
    %c0_725 = arith.constant 0 : index
    %c2_726 = arith.constant 2 : index
    %c0_727 = arith.constant 0 : index
    %c0_728 = arith.constant 0 : index
    %768 = vector.load %arg4[%c1_724, %c0_725, %c2_726, %c0_727, %c0_728] : memref<3x3x3x8x1xf32, #tpu.memory_space<vmem>>, vector<1x1x1x8x1xf32>
    %769 = vector.shape_cast %768 : vector<1x1x1x8x1xf32> to vector<8x1xf32>
    %770 = vector.broadcast %769 : vector<8x1xf32> to vector<8x256xf32>
    %771 = arith.mulf %767, %770 : vector<8x256xf32>
    %772 = arith.addf %762, %771 : vector<8x256xf32>
    %c0_729 = arith.constant 0 : index
    %c127_730 = arith.constant 127 : index
    %773 = vector.load %arg10[%c0_729, %c127_730] : memref<8x452xf32, #tpu.memory_space<vmem>>, vector<8x256xf32>
    %c2_731 = arith.constant 2 : index
    %c0_732 = arith.constant 0 : index
    %c0_733 = arith.constant 0 : index
    %774 = vector.load %arg3[%c2_731, %c0_732, %c0_733] : memref<6x1x256xf32, #tpu.memory_space<vmem>>, vector<1x1x256xf32>
    %775 = vector.shape_cast %774 : vector<1x1x256xf32> to vector<1x256xf32>
    %776 = vector.broadcast %775 : vector<1x256xf32> to vector<8x256xf32>
    %777 = arith.mulf %773, %776 : vector<8x256xf32>
    %c1_734 = arith.constant 1 : index
    %c1_735 = arith.constant 1 : index
    %c0_736 = arith.constant 0 : index
    %c0_737 = arith.constant 0 : index
    %c0_738 = arith.constant 0 : index
    %778 = vector.load %arg4[%c1_734, %c1_735, %c0_736, %c0_737, %c0_738] : memref<3x3x3x8x1xf32, #tpu.memory_space<vmem>>, vector<1x1x1x8x1xf32>
    %779 = vector.shape_cast %778 : vector<1x1x1x8x1xf32> to vector<8x1xf32>
    %780 = vector.broadcast %779 : vector<8x1xf32> to vector<8x256xf32>
    %781 = arith.mulf %777, %780 : vector<8x256xf32>
    %782 = arith.addf %772, %781 : vector<8x256xf32>
    %c0_739 = arith.constant 0 : index
    %c128_740 = arith.constant 128 : index
    %783 = vector.load %arg10[%c0_739, %c128_740] : memref<8x452xf32, #tpu.memory_space<vmem>>, vector<8x256xf32>
    %c1_741 = arith.constant 1 : index
    %c1_742 = arith.constant 1 : index
    %c1_743 = arith.constant 1 : index
    %c0_744 = arith.constant 0 : index
    %c0_745 = arith.constant 0 : index
    %784 = vector.load %arg4[%c1_741, %c1_742, %c1_743, %c0_744, %c0_745] : memref<3x3x3x8x1xf32, #tpu.memory_space<vmem>>, vector<1x1x1x8x1xf32>
    %785 = vector.shape_cast %784 : vector<1x1x1x8x1xf32> to vector<8x1xf32>
    %786 = vector.broadcast %785 : vector<8x1xf32> to vector<8x256xf32>
    %787 = arith.mulf %783, %786 : vector<8x256xf32>
    %788 = arith.addf %782, %787 : vector<8x256xf32>
    %c0_746 = arith.constant 0 : index
    %c129_747 = arith.constant 129 : index
    %789 = vector.load %arg10[%c0_746, %c129_747] : memref<8x452xf32, #tpu.memory_space<vmem>>, vector<8x256xf32>
    %c3_748 = arith.constant 3 : index
    %c0_749 = arith.constant 0 : index
    %c0_750 = arith.constant 0 : index
    %790 = vector.load %arg3[%c3_748, %c0_749, %c0_750] : memref<6x1x256xf32, #tpu.memory_space<vmem>>, vector<1x1x256xf32>
    %791 = vector.shape_cast %790 : vector<1x1x256xf32> to vector<1x256xf32>
    %792 = vector.broadcast %791 : vector<1x256xf32> to vector<8x256xf32>
    %793 = arith.mulf %789, %792 : vector<8x256xf32>
    %c1_751 = arith.constant 1 : index
    %c1_752 = arith.constant 1 : index
    %c2_753 = arith.constant 2 : index
    %c0_754 = arith.constant 0 : index
    %c0_755 = arith.constant 0 : index
    %794 = vector.load %arg4[%c1_751, %c1_752, %c2_753, %c0_754, %c0_755] : memref<3x3x3x8x1xf32, #tpu.memory_space<vmem>>, vector<1x1x1x8x1xf32>
    %795 = vector.shape_cast %794 : vector<1x1x1x8x1xf32> to vector<8x1xf32>
    %796 = vector.broadcast %795 : vector<8x1xf32> to vector<8x256xf32>
    %797 = arith.mulf %793, %796 : vector<8x256xf32>
    %798 = arith.addf %788, %797 : vector<8x256xf32>
    %c0_756 = arith.constant 0 : index
    %c143_757 = arith.constant 143 : index
    %799 = vector.load %arg10[%c0_756, %c143_757] : memref<8x452xf32, #tpu.memory_space<vmem>>, vector<8x256xf32>
    %c2_758 = arith.constant 2 : index
    %c0_759 = arith.constant 0 : index
    %c0_760 = arith.constant 0 : index
    %800 = vector.load %arg3[%c2_758, %c0_759, %c0_760] : memref<6x1x256xf32, #tpu.memory_space<vmem>>, vector<1x1x256xf32>
    %801 = vector.shape_cast %800 : vector<1x1x256xf32> to vector<1x256xf32>
    %802 = vector.broadcast %801 : vector<1x256xf32> to vector<8x256xf32>
    %803 = arith.mulf %799, %802 : vector<8x256xf32>
    %c1_761 = arith.constant 1 : index
    %c2_762 = arith.constant 2 : index
    %c0_763 = arith.constant 0 : index
    %c0_764 = arith.constant 0 : index
    %c0_765 = arith.constant 0 : index
    %804 = vector.load %arg4[%c1_761, %c2_762, %c0_763, %c0_764, %c0_765] : memref<3x3x3x8x1xf32, #tpu.memory_space<vmem>>, vector<1x1x1x8x1xf32>
    %805 = vector.shape_cast %804 : vector<1x1x1x8x1xf32> to vector<8x1xf32>
    %806 = vector.broadcast %805 : vector<8x1xf32> to vector<8x256xf32>
    %807 = arith.mulf %803, %806 : vector<8x256xf32>
    %808 = arith.addf %798, %807 : vector<8x256xf32>
    %c0_766 = arith.constant 0 : index
    %c144_767 = arith.constant 144 : index
    %809 = vector.load %arg10[%c0_766, %c144_767] : memref<8x452xf32, #tpu.memory_space<vmem>>, vector<8x256xf32>
    %c1_768 = arith.constant 1 : index
    %c2_769 = arith.constant 2 : index
    %c1_770 = arith.constant 1 : index
    %c0_771 = arith.constant 0 : index
    %c0_772 = arith.constant 0 : index
    %810 = vector.load %arg4[%c1_768, %c2_769, %c1_770, %c0_771, %c0_772] : memref<3x3x3x8x1xf32, #tpu.memory_space<vmem>>, vector<1x1x1x8x1xf32>
    %811 = vector.shape_cast %810 : vector<1x1x1x8x1xf32> to vector<8x1xf32>
    %812 = vector.broadcast %811 : vector<8x1xf32> to vector<8x256xf32>
    %813 = arith.mulf %809, %812 : vector<8x256xf32>
    %814 = arith.addf %808, %813 : vector<8x256xf32>
    %c0_773 = arith.constant 0 : index
    %c145_774 = arith.constant 145 : index
    %815 = vector.load %arg10[%c0_773, %c145_774] : memref<8x452xf32, #tpu.memory_space<vmem>>, vector<8x256xf32>
    %c3_775 = arith.constant 3 : index
    %c0_776 = arith.constant 0 : index
    %c0_777 = arith.constant 0 : index
    %816 = vector.load %arg3[%c3_775, %c0_776, %c0_777] : memref<6x1x256xf32, #tpu.memory_space<vmem>>, vector<1x1x256xf32>
    %817 = vector.shape_cast %816 : vector<1x1x256xf32> to vector<1x256xf32>
    %818 = vector.broadcast %817 : vector<1x256xf32> to vector<8x256xf32>
    %819 = arith.mulf %815, %818 : vector<8x256xf32>
    %c1_778 = arith.constant 1 : index
    %c2_779 = arith.constant 2 : index
    %c2_780 = arith.constant 2 : index
    %c0_781 = arith.constant 0 : index
    %c0_782 = arith.constant 0 : index
    %820 = vector.load %arg4[%c1_778, %c2_779, %c2_780, %c0_781, %c0_782] : memref<3x3x3x8x1xf32, #tpu.memory_space<vmem>>, vector<1x1x1x8x1xf32>
    %821 = vector.shape_cast %820 : vector<1x1x1x8x1xf32> to vector<8x1xf32>
    %822 = vector.broadcast %821 : vector<8x1xf32> to vector<8x256xf32>
    %823 = arith.mulf %819, %822 : vector<8x256xf32>
    %824 = arith.addf %814, %823 : vector<8x256xf32>
    %825 = vector.extract_strided_slice %741 {offsets = [8, 0], sizes = [8, 256], strides = [1, 1]} : vector<24x256xf32> to vector<8x256xf32>
    %cst_783 = arith.constant 0.000000e+00 : f32
    %826 = vector.broadcast %cst_783 : f32 to vector<8x256xf32>
    %827 = arith.maximumf %825, %826 : vector<8x256xf32>
    %c0_784 = arith.constant 0 : index
    %c128_785 = arith.constant 128 : index
    %828 = vector.load %arg10[%c0_784, %c128_785] : memref<8x452xf32, #tpu.memory_space<vmem>>, vector<8x256xf32>
    tpu.vector_store %arg10[%c0_784, %c128_785], %827 {strides = array<i32>} : memref<8x452xf32, #tpu.memory_space<vmem>>, vector<8x256xf32>,
    %c0_786 = arith.constant 0 : index
    %c94_787 = arith.constant 94 : index
    %829 = vector.load %arg10[%c0_786, %c94_787] : memref<8x452xf32, #tpu.memory_space<vmem>>, vector<8x256xf32>
    %c1_788 = arith.constant 1 : index
    %c0_789 = arith.constant 0 : index
    %c0_790 = arith.constant 0 : index
    %830 = vector.load %arg3[%c1_788, %c0_789, %c0_790] : memref<6x1x256xf32, #tpu.memory_space<vmem>>, vector<1x1x256xf32>
    %831 = vector.shape_cast %830 : vector<1x1x256xf32> to vector<1x256xf32>
    %832 = vector.broadcast %831 : vector<1x256xf32> to vector<8x256xf32>
    %833 = arith.mulf %829, %832 : vector<8x256xf32>
    %c1_791 = arith.constant 1 : index
    %c0_792 = arith.constant 0 : index
    %c0_793 = arith.constant 0 : index
    %c0_794 = arith.constant 0 : index
    %c0_795 = arith.constant 0 : index
    %834 = vector.load %arg5[%c1_791, %c0_792, %c0_793, %c0_794, %c0_795] : memref<3x5x5x8x1xf32, #tpu.memory_space<vmem>>, vector<1x1x1x8x1xf32>
    %835 = vector.shape_cast %834 : vector<1x1x1x8x1xf32> to vector<8x1xf32>
    %836 = vector.broadcast %835 : vector<8x1xf32> to vector<8x256xf32>
    %837 = arith.mulf %833, %836 : vector<8x256xf32>
    %c0_796 = arith.constant 0 : index
    %c95_797 = arith.constant 95 : index
    %838 = vector.load %arg10[%c0_796, %c95_797] : memref<8x452xf32, #tpu.memory_space<vmem>>, vector<8x256xf32>
    %c2_798 = arith.constant 2 : index
    %c0_799 = arith.constant 0 : index
    %c0_800 = arith.constant 0 : index
    %839 = vector.load %arg3[%c2_798, %c0_799, %c0_800] : memref<6x1x256xf32, #tpu.memory_space<vmem>>, vector<1x1x256xf32>
    %840 = vector.shape_cast %839 : vector<1x1x256xf32> to vector<1x256xf32>
    %841 = vector.broadcast %840 : vector<1x256xf32> to vector<8x256xf32>
    %842 = arith.mulf %838, %841 : vector<8x256xf32>
    %c1_801 = arith.constant 1 : index
    %c0_802 = arith.constant 0 : index
    %c1_803 = arith.constant 1 : index
    %c0_804 = arith.constant 0 : index
    %c0_805 = arith.constant 0 : index
    %843 = vector.load %arg5[%c1_801, %c0_802, %c1_803, %c0_804, %c0_805] : memref<3x5x5x8x1xf32, #tpu.memory_space<vmem>>, vector<1x1x1x8x1xf32>
    %844 = vector.shape_cast %843 : vector<1x1x1x8x1xf32> to vector<8x1xf32>
    %845 = vector.broadcast %844 : vector<8x1xf32> to vector<8x256xf32>
    %846 = arith.mulf %842, %845 : vector<8x256xf32>
    %847 = arith.addf %837, %846 : vector<8x256xf32>
    %c0_806 = arith.constant 0 : index
    %c96_807 = arith.constant 96 : index
    %848 = vector.load %arg10[%c0_806, %c96_807] : memref<8x452xf32, #tpu.memory_space<vmem>>, vector<8x256xf32>
    %c1_808 = arith.constant 1 : index
    %c0_809 = arith.constant 0 : index
    %c2_810 = arith.constant 2 : index
    %c0_811 = arith.constant 0 : index
    %c0_812 = arith.constant 0 : index
    %849 = vector.load %arg5[%c1_808, %c0_809, %c2_810, %c0_811, %c0_812] : memref<3x5x5x8x1xf32, #tpu.memory_space<vmem>>, vector<1x1x1x8x1xf32>
    %850 = vector.shape_cast %849 : vector<1x1x1x8x1xf32> to vector<8x1xf32>
    %851 = vector.broadcast %850 : vector<8x1xf32> to vector<8x256xf32>
    %852 = arith.mulf %848, %851 : vector<8x256xf32>
    %853 = arith.addf %847, %852 : vector<8x256xf32>
    %c0_813 = arith.constant 0 : index
    %c97_814 = arith.constant 97 : index
    %854 = vector.load %arg10[%c0_813, %c97_814] : memref<8x452xf32, #tpu.memory_space<vmem>>, vector<8x256xf32>
    %c3_815 = arith.constant 3 : index
    %c0_816 = arith.constant 0 : index
    %c0_817 = arith.constant 0 : index
    %855 = vector.load %arg3[%c3_815, %c0_816, %c0_817] : memref<6x1x256xf32, #tpu.memory_space<vmem>>, vector<1x1x256xf32>
    %856 = vector.shape_cast %855 : vector<1x1x256xf32> to vector<1x256xf32>
    %857 = vector.broadcast %856 : vector<1x256xf32> to vector<8x256xf32>
    %858 = arith.mulf %854, %857 : vector<8x256xf32>
    %c1_818 = arith.constant 1 : index
    %c0_819 = arith.constant 0 : index
    %c3_820 = arith.constant 3 : index
    %c0_821 = arith.constant 0 : index
    %c0_822 = arith.constant 0 : index
    %859 = vector.load %arg5[%c1_818, %c0_819, %c3_820, %c0_821, %c0_822] : memref<3x5x5x8x1xf32, #tpu.memory_space<vmem>>, vector<1x1x1x8x1xf32>
    %860 = vector.shape_cast %859 : vector<1x1x1x8x1xf32> to vector<8x1xf32>
    %861 = vector.broadcast %860 : vector<8x1xf32> to vector<8x256xf32>
    %862 = arith.mulf %858, %861 : vector<8x256xf32>
    %863 = arith.addf %853, %862 : vector<8x256xf32>
    %c0_823 = arith.constant 0 : index
    %c98_824 = arith.constant 98 : index
    %864 = vector.load %arg10[%c0_823, %c98_824] : memref<8x452xf32, #tpu.memory_space<vmem>>, vector<8x256xf32>
    %c4_825 = arith.constant 4 : index
    %c0_826 = arith.constant 0 : index
    %c0_827 = arith.constant 0 : index
    %865 = vector.load %arg3[%c4_825, %c0_826, %c0_827] : memref<6x1x256xf32, #tpu.memory_space<vmem>>, vector<1x1x256xf32>
    %866 = vector.shape_cast %865 : vector<1x1x256xf32> to vector<1x256xf32>
    %867 = vector.broadcast %866 : vector<1x256xf32> to vector<8x256xf32>
    %868 = arith.mulf %864, %867 : vector<8x256xf32>
    %c1_828 = arith.constant 1 : index
    %c0_829 = arith.constant 0 : index
    %c4_830 = arith.constant 4 : index
    %c0_831 = arith.constant 0 : index
    %c0_832 = arith.constant 0 : index
    %869 = vector.load %arg5[%c1_828, %c0_829, %c4_830, %c0_831, %c0_832] : memref<3x5x5x8x1xf32, #tpu.memory_space<vmem>>, vector<1x1x1x8x1xf32>
    %870 = vector.shape_cast %869 : vector<1x1x1x8x1xf32> to vector<8x1xf32>
    %871 = vector.broadcast %870 : vector<8x1xf32> to vector<8x256xf32>
    %872 = arith.mulf %868, %871 : vector<8x256xf32>
    %873 = arith.addf %863, %872 : vector<8x256xf32>
    %c0_833 = arith.constant 0 : index
    %c110_834 = arith.constant 110 : index
    %874 = vector.load %arg10[%c0_833, %c110_834] : memref<8x452xf32, #tpu.memory_space<vmem>>, vector<8x256xf32>
    %c1_835 = arith.constant 1 : index
    %c0_836 = arith.constant 0 : index
    %c0_837 = arith.constant 0 : index
    %875 = vector.load %arg3[%c1_835, %c0_836, %c0_837] : memref<6x1x256xf32, #tpu.memory_space<vmem>>, vector<1x1x256xf32>
    %876 = vector.shape_cast %875 : vector<1x1x256xf32> to vector<1x256xf32>
    %877 = vector.broadcast %876 : vector<1x256xf32> to vector<8x256xf32>
    %878 = arith.mulf %874, %877 : vector<8x256xf32>
    %c1_838 = arith.constant 1 : index
    %c1_839 = arith.constant 1 : index
    %c0_840 = arith.constant 0 : index
    %c0_841 = arith.constant 0 : index
    %c0_842 = arith.constant 0 : index
    %879 = vector.load %arg5[%c1_838, %c1_839, %c0_840, %c0_841, %c0_842] : memref<3x5x5x8x1xf32, #tpu.memory_space<vmem>>, vector<1x1x1x8x1xf32>
    %880 = vector.shape_cast %879 : vector<1x1x1x8x1xf32> to vector<8x1xf32>
    %881 = vector.broadcast %880 : vector<8x1xf32> to vector<8x256xf32>
    %882 = arith.mulf %878, %881 : vector<8x256xf32>
    %883 = arith.addf %873, %882 : vector<8x256xf32>
    %c0_843 = arith.constant 0 : index
    %c111_844 = arith.constant 111 : index
    %884 = vector.load %arg10[%c0_843, %c111_844] : memref<8x452xf32, #tpu.memory_space<vmem>>, vector<8x256xf32>
    %c2_845 = arith.constant 2 : index
    %c0_846 = arith.constant 0 : index
    %c0_847 = arith.constant 0 : index
    %885 = vector.load %arg3[%c2_845, %c0_846, %c0_847] : memref<6x1x256xf32, #tpu.memory_space<vmem>>, vector<1x1x256xf32>
    %886 = vector.shape_cast %885 : vector<1x1x256xf32> to vector<1x256xf32>
    %887 = vector.broadcast %886 : vector<1x256xf32> to vector<8x256xf32>
    %888 = arith.mulf %884, %887 : vector<8x256xf32>
    %c1_848 = arith.constant 1 : index
    %c1_849 = arith.constant 1 : index
    %c1_850 = arith.constant 1 : index
    %c0_851 = arith.constant 0 : index
    %c0_852 = arith.constant 0 : index
    %889 = vector.load %arg5[%c1_848, %c1_849, %c1_850, %c0_851, %c0_852] : memref<3x5x5x8x1xf32, #tpu.memory_space<vmem>>, vector<1x1x1x8x1xf32>
    %890 = vector.shape_cast %889 : vector<1x1x1x8x1xf32> to vector<8x1xf32>
    %891 = vector.broadcast %890 : vector<8x1xf32> to vector<8x256xf32>
    %892 = arith.mulf %888, %891 : vector<8x256xf32>
    %893 = arith.addf %883, %892 : vector<8x256xf32>
    %c0_853 = arith.constant 0 : index
    %c112_854 = arith.constant 112 : index
    %894 = vector.load %arg10[%c0_853, %c112_854] : memref<8x452xf32, #tpu.memory_space<vmem>>, vector<8x256xf32>
    %c1_855 = arith.constant 1 : index
    %c1_856 = arith.constant 1 : index
    %c2_857 = arith.constant 2 : index
    %c0_858 = arith.constant 0 : index
    %c0_859 = arith.constant 0 : index
    %895 = vector.load %arg5[%c1_855, %c1_856, %c2_857, %c0_858, %c0_859] : memref<3x5x5x8x1xf32, #tpu.memory_space<vmem>>, vector<1x1x1x8x1xf32>
    %896 = vector.shape_cast %895 : vector<1x1x1x8x1xf32> to vector<8x1xf32>
    %897 = vector.broadcast %896 : vector<8x1xf32> to vector<8x256xf32>
    %898 = arith.mulf %894, %897 : vector<8x256xf32>
    %899 = arith.addf %893, %898 : vector<8x256xf32>
    %c0_860 = arith.constant 0 : index
    %c113_861 = arith.constant 113 : index
    %900 = vector.load %arg10[%c0_860, %c113_861] : memref<8x452xf32, #tpu.memory_space<vmem>>, vector<8x256xf32>
    %c3_862 = arith.constant 3 : index
    %c0_863 = arith.constant 0 : index
    %c0_864 = arith.constant 0 : index
    %901 = vector.load %arg3[%c3_862, %c0_863, %c0_864] : memref<6x1x256xf32, #tpu.memory_space<vmem>>, vector<1x1x256xf32>
    %902 = vector.shape_cast %901 : vector<1x1x256xf32> to vector<1x256xf32>
    %903 = vector.broadcast %902 : vector<1x256xf32> to vector<8x256xf32>
    %904 = arith.mulf %900, %903 : vector<8x256xf32>
    %c1_865 = arith.constant 1 : index
    %c1_866 = arith.constant 1 : index
    %c3_867 = arith.constant 3 : index
    %c0_868 = arith.constant 0 : index
    %c0_869 = arith.constant 0 : index
    %905 = vector.load %arg5[%c1_865, %c1_866, %c3_867, %c0_868, %c0_869] : memref<3x5x5x8x1xf32, #tpu.memory_space<vmem>>, vector<1x1x1x8x1xf32>
    %906 = vector.shape_cast %905 : vector<1x1x1x8x1xf32> to vector<8x1xf32>
    %907 = vector.broadcast %906 : vector<8x1xf32> to vector<8x256xf32>
    %908 = arith.mulf %904, %907 : vector<8x256xf32>
    %909 = arith.addf %899, %908 : vector<8x256xf32>
    %c0_870 = arith.constant 0 : index
    %c114_871 = arith.constant 114 : index
    %910 = vector.load %arg10[%c0_870, %c114_871] : memref<8x452xf32, #tpu.memory_space<vmem>>, vector<8x256xf32>
    %c4_872 = arith.constant 4 : index
    %c0_873 = arith.constant 0 : index
    %c0_874 = arith.constant 0 : index
    %911 = vector.load %arg3[%c4_872, %c0_873, %c0_874] : memref<6x1x256xf32, #tpu.memory_space<vmem>>, vector<1x1x256xf32>
    %912 = vector.shape_cast %911 : vector<1x1x256xf32> to vector<1x256xf32>
    %913 = vector.broadcast %912 : vector<1x256xf32> to vector<8x256xf32>
    %914 = arith.mulf %910, %913 : vector<8x256xf32>
    %c1_875 = arith.constant 1 : index
    %c1_876 = arith.constant 1 : index
    %c4_877 = arith.constant 4 : index
    %c0_878 = arith.constant 0 : index
    %c0_879 = arith.constant 0 : index
    %915 = vector.load %arg5[%c1_875, %c1_876, %c4_877, %c0_878, %c0_879] : memref<3x5x5x8x1xf32, #tpu.memory_space<vmem>>, vector<1x1x1x8x1xf32>
    %916 = vector.shape_cast %915 : vector<1x1x1x8x1xf32> to vector<8x1xf32>
    %917 = vector.broadcast %916 : vector<8x1xf32> to vector<8x256xf32>
    %918 = arith.mulf %914, %917 : vector<8x256xf32>
    %919 = arith.addf %909, %918 : vector<8x256xf32>
    %c0_880 = arith.constant 0 : index
    %c126_881 = arith.constant 126 : index
    %920 = vector.load %arg10[%c0_880, %c126_881] : memref<8x452xf32, #tpu.memory_space<vmem>>, vector<8x256xf32>
    %c1_882 = arith.constant 1 : index
    %c0_883 = arith.constant 0 : index
    %c0_884 = arith.constant 0 : index
    %921 = vector.load %arg3[%c1_882, %c0_883, %c0_884] : memref<6x1x256xf32, #tpu.memory_space<vmem>>, vector<1x1x256xf32>
    %922 = vector.shape_cast %921 : vector<1x1x256xf32> to vector<1x256xf32>
    %923 = vector.broadcast %922 : vector<1x256xf32> to vector<8x256xf32>
    %924 = arith.mulf %920, %923 : vector<8x256xf32>
    %c1_885 = arith.constant 1 : index
    %c2_886 = arith.constant 2 : index
    %c0_887 = arith.constant 0 : index
    %c0_888 = arith.constant 0 : index
    %c0_889 = arith.constant 0 : index
    %925 = vector.load %arg5[%c1_885, %c2_886, %c0_887, %c0_888, %c0_889] : memref<3x5x5x8x1xf32, #tpu.memory_space<vmem>>, vector<1x1x1x8x1xf32>
    %926 = vector.shape_cast %925 : vector<1x1x1x8x1xf32> to vector<8x1xf32>
    %927 = vector.broadcast %926 : vector<8x1xf32> to vector<8x256xf32>
    %928 = arith.mulf %924, %927 : vector<8x256xf32>
    %929 = arith.addf %919, %928 : vector<8x256xf32>
    %c0_890 = arith.constant 0 : index
    %c127_891 = arith.constant 127 : index
    %930 = vector.load %arg10[%c0_890, %c127_891] : memref<8x452xf32, #tpu.memory_space<vmem>>, vector<8x256xf32>
    %c2_892 = arith.constant 2 : index
    %c0_893 = arith.constant 0 : index
    %c0_894 = arith.constant 0 : index
    %931 = vector.load %arg3[%c2_892, %c0_893, %c0_894] : memref<6x1x256xf32, #tpu.memory_space<vmem>>, vector<1x1x256xf32>
    %932 = vector.shape_cast %931 : vector<1x1x256xf32> to vector<1x256xf32>
    %933 = vector.broadcast %932 : vector<1x256xf32> to vector<8x256xf32>
    %934 = arith.mulf %930, %933 : vector<8x256xf32>
    %c1_895 = arith.constant 1 : index
    %c2_896 = arith.constant 2 : index
    %c1_897 = arith.constant 1 : index
    %c0_898 = arith.constant 0 : index
    %c0_899 = arith.constant 0 : index
    %935 = vector.load %arg5[%c1_895, %c2_896, %c1_897, %c0_898, %c0_899] : memref<3x5x5x8x1xf32, #tpu.memory_space<vmem>>, vector<1x1x1x8x1xf32>
    %936 = vector.shape_cast %935 : vector<1x1x1x8x1xf32> to vector<8x1xf32>
    %937 = vector.broadcast %936 : vector<8x1xf32> to vector<8x256xf32>
    %938 = arith.mulf %934, %937 : vector<8x256xf32>
    %939 = arith.addf %929, %938 : vector<8x256xf32>
    %c0_900 = arith.constant 0 : index
    %c128_901 = arith.constant 128 : index
    %940 = vector.load %arg10[%c0_900, %c128_901] : memref<8x452xf32, #tpu.memory_space<vmem>>, vector<8x256xf32>
    %c1_902 = arith.constant 1 : index
    %c2_903 = arith.constant 2 : index
    %c2_904 = arith.constant 2 : index
    %c0_905 = arith.constant 0 : index
    %c0_906 = arith.constant 0 : index
    %941 = vector.load %arg5[%c1_902, %c2_903, %c2_904, %c0_905, %c0_906] : memref<3x5x5x8x1xf32, #tpu.memory_space<vmem>>, vector<1x1x1x8x1xf32>
    %942 = vector.shape_cast %941 : vector<1x1x1x8x1xf32> to vector<8x1xf32>
    %943 = vector.broadcast %942 : vector<8x1xf32> to vector<8x256xf32>
    %944 = arith.mulf %940, %943 : vector<8x256xf32>
    %945 = arith.addf %939, %944 : vector<8x256xf32>
    %c0_907 = arith.constant 0 : index
    %c129_908 = arith.constant 129 : index
    %946 = vector.load %arg10[%c0_907, %c129_908] : memref<8x452xf32, #tpu.memory_space<vmem>>, vector<8x256xf32>
    %c3_909 = arith.constant 3 : index
    %c0_910 = arith.constant 0 : index
    %c0_911 = arith.constant 0 : index
    %947 = vector.load %arg3[%c3_909, %c0_910, %c0_911] : memref<6x1x256xf32, #tpu.memory_space<vmem>>, vector<1x1x256xf32>
    %948 = vector.shape_cast %947 : vector<1x1x256xf32> to vector<1x256xf32>
    %949 = vector.broadcast %948 : vector<1x256xf32> to vector<8x256xf32>
    %950 = arith.mulf %946, %949 : vector<8x256xf32>
    %c1_912 = arith.constant 1 : index
    %c2_913 = arith.constant 2 : index
    %c3_914 = arith.constant 3 : index
    %c0_915 = arith.constant 0 : index
    %c0_916 = arith.constant 0 : index
    %951 = vector.load %arg5[%c1_912, %c2_913, %c3_914, %c0_915, %c0_916] : memref<3x5x5x8x1xf32, #tpu.memory_space<vmem>>, vector<1x1x1x8x1xf32>
    %952 = vector.shape_cast %951 : vector<1x1x1x8x1xf32> to vector<8x1xf32>
    %953 = vector.broadcast %952 : vector<8x1xf32> to vector<8x256xf32>
    %954 = arith.mulf %950, %953 : vector<8x256xf32>
    %955 = arith.addf %945, %954 : vector<8x256xf32>
    %c0_917 = arith.constant 0 : index
    %c130_918 = arith.constant 130 : index
    %956 = vector.load %arg10[%c0_917, %c130_918] : memref<8x452xf32, #tpu.memory_space<vmem>>, vector<8x256xf32>
    %c4_919 = arith.constant 4 : index
    %c0_920 = arith.constant 0 : index
    %c0_921 = arith.constant 0 : index
    %957 = vector.load %arg3[%c4_919, %c0_920, %c0_921] : memref<6x1x256xf32, #tpu.memory_space<vmem>>, vector<1x1x256xf32>
    %958 = vector.shape_cast %957 : vector<1x1x256xf32> to vector<1x256xf32>
    %959 = vector.broadcast %958 : vector<1x256xf32> to vector<8x256xf32>
    %960 = arith.mulf %956, %959 : vector<8x256xf32>
    %c1_922 = arith.constant 1 : index
    %c2_923 = arith.constant 2 : index
    %c4_924 = arith.constant 4 : index
    %c0_925 = arith.constant 0 : index
    %c0_926 = arith.constant 0 : index
    %961 = vector.load %arg5[%c1_922, %c2_923, %c4_924, %c0_925, %c0_926] : memref<3x5x5x8x1xf32, #tpu.memory_space<vmem>>, vector<1x1x1x8x1xf32>
    %962 = vector.shape_cast %961 : vector<1x1x1x8x1xf32> to vector<8x1xf32>
    %963 = vector.broadcast %962 : vector<8x1xf32> to vector<8x256xf32>
    %964 = arith.mulf %960, %963 : vector<8x256xf32>
    %965 = arith.addf %955, %964 : vector<8x256xf32>
    %c0_927 = arith.constant 0 : index
    %c142_928 = arith.constant 142 : index
    %966 = vector.load %arg10[%c0_927, %c142_928] : memref<8x452xf32, #tpu.memory_space<vmem>>, vector<8x256xf32>
    %c1_929 = arith.constant 1 : index
    %c0_930 = arith.constant 0 : index
    %c0_931 = arith.constant 0 : index
    %967 = vector.load %arg3[%c1_929, %c0_930, %c0_931] : memref<6x1x256xf32, #tpu.memory_space<vmem>>, vector<1x1x256xf32>
    %968 = vector.shape_cast %967 : vector<1x1x256xf32> to vector<1x256xf32>
    %969 = vector.broadcast %968 : vector<1x256xf32> to vector<8x256xf32>
    %970 = arith.mulf %966, %969 : vector<8x256xf32>
    %c1_932 = arith.constant 1 : index
    %c3_933 = arith.constant 3 : index
    %c0_934 = arith.constant 0 : index
    %c0_935 = arith.constant 0 : index
    %c0_936 = arith.constant 0 : index
    %971 = vector.load %arg5[%c1_932, %c3_933, %c0_934, %c0_935, %c0_936] : memref<3x5x5x8x1xf32, #tpu.memory_space<vmem>>, vector<1x1x1x8x1xf32>
    %972 = vector.shape_cast %971 : vector<1x1x1x8x1xf32> to vector<8x1xf32>
    %973 = vector.broadcast %972 : vector<8x1xf32> to vector<8x256xf32>
    %974 = arith.mulf %970, %973 : vector<8x256xf32>
    %975 = arith.addf %965, %974 : vector<8x256xf32>
    %c0_937 = arith.constant 0 : index
    %c143_938 = arith.constant 143 : index
    %976 = vector.load %arg10[%c0_937, %c143_938] : memref<8x452xf32, #tpu.memory_space<vmem>>, vector<8x256xf32>
    %c2_939 = arith.constant 2 : index
    %c0_940 = arith.constant 0 : index
    %c0_941 = arith.constant 0 : index
    %977 = vector.load %arg3[%c2_939, %c0_940, %c0_941] : memref<6x1x256xf32, #tpu.memory_space<vmem>>, vector<1x1x256xf32>
    %978 = vector.shape_cast %977 : vector<1x1x256xf32> to vector<1x256xf32>
    %979 = vector.broadcast %978 : vector<1x256xf32> to vector<8x256xf32>
    %980 = arith.mulf %976, %979 : vector<8x256xf32>
    %c1_942 = arith.constant 1 : index
    %c3_943 = arith.constant 3 : index
    %c1_944 = arith.constant 1 : index
    %c0_945 = arith.constant 0 : index
    %c0_946 = arith.constant 0 : index
    %981 = vector.load %arg5[%c1_942, %c3_943, %c1_944, %c0_945, %c0_946] : memref<3x5x5x8x1xf32, #tpu.memory_space<vmem>>, vector<1x1x1x8x1xf32>
    %982 = vector.shape_cast %981 : vector<1x1x1x8x1xf32> to vector<8x1xf32>
    %983 = vector.broadcast %982 : vector<8x1xf32> to vector<8x256xf32>
    %984 = arith.mulf %980, %983 : vector<8x256xf32>
    %985 = arith.addf %975, %984 : vector<8x256xf32>
    %c0_947 = arith.constant 0 : index
    %c144_948 = arith.constant 144 : index
    %986 = vector.load %arg10[%c0_947, %c144_948] : memref<8x452xf32, #tpu.memory_space<vmem>>, vector<8x256xf32>
    %c1_949 = arith.constant 1 : index
    %c3_950 = arith.constant 3 : index
    %c2_951 = arith.constant 2 : index
    %c0_952 = arith.constant 0 : index
    %c0_953 = arith.constant 0 : index
    %987 = vector.load %arg5[%c1_949, %c3_950, %c2_951, %c0_952, %c0_953] : memref<3x5x5x8x1xf32, #tpu.memory_space<vmem>>, vector<1x1x1x8x1xf32>
    %988 = vector.shape_cast %987 : vector<1x1x1x8x1xf32> to vector<8x1xf32>
    %989 = vector.broadcast %988 : vector<8x1xf32> to vector<8x256xf32>
    %990 = arith.mulf %986, %989 : vector<8x256xf32>
    %991 = arith.addf %985, %990 : vector<8x256xf32>
    %c0_954 = arith.constant 0 : index
    %c145_955 = arith.constant 145 : index
    %992 = vector.load %arg10[%c0_954, %c145_955] : memref<8x452xf32, #tpu.memory_space<vmem>>, vector<8x256xf32>
    %c3_956 = arith.constant 3 : index
    %c0_957 = arith.constant 0 : index
    %c0_958 = arith.constant 0 : index
    %993 = vector.load %arg3[%c3_956, %c0_957, %c0_958] : memref<6x1x256xf32, #tpu.memory_space<vmem>>, vector<1x1x256xf32>
    %994 = vector.shape_cast %993 : vector<1x1x256xf32> to vector<1x256xf32>
    %995 = vector.broadcast %994 : vector<1x256xf32> to vector<8x256xf32>
    %996 = arith.mulf %992, %995 : vector<8x256xf32>
    %c1_959 = arith.constant 1 : index
    %c3_960 = arith.constant 3 : index
    %c3_961 = arith.constant 3 : index
    %c0_962 = arith.constant 0 : index
    %c0_963 = arith.constant 0 : index
    %997 = vector.load %arg5[%c1_959, %c3_960, %c3_961, %c0_962, %c0_963] : memref<3x5x5x8x1xf32, #tpu.memory_space<vmem>>, vector<1x1x1x8x1xf32>
    %998 = vector.shape_cast %997 : vector<1x1x1x8x1xf32> to vector<8x1xf32>
    %999 = vector.broadcast %998 : vector<8x1xf32> to vector<8x256xf32>
    %1000 = arith.mulf %996, %999 : vector<8x256xf32>
    %1001 = arith.addf %991, %1000 : vector<8x256xf32>
    %c0_964 = arith.constant 0 : index
    %c146_965 = arith.constant 146 : index
    %1002 = vector.load %arg10[%c0_964, %c146_965] : memref<8x452xf32, #tpu.memory_space<vmem>>, vector<8x256xf32>
    %c4_966 = arith.constant 4 : index
    %c0_967 = arith.constant 0 : index
    %c0_968 = arith.constant 0 : index
    %1003 = vector.load %arg3[%c4_966, %c0_967, %c0_968] : memref<6x1x256xf32, #tpu.memory_space<vmem>>, vector<1x1x256xf32>
    %1004 = vector.shape_cast %1003 : vector<1x1x256xf32> to vector<1x256xf32>
    %1005 = vector.broadcast %1004 : vector<1x256xf32> to vector<8x256xf32>
    %1006 = arith.mulf %1002, %1005 : vector<8x256xf32>
    %c1_969 = arith.constant 1 : index
    %c3_970 = arith.constant 3 : index
    %c4_971 = arith.constant 4 : index
    %c0_972 = arith.constant 0 : index
    %c0_973 = arith.constant 0 : index
    %1007 = vector.load %arg5[%c1_969, %c3_970, %c4_971, %c0_972, %c0_973] : memref<3x5x5x8x1xf32, #tpu.memory_space<vmem>>, vector<1x1x1x8x1xf32>
    %1008 = vector.shape_cast %1007 : vector<1x1x1x8x1xf32> to vector<8x1xf32>
    %1009 = vector.broadcast %1008 : vector<8x1xf32> to vector<8x256xf32>
    %1010 = arith.mulf %1006, %1009 : vector<8x256xf32>
    %1011 = arith.addf %1001, %1010 : vector<8x256xf32>
    %c0_974 = arith.constant 0 : index
    %c158_975 = arith.constant 158 : index
    %1012 = vector.load %arg10[%c0_974, %c158_975] : memref<8x452xf32, #tpu.memory_space<vmem>>, vector<8x256xf32>
    %c1_976 = arith.constant 1 : index
    %c0_977 = arith.constant 0 : index
    %c0_978 = arith.constant 0 : index
    %1013 = vector.load %arg3[%c1_976, %c0_977, %c0_978] : memref<6x1x256xf32, #tpu.memory_space<vmem>>, vector<1x1x256xf32>
    %1014 = vector.shape_cast %1013 : vector<1x1x256xf32> to vector<1x256xf32>
    %1015 = vector.broadcast %1014 : vector<1x256xf32> to vector<8x256xf32>
    %1016 = arith.mulf %1012, %1015 : vector<8x256xf32>
    %c1_979 = arith.constant 1 : index
    %c4_980 = arith.constant 4 : index
    %c0_981 = arith.constant 0 : index
    %c0_982 = arith.constant 0 : index
    %c0_983 = arith.constant 0 : index
    %1017 = vector.load %arg5[%c1_979, %c4_980, %c0_981, %c0_982, %c0_983] : memref<3x5x5x8x1xf32, #tpu.memory_space<vmem>>, vector<1x1x1x8x1xf32>
    %1018 = vector.shape_cast %1017 : vector<1x1x1x8x1xf32> to vector<8x1xf32>
    %1019 = vector.broadcast %1018 : vector<8x1xf32> to vector<8x256xf32>
    %1020 = arith.mulf %1016, %1019 : vector<8x256xf32>
    %1021 = arith.addf %1011, %1020 : vector<8x256xf32>
    %c0_984 = arith.constant 0 : index
    %c159_985 = arith.constant 159 : index
    %1022 = vector.load %arg10[%c0_984, %c159_985] : memref<8x452xf32, #tpu.memory_space<vmem>>, vector<8x256xf32>
    %c2_986 = arith.constant 2 : index
    %c0_987 = arith.constant 0 : index
    %c0_988 = arith.constant 0 : index
    %1023 = vector.load %arg3[%c2_986, %c0_987, %c0_988] : memref<6x1x256xf32, #tpu.memory_space<vmem>>, vector<1x1x256xf32>
    %1024 = vector.shape_cast %1023 : vector<1x1x256xf32> to vector<1x256xf32>
    %1025 = vector.broadcast %1024 : vector<1x256xf32> to vector<8x256xf32>
    %1026 = arith.mulf %1022, %1025 : vector<8x256xf32>
    %c1_989 = arith.constant 1 : index
    %c4_990 = arith.constant 4 : index
    %c1_991 = arith.constant 1 : index
    %c0_992 = arith.constant 0 : index
    %c0_993 = arith.constant 0 : index
    %1027 = vector.load %arg5[%c1_989, %c4_990, %c1_991, %c0_992, %c0_993] : memref<3x5x5x8x1xf32, #tpu.memory_space<vmem>>, vector<1x1x1x8x1xf32>
    %1028 = vector.shape_cast %1027 : vector<1x1x1x8x1xf32> to vector<8x1xf32>
    %1029 = vector.broadcast %1028 : vector<8x1xf32> to vector<8x256xf32>
    %1030 = arith.mulf %1026, %1029 : vector<8x256xf32>
    %1031 = arith.addf %1021, %1030 : vector<8x256xf32>
    %c0_994 = arith.constant 0 : index
    %c160_995 = arith.constant 160 : index
    %1032 = vector.load %arg10[%c0_994, %c160_995] : memref<8x452xf32, #tpu.memory_space<vmem>>, vector<8x256xf32>
    %c1_996 = arith.constant 1 : index
    %c4_997 = arith.constant 4 : index
    %c2_998 = arith.constant 2 : index
    %c0_999 = arith.constant 0 : index
    %c0_1000 = arith.constant 0 : index
    %1033 = vector.load %arg5[%c1_996, %c4_997, %c2_998, %c0_999, %c0_1000] : memref<3x5x5x8x1xf32, #tpu.memory_space<vmem>>, vector<1x1x1x8x1xf32>
    %1034 = vector.shape_cast %1033 : vector<1x1x1x8x1xf32> to vector<8x1xf32>
    %1035 = vector.broadcast %1034 : vector<8x1xf32> to vector<8x256xf32>
    %1036 = arith.mulf %1032, %1035 : vector<8x256xf32>
    %1037 = arith.addf %1031, %1036 : vector<8x256xf32>
    %c0_1001 = arith.constant 0 : index
    %c161_1002 = arith.constant 161 : index
    %1038 = vector.load %arg10[%c0_1001, %c161_1002] : memref<8x452xf32, #tpu.memory_space<vmem>>, vector<8x256xf32>
    %c3_1003 = arith.constant 3 : index
    %c0_1004 = arith.constant 0 : index
    %c0_1005 = arith.constant 0 : index
    %1039 = vector.load %arg3[%c3_1003, %c0_1004, %c0_1005] : memref<6x1x256xf32, #tpu.memory_space<vmem>>, vector<1x1x256xf32>
    %1040 = vector.shape_cast %1039 : vector<1x1x256xf32> to vector<1x256xf32>
    %1041 = vector.broadcast %1040 : vector<1x256xf32> to vector<8x256xf32>
    %1042 = arith.mulf %1038, %1041 : vector<8x256xf32>
    %c1_1006 = arith.constant 1 : index
    %c4_1007 = arith.constant 4 : index
    %c3_1008 = arith.constant 3 : index
    %c0_1009 = arith.constant 0 : index
    %c0_1010 = arith.constant 0 : index
    %1043 = vector.load %arg5[%c1_1006, %c4_1007, %c3_1008, %c0_1009, %c0_1010] : memref<3x5x5x8x1xf32, #tpu.memory_space<vmem>>, vector<1x1x1x8x1xf32>
    %1044 = vector.shape_cast %1043 : vector<1x1x1x8x1xf32> to vector<8x1xf32>
    %1045 = vector.broadcast %1044 : vector<8x1xf32> to vector<8x256xf32>
    %1046 = arith.mulf %1042, %1045 : vector<8x256xf32>
    %1047 = arith.addf %1037, %1046 : vector<8x256xf32>
    %c0_1011 = arith.constant 0 : index
    %c162_1012 = arith.constant 162 : index
    %1048 = vector.load %arg10[%c0_1011, %c162_1012] : memref<8x452xf32, #tpu.memory_space<vmem>>, vector<8x256xf32>
    %c4_1013 = arith.constant 4 : index
    %c0_1014 = arith.constant 0 : index
    %c0_1015 = arith.constant 0 : index
    %1049 = vector.load %arg3[%c4_1013, %c0_1014, %c0_1015] : memref<6x1x256xf32, #tpu.memory_space<vmem>>, vector<1x1x256xf32>
    %1050 = vector.shape_cast %1049 : vector<1x1x256xf32> to vector<1x256xf32>
    %1051 = vector.broadcast %1050 : vector<1x256xf32> to vector<8x256xf32>
    %1052 = arith.mulf %1048, %1051 : vector<8x256xf32>
    %c1_1016 = arith.constant 1 : index
    %c4_1017 = arith.constant 4 : index
    %c4_1018 = arith.constant 4 : index
    %c0_1019 = arith.constant 0 : index
    %c0_1020 = arith.constant 0 : index
    %1053 = vector.load %arg5[%c1_1016, %c4_1017, %c4_1018, %c0_1019, %c0_1020] : memref<3x5x5x8x1xf32, #tpu.memory_space<vmem>>, vector<1x1x1x8x1xf32>
    %1054 = vector.shape_cast %1053 : vector<1x1x1x8x1xf32> to vector<8x1xf32>
    %1055 = vector.broadcast %1054 : vector<8x1xf32> to vector<8x256xf32>
    %1056 = arith.mulf %1052, %1055 : vector<8x256xf32>
    %1057 = arith.addf %1047, %1056 : vector<8x256xf32>
    %c0_1021 = arith.constant 0 : index
    %c0_1022 = arith.constant 0 : index
    %1058 = vector.load %arg7[%c0_1021, %c0_1022] : memref<8x32xf32, #tpu.memory_space<vmem>>, vector<8x32xf32>
    %1059 = tpu.concatenate %824, %1057, %12, %82 in 0 : vector<8x256xf32>, vector<8x256xf32>, vector<8x256xf32>, vector<8x256xf32> -> vector<32x256xf32>
    %cst_1023 = arith.constant dense<0.000000e+00> : vector<8x256xf32>
    %1060 = tpu.matmul %1058, %1059, %cst_1023 {dimension_numbers = #tpu.dot_dimension_numbers<[1], [0], [0], [1], [0, 0, 1, 1], [], []>} : vector<8x32xf32>, vector<32x256xf32>, vector<8x256xf32> -> vector<8x256xf32>
    %1061 = arith.addf %743, %1060 : vector<8x256xf32>
    %c0_1024 = arith.constant 0 : index
    %c0_1025 = arith.constant 0 : index
    %1062 = vector.load %arg8[%c0_1024, %c0_1025] : memref<8x256xf32, #tpu.memory_space<vmem>>, vector<8x256xf32>
    tpu.vector_store %arg8[%c0_1024, %c0_1025], %1061 {strides = array<i32>} : memref<8x256xf32, #tpu.memory_space<vmem>>, vector<8x256xf32>,
    return
  }
  func.func @transform_0(%arg0: i32) -> (i32, i32) {
    %c0_i32 = arith.constant 0 : i32
    %c0_i32_0 = arith.constant 0 : i32
    return %arg0, %c0_i32 : i32, i32
  }
  func.func @transform_1(%arg0: i32) -> (i32, i32) {
    %c0_i32 = arith.constant 0 : i32
    %c0_i32_0 = arith.constant 0 : i32
    %c0_i32_1 = arith.constant 0 : i32
    return %c0_i32, %c0_i32_0 : i32, i32
  }
  func.func @transform_2(%arg0: i32) -> (i32, i32, i32) {
    %c0_i32 = arith.constant 0 : i32
    %c0_i32_0 = arith.constant 0 : i32
    %c0_i32_1 = arith.constant 0 : i32
    %c0_i32_2 = arith.constant 0 : i32
    return %c0_i32, %c0_i32_0, %c0_i32_1 : i32, i32, i32
  }
  func.func @transform_3(%arg0: i32) -> (i32, i32, i32, i32, i32) {
    %c0_i32 = arith.constant 0 : i32
    %c0_i32_0 = arith.constant 0 : i32
    %c0_i32_1 = arith.constant 0 : i32
    %c0_i32_2 = arith.constant 0 : i32
    %c0_i32_3 = arith.constant 0 : i32
    %c0_i32_4 = arith.constant 0 : i32
    return %c0_i32, %c0_i32_0, %c0_i32_1, %c0_i32_2, %c0_i32_3 : i32, i32, i32, i32, i32
  }
  func.func @transform_4(%arg0: i32) -> (i32, i32, i32, i32, i32) {
    %c0_i32 = arith.constant 0 : i32
    %c0_i32_0 = arith.constant 0 : i32
    %c0_i32_1 = arith.constant 0 : i32
    %c0_i32_2 = arith.constant 0 : i32
    %c0_i32_3 = arith.constant 0 : i32
    %c0_i32_4 = arith.constant 0 : i32
    return %c0_i32, %c0_i32_0, %c0_i32_1, %c0_i32_2, %c0_i32_3 : i32, i32, i32, i32, i32
  }
  func.func @transform_5(%arg0: i32) -> (i32, i32) {
    %c0_i32 = arith.constant 0 : i32
    %c0_i32_0 = arith.constant 0 : i32
    %c0_i32_1 = arith.constant 0 : i32
    return %c0_i32, %c0_i32_0 : i32, i32
  }
  func.func @transform_6(%arg0: i32) -> (i32, i32) {
    %c0_i32 = arith.constant 0 : i32
    %c0_i32_0 = arith.constant 0 : i32
    %c0_i32_1 = arith.constant 0 : i32
    return %c0_i32, %c0_i32_0 : i32, i32
  }
  func.func @transform_7(%arg0: i32) -> (i32, i32) {
    %c0_i32 = arith.constant 0 : i32
    %c0_i32_0 = arith.constant 0 : i32
    return %arg0, %c0_i32 : i32, i32
  }
}

</mosaic_0001>

<bundles_post_ra>
// kernel: _lambda_.1
= control target key start
LH: loop header
LB: loop body
LE: loop exit
PB: predicated region body
PF: predicated region fallthrough
CT: control target
= control target key end

     0   :  { %vm8158_vm0 = vcmask 138240   ;;  %v4339_v0 = vmov -inf   ;;  %s4340_s24 = smov 16   ;;  %s4341_s25 = smov 17   ;;  %v4342_v3 = vmov 0.0   ;;  %vm27_vm1 = vcmask 556032   ;;  %s7981_s0 = inlined_call_operand.vmem [shape: f32[8,256], index: 0, kind: input, shape index: {}]   ;;  %s7982_s2 = inlined_call_operand.vmem [shape: f32[6,1,256], index: 2, kind: input, shape index: {}]   ;;  %s7983_s1 = inlined_call_operand.vmem [shape: f32[1,256], index: 1, kind: input, shape index: {}]   ;;  %s7984_s3 = inlined_call_operand.vmem [shape: f32[3,3,3,8,1], index: 3, kind: input, shape index: {}]   ;;  %s7985_s4 = inlined_call_operand.vmem [shape: f32[3,5,5,8,1], index: 4, kind: input, shape index: {}]   ;;  %s7986_s5 = inlined_call_operand.vmem [shape: f32[24,32], index: 5, kind: input, shape index: {}]   ;;  %s7987_s6 = inlined_call_operand.vmem [shape: f32[8,32], index: 6, kind: input, shape index: {}]   ;;  %s7988_s7 = inlined_call_operand.vmem [shape: f32[8,256], index: 7, kind: output, shape index: {}]  }
   0x1   :  { %76 = vrot.lane.b32.xlu1 %v4339_v0, %s4340_s24  ;;  %64 = vrot.lane.b32.xlu0 %v4339_v0, %s4341_s25  ;;  %v4442_v1 = vld [vmem:[%s7981_s0 + $0x8] sm:$0xff]  ;;  %v4447_v2 = vld [vmem:[%s7981_s0] sm:$0xff]  ;;  %33 = vst.msk [vmem:[#allocation4 + $0x18] sm:$0xff] %vm8158_vm0, %v4339_v0  ;;  %26 = vst [vmem:[#allocation2] sm:$0xff] %v4342_v3  ;;  %v4343_v7 = vmov 0   ;;  %s8039_s10 = smov 15   ;;  %v51_v12 = vlaneseq }
   0x2   :  { %43 = vst [vmem:[#allocation4 + $0x10] sm:$0xff] %v4442_v1  ;;  %v4452_v4 = vmax.f32 %v4442_v1, 0.0  ;;  %42 = vst [vmem:[#allocation4 + $0x8] sm:$0xff] %v4447_v2  ;;  %v4456_v5 = vmax.f32 %v4447_v2, 0.0  ;;  %v4152_v6 = vld [vmem:[%s7982_s2 + $0x4] sm:$0x3]  ;;  %4325 = vset.pattern.permute.xlu1 %v4343_v7  ;;  %4326 = vset.pattern.permute.xlu0 %v4343_v7 }
   0x3   :  { %28 = vst.msk [vmem:[#allocation2 + $0x18] sm:$0xff] %vm27_vm1, %v4342_v3  ;;  %30 = vst.msk [vmem:[#allocation3 + $0x18] sm:$0xff] %vm27_vm1, %v4342_v3  ;;  %vm49_vm2 = vcmp.gt.f32.partialorder %v4152_v6, 0.5  ;;  %2705 = vmatprep.mubr.f32.mxu0 %v4342_v3  ;;  %4113 = vmatprep.mubr.f32.mxu1 %v4342_v3  ;;  %v4153_v8 = vld [vmem:[%s7982_s2 + $0x6] sm:$0x3]  ;;  %s8041_s11 = smov 1  }
   0x4   :  { %39 = vst [vmem:[#allocation2 + $0x10] sm:$0xff] %v4452_v4  ;;  %38 = vst [vmem:[#allocation2 + $0x8] sm:$0xff] %v4456_v5  ;;  %v4468_v9 = vsel %vm49_vm2, 1, %v4343_v7  ;;  %vm91_vm3 = vcmp.gt.f32.partialorder %v4153_v8, 0.5  ;;  %s8045_s12 = smov 127   ;;  %s4347_s13 = smov 113  }
   0x5   :  { %68 = vrot.lane.b32.xlu1 %v4442_v1, %s4341_s25  ;;  %66 = vrot.lane.b32.xlu0 %v4447_v2, %s4341_s25  ;;  %v4474_v10 = vsel %vm91_vm3, 1, %v4343_v7  ;;  %s8035_s14 = smov 112   ;;  %v52_v13 = vshrl.u32 %v51_v12, 7  ;;  %s4349_s15 = smov 111   ;;  %v416_v21 = vld [vmem:[%s7983_s1] sm:$0x3] }
   0x6   :  { %s4350_s16 = smov 95   ;;  %v443_v24 = vld [vmem:[%s7984_s3] sm:$0xff]  ;;  %vm82_vm4 = vcmask 130048   ;;  %vm8083_vm6 = vcmask 121856   ;;  %vm8086_vm10 = vcmask 7168   ;;  %vm8165_vm11 = vcmask 1039360  }
   0x7   :  { %v4507_v14 = vsub.s32 1, %v52_v13  ;;  %v4509_v15 = vsub.s32 0, %v52_v13  ;;  %vm8098_vm12 = vcmask 924672   ;;  %vm8163_vm13 = vcmask 916480   ;;  %s4351_s1 = smov 126   ;;  %s4352_s21 = smov 110  }
   0x8   :  { %v135_v11 = vld [vmem:[#allocation4 + $0x18] sm:$0xff]  ;;  %vm8159_vm14 = vcmask 908288   ;;  %s4353_s22 = smov 96   ;;  %s4354_s23 = smov 94   ;;  %vm8170_vm15 = vcmask 777216   ;;  %vm8157_vm2 = vcmask 793600  }
   0x9   :  { %80 = vrot.lane.b32.xlu1 %v4442_v1, %s4340_s24  ;;  %78 = vrot.lane.b32.xlu0 %v4447_v2, %s4340_s24  ;;  %8189 = vst [vmem:[#allocation5_spill] sm:$0xff] %v4507_v14  ;;  %8190 = vst [vmem:[#allocation6_spill] sm:$0xff] %v4509_v15  ;;  %v4515_v16 = vrot.slane %v4152_v6, %v4507_v14  ;;  %v4518_v17 = vrot.slane %v4152_v6, %v4509_v15  ;;  %s4355_s19 = smov 97   ;;  %s8037_s28 = smov 125   ;;  %vm8145_vm3 = vcmask 801792  }
   0xa   :  { %v4528_v18 = vrot.slane %v4153_v8, %v4509_v15  ;;  %v4535_v19 = vrot.slane %v4153_v8, %v4507_v14  ;;  %v4557_v20 = vld [vmem:[#allocation3 + $0x18] sm:$0xff]  ;;  %v421_v22 = vrot.slane %v416_v21, %v4509_v15  ;;  %v425_v23 = vrot.slane %v416_v21, %v4507_v14  ;;  %s4357_s29 = smov 98   ;;  %s4358_s0 = smov 124  }
   0xb   :  { %v54_v29 = vrot.slane %v4468_v9, %v4509_v15  ;;  %v96_v30 = vrot.slane %v4474_v10, %v4509_v15  ;;  %v58_v33 = vrot.slane %v4468_v9, %v4507_v14  ;;  %v100_v38 = vrot.slane %v4474_v10, %v4507_v14  ;;  %s8033_s8 = smov 109   ;;  %s4360_s9 = smov 114  }
   0xc   :  { %s8031_s20 = smov 108   ;;  %s8179_s27 = smov 62  }
   0xd   :  { %105 = vrot.lane.b32.xlu1 %v4447_v2, %s8039_s10  ;;  %103 = vrot.lane.b32.xlu0 %v4339_v0, %s8039_s10  ;;  %vm4583_vm5 = vcmp.eq.s32.totalorder %v54_v29, 1  ;;  %vm4589_vm7 = vcmp.eq.s32.totalorder %v96_v30, 1  ;;  %vm4597_vm8 = vcmp.eq.s32.totalorder %v58_v33, 1  ;;  %vm4606_vm9 = vcmp.eq.s32.totalorder %v100_v38, 1  ;;  %s4363_s24 = smov 66   ;;  %s4364_s17 = smov 68  }
   0xe   :  { %s4366_s18 = smov 100   ;;  %s8043_s30 = smov 2  }
   0xf   :  { %s8183_s26 = smov 64  }
  0x11   :  { %118 = vrot.lane.b32.xlu1 %v4339_v0, %s8041_s11  ;;  %107 = vrot.lane.b32.xlu0 %v4442_v1, %s8039_s10 }
  0x15   :  { %122 = vrot.lane.b32.xlu1 %v4442_v1, %s8041_s11  ;;  %120 = vrot.lane.b32.xlu0 %v4447_v2, %s8041_s11 }
  0x19   :  { %139 = vrot.lane.b32.xlu1 %v4442_v1, %s8045_s12  ;;  %137 = vrot.lane.b32.xlu0 %v4447_v2, %s8045_s12 }
  0x1d   :  { %152 = vrot.lane.b32.xlu1 %v4447_v2, %s4347_s13  ;;  %141 = vrot.lane.b32.xlu0 %v135_v11, %s8045_s12 }
  0x21   :  { %156 = vrot.lane.b32.xlu1 %v135_v11, %s4347_s13  ;;  %154 = vrot.lane.b32.xlu0 %v4442_v1, %s4347_s13 }
  0x25   :  { %169 = vrot.lane.b32.xlu1 %v4442_v1, %s8035_s14  ;;  %167 = vrot.lane.b32.xlu0 %v4447_v2, %s8035_s14 }
  0x29   :  { %180 = vrot.lane.b32.xlu1 %v4447_v2, %s4349_s15  ;;  %171 = vrot.lane.b32.xlu0 %v135_v11, %s8035_s14 }
  0x2d   :  { %184 = vrot.lane.b32.xlu1 %v135_v11, %s4349_s15  ;;  %182 = vrot.lane.b32.xlu0 %v4442_v1, %s4349_s15 }
  0x31   :  { %209 = vrot.lane.b32.xlu1 %v4515_v16, %s4349_s15  ;;  %207 = vrot.lane.b32.xlu0 %v4518_v17, %s4349_s15 }
  0x35   :  { %221 = vrot.lane.b32.xlu0 %v4342_v3, %s8045_s12  ;;  %223 = vrot.lane.b32.xlu1 %v4447_v2, %s8045_s12 }
  0x39   :  { %225 = vrot.lane.b32.xlu0 %v4442_v1, %s8045_s12  ;;  %244 = vrot.lane.b32.xlu1 %v4528_v18, %s4347_s13 }
  0x3d   :  { %246 = vrot.lane.b32.xlu0 %v4535_v19, %s4347_s13  ;;  %275 = vrot.lane.b32.xlu1 %v4515_v16, %s8045_s12 }
  0x41   :  { %273 = vrot.lane.b32.xlu0 %v4518_v17, %s8045_s12  ;;  %301 = vrot.lane.b32.xlu1 %v4447_v2, %s4349_s15 }
  0x45   :  { %303 = vrot.lane.b32.xlu0 %v4442_v1, %s4349_s15  ;;  %313 = vrot.lane.b32.xlu1 %v4528_v18, %s8041_s11 }
  0x49   :  { %315 = vrot.lane.b32.xlu0 %v4535_v19, %s8041_s11  ;;  %344 = vrot.lane.b32.xlu1 %v4515_v16, %s8039_s10  ;;  %s4368_s11 = smov 4  }
  0x4d   :  { %342 = vrot.lane.b32.xlu0 %v4518_v17, %s8039_s10  ;;  %372 = vrot.lane.b32.xlu1 %v4447_v2, %s4350_s16  ;;  %s4369_s10 = smov 28  }
  0x51   :  { %374 = vrot.lane.b32.xlu0 %v4442_v1, %s4350_s16  ;;  %376 = vrot.lane.b32.xlu1 %v4557_v20, %s4350_s16 }
  0x55   :  { %387 = vrot.lane.b32.xlu0 %v4528_v18, %s4341_s25  ;;  %389 = vrot.lane.b32.xlu1 %v4535_v19, %s4341_s25 }
  0x59   :  { %426 = vrot.lane.b32.xlu1 %v421_v22, %s4349_s15  ;;  %428 = vrot.lane.b32.xlu0 %v425_v23, %s4349_s15 }
  0x5d   :  { %446 = vperm.xlu1 %4325, %v443_v24  }
  0x73   :  { %v77_v25 = vpop.permute.xlu1 %76  ;;  %v65_v26 = vpop.permute.xlu0 %64 }
  0x77   :  { %v69_v27 = vpop.permute.xlu1 %68  ;;  %v67_v28 = vpop.permute.xlu0 %66 }
  0x78   :  { %v70_v35 = vsel %vm8158_vm0, %v65_v26, %v67_v28  ;;  %v71_v43 = vsel %vm8158_vm0, %v67_v28, %v69_v27 }
  0x79   :  { %v74_v39 = vsel %vm4583_vm5, %v70_v35, -inf  ;;  %v75_v50 = vsel %vm4597_vm8, %v71_v43, -inf }
  0x7b   :  { %v81_v31 = vpop.permute.xlu1 %80  ;;  %v79_v32 = vpop.permute.xlu0 %78 }
  0x7c   :  { %v83_v36 = vsel %vm82_vm4, %v77_v25, %v79_v32  ;;  %v84_v46 = vsel %vm82_vm4, %v79_v32, %v81_v31  ;;  %vm8162_vm4 = vcmask 900096  }
  0x7d   :  { %v87_v44 = vmax.f32 %v74_v39, %v83_v36  ;;  %v88_v53 = vmax.f32 %v75_v50, %v84_v46 }
  0x7f   :  { %v106_v40 = vpop.permute.xlu1 %105  ;;  %v104_v41 = vpop.permute.xlu0 %103 }
  0x80   :  { %v110_v45 = vsel %vm8083_vm6, %v104_v41, %v106_v40 }
  0x81   :  { %v114_v47 = vsel %vm4589_vm7, %v110_v45, -inf }
  0x82   :  { %v116_v48 = vmax.f32 %v87_v44, %v114_v47 }
  0x83   :  { %v119_v51 = vpop.permute.xlu1 %118  ;;  %v108_v52 = vpop.permute.xlu0 %107 }
  0x84   :  { %v111_v54 = vsel %vm8083_vm6, %v106_v40, %v108_v52 }
  0x85   :  { %v115_v55 = vsel %vm4606_vm9, %v111_v54, -inf }
  0x86   :  { %v117_v56 = vmax.f32 %v88_v53, %v115_v55 }
  0x87   :  { %v123_v57 = vpop.permute.xlu1 %122  ;;  %v121_v58 = vpop.permute.xlu0 %120 }
  0x88   :  { %v125_v59 = vsel %vm8086_vm10, %v119_v51, %v121_v58  ;;  %v126_v60 = vsel %vm8086_vm10, %v121_v58, %v123_v57 }
  0x89   :  { %v129_v61 = vsel %vm4583_vm5, %v125_v59, -inf  ;;  %v130_v62 = vsel %vm4597_vm8, %v126_v60, -inf }
  0x8a   :  { %v131_v63 = vmax.f32 %v116_v48, %v129_v61  ;;  %v132_v0 = vmax.f32 %v117_v56, %v130_v62 }
  0x8b   :  { %v140_v3 = vpop.permute.xlu1 %139  ;;  %v138_v6 = vpop.permute.xlu0 %137 }
  0x8c   :  { %v133_v7 = vmax.f32 %v131_v63, %v4447_v2  ;;  %v144_v8 = vsel %vm8165_vm11, %v138_v6, %v140_v3  ;;  %v134_v13 = vmax.f32 %v132_v0, %v4442_v1 }
  0x8d   :  { %v148_v9 = vsel %vm4589_vm7, %v144_v8, -inf }
  0x8e   :  { %v150_v10 = vmax.f32 %v133_v7, %v148_v9 }
  0x8f   :  { %v153_v11 = vpop.permute.xlu1 %152  ;;  %v142_v12 = vpop.permute.xlu0 %141 }
  0x90   :  { %v145_v21 = vsel %vm8165_vm11, %v140_v3, %v142_v12 }
  0x91   :  { %v149_v22 = vsel %vm4606_vm9, %v145_v21, -inf }
  0x92   :  { %v151_v23 = vmax.f32 %v134_v13, %v149_v22 }
  0x93   :  { %v157_v24 = vpop.permute.xlu1 %156  ;;  %v155_v25 = vpop.permute.xlu0 %154 }
  0x94   :  { %v159_v26 = vsel %vm8098_vm12, %v153_v11, %v155_v25  ;;  %v160_v27 = vsel %vm8098_vm12, %v155_v25, %v157_v24 }
  0x95   :  { %v163_v28 = vsel %vm4583_vm5, %v159_v26, -inf  ;;  %v164_v29 = vsel %vm4597_vm8, %v160_v27, -inf  ;;  %vm8097_vm5 = vcmask 932864   ;;  %vm1856_vm8 = vcmask 539648  }
  0x96   :  { %v165_v30 = vmax.f32 %v150_v10, %v163_v28  ;;  %v166_v31 = vmax.f32 %v151_v23, %v164_v29 }
  0x97   :  { %v170_v32 = vpop.permute.xlu1 %169  ;;  %v168_v33 = vpop.permute.xlu0 %167 }
  0x98   :  { %v174_v38 = vsel %vm8163_vm13, %v168_v33, %v170_v32 }
  0x99   :  { %v178_v43 = vmax.f32 %v165_v30, %v174_v38 }
  0x9b   :  { %v181_v35 = vpop.permute.xlu1 %180  ;;  %v172_v36 = vpop.permute.xlu0 %171 }
  0x9c   :  { %v175_v39 = vsel %vm8163_vm13, %v170_v32, %v172_v36 }
  0x9d   :  { %v179_v34 = vmax.f32 %v166_v31, %v175_v39 }
  0x9f   :  { %v185_v40 = vpop.permute.xlu1 %184  ;;  %v183_v41 = vpop.permute.xlu0 %182 }
  0xa0   :  { %v187_v44 = vsel %vm8159_vm14, %v181_v35, %v183_v41  ;;  %v188_v42 = vsel %vm8159_vm14, %v183_v41, %v185_v40 }
  0xa1   :  { %v191_v45 = vsel %vm4589_vm7, %v187_v44, -inf  ;;  %v192_v46 = vsel %vm4606_vm9, %v188_v42, -inf  ;;  %vm8168_vm7 = vcmask 506880   ;;  %vm1174_vm9 = vcmask 752640  }
  0xa2   :  { %v4643_v47 = vmax.f32 %v178_v43, %v191_v45  ;;  %v4645_v48 = vmax.f32 %v179_v34, %v192_v46 }
  0xa3   :  { %v4647_v50 = vpop.permute.xlu1 %209  ;;  %v4649_v51 = vpop.permute.xlu0 %207 }
  0xa4   :  { %8199 = vst [vmem:[#allocation7_spill] sm:$0xff] %v4643_v47  ;;  %8200 = vst [vmem:[#allocation8_spill] sm:$0xff] %v4645_v48  ;;  %v4164_v47 = vld [vmem:[%s7985_s4 + $0x10] sm:$0xff] }
  0xa5   :  { %8201 = vst [vmem:[#allocation9_spill] sm:$0xff] %v4647_v50  ;;  %8202 = vst [vmem:[#allocation10_spill] sm:$0xff] %v4649_v51 }
  0xa7   :  { %v4651_v52 = vpop.permute.xlu0 %221  ;;  %v4653_v53 = vpop.permute.xlu1 %223 }
  0xa8   :  { %8203 = vst [vmem:[#allocation11_spill] sm:$0xff] %v4651_v52  ;;  %8204 = vst [vmem:[#allocation12_spill] sm:$0xff] %v4653_v53 }
  0xab   :  { %v4655_v54 = vpop.permute.xlu0 %225  ;;  %v245_v55 = vpop.permute.xlu1 %244 }
  0xac   :  { %8205 = vst [vmem:[#allocation13_spill] sm:$0xff] %v4655_v54  ;;  %v4657_v37 = vmul.f32 0.0, %v245_v55 }
  0xae   :  { %258 = vrot.lane.b32.xlu1 %v4657_v37, %s4351_s1 }
  0xaf   :  { %v4661_v49 = vpop.permute.xlu0 %246  ;;  %v4663_v56 = vpop.permute.xlu1 %275 }
  0xb0   :  { %v254_v57 = vmul.f32 %v4661_v49, %v4442_v1  ;;  %v283_v63 = vmul.f32 %v4663_v56, %v4442_v1  ;;  %v248_v31 = vsel %vm8098_vm12, %v245_v55, %v4661_v49  ;;  %v4155_v55 = vld [vmem:[%s7984_s3 + $0x10] sm:$0xff]  ;;  %vm8106_vm12 = vcmask 113664  }
  0xb1   :  { %v253_v32 = vmul.f32 %v248_v31, %v4447_v2 }
  0xb2   :  { %262 = vrot.lane.b32.xlu1 %v254_v57, %s4351_s1 }
  0xb3   :  { %v274_v58 = vpop.permute.xlu0 %273  ;;  %v4668_v59 = vpop.permute.xlu1 %301 }
  0xb4   :  { %8206 = vst [vmem:[#allocation14_spill] sm:$0xff] %v4668_v59  ;;  %v4670_v60 = vmul.f32 0.0, %v274_v58  ;;  %v4692_v8 = vsel %vm8165_vm11, %v274_v58, %v4663_v56 }
  0xb5   :  { %v282_v11 = vmul.f32 %v4692_v8, %v4447_v2 }
  0xb6   :  { %287 = vrot.lane.b32.xlu0 %v4670_v60, %s8035_s14 }
  0xb7   :  { %v4674_v61 = vpop.permute.xlu0 %303  ;;  %v4676_v62 = vpop.permute.xlu1 %313 }
  0xb8   :  { %8207 = vst [vmem:[#allocation15_spill] sm:$0xff] %v4674_v61  ;;  %v321_v0 = vmul.f32 %v4676_v62, %v4447_v2 }
  0xba   :  { %291 = vrot.lane.b32.xlu0 %v283_v63, %s8035_s14  ;;  %327 = vrot.lane.b32.xlu1 %v321_v0, %s4352_s21 }
  0xbb   :  { %v4684_v3 = vpop.permute.xlu0 %315  ;;  %v4686_v6 = vpop.permute.xlu1 %344 }
  0xbc   :  { %v323_v7 = vmul.f32 %v4684_v3, %v4557_v20  ;;  %v352_v24 = vmul.f32 %v4686_v6, %v4557_v20  ;;  %v4744_v33 = vsel %vm8086_vm10, %v4676_v62, %v4684_v3  ;;  %vm8090_vm10 = vcmask 15360  }
  0xbd   :  { %v322_v35 = vmul.f32 %v4744_v33, %v4442_v1 }
  0xbe   :  { %331 = vrot.lane.b32.xlu1 %v323_v7, %s4352_s21 }
  0xbf   :  { %v4695_v9 = vpop.permute.xlu0 %342  ;;  %v4697_v10 = vpop.permute.xlu1 %372 }
  0xc0   :  { %8208 = vst [vmem:[#allocation16_spill] sm:$0xff] %v4697_v10  ;;  %v350_v12 = vmul.f32 %v4695_v9, %v4447_v2  ;;  %v4706_v13 = vsel %vm8083_vm6, %v4695_v9, %v4686_v6  ;;  %v4881_v10 = vmul.f32 %v4695_v9, %v4456_v5  ;;  %v4160_v9 = vld [vmem:[%s7984_s3 + $0x38] sm:$0xff]  ;;  %vm264_vm6 = vcmask 1031168  }
  0xc1   :  { %v351_v23 = vmul.f32 %v4706_v13, %v4442_v1 }
  0xc2   :  { %289 = vrot.lane.b32.xlu1 %v282_v11, %s8035_s14  ;;  %356 = vrot.lane.b32.xlu0 %v350_v12, %s4353_s22 }
  0xc3   :  { %v4710_v21 = vpop.permute.xlu0 %374  ;;  %v4712_v22 = vpop.permute.xlu1 %376 }
  0xc4   :  { %8209 = vst [vmem:[#allocation17_spill] sm:$0xff] %v4710_v21  ;;  %8210 = vst [vmem:[#allocation18_spill] sm:$0xff] %v4712_v22 }
  0xc6   :  { %358 = vrot.lane.b32.xlu1 %v351_v23, %s4353_s22  ;;  %360 = vrot.lane.b32.xlu0 %v352_v24, %s4353_s22 }
  0xc7   :  { %v4720_v25 = vpop.permute.xlu0 %387  ;;  %v4722_v26 = vpop.permute.xlu1 %389 }
  0xc8   :  { %v395_v27 = vmul.f32 %v4720_v25, %v4447_v2  ;;  %v4729_v28 = vsel %vm8158_vm0, %v4720_v25, %v4722_v26  ;;  %v397_v30 = vmul.f32 %v4722_v26, %v4557_v20  ;;  %v4154_v20 = vld [vmem:[%s7984_s3 + $0x8] sm:$0xff]  ;;  %vm1933_vm0 = vcmask 982016  }
  0xc9   :  { %v396_v29 = vmul.f32 %v4729_v28, %v4442_v1 }
  0xca   :  { %401 = vrot.lane.b32.xlu0 %v395_v27, %s4354_s23 }
  0xcb   :  { %403 = vrot.lane.b32.xlu1 %v396_v29, %s4354_s23  ;;  %v4753_v36 = vpop.permute.xlu0 %428  ;;  %v4779_v57 = vpop.permute.xlu1 %426 }
  0xcc   :  { %8211 = vst [vmem:[#allocation19_spill] sm:$0xff] %v4753_v36  ;;  %8220 = vst [vmem:[#allocation28_spill] sm:$0xff] %v4779_v57 }
  0xce   :  { %405 = vrot.lane.b32.xlu0 %v397_v30, %s4354_s23  ;;  %v4802_v30 = vmul.f32 %v248_v31, %v4456_v5 }
  0xd2   :  { %260 = vrot.lane.b32.xlu0 %v253_v32, %s4351_s1 }
  0xd6   :  { %329 = vrot.lane.b32.xlu0 %v322_v35, %s4352_s21 }
  0xd8   :  { %v4781_v58 = vpop.permute.xlu1 %446 }
  0xd9   :  { %8221 = vst [vmem:[#allocation29_spill] sm:$0xff] %v4781_v58 }
  0xda   :  { %456 = vperm.xlu0 %4326, %v4154_v20  }
 0x120   :  { %v4783_v63 = vpop.permute.xlu1 %258 }
 0x121   :  { %8222 = vst [vmem:[#allocation30_spill] sm:$0xff] %v4783_v63 }
 0x124   :  { %v4785_v0 = vpop.permute.xlu1 %262 }
 0x125   :  { %8223 = vst [vmem:[#allocation31_spill] sm:$0xff] %v4785_v0 }
 0x128   :  { %v4755_v2 = vpop.permute.xlu0 %287 }
 0x129   :  { %8212 = vst [vmem:[#allocation20_spill] sm:$0xff] %v4755_v2 }
 0x12c   :  { %v4757_v38 = vpop.permute.xlu0 %291  ;;  %v4787_v7 = vpop.permute.xlu1 %327 }
 0x12d   :  { %8213 = vst [vmem:[#allocation21_spill] sm:$0xff] %v4757_v38  ;;  %8224 = vst [vmem:[#allocation32_spill] sm:$0xff] %v4787_v7 }
 0x130   :  { %v4789_v11 = vpop.permute.xlu1 %331 }
 0x131   :  { %8225 = vst [vmem:[#allocation33_spill] sm:$0xff] %v4789_v11 }
 0x134   :  { %v4759_v39 = vpop.permute.xlu0 %356  ;;  %v4791_v12 = vpop.permute.xlu1 %289 }
 0x135   :  { %8214 = vst [vmem:[#allocation22_spill] sm:$0xff] %v4759_v39  ;;  %8226 = vst [vmem:[#allocation34_spill] sm:$0xff] %v4791_v12 }
 0x138   :  { %v4761_v40 = vpop.permute.xlu0 %360  ;;  %v4793_v23 = vpop.permute.xlu1 %358 }
 0x139   :  { %8215 = vst [vmem:[#allocation23_spill] sm:$0xff] %v4761_v40  ;;  %8227 = vst [vmem:[#allocation35_spill] sm:$0xff] %v4793_v23 }
 0x13c   :  { %v4763_v41 = vpop.permute.xlu0 %401 }
 0x13d   :  { %8216 = vst [vmem:[#allocation24_spill] sm:$0xff] %v4763_v41  ;;  %v4795_v24 = vpop.permute.xlu1 %403 }
 0x13e   :  { %8228 = vst [vmem:[#allocation36_spill] sm:$0xff] %v4795_v24 }
 0x140   :  { %v4765_v1 = vpop.permute.xlu0 %405 }
 0x141   :  { %8217 = vst [vmem:[#allocation25_spill] sm:$0xff] %v4765_v1 }
 0x144   :  { %v4767_v43 = vpop.permute.xlu0 %260 }
 0x145   :  { %8218 = vst [vmem:[#allocation26_spill] sm:$0xff] %v4767_v43 }
 0x148   :  { %v4769_v34 = vpop.permute.xlu0 %329 }
 0x149   :  { %8219 = vst [vmem:[#allocation27_spill] sm:$0xff] %v4769_v34 }
 0x155   :  { %v457_v44 = vpop.permute.xlu0 %456 }
 0x156   :  { %v461_v42 = vmul.f32 %v457_v44, %v4452_v4  ;;  %v459_v45 = vmul.f32 0.0, %v457_v44  ;;  %v460_v46 = vmul.f32 %v457_v44, %v4456_v5  ;;  %v4808_v44 = vmul.f32 %v4661_v49, %v4452_v4 }
 0x158   :  { %469 = vrot.lane.b32.xlu0 %v461_v42, %s8045_s12  ;;  %465 = vrot.lane.b32.xlu1 %v459_v45, %s8045_s12  ;;  %v4156_v42 = vld [vmem:[%s7984_s3 + $0x18] sm:$0xff] }
 0x15c   :  { %467 = vrot.lane.b32.xlu1 %v460_v46, %s8045_s12  ;;  %v4821_v46 = vmul.f32 %v4692_v8, %v4456_v5 }
 0x160   :  { %486 = vperm.xlu1 %4325, %v4155_v55  }
 0x1ca   :  { %v4797_v27 = vpop.permute.xlu1 %465 }
 0x1cb   :  { %8229 = vst [vmem:[#allocation37_spill] sm:$0xff] %v4797_v27 }
 0x1ce   :  { %v4799_v29 = vpop.permute.xlu1 %467 }
 0x1cf   :  { %8230 = vst [vmem:[#allocation38_spill] sm:$0xff] %v4799_v29 }
 0x1db   :  { %v487_v32 = vpop.permute.xlu1 %486 }
 0x1dc   :  { %v490_v35 = vmul.f32 %v487_v32, %v4802_v30  ;;  %v489_v20 = vmul.f32 %v487_v32, %v4657_v37  ;;  %v491_v31 = vmul.f32 %v487_v32, %v4808_v44  ;;  %v4157_v32 = vld [vmem:[%s7984_s3 + $0x20] sm:$0xff] }
 0x1de   :  { %497 = vrot.lane.b32.xlu1 %v490_v35, %s4351_s1  ;;  %495 = vrot.lane.b32.xlu0 %v489_v20, %s4351_s1  ;;  %v4827_v20 = vmul.f32 %v4663_v56, %v4452_v4 }
 0x1e2   :  { %516 = vperm.xlu1 %4325, %v4156_v42   ;;  %499 = vrot.lane.b32.xlu0 %v491_v31, %s4351_s1 }
 0x250   :  { %v4817_v45 = vpop.permute.xlu1 %497 }
 0x251   :  { %8231 = vst [vmem:[#allocation39_spill] sm:$0xff] %v4817_v45  ;;  %v5146_v45 = vld [vmem:[#allocation2] sm:$0xff] }
 0x25d   :  { %v517_v49 = vpop.permute.xlu1 %516 }
 0x25e   :  { %v520_v55 = vmul.f32 %v517_v49, %v4821_v46  ;;  %v519_v35 = vmul.f32 %v517_v49, %v4670_v60  ;;  %v521_v8 = vmul.f32 %v517_v49, %v4827_v20  ;;  %v4845_v49 = vpop.permute.xlu0 %469 }
 0x25f   :  { %8233 = vst [vmem:[#allocation41_spill] sm:$0xff] %v4845_v49 }
 0x260   :  { %527 = vrot.lane.b32.xlu1 %v520_v55, %s8035_s14  ;;  %525 = vrot.lane.b32.xlu0 %v519_v35, %s8035_s14  ;;  %v4158_v55 = vld [vmem:[%s7984_s3 + $0x28] sm:$0xff] }
 0x262   :  { %v4847_v35 = vpop.permute.xlu0 %495 }
 0x263   :  { %8234 = vst [vmem:[#allocation42_spill] sm:$0xff] %v4847_v35 }
 0x264   :  { %543 = vperm.xlu1 %4325, %v4157_v32   ;;  %529 = vrot.lane.b32.xlu0 %v521_v8, %s8035_s14 }
 0x266   :  { %v4849_v32 = vpop.permute.xlu0 %499 }
 0x267   :  { %8235 = vst [vmem:[#allocation43_spill] sm:$0xff] %v4849_v32 }
 0x2d2   :  { %v4836_v42 = vpop.permute.xlu1 %527  ;;  %v4851_v8 = vpop.permute.xlu0 %525 }
 0x2d3   :  { %8232 = vst [vmem:[#allocation40_spill] sm:$0xff] %v4836_v42  ;;  %8236 = vst [vmem:[#allocation44_spill] sm:$0xff] %v4851_v8 }
 0x2d6   :  { %v4853_v57 = vpop.permute.xlu0 %529 }
 0x2d7   :  { %8237 = vst [vmem:[#allocation45_spill] sm:$0xff] %v4853_v57 }
 0x2df   :  { %v544_v31 = vpop.permute.xlu1 %543 }
 0x2e0   :  { %v546_v36 = vmul.f32 %v544_v31, %v4456_v5  ;;  %v547_v56 = vmul.f32 %v544_v31, %v4452_v4 }
 0x2e2   :  { %552 = vrot.lane.b32.xlu1 %v547_v56, %s4349_s15  ;;  %550 = vrot.lane.b32.xlu0 %v546_v36, %s4349_s15  ;;  %v4859_v36 = vmul.f32 %v4676_v62, %v4456_v5  ;;  %v4863_v56 = vmul.f32 %v4744_v33, %v4452_v4  ;;  %v4159_v62 = vld [vmem:[%s7984_s3 + $0x30] sm:$0xff] }
 0x2e6   :  { %571 = vperm.xlu0 %4326, %v4158_v55   ;;  %v563_v55 = vld [vmem:[#allocation2 + $0x18] sm:$0xff] }
 0x2e7   :  { %v4868_v22 = vmul.f32 %v563_v55, %v4684_v3  ;;  %v4885_v3 = vmul.f32 %v4706_v13, %v4452_v4 }
 0x354   :  { %v4855_v31 = vpop.permute.xlu0 %550 }
 0x355   :  { %8238 = vst [vmem:[#allocation46_spill] sm:$0xff] %v4855_v31 }
 0x361   :  { %v572_v1 = vpop.permute.xlu0 %571 }
 0x362   :  { %v575_v24 = vmul.f32 %v572_v1, %v4863_v56  ;;  %v574_v41 = vmul.f32 %v572_v1, %v4859_v36  ;;  %v576_v33 = vmul.f32 %v572_v1, %v4868_v22  ;;  %v4890_v1 = vmul.f32 %v563_v55, %v4686_v6 }
 0x364   :  { %582 = vrot.lane.b32.xlu0 %v575_v24, %s4352_s21  ;;  %580 = vrot.lane.b32.xlu1 %v574_v41, %s4352_s21 }
 0x368   :  { %601 = vperm.xlu0 %4326, %v4159_v62   ;;  %584 = vrot.lane.b32.xlu1 %v576_v33, %s4352_s21 }
 0x3d6   :  { %v4877_v21 = vpop.permute.xlu0 %582 }
 0x3d7   :  { %8239 = vst [vmem:[#allocation47_spill] sm:$0xff] %v4877_v21 }
 0x3e3   :  { %v602_v41 = vpop.permute.xlu0 %601 }
 0x3e4   :  { %v605_v24 = vmul.f32 %v602_v41, %v4885_v3  ;;  %v604_v40 = vmul.f32 %v602_v41, %v4881_v10  ;;  %v606_v62 = vmul.f32 %v602_v41, %v4890_v1 }
 0x3e6   :  { %612 = vrot.lane.b32.xlu0 %v605_v24, %s4353_s22  ;;  %610 = vrot.lane.b32.xlu1 %v604_v40, %s4353_s22  ;;  %v4161_v40 = vld [vmem:[%s7984_s3 + $0x40] sm:$0xff] }
 0x3ea   :  { %628 = vperm.xlu0 %4326, %v4160_v9   ;;  %614 = vrot.lane.b32.xlu1 %v606_v62, %s4353_s22  ;;  %v4913_v9 = vmul.f32 %v4720_v25, %v4456_v5  ;;  %v4917_v62 = vmul.f32 %v4729_v28, %v4452_v4 }
 0x458   :  { %v4899_v13 = vpop.permute.xlu0 %612 }
 0x459   :  { %8240 = vst [vmem:[#allocation48_spill] sm:$0xff] %v4899_v13 }
 0x465   :  { %v629_v33 = vpop.permute.xlu0 %628 }
 0x466   :  { %v632_v23 = vmul.f32 %v629_v33, %v4452_v4  ;;  %v631_v6 = vmul.f32 %v629_v33, %v4456_v5  ;;  %v633_v24 = vmul.f32 %v629_v33, %v563_v55 }
 0x468   :  { %639 = vrot.lane.b32.xlu0 %v632_v23, %s4350_s16  ;;  %637 = vrot.lane.b32.xlu1 %v631_v6, %s4350_s16  ;;  %v4162_v6 = vld [vmem:[%s7982_s2 + $0x2] sm:$0x3] }
 0x469   :  { %v4930_v25 = vrot.slane %v4162_v6, %v4509_v15  ;;  %v4937_v39 = vrot.slane %v4162_v6, %v4507_v14 }
 0x46c   :  { %658 = vperm.xlu0 %4326, %v4161_v40   ;;  %641 = vrot.lane.b32.xlu1 %v633_v24, %s4350_s16  ;;  %v4925_v24 = vmul.f32 %v563_v55, %v4722_v26  ;;  %v703_v26 = vld [vmem:[%s7985_s4] sm:$0xff]  ;;  %v4163_v55 = vld [vmem:[%s7985_s4 + $0x8] sm:$0xff] }
 0x4da   :  { %v4909_v41 = vpop.permute.xlu0 %639 }
 0x4db   :  { %8241 = vst [vmem:[#allocation49_spill] sm:$0xff] %v4909_v41 }
 0x4e7   :  { %v659_v23 = vpop.permute.xlu0 %658 }
 0x4e8   :  { %v662_v33 = vmul.f32 %v659_v23, %v4917_v62  ;;  %v661_v40 = vmul.f32 %v659_v23, %v4913_v9  ;;  %v663_v28 = vmul.f32 %v659_v23, %v4925_v24  ;;  %v4951_v23 = vpop.permute.xlu1 %552 }
 0x4e9   :  { %8242 = vst [vmem:[#allocation50_spill] sm:$0xff] %v4951_v23 }
 0x4ea   :  { %669 = vrot.lane.b32.xlu0 %v662_v33, %s4354_s23  ;;  %667 = vrot.lane.b32.xlu1 %v661_v40, %s4354_s23 }
 0x4ec   :  { %v4953_v6 = vpop.permute.xlu1 %580 }
 0x4ed   :  { %8243 = vst [vmem:[#allocation51_spill] sm:$0xff] %v4953_v6 }
 0x4ee   :  { %692 = vrot.lane.b32.xlu0 %v4930_v25, %s4354_s23  ;;  %671 = vrot.lane.b32.xlu1 %v663_v28, %s4354_s23 }
 0x4f0   :  { %v4955_v33 = vpop.permute.xlu1 %584 }
 0x4f1   :  { %8244 = vst [vmem:[#allocation52_spill] sm:$0xff] %v4955_v33 }
 0x4f2   :  { %706 = vperm.xlu0 %4326, %v703_v26   ;;  %694 = vrot.lane.b32.xlu1 %v4937_v39, %s4354_s23 }
 0x4f4   :  { %v4957_v40 = vpop.permute.xlu1 %610 }
 0x4f5   :  { %8245 = vst [vmem:[#allocation53_spill] sm:$0xff] %v4957_v40 }
 0x4f6   :  { %712 = vrot.lane.b32.xlu1 %v4518_v17, %s4350_s16  ;;  %714 = vrot.lane.b32.xlu0 %v4515_v16, %s4350_s16 }
 0x4f8   :  { %v4959_v28 = vpop.permute.xlu1 %614 }
 0x4f9   :  { %8246 = vst [vmem:[#allocation54_spill] sm:$0xff] %v4959_v28 }
 0x4fa   :  { %727 = vperm.xlu1 %4325, %v4163_v55  }
 0x4fc   :  { %v4961_v26 = vpop.permute.xlu1 %637 }
 0x4fd   :  { %8247 = vst [vmem:[#allocation55_spill] sm:$0xff] %v4961_v26 }
 0x500   :  { %v4963_v34 = vpop.permute.xlu1 %641 }
 0x501   :  { %8248 = vst [vmem:[#allocation56_spill] sm:$0xff] %v4963_v34 }
 0x55c   :  { %v4965_v11 = vpop.permute.xlu1 %667  ;;  %v4967_v7 = vpop.permute.xlu0 %669 }
 0x55d   :  { %8249 = vst [vmem:[#allocation57_spill] sm:$0xff] %v4965_v11  ;;  %8250 = vst [vmem:[#allocation58_spill] sm:$0xff] %v4967_v7  ;;  %v4166_v7 = vld [vmem:[%s7982_s2 + $0x8] sm:$0x3] }
 0x55e   :  { %v5019_v28 = vrot.slane %v4166_v7, %v4509_v15 }
 0x560   :  { %v4969_v61 = vpop.permute.xlu1 %671  ;;  %v4971_v55 = vpop.permute.xlu0 %692 }
 0x561   :  { %8251 = vst [vmem:[#allocation59_spill] sm:$0xff] %v4969_v61 }
 0x564   :  { %v4973_v59 = vpop.permute.xlu1 %694 }
 0x568   :  { %v713_v2 = vpop.permute.xlu1 %712 }
 0x569   :  { %v720_v63 = vmul.f32 0.0, %v713_v2 }
 0x56d   :  { %v4975_v38 = vpop.permute.xlu0 %706 }
 0x56e   :  { %8252 = vst [vmem:[#allocation60_spill] sm:$0xff] %v4975_v38 }
 0x571   :  { %v715_v12 = vpop.permute.xlu0 %714 }
 0x572   :  { %v716_v0 = vsel %vm8170_vm15, %v713_v2, %v715_v12  ;;  %v722_v52 = vmul.f32 %v715_v12, %v4452_v4 }
 0x573   :  { %v721_v54 = vmul.f32 %v716_v0, %v4456_v5 }
 0x575   :  { %v728_v43 = vpop.permute.xlu1 %727 }
 0x576   :  { %v730_v53 = vmul.f32 %v728_v43, %v720_v63  ;;  %v731_v48 = vmul.f32 %v728_v43, %v721_v54  ;;  %v732_v61 = vmul.f32 %v728_v43, %v722_v52 }
 0x578   :  { %738 = vrot.lane.b32.xlu1 %v731_v48, %s8045_s12  ;;  %736 = vrot.lane.b32.xlu0 %v730_v53, %s8045_s12 }
 0x57c   :  { %754 = vperm.xlu1 %4325, %v4164_v47   ;;  %740 = vrot.lane.b32.xlu0 %v732_v61, %s8045_s12  ;;  %v4165_v47 = vld [vmem:[%s7985_s4 + $0x18] sm:$0xff]  ;;  %s4379_s12 = smov 120  }
 0x5ea   :  { %v4986_v11 = vpop.permute.xlu1 %738  ;;  %v5000_v52 = vpop.permute.xlu0 %736 }
 0x5eb   :  { %8253 = vst [vmem:[#allocation61_spill] sm:$0xff] %v4986_v11  ;;  %8254 = vst [vmem:[#allocation62_spill] sm:$0xff] %v5000_v52 }
 0x5ee   :  { %v5002_v53 = vpop.permute.xlu0 %740 }
 0x5ef   :  { %8255 = vst [vmem:[#allocation63_spill] sm:$0xff] %v5002_v53 }
 0x5f7   :  { %v755_v2 = vpop.permute.xlu1 %754 }
 0x5f8   :  { %v757_v0 = vmul.f32 0.0, %v755_v2  ;;  %v758_v12 = vmul.f32 %v755_v2, %v4456_v5  ;;  %v759_v48 = vmul.f32 %v755_v2, %v4452_v4 }
 0x5fa   :  { %765 = vrot.lane.b32.xlu1 %v758_v12, %s4351_s1  ;;  %763 = vrot.lane.b32.xlu0 %v757_v0, %s4351_s1 }
 0x5fe   :  { %777 = vrot.lane.b32.xlu1 %v4528_v18, %s4355_s19  ;;  %767 = vrot.lane.b32.xlu0 %v759_v48, %s4351_s1 }
 0x602   :  { %793 = vperm.xlu1 %4325, %v4165_v47   ;;  %779 = vrot.lane.b32.xlu0 %v4535_v19, %s4355_s19 }
 0x66c   :  { %v5004_v54 = vpop.permute.xlu0 %763  ;;  %v5008_v43 = vpop.permute.xlu1 %765 }
 0x66d   :  { %8256 = vst [vmem:[#allocation64_spill] sm:$0xff] %v5004_v54  ;;  %8258 = vst [vmem:[#allocation66_spill] sm:$0xff] %v5008_v43 }
 0x670   :  { %v5006_v61 = vpop.permute.xlu0 %767  ;;  %v778_v2 = vpop.permute.xlu1 %777 }
 0x671   :  { %8257 = vst [vmem:[#allocation65_spill] sm:$0xff] %v5006_v61  ;;  %v786_v12 = vmul.f32 0.0, %v778_v2 }
 0x674   :  { %v780_v63 = vpop.permute.xlu0 %779 }
 0x675   :  { %v782_v0 = vsel %vm8157_vm2, %v778_v2, %v780_v63  ;;  %v788_v34 = vmul.f32 %v780_v63, %v4452_v4  ;;  %v4167_v63 = vld [vmem:[%s7985_s4 + $0x20] sm:$0xff]  ;;  %vm1883_vm2 = vcmask 998400  }
 0x676   :  { %v787_v48 = vmul.f32 %v782_v0, %v4456_v5  ;;  %v5025_v0 = vrot.slane %v4166_v7, %v4507_v14 }
 0x67d   :  { %v794_v47 = vpop.permute.xlu1 %793 }
 0x67e   :  { %v796_v26 = vmul.f32 %v794_v47, %v786_v12  ;;  %v797_v41 = vmul.f32 %v794_v47, %v787_v48  ;;  %v798_v2 = vmul.f32 %v794_v47, %v788_v34 }
 0x680   :  { %802 = vrot.lane.b32.xlu0 %v796_v26, %s8037_s28  ;;  %804 = vrot.lane.b32.xlu1 %v797_v41, %s8037_s28 }
 0x684   :  { %806 = vrot.lane.b32.xlu0 %v798_v2, %s8037_s28  ;;  %828 = vrot.lane.b32.xlu1 %v5019_v28, %s4357_s29  ;;  %s8057_s28 = smov 31  }
 0x688   :  { %830 = vrot.lane.b32.xlu0 %v5025_v0, %s4357_s29  ;;  %844 = vperm.xlu1 %4325, %v4167_v63  }
 0x6f2   :  { %v5032_v41 = vpop.permute.xlu0 %802  ;;  %v5036_v26 = vpop.permute.xlu1 %804 }
 0x6f3   :  { %8259 = vst [vmem:[#allocation67_spill] sm:$0xff] %v5032_v41  ;;  %8261 = vst [vmem:[#allocation69_spill] sm:$0xff] %v5036_v26 }
 0x6f6   :  { %v5034_v34 = vpop.permute.xlu0 %806  ;;  %v829_v48 = vpop.permute.xlu1 %828 }
 0x6f7   :  { %8260 = vst [vmem:[#allocation68_spill] sm:$0xff] %v5034_v34  ;;  %v5039_v47 = vmul.f32 0.0, %v829_v48 }
 0x6fa   :  { %v831_v12 = vpop.permute.xlu0 %830 }
 0x6fb   :  { %v833_v7 = vsel %vm8145_vm3, %v829_v48, %v831_v12  ;;  %v5045_v13 = vmul.f32 %v831_v12, %v4452_v4  ;;  %v4168_v12 = vld [vmem:[%s7985_s4 + $0x28] sm:$0xff]  ;;  %vm8169_vm3 = vcmask 490496  }
 0x6fc   :  { %v5042_v2 = vmul.f32 %v833_v7, %v4456_v5 }
 0x703   :  { %v845_v40 = vpop.permute.xlu1 %844 }
 0x704   :  { %v847_v63 = vmul.f32 %v845_v40, %v5039_v47  ;;  %v848_v33 = vmul.f32 %v845_v40, %v5042_v2  ;;  %v849_v6 = vmul.f32 %v845_v40, %v5045_v13 }
 0x706   :  { %853 = vrot.lane.b32.xlu0 %v847_v63, %s4358_s0  ;;  %855 = vrot.lane.b32.xlu1 %v848_v33, %s4358_s0 }
 0x70a   :  { %857 = vrot.lane.b32.xlu0 %v849_v6, %s4358_s0  ;;  %868 = vrot.lane.b32.xlu1 %v4930_v25, %s4352_s21 }
 0x70e   :  { %870 = vrot.lane.b32.xlu0 %v4937_v39, %s4352_s21  ;;  %883 = vperm.xlu1 %4325, %v4168_v12   ;;  %v4169_v12 = vld [vmem:[%s7985_s4 + $0x30] sm:$0xff] }
 0x778   :  { %v5060_v48 = vpop.permute.xlu0 %853  ;;  %v5064_v33 = vpop.permute.xlu1 %855 }
 0x779   :  { %8262 = vst [vmem:[#allocation70_spill] sm:$0xff] %v5060_v48  ;;  %8264 = vst [vmem:[#allocation72_spill] sm:$0xff] %v5064_v33 }
 0x77c   :  { %v5062_v7 = vpop.permute.xlu0 %857  ;;  %v869_v6 = vpop.permute.xlu1 %868 }
 0x77d   :  { %8263 = vst [vmem:[#allocation71_spill] sm:$0xff] %v5062_v7  ;;  %v876_v21 = vmul.f32 0.0, %v869_v6 }
 0x780   :  { %v871_v40 = vpop.permute.xlu0 %870 }
 0x781   :  { %v872_v63 = vsel %vm8162_vm4, %v869_v6, %v871_v40  ;;  %v878_v23 = vmul.f32 %v871_v40, %v4452_v4  ;;  %v5078_v6 = vsel %vm8159_vm14, %v4649_v51, %v4647_v50 }
 0x782   :  { %v877_v8 = vmul.f32 %v872_v63, %v4456_v5  ;;  %8265 = vst [vmem:[#allocation73_spill] sm:$0xff] %v5078_v6 }
 0x789   :  { %v884_v31 = vpop.permute.xlu1 %883 }
 0x78a   :  { %v886_v35 = vmul.f32 %v884_v31, %v876_v21  ;;  %v887_v42 = vmul.f32 %v884_v31, %v877_v8  ;;  %v888_v57 = vmul.f32 %v884_v31, %v878_v23  ;;  %v5083_v21 = vmul.f32 0.0, %v4649_v51  ;;  %v4170_v23 = vld [vmem:[%s7985_s4 + $0x38] sm:$0xff] }
 0x78b   :  { %v5093_v31 = vmul.f32 %v4647_v50, %v4452_v4 }
 0x78c   :  { %892 = vrot.lane.b32.xlu0 %v886_v35, %s8035_s14  ;;  %894 = vrot.lane.b32.xlu1 %v887_v42, %s8035_s14  ;;  %8267 = vst [vmem:[#allocation75_spill] sm:$0xff] %v5083_v21  ;;  %v5087_v42 = vmul.f32 %v5078_v6, %v4456_v5 }
 0x78d   :  { %8269 = vst [vmem:[#allocation77_spill] sm:$0xff] %v5093_v31 }
 0x78e   :  { %8268 = vst [vmem:[#allocation76_spill] sm:$0xff] %v5087_v42 }
 0x790   :  { %896 = vrot.lane.b32.xlu0 %v888_v57, %s8035_s14  ;;  %910 = vperm.xlu1 %4325, %v4169_v12   ;;  %s8175_s14 = smov 60  }
 0x7fe   :  { %v5080_v40 = vpop.permute.xlu1 %894 }
 0x7ff   :  { %8266 = vst [vmem:[#allocation74_spill] sm:$0xff] %v5080_v40 }
 0x80b   :  { %v911_v35 = vpop.permute.xlu1 %910 }
 0x80c   :  { %v913_v8 = vmul.f32 %v911_v35, %v5083_v21  ;;  %v914_v57 = vmul.f32 %v911_v35, %v5087_v42  ;;  %v915_v63 = vmul.f32 %v911_v35, %v5093_v31 }
 0x80e   :  { %919 = vrot.lane.b32.xlu0 %v913_v8, %s4349_s15  ;;  %921 = vrot.lane.b32.xlu1 %v914_v57, %s4349_s15  ;;  %v4171_v8 = vld [vmem:[%s7985_s4 + $0x40] sm:$0xff] }
 0x812   :  { %923 = vrot.lane.b32.xlu0 %v915_v63, %s4349_s15  ;;  %937 = vperm.xlu1 %4325, %v4170_v23  }
 0x880   :  { %v5102_v12 = vpop.permute.xlu1 %921 }
 0x881   :  { %8270 = vst [vmem:[#allocation78_spill] sm:$0xff] %v5102_v12 }
 0x88d   :  { %v938_v6 = vpop.permute.xlu1 %937 }
 0x88e   :  { %v940_v51 = vmul.f32 0.0, %v938_v6  ;;  %v941_v50 = vmul.f32 %v938_v6, %v4456_v5  ;;  %v942_v57 = vmul.f32 %v938_v6, %v4452_v4 }
 0x890   :  { %948 = vrot.lane.b32.xlu1 %v941_v50, %s4352_s21  ;;  %946 = vrot.lane.b32.xlu0 %v940_v51, %s4352_s21  ;;  %v4172_v51 = vld [vmem:[%s7985_s4 + $0x48] sm:$0xff] }
 0x894   :  { %964 = vperm.xlu1 %4325, %v4171_v8   ;;  %950 = vrot.lane.b32.xlu0 %v942_v57, %s4352_s21 }
 0x902   :  { %v5112_v35 = vpop.permute.xlu1 %948 }
 0x903   :  { %8271 = vst [vmem:[#allocation79_spill] sm:$0xff] %v5112_v35 }
 0x90f   :  { %v965_v23 = vpop.permute.xlu1 %964 }
 0x910   :  { %v967_v63 = vmul.f32 %v965_v23, %v4657_v37  ;;  %v968_v21 = vmul.f32 %v965_v23, %v4802_v30  ;;  %v969_v50 = vmul.f32 %v965_v23, %v4808_v44  ;;  %v5127_v37 = vpop.permute.xlu0 %892 }
 0x911   :  { %8272 = vst [vmem:[#allocation80_spill] sm:$0xff] %v5127_v37 }
 0x912   :  { %975 = vrot.lane.b32.xlu1 %v968_v21, %s8033_s8  ;;  %973 = vrot.lane.b32.xlu0 %v967_v63, %s8033_s8 }
 0x914   :  { %v5129_v30 = vpop.permute.xlu0 %896 }
 0x915   :  { %8273 = vst [vmem:[#allocation81_spill] sm:$0xff] %v5129_v30 }
 0x916   :  { %988 = vrot.lane.b32.xlu1 %v5019_v28, %s4360_s9  ;;  %977 = vrot.lane.b32.xlu0 %v969_v50, %s8033_s8  ;;  %s4365_s8 = smov 92  }
 0x918   :  { %v5131_v6 = vpop.permute.xlu0 %919 }
 0x919   :  { %8274 = vst [vmem:[#allocation82_spill] sm:$0xff] %v5131_v6 }
 0x91a   :  { %1004 = vperm.xlu1 %4325, %v4172_v51   ;;  %990 = vrot.lane.b32.xlu0 %v5025_v0, %s4360_s9 }
 0x91c   :  { %v5133_v44 = vpop.permute.xlu0 %923 }
 0x91d   :  { %8275 = vst [vmem:[#allocation83_spill] sm:$0xff] %v5133_v44 }
 0x920   :  { %v5135_v21 = vpop.permute.xlu0 %946 }
 0x921   :  { %8276 = vst [vmem:[#allocation84_spill] sm:$0xff] %v5135_v21 }
 0x924   :  { %v5137_v8 = vpop.permute.xlu0 %950 }
 0x925   :  { %8277 = vst [vmem:[#allocation85_spill] sm:$0xff] %v5137_v8 }
 0x984   :  { %v5139_v57 = vpop.permute.xlu0 %973  ;;  %v5143_v63 = vpop.permute.xlu1 %975 }
 0x985   :  { %8278 = vst [vmem:[#allocation86_spill] sm:$0xff] %v5139_v57  ;;  %8280 = vst [vmem:[#allocation88_spill] sm:$0xff] %v5143_v63 }
 0x988   :  { %v5141_v23 = vpop.permute.xlu0 %977  ;;  %v989_v51 = vpop.permute.xlu1 %988 }
 0x989   :  { %8279 = vst [vmem:[#allocation87_spill] sm:$0xff] %v5141_v23  ;;  %v997_v32 = vmul.f32 %v5146_v45, %v989_v51 }
 0x98c   :  { %v991_v50 = vpop.permute.xlu0 %990 }
 0x98d   :  { %v993_v27 = vsel %vm8097_vm5, %v989_v51, %v991_v50  ;;  %v999_v42 = vmul.f32 %v991_v50, %v4452_v4  ;;  %v4199_v4 = vld [vmem:[%s7985_s4 + $0x1a0] sm:$0xff]  ;;  %vm1351_vm5 = vcmask 244736  }
 0x98e   :  { %v998_v31 = vmul.f32 %v993_v27, %v4456_v5  ;;  %v4198_v5 = vld [vmem:[%s7985_s4 + $0x198] sm:$0xff]  ;;  %v4202_v27 = vld [vmem:[%s7985_s4 + $0x1b0] sm:$0xff]  ;;  %v4204_v51 = vld [vmem:[%s7985_s4 + $0x1c0] sm:$0xff] }
 0x995   :  { %v1005_v58 = vpop.permute.xlu1 %1004 }
 0x996   :  { %v1007_v29 = vmul.f32 %v1005_v58, %v997_v32  ;;  %v1008_v49 = vmul.f32 %v1005_v58, %v998_v31  ;;  %v1009_v23 = vmul.f32 %v1005_v58, %v999_v42  ;;  %v4200_v58 = vld [vmem:[%s7985_s4 + $0x1a8] sm:$0xff]  ;;  %v1756_v42 = vld [vmem:[%s7982_s2] sm:$0x3] }
 0x997   :  { %v5189_v31 = vrot.slane %v1756_v42, %v4509_v15  ;;  %v5197_v50 = vrot.slane %v1756_v42, %v4507_v14  ;;  %v4173_v42 = vld [vmem:[%s7985_s4 + $0x50] sm:$0xff] }
 0x998   :  { %1013 = vrot.lane.b32.xlu0 %v1007_v29, %s8031_s20  ;;  %1015 = vrot.lane.b32.xlu1 %v1008_v49, %s8031_s20  ;;  %v4201_v29 = vld [vmem:[%s7982_s2 + $0xa] sm:$0x3] }
 0x999   :  { %v5178_v49 = vrot.slane %v4201_v29, %v4509_v15  ;;  %v5181_v32 = vrot.slane %v4201_v29, %v4507_v14  ;;  %v4209_v29 = vld [vmem:[%s7985_s4 + $0x1e8] sm:$0xff]  ;;  %v4185_v15 = vld [vmem:[%s7985_s4 + $0xb0] sm:$0xff] }
 0x99a   :  { %v4221_v14 = vld [vmem:[%s7985_s4 + $0x248] sm:$0xff] }
 0x99c   :  { %1017 = vrot.lane.b32.xlu0 %v1009_v23, %s8031_s20  ;;  %1028 = vrot.lane.b32.xlu1 %v4930_v25, %s4351_s1  ;;  %v4203_v23 = vld [vmem:[%s7985_s4 + $0x1b8] sm:$0xff]  ;;  %s8047_s20 = smov 14  }
 0x9a0   :  { %1802 = vperm.xlu0 %4326, %v4198_v5   ;;  %1787 = vrot.lane.b32.xlu1 %v4930_v25, %s8179_s27  ;;  %v4205_v5 = vld [vmem:[%s7985_s4 + $0x1c8] sm:$0xff] }
 0x9a4   :  { %1789 = vrot.lane.b32.xlu0 %v4937_v39, %s8179_s27  ;;  %1829 = vperm.xlu1 %4325, %v4199_v4   ;;  %v4206_v4 = vld [vmem:[%s7985_s4 + $0x1d0] sm:$0xff] }
 0x9a8   :  { %1868 = vperm.xlu0 %4326, %v4200_v58   ;;  %1852 = vrot.lane.b32.xlu1 %v5019_v28, %s4363_s24  ;;  %v4207_v58 = vld [vmem:[%s7985_s4 + $0x1d8] sm:$0xff] }
 0x9ac   :  { %1854 = vrot.lane.b32.xlu0 %v5025_v0, %s4363_s24  ;;  %1918 = vperm.xlu1 %4325, %v4202_v27   ;;  %v4208_v27 = vld [vmem:[%s7985_s4 + $0x1e0] sm:$0xff]  ;;  %s4381_s24 = smov 88  }
 0x9b0   :  { %1903 = vrot.lane.b32.xlu0 %v5178_v49, %s4364_s17  ;;  %1905 = vrot.lane.b32.xlu1 %v5181_v32, %s4364_s17  ;;  %s4383_s17 = smov 58  }
 0x9b4   :  { %1957 = vperm.xlu0 %4326, %v4203_v23   ;;  %1942 = vrot.lane.b32.xlu1 %v5189_v31, %s4365_s8  ;;  %v4210_v23 = vld [vmem:[%s7985_s4 + $0x1f0] sm:$0xff] }
 0x9b8   :  { %1944 = vrot.lane.b32.xlu0 %v5197_v50, %s4365_s8  ;;  %1984 = vperm.xlu1 %4325, %v4204_v51   ;;  %v4174_v51 = vld [vmem:[%s7985_s4 + $0x58] sm:$0xff] }
 0x9bc   :  { %2011 = vperm.xlu0 %4326, %v4205_v5   ;;  %2038 = vperm.xlu1 %4325, %v4206_v4   ;;  %v4211_v5 = vld [vmem:[%s7985_s4 + $0x1f8] sm:$0xff]  ;;  %v4175_v4 = vld [vmem:[%s7985_s4 + $0x60] sm:$0xff] }
 0x9c0   :  { %2078 = vperm.xlu0 %4326, %v4207_v58   ;;  %2062 = vrot.lane.b32.xlu1 %v5178_v49, %s4366_s18  ;;  %v4212_v58 = vld [vmem:[%s7985_s4 + $0x200] sm:$0xff] }
 0x9c4   :  { %2064 = vrot.lane.b32.xlu0 %v5181_v32, %s4366_s18  ;;  %2117 = vperm.xlu1 %4325, %v4208_v27   ;;  %v4176_v27 = vld [vmem:[%s7985_s4 + $0x68] sm:$0xff]  ;;  %s4370_s18 = smov 30  }
 0x9c8   :  { %2102 = vrot.lane.b32.xlu0 %v5189_v31, %s4358_s0  ;;  %2104 = vrot.lane.b32.xlu1 %v5197_v50, %s4358_s0 }
 0x9cc   :  { %2144 = vperm.xlu0 %4326, %v4209_v29   ;;  %1030 = vrot.lane.b32.xlu1 %v4937_v39, %s4351_s1  ;;  %v4213_v29 = vld [vmem:[%s7985_s4 + $0x208] sm:$0xff] }
 0x9d0   :  { %1043 = vperm.xlu0 %4326, %v4173_v42   ;;  %2171 = vperm.xlu1 %4325, %v4210_v23   ;;  %v4177_v42 = vld [vmem:[%s7985_s4 + $0x70] sm:$0xff] }
 0x9d1   :  { %v4214_v23 = vld [vmem:[%s7985_s4 + $0x210] sm:$0xff] }
 0x9d4   :  { %1070 = vperm.xlu0 %4326, %v4174_v51   ;;  %2193 = vperm.xlu1 %4325, %v4211_v5   ;;  %v4178_v51 = vld [vmem:[%s7985_s4 + $0x78] sm:$0xff] }
 0x9d5   :  { %v4215_v5 = vld [vmem:[%s7985_s4 + $0x218] sm:$0xff] }
 0x9d8   :  { %1097 = vperm.xlu0 %4326, %v4175_v4   ;;  %1143 = vrot.lane.b32.xlu1 %v5019_v28, %s8043_s30  ;;  %v4179_v4 = vld [vmem:[%s7985_s4 + $0x80] sm:$0xff] }
 0x9dc   :  { %1145 = vrot.lane.b32.xlu0 %v5025_v0, %s8043_s30  ;;  %2233 = vperm.xlu1 %4325, %v4212_v58   ;;  %v4189_v58 = vld [vmem:[%s7984_s3 + $0x98] sm:$0xff]  ;;  %s8095_s30 = smov 33  }
 0x9e0   :  { %1119 = vperm.xlu0 %4326, %v4176_v27   ;;  %2217 = vrot.lane.b32.xlu1 %v5178_v49, %s4368_s11  ;;  %v4216_v27 = vld [vmem:[%s7985_s4 + $0x220] sm:$0xff] }
 0x9e4   :  { %2219 = vrot.lane.b32.xlu0 %v5181_v32, %s4368_s11  ;;  %2273 = vperm.xlu1 %4325, %v4213_v29   ;;  %v4217_v29 = vld [vmem:[%s7985_s4 + $0x228] sm:$0xff]  ;;  %s4378_s11 = smov 122  }
 0x9e8   :  { %1159 = vperm.xlu0 %4326, %v4177_v42   ;;  %2257 = vrot.lane.b32.xlu1 %v5189_v31, %s4369_s10  ;;  %v4181_v42 = vld [vmem:[%s7985_s4 + $0x90] sm:$0xff] }
 0x9ec   :  { %2259 = vrot.lane.b32.xlu0 %v5197_v50, %s4369_s10  ;;  %2301 = vperm.xlu1 %4325, %v4214_v23   ;;  %v4191_v23 = vld [vmem:[%s7984_s3 + $0xa8] sm:$0xff] }
 0x9f0   :  { %1199 = vperm.xlu0 %4326, %v4178_v51   ;;  %1347 = vrot.lane.b32.xlu1 %v4930_v25, %s4370_s18 }
 0x9f4   :  { %1349 = vrot.lane.b32.xlu0 %v4937_v39, %s4370_s18  ;;  %2328 = vperm.xlu1 %4325, %v4215_v5  }
 0x9f8   :  { %1183 = vrot.lane.b32.xlu0 %v4930_v25, %s8047_s20  ;;  %1185 = vrot.lane.b32.xlu1 %v4937_v39, %s8047_s20  ;;  %v4180_v25 = vld [vmem:[%s7985_s4 + $0x88] sm:$0xff]  ;;  %s8049_s20 = smov 34   ;;  %v4190_v39 = vld [vmem:[%s7984_s3 + $0xa0] sm:$0xff] }
 0x9fc   :  { %1227 = vperm.xlu0 %4326, %v4179_v4   ;;  %1549 = vperm.xlu1 %4325, %v4189_v58   ;;  %v4182_v4 = vld [vmem:[%s7985_s4 + $0x98] sm:$0xff]  ;;  %v4192_v58 = vld [vmem:[%s7984_s3 + $0xb0] sm:$0xff] }
 0xa00   :  { %2355 = vperm.xlu0 %4326, %v4216_v27   ;;  %1255 = vperm.xlu1 %4325, %v4180_v25   ;;  %v4183_v25 = vld [vmem:[%s7985_s4 + $0xa0] sm:$0xff] }
 0xa04   :  { %1495 = vrot.lane.b32.xlu0 %v5019_v28, %s8049_s20  ;;  %1497 = vrot.lane.b32.xlu1 %v5025_v0, %s8049_s20  ;;  %s4373_s20 = smov 36  }
 0xa08   :  { %1576 = vperm.xlu0 %4326, %v4190_v39   ;;  %2395 = vperm.xlu1 %4325, %v4217_v29  }
 0xa0a   :  { %v5311_v51 = vpop.permute.xlu1 %1015  ;;  %v5313_v5 = vpop.permute.xlu0 %1013 }
 0xa0b   :  { %8281 = vst [vmem:[#allocation89_spill] sm:$0xff] %v5311_v51  ;;  %8282 = vst [vmem:[#allocation90_spill] sm:$0xff] %v5313_v5  ;;  %v4186_v51 = vld [vmem:[%s7985_s4 + $0xb8] sm:$0xff] }
 0xa0c   :  { %1283 = vperm.xlu0 %4326, %v4181_v42   ;;  %1603 = vperm.xlu1 %4325, %v4191_v23   ;;  %v4193_v42 = vld [vmem:[%s7984_s3 + $0xb8] sm:$0xff] }
 0xa0e   :  { %v5321_v27 = vpop.permute.xlu1 %1028 }
 0xa10   :  { %2379 = vrot.lane.b32.xlu0 %v5178_v49, %s4373_s20  ;;  %2381 = vrot.lane.b32.xlu1 %v5181_v32, %s4373_s20  ;;  %v4219_v49 = vld [vmem:[%s7985_s4 + $0x238] sm:$0xff]  ;;  %v5326_v32 = vpop.permute.xlu0 %1017  ;;  %s4374_s20 = smov 18  }
 0xa11   :  { %8283 = vst [vmem:[#allocation91_spill] sm:$0xff] %v5326_v32 }
 0xa12   :  { %v5333_v39 = vpop.permute.xlu1 %1787 }
 0xa13   :  { %8284 = vst [vmem:[#allocation92_spill] sm:$0xff] %v5333_v39  ;;  %v1795_v6 = vmul.f32 %v5146_v45, %v5333_v39 }
 0xa14   :  { %1323 = vperm.xlu0 %4326, %v4182_v4   ;;  %1630 = vperm.xlu1 %4325, %v4192_v58   ;;  %v4184_v58 = vld [vmem:[%s7985_s4 + $0xa8] sm:$0xff] }
 0xa18   :  { %2442 = vperm.xlu0 %4326, %v4219_v49   ;;  %1307 = vrot.lane.b32.xlu1 %v5019_v28, %s4374_s20  ;;  %v4220_v28 = vld [vmem:[%s7985_s4 + $0x240] sm:$0xff] }
 0xa1b   :  { %v5335_v29 = vpop.permute.xlu0 %1802 }
 0xa1c   :  { %1309 = vrot.lane.b32.xlu0 %v5025_v0, %s4374_s20  ;;  %1363 = vperm.xlu1 %4325, %v4183_v25   ;;  %v4194_v0 = vld [vmem:[%s7984_s3 + $0xc0] sm:$0xff] }
 0xa1f   :  { %v5345_v23 = vpop.permute.xlu1 %1829  ;;  %v5347_v4 = vpop.permute.xlu0 %1789 }
 0xa20   :  { %8285 = vst [vmem:[#allocation93_spill] sm:$0xff] %v5347_v4  ;;  %1652 = vperm.xlu0 %4326, %v4193_v42   ;;  %2469 = vperm.xlu1 %4325, %v4220_v28  }
 0xa23   :  { %v5355_v49 = vpop.permute.xlu1 %1852  ;;  %v5357_v25 = vpop.permute.xlu0 %1868 }
 0xa24   :  { %8286 = vst [vmem:[#allocation94_spill] sm:$0xff] %v5355_v49  ;;  %1403 = vperm.xlu0 %4326, %v4184_v58   ;;  %1679 = vperm.xlu1 %4325, %v4194_v0  }
 0xa27   :  { %v5362_v42 = vpop.permute.xlu1 %1918  ;;  %v5364_v28 = vpop.permute.xlu0 %1854 }
 0xa28   :  { %8287 = vst [vmem:[#allocation95_spill] sm:$0xff] %v5364_v28  ;;  %2499 = vperm.xlu0 %4326, %v4221_v14   ;;  %1387 = vrot.lane.b32.xlu1 %v4518_v17, %s8057_s28  ;;  %v4195_v14 = vld [vmem:[%s7984_s3 + $0xc8] sm:$0xff]  ;;  %v4222_v17 = vld [vmem:[%s7985_s4 + $0x250] sm:$0xff]  ;;  %v5455_v48 = vsel %vm1856_vm8, %v5355_v49, %v5364_v28  ;;  %vm2066_vm8 = vcmask 818176  }
 0xa29   :  { %8291 = vst [vmem:[#allocation99_spill] sm:$0xff] %v5455_v48 }
 0xa2b   :  { %v5371_v32 = vpop.permute.xlu1 %1905  ;;  %v5373_v58 = vpop.permute.xlu0 %1903 }
 0xa2c   :  { %8288 = vst [vmem:[#allocation96_spill] sm:$0xff] %v5371_v32  ;;  %8289 = vst [vmem:[#allocation97_spill] sm:$0xff] %v5373_v58  ;;  %1389 = vrot.lane.b32.xlu0 %v4515_v16, %s8057_s28  ;;  %1431 = vperm.xlu1 %4325, %v4185_v15   ;;  %v4196_v15 = vld [vmem:[%s7984_s3 + $0xd0] sm:$0xff]  ;;  %v1911_v34 = vmul.f32 %v5146_v45, %v5373_v58  ;;  %s4380_s28 = smov 90  }
 0xa2f   :  { %v5383_v0 = vpop.permute.xlu1 %1942  ;;  %v5385_v5 = vpop.permute.xlu0 %1957 }
 0xa30   :  { %1706 = vperm.xlu0 %4326, %v4195_v14   ;;  %2529 = vperm.xlu1 %4325, %v4222_v17   ;;  %v4187_v14 = vld [vmem:[%s7985_s4 + $0xc0] sm:$0xff] }
 0xa33   :  { %v5393_v16 = vpop.permute.xlu1 %1984  ;;  %v5395_v57 = vpop.permute.xlu0 %1944 }
 0xa34   :  { %1471 = vperm.xlu0 %4326, %v4186_v51   ;;  %1733 = vperm.xlu1 %4325, %v4196_v15   ;;  %v4197_v51 = vld [vmem:[%s7985_s4 + $0x190] sm:$0xff] }
 0xa37   :  { %v5397_v63 = vpop.permute.xlu1 %2038  ;;  %v5399_v8 = vpop.permute.xlu0 %2011 }
 0xa38   :  { %1455 = vrot.lane.b32.xlu0 %v4528_v18, %s8095_s30  ;;  %1457 = vrot.lane.b32.xlu1 %v4535_v19, %s8095_s30  ;;  %v5418_v18 = vsel %vm8168_vm7, %v5333_v39, %v5347_v4  ;;  %v5420_v19 = vld [vmem:[#allocation2 + $0x8] sm:$0xff]  ;;  %s4386_s30 = smov 32  }
 0xa39   :  { %8290 = vst [vmem:[#allocation98_spill] sm:$0xff] %v5418_v18  ;;  %v1796_v21 = vmul.f32 %v5420_v19, %v5418_v18 }
 0xa3b   :  { %v5411_v17 = vpop.permute.xlu1 %2062  ;;  %v5413_v15 = vpop.permute.xlu0 %2078  ;;  %v1806_v40 = vmul.f32 %v5335_v29, %v1796_v21 }
 0xa3c   :  { %1511 = vperm.xlu0 %4326, %v4187_v14   ;;  %1781 = vperm.xlu1 %4325, %v4197_v51   ;;  %v1805_v14 = vmul.f32 %v5335_v29, %v1795_v6  ;;  %v5435_v51 = vld [vmem:[#allocation2 + $0x10] sm:$0xff]  ;;  %v1832_v6 = vmul.f32 %v5146_v45, %v5345_v23 }
 0xa3d   :  { %v1797_v12 = vmul.f32 %v5435_v51, %v5347_v4  ;;  %v1834_v21 = vmul.f32 %v5435_v51, %v5345_v23  ;;  %v1913_v61 = vmul.f32 %v5435_v51, %v5371_v32 }
 0xa3f   :  { %v5424_v35 = vpop.permute.xlu1 %2117  ;;  %v5426_v44 = vpop.permute.xlu0 %2064 }
 0xa40   :  { %1766 = vrot.lane.b32.xlu0 %v5189_v31, %s8175_s14  ;;  %1768 = vrot.lane.b32.xlu1 %v5197_v50, %s8175_s14  ;;  %v1807_v31 = vmul.f32 %v5335_v29, %v1797_v12  ;;  %v1861_v12 = vmul.f32 %v5146_v45, %v5355_v49  ;;  %v1862_v29 = vmul.f32 %v5420_v19, %v5455_v48 }
 0xa43   :  { %v5439_v30 = vpop.permute.xlu1 %2104  ;;  %v5441_v37 = vpop.permute.xlu0 %2102 }
 0xa44   :  { %1811 = vrot.lane.b32.xlu0 %v1805_v14, %s4351_s1  ;;  %1813 = vrot.lane.b32.xlu1 %v1806_v40, %s4351_s1  ;;  %v1833_v40 = vmul.f32 %v5420_v19, %v5345_v23  ;;  %v5479_v23 = vsel %vm27_vm1, %v5373_v58, %v5371_v32  ;;  %vm407_vm1 = vcmask 769024  }
 0xa45   :  { %8292 = vst [vmem:[#allocation100_spill] sm:$0xff] %v5479_v23 }
 0xa47   :  { %v5449_v50 = vpop.permute.xlu1 %1030  ;;  %v5451_v7 = vpop.permute.xlu0 %2144 }
 0xa48   :  { %1815 = vrot.lane.b32.xlu0 %v1807_v31, %s4351_s1  ;;  %1838 = vrot.lane.b32.xlu1 %v1832_v6, %s4358_s0  ;;  %v1871_v31 = vmul.f32 %v5357_v25, %v1861_v12  ;;  %v1863_v6 = vmul.f32 %v5435_v51, %v5364_v28  ;;  %v1912_v12 = vmul.f32 %v5420_v19, %v5479_v23 }
 0xa49   :  { %v1032_v58 = vsel %vm264_vm6, %v5321_v27, %v5449_v50 }
 0xa4b   :  { %v5467_v14 = vpop.permute.xlu1 %2171  ;;  %v5469_v33 = vpop.permute.xlu0 %1043 }
 0xa4c   :  { %1840 = vrot.lane.b32.xlu0 %v1833_v40, %s4358_s0  ;;  %1842 = vrot.lane.b32.xlu1 %v1834_v21, %s4358_s0  ;;  %v1872_v40 = vmul.f32 %v5357_v25, %v1862_v29  ;;  %v1873_v21 = vmul.f32 %v5357_v25, %v1863_v6  ;;  %v1921_v29 = vmul.f32 %v5362_v42, %v1911_v34 }
 0xa4d   :  { %v1950_v25 = vmul.f32 %v5146_v45, %v5383_v0  ;;  %v1922_v6 = vmul.f32 %v5362_v42, %v1912_v12  ;;  %v1923_v34 = vmul.f32 %v5362_v42, %v1913_v61  ;;  %v5527_v61 = vmul.f32 %v5146_v45, %v4971_v55 }
 0xa4e   :  { %v696_v42 = vsel %vm407_vm1, %v4971_v55, %v4973_v59 }
 0xa4f   :  { %v5483_v41 = vpop.permute.xlu1 %2193  ;;  %v5485_v26 = vpop.permute.xlu0 %1070  ;;  %8293 = vst [vmem:[#allocation101_spill] sm:$0xff] %v5527_v61 }
 0xa50   :  { %1877 = vrot.lane.b32.xlu0 %v1871_v31, %s4378_s11  ;;  %1879 = vrot.lane.b32.xlu1 %v1872_v40, %s4378_s11  ;;  %v1946_v31 = vsel %vm1174_vm9, %v5383_v0, %v5395_v57 }
 0xa51   :  { %v1951_v40 = vmul.f32 %v5420_v19, %v1946_v31 }
 0xa53   :  { %v5495_v54 = vpop.permute.xlu1 %1143  ;;  %v5497_v43 = vpop.permute.xlu0 %1097  ;;  %v1961_v0 = vmul.f32 %v5385_v5, %v1951_v40 }
 0xa54   :  { %1881 = vrot.lane.b32.xlu0 %v1873_v21, %s4378_s11  ;;  %1927 = vrot.lane.b32.xlu1 %v1921_v29, %s4379_s12  ;;  %v1960_v21 = vmul.f32 %v5385_v5, %v1950_v25  ;;  %v1952_v29 = vmul.f32 %v5435_v51, %v5395_v57  ;;  %v1987_v25 = vmul.f32 %v5393_v16, %v5527_v61 }
 0xa56   :  { %v1962_v57 = vmul.f32 %v5385_v5, %v1952_v29 }
 0xa57   :  { %v5509_v53 = vpop.permute.xlu1 %2233  ;;  %v5511_v38 = vpop.permute.xlu0 %1145 }
 0xa58   :  { %1929 = vrot.lane.b32.xlu0 %v1922_v6, %s4379_s12  ;;  %1931 = vrot.lane.b32.xlu1 %v1923_v34, %s4379_s12  ;;  %v5541_v34 = vmul.f32 %v5420_v19, %v696_v42  ;;  %v2015_v42 = vmul.f32 %v5420_v19, %v5399_v8 }
 0xa5a   :  { %8294 = vst [vmem:[#allocation102_spill] sm:$0xff] %v5541_v34  ;;  %v1988_v55 = vmul.f32 %v5393_v16, %v5541_v34  ;;  %v2067_v34 = vsel %vm2066_vm8, %v5411_v17, %v5426_v44  ;;  %vm859_vm8 = vcmask 1014784  }
 0xa5b   :  { %v5520_v12 = vpop.permute.xlu1 %2217  ;;  %v5522_v31 = vpop.permute.xlu0 %1119  ;;  %v2072_v61 = vmul.f32 %v5420_v19, %v2067_v34 }
 0xa5c   :  { %1966 = vrot.lane.b32.xlu0 %v1960_v21, %s4353_s22  ;;  %1968 = vrot.lane.b32.xlu1 %v1961_v0, %s4353_s22  ;;  %v5546_v21 = vmul.f32 %v5435_v51, %v4973_v59  ;;  %v2014_v59 = vmul.f32 %v5146_v45, %v5399_v8 }
 0xa5d   :  { %v2082_v32 = vmul.f32 %v5413_v15, %v2072_v61  ;;  %v2112_v61 = vmul.f32 %v5435_v51, %v5439_v30 }
 0xa5e   :  { %8295 = vst [vmem:[#allocation103_spill] sm:$0xff] %v5546_v21  ;;  %v1989_v5 = vmul.f32 %v5393_v16, %v5546_v21  ;;  %v2016_v16 = vmul.f32 %v5435_v51, %v5399_v8  ;;  %v2071_v8 = vmul.f32 %v5146_v45, %v5411_v17  ;;  %v2110_v17 = vmul.f32 %v5146_v45, %v5441_v37 }
 0xa5f   :  { %v5536_v6 = vpop.permute.xlu1 %2273  ;;  %v5538_v40 = vpop.permute.xlu0 %2219 }
 0xa60   :  { %1970 = vrot.lane.b32.xlu0 %v1962_v57, %s4353_s22  ;;  %1993 = vrot.lane.b32.xlu1 %v1987_v25, %s4354_s23 }
 0xa63   :  { %v5553_v29 = vpop.permute.xlu1 %2257  ;;  %v5555_v0 = vpop.permute.xlu0 %1159 }
 0xa64   :  { %1995 = vrot.lane.b32.xlu0 %v1988_v55, %s4354_s23  ;;  %1997 = vrot.lane.b32.xlu1 %v1989_v5, %s4354_s23  ;;  %v2041_v55 = vmul.f32 %v5397_v63, %v5039_v47 }
 0xa67   :  { %v5563_v57 = vpop.permute.xlu1 %2301  ;;  %v5565_v25 = vpop.permute.xlu0 %2259 }
 0xa68   :  { %2020 = vrot.lane.b32.xlu0 %v2014_v59, %s4365_s8  ;;  %2022 = vrot.lane.b32.xlu1 %v2015_v42, %s4365_s8  ;;  %v2042_v59 = vmul.f32 %v5397_v63, %v5042_v2  ;;  %v2043_v42 = vmul.f32 %v5397_v63, %v5045_v13  ;;  %v2106_v63 = vsel %vm859_vm8, %v5441_v37, %v5439_v30 }
 0xa69   :  { %v5620_v30 = vmul.f32 %v5420_v19, %v1032_v58 }
 0xa6b   :  { %v5573_v5 = vpop.permute.xlu1 %1347  ;;  %v5575_v21 = vpop.permute.xlu0 %1199  ;;  %v2148_v58 = vmul.f32 %v5451_v7, %v5620_v30 }
 0xa6c   :  { %2024 = vrot.lane.b32.xlu0 %v2016_v16, %s4365_s8  ;;  %2047 = vrot.lane.b32.xlu1 %v2041_v55, %s4380_s28  ;;  %v2081_v16 = vmul.f32 %v5413_v15, %v2071_v8  ;;  %v2073_v55 = vmul.f32 %v5435_v51, %v5426_v44  ;;  %v2111_v44 = vmul.f32 %v5420_v19, %v2106_v63 }
 0xa6d   :  { %v2120_v8 = vmul.f32 %v5424_v35, %v2110_v17  ;;  %v5628_v63 = vmul.f32 %v5146_v45, %v5321_v27  ;;  %v5634_v17 = vmul.f32 %v5435_v51, %v5449_v50 }
 0xa6f   :  { %v5587_v52 = vpop.permute.xlu1 %2328  ;;  %v5589_v11 = vpop.permute.xlu0 %1349  ;;  %v2149_v27 = vmul.f32 %v5451_v7, %v5634_v17  ;;  %v1046_v50 = vmul.f32 %v5469_v33, %v5628_v63 }
 0xa70   :  { %2049 = vrot.lane.b32.xlu0 %v2042_v59, %s4380_s28  ;;  %2051 = vrot.lane.b32.xlu1 %v2043_v42, %s4380_s28  ;;  %v2083_v59 = vmul.f32 %v5413_v15, %v2073_v55  ;;  %v2122_v15 = vmul.f32 %v5424_v35, %v2112_v61  ;;  %s4384_s28 = smov 56  }
 0xa73   :  { %v5600_v34 = vpop.permute.xlu1 %1185  ;;  %v5602_v23 = vpop.permute.xlu0 %1183 }
 0xa74   :  { %2087 = vrot.lane.b32.xlu0 %v2081_v16, %s4381_s24  ;;  %2089 = vrot.lane.b32.xlu1 %v2082_v32, %s4381_s24  ;;  %v2121_v32 = vmul.f32 %v5424_v35, %v2111_v44  ;;  %v2147_v35 = vmul.f32 %v5451_v7, %v5628_v63 }
 0xa77   :  { %v5609_v42 = vpop.permute.xlu1 %1549  ;;  %v5611_v37 = vpop.permute.xlu0 %1227 }
 0xa78   :  { %2091 = vrot.lane.b32.xlu0 %v2083_v59, %s4381_s24  ;;  %2126 = vrot.lane.b32.xlu1 %v2120_v8, %s8183_s26  ;;  %s4385_s24 = smov 93  }
 0xa7b   :  { %v5622_v16 = vpop.permute.xlu1 %1255  ;;  %v5624_v55 = vpop.permute.xlu0 %2355 }
 0xa7c   :  { %2128 = vrot.lane.b32.xlu0 %v2121_v32, %s8183_s26  ;;  %2130 = vrot.lane.b32.xlu1 %v2122_v15, %s8183_s26  ;;  %v1047_v32 = vmul.f32 %v5469_v33, %v5620_v30  ;;  %v1048_v15 = vmul.f32 %v5469_v33, %v5634_v17  ;;  %v1073_v33 = vmul.f32 %v5485_v26, %v4670_v60 }
 0xa7d   :  { %v1075_v60 = vmul.f32 %v5485_v26, %v4827_v20 }
 0xa7f   :  { %v5640_v59 = vpop.permute.xlu1 %1497  ;;  %v5642_v44 = vpop.permute.xlu0 %1495 }
 0xa80   :  { %2153 = vrot.lane.b32.xlu0 %v2147_v35, %s8179_s27  ;;  %2155 = vrot.lane.b32.xlu1 %v2148_v58, %s8179_s27  ;;  %v2174_v58 = vmul.f32 %v5420_v19, %v5467_v14 }
 0xa83   :  { %v5650_v61 = vpop.permute.xlu1 %2395  ;;  %v5652_v8 = vpop.permute.xlu0 %1576 }
 0xa84   :  { %2157 = vrot.lane.b32.xlu0 %v2149_v27, %s8179_s27  ;;  %1052 = vrot.lane.b32.xlu1 %v1046_v50, %s4353_s22  ;;  %v2175_v27 = vmul.f32 %v5435_v51, %v5467_v14  ;;  %v1148_v14 = vsel %vm8090_vm10, %v5495_v54, %v5511_v38  ;;  %vm2221_vm10 = vcmask 31744  }
 0xa87   :  { %v5660_v35 = vpop.permute.xlu1 %1603  ;;  %v5662_v7 = vpop.permute.xlu0 %1283 }
 0xa88   :  { %1054 = vrot.lane.b32.xlu0 %v1047_v32, %s4353_s22  ;;  %1056 = vrot.lane.b32.xlu1 %v1048_v15, %s4353_s22  ;;  %v1074_v32 = vmul.f32 %v5485_v26, %v4821_v46  ;;  %v5682_v15 = vmul.f32 %v5420_v19, %v5495_v54  ;;  %v5696_v46 = vmul.f32 %v5435_v51, %v1148_v14 }
 0xa89   :  { %v2222_v14 = vsel %vm2221_vm10, %v5520_v12, %v5538_v40  ;;  %vm2261_vm10 = vcmask 228352  }
 0xa8a   :  { %v2197_v20 = vmul.f32 %v5483_v41, %v5696_v46 }
 0xa8b   :  { %v5670_v50 = vpop.permute.xlu1 %2381  ;;  %v5672_v28 = vpop.permute.xlu0 %2379 }
 0xa8c   :  { %2178 = vrot.lane.b32.xlu0 %v2174_v58, %s8175_s14  ;;  %2180 = vrot.lane.b32.xlu1 %v2175_v27, %s8175_s14  ;;  %v5698_v58 = vld [vmem:[#allocation2 + $0x18] sm:$0xff] }
 0xa8d   :  { %v5702_v27 = vmul.f32 %v5698_v58, %v5511_v38 }
 0xa8f   :  { %v5687_v48 = vpop.permute.xlu1 %1630  ;;  %v5689_v49 = vpop.permute.xlu0 %1323  ;;  %v2198_v38 = vmul.f32 %v5483_v41, %v5702_v27 }
 0xa90   :  { %1079 = vrot.lane.b32.xlu0 %v1073_v33, %s4350_s16  ;;  %1081 = vrot.lane.b32.xlu1 %v1074_v32, %s4350_s16  ;;  %v2196_v33 = vmul.f32 %v5483_v41, %v5682_v15 }
 0xa93   :  { %v5704_v54 = vpop.permute.xlu1 %1307  ;;  %v5706_v4 = vpop.permute.xlu0 %2442 }
 0xa94   :  { %8296 = vst [vmem:[#allocation104_spill] sm:$0xff] %v5706_v4  ;;  %1083 = vrot.lane.b32.xlu0 %v1075_v60, %s4350_s16  ;;  %2202 = vrot.lane.b32.xlu1 %v2196_v33, %s4383_s17  ;;  %v1100_v60 = vmul.f32 %v5420_v19, %v5497_v43  ;;  %v2226_v33 = vmul.f32 %v5420_v19, %v5520_v12 }
 0xa95   :  { %v1101_v4 = vmul.f32 %v5435_v51, %v5497_v43 }
 0xa96   :  { %v2236_v41 = vmul.f32 %v5509_v53, %v2226_v33 }
 0xa97   :  { %v5713_v26 = vpop.permute.xlu1 %1363  ;;  %v5715_v32 = vpop.permute.xlu0 %1309 }
 0xa98   :  { %8297 = vst [vmem:[#allocation105_spill] sm:$0xff] %v5713_v26  ;;  %2204 = vrot.lane.b32.xlu0 %v2197_v20, %s4383_s17  ;;  %2206 = vrot.lane.b32.xlu1 %v2198_v38, %s4383_s17  ;;  %v2227_v26 = vmul.f32 %v5435_v51, %v2222_v14  ;;  %v2228_v20 = vmul.f32 %v5698_v58, %v5538_v40  ;;  %s8187_s17 = smov 78  }
 0xa99   :  { %v1123_v40 = vmul.f32 %v5522_v31, %v4863_v56  ;;  %v4188_v56 = vld [vmem:[%s7984_s3 + $0x90] sm:$0xff] }
 0xa9a   :  { %v2237_v12 = vmul.f32 %v5509_v53, %v2227_v26  ;;  %v2238_v14 = vmul.f32 %v5509_v53, %v2228_v20  ;;  %v1124_v26 = vmul.f32 %v5522_v31, %v4868_v22  ;;  %v2266_v53 = vmul.f32 %v5420_v19, %v5553_v29 }
 0xa9b   :  { %v5728_v18 = vpop.permute.xlu0 %1652  ;;  %v5730_v39 = vpop.permute.xlu1 %2469 }
 0xa9c   :  { %1104 = vrot.lane.b32.xlu0 %v1100_v60, %s4354_s23  ;;  %1106 = vrot.lane.b32.xlu1 %v1101_v4, %s4354_s23  ;;  %v1122_v60 = vmul.f32 %v5522_v31, %v4859_v36  ;;  %v2262_v36 = vsel %vm2261_vm10, %v5553_v29, %v5565_v25  ;;  %v2276_v31 = vmul.f32 %v5536_v6, %v2266_v53 }
 0xa9d   :  { %v2267_v22 = vmul.f32 %v5435_v51, %v2262_v36  ;;  %v1163_v53 = vmul.f32 %v5555_v0, %v5696_v46 }
 0xa9f   :  { %v5738_v38 = vpop.permute.xlu0 %1403  ;;  %v5740_v43 = vpop.permute.xlu1 %1679 }
 0xaa0   :  { %2242 = vrot.lane.b32.xlu0 %v2236_v41, %s4384_s28  ;;  %2244 = vrot.lane.b32.xlu1 %v2237_v12, %s4384_s28  ;;  %v2268_v12 = vmul.f32 %v5698_v58, %v5565_v25  ;;  %v1162_v25 = vmul.f32 %v5555_v0, %v5682_v15 }
 0xaa3   :  { %v5745_v4 = vpop.permute.xlu0 %2499  ;;  %v5747_v33 = vpop.permute.xlu1 %1387 }
 0xaa4   :  { %2246 = vrot.lane.b32.xlu0 %v2238_v14, %s4384_s28  ;;  %1128 = vrot.lane.b32.xlu1 %v1122_v60, %s4385_s24  ;;  %v2277_v60 = vmul.f32 %v5536_v6, %v2267_v22  ;;  %s4391_s28 = smov 24  }
 0xaa7   :  { %v5759_v41 = vpop.permute.xlu0 %1389  ;;  %v5761_v20 = vpop.permute.xlu1 %1431 }
 0xaa8   :  { %1130 = vrot.lane.b32.xlu0 %v1123_v40, %s4385_s24  ;;  %1132 = vrot.lane.b32.xlu1 %v1124_v26, %s4385_s24  ;;  %v2278_v40 = vmul.f32 %v5536_v6, %v2268_v12  ;;  %v1352_v6 = vsel %vm1351_vm5, %v5573_v5, %v5589_v11  ;;  %v1164_v12 = vmul.f32 %v5555_v0, %v5702_v27 }
 0xaa9   :  { %v1192_v0 = vmul.f32 %v5420_v19, %v5602_v23 }
 0xaab   :  { %v5772_v29 = vpop.permute.xlu0 %1706  ;;  %v5774_v14 = vpop.permute.xlu1 %2529 }
 0xaac   :  { %1539 = vperm.xlu0 %4326, %v4188_v56   ;;  %2282 = vrot.lane.b32.xlu1 %v2276_v31, %s4386_s30  ;;  %v5788_v56 = vmul.f32 %v5420_v19, %v5573_v5 }
 0xaaf   :  { %v5778_v26 = vpop.permute.xlu0 %1471  ;;  %v5780_v36 = vpop.permute.xlu1 %1733 }
 0xab0   :  { %8298 = vst [vmem:[#allocation106_spill] sm:$0xff] %v5778_v26  ;;  %8299 = vst [vmem:[#allocation107_spill] sm:$0xff] %v5780_v36  ;;  %2284 = vrot.lane.b32.xlu0 %v2277_v60, %s4386_s30  ;;  %2286 = vrot.lane.b32.xlu1 %v2278_v40, %s4386_s30  ;;  %v5802_v60 = vmul.f32 %v5435_v51, %v1352_v6  ;;  %v5806_v40 = vmul.f32 %v5698_v58, %v5589_v11  ;;  %s8104_s30 = smov 80  }
 0xab1   :  { %v2304_v36 = vmul.f32 %v5563_v57, %v5788_v56 }
 0xab2   :  { %v2305_v11 = vmul.f32 %v5563_v57, %v5802_v60  ;;  %v2306_v26 = vmul.f32 %v5563_v57, %v5806_v40 }
 0xab3   :  { %v5793_v22 = vpop.permute.xlu0 %1455  ;;  %v5795_v31 = vpop.permute.xlu1 %1457 }
 0xab4   :  { %8300 = vst [vmem:[#allocation108_spill] sm:$0xff] %v5793_v22  ;;  %1168 = vrot.lane.b32.xlu0 %v1162_v25, %s4365_s8  ;;  %1170 = vrot.lane.b32.xlu1 %v1163_v53, %s4365_s8  ;;  %v1188_v25 = vsel %vm8106_vm12, %v5602_v23, %v5600_v34  ;;  %v1202_v23 = vmul.f32 %v5575_v21, %v1192_v0  ;;  %vm8109_vm12 = vcmask 277504  }
 0xab5   :  { %v1193_v6 = vmul.f32 %v5435_v51, %v1188_v25  ;;  %v2332_v0 = vmul.f32 %v5435_v51, %v5587_v52 }
 0xab7   :  { %v5808_v5 = vpop.permute.xlu0 %1511  ;;  %v5815_v53 = vpop.permute.xlu1 %1781 }
 0xab8   :  { %8301 = vst [vmem:[#allocation109_spill] sm:$0xff] %v5808_v5  ;;  %8302 = vst [vmem:[#allocation110_spill] sm:$0xff] %v5815_v53  ;;  %1172 = vrot.lane.b32.xlu0 %v1164_v12, %s4365_s8  ;;  %2310 = vrot.lane.b32.xlu1 %v2304_v36, %s4370_s18  ;;  %v1194_v36 = vmul.f32 %v5698_v58, %v5600_v34  ;;  %v1203_v12 = vmul.f32 %v5575_v21, %v1193_v6 }
 0xab9   :  { %v2333_v6 = vmul.f32 %v5698_v58, %v5587_v52 }
 0xaba   :  { %v1204_v57 = vmul.f32 %v5575_v21, %v1194_v36  ;;  %v4218_v36 = vld [vmem:[%s7985_s4 + $0x230] sm:$0xff] }
 0xabb   :  { %v5824_v5 = vpop.permute.xlu0 %1766  ;;  %v5828_v22 = vpop.permute.xlu1 %1768 }
 0xabc   :  { %2312 = vrot.lane.b32.xlu0 %v2305_v11, %s4370_s18  ;;  %2314 = vrot.lane.b32.xlu1 %v2306_v26, %s4370_s18  ;;  %v2331_v26 = vmul.f32 %v5420_v19, %v5587_v52  ;;  %v1231_v52 = vmul.f32 %v5611_v37, %v4885_v3  ;;  %v1500_v3 = vsel %vm8109_vm12, %v5642_v44, %v5640_v59  ;;  %vm2383_vm12 = vcmask 293888  }
 0xabf   :  { %v5836_v53 = vpop.permute.xlu0 %1811  ;;  %v5838_v25 = vpop.permute.xlu1 %1813 }
 0xac0   :  { %1208 = vrot.lane.b32.xlu0 %v1202_v23, %s8104_s30  ;;  %1210 = vrot.lane.b32.xlu1 %v1203_v12, %s8104_s30  ;;  %v1230_v12 = vmul.f32 %v5611_v37, %v4881_v10  ;;  %v1552_v10 = vmul.f32 %v5146_v45, %v5609_v42  ;;  %v1554_v45 = vmul.f32 %v5435_v51, %v5609_v42 }
 0xac3   :  { %v5845_v11 = vpop.permute.xlu0 %1815  ;;  %v5847_v34 = vpop.permute.xlu1 %1838 }
 0xac4   :  { %1212 = vrot.lane.b32.xlu0 %v1204_v57, %s8104_s30  ;;  %2337 = vrot.lane.b32.xlu1 %v2331_v26, %s4369_s10  ;;  %s4388_s30 = smov 79  }
 0xac7   :  { %v5855_v23 = vpop.permute.xlu0 %1840  ;;  %v5857_v21 = vpop.permute.xlu1 %1842 }
 0xac8   :  { %8303 = vst [vmem:[#allocation111_spill] sm:$0xff] %v5857_v21  ;;  %2339 = vrot.lane.b32.xlu0 %v2332_v0, %s4369_s10  ;;  %2341 = vrot.lane.b32.xlu1 %v2333_v6, %s4369_s10  ;;  %v1232_v0 = vmul.f32 %v5611_v37, %v4890_v1  ;;  %v5890_v1 = vmul.f32 %v5420_v19, %v5642_v44  ;;  %s4389_s10 = smov 26  }
 0xacb   :  { %v5866_v57 = vpop.permute.xlu0 %1877  ;;  %v5868_v26 = vpop.permute.xlu1 %1879 }
 0xacc   :  { %2426 = vperm.xlu0 %4326, %v4218_v36   ;;  %1236 = vrot.lane.b32.xlu1 %v1230_v12, %s4388_s30  ;;  %v1553_v36 = vmul.f32 %v5420_v19, %v5609_v42 }
 0xacf   :  { %v5875_v6 = vpop.permute.xlu0 %1881  ;;  %v5877_v21 = vpop.permute.xlu1 %1927 }
 0xad0   :  { %8304 = vst [vmem:[#allocation112_spill] sm:$0xff] %v5877_v21  ;;  %1238 = vrot.lane.b32.xlu0 %v1231_v52, %s4388_s30  ;;  %1240 = vrot.lane.b32.xlu1 %v1232_v0, %s4388_s30  ;;  %v5901_v52 = vmul.f32 %v5435_v51, %v1500_v3  ;;  %v5905_v0 = vmul.f32 %v5698_v58, %v5640_v59 }
 0xad1   :  { %v2358_v21 = vmul.f32 %v5624_v55, %v5890_v1  ;;  %v1258_v3 = vmul.f32 %v5420_v19, %v5622_v16 }
 0xad2   :  { %v2359_v42 = vmul.f32 %v5624_v55, %v5901_v52  ;;  %v2360_v59 = vmul.f32 %v5624_v55, %v5905_v0  ;;  %v1260_v55 = vmul.f32 %v5698_v58, %v5622_v16 }
 0xad3   :  { %v5892_v37 = vpop.permute.xlu0 %1929  ;;  %v5894_v12 = vpop.permute.xlu1 %1931 }
 0xad4   :  { %8305 = vst [vmem:[#allocation113_spill] sm:$0xff] %v5894_v12  ;;  %1558 = vrot.lane.b32.xlu0 %v1552_v10, %s4351_s1  ;;  %1560 = vrot.lane.b32.xlu1 %v1553_v36, %s4351_s1 }
 0xad7   :  { %v5907_v44 = vpop.permute.xlu0 %1966  ;;  %v5911_v12 = vpop.permute.xlu1 %1968 }
 0xad8   :  { %8306 = vst [vmem:[#allocation114_spill] sm:$0xff] %v5907_v44  ;;  %1562 = vrot.lane.b32.xlu0 %v1554_v45, %s4351_s1  ;;  %2364 = vrot.lane.b32.xlu1 %v2358_v21, %s4389_s10  ;;  %v1259_v45 = vmul.f32 %v5435_v51, %v5622_v16  ;;  %v2388_v16 = vmul.f32 %v5420_v19, %v5672_v28 }
 0xadb   :  { %v5916_v10 = vpop.permute.xlu0 %1970  ;;  %v5920_v36 = vpop.permute.xlu1 %1993 }
 0xadc   :  { %8307 = vst [vmem:[#allocation115_spill] sm:$0xff] %v5920_v36  ;;  %2366 = vrot.lane.b32.xlu0 %v2359_v42, %s4389_s10  ;;  %2368 = vrot.lane.b32.xlu1 %v2360_v59, %s4389_s10  ;;  %v1579_v42 = vmul.f32 %v5652_v8, %v5039_v47  ;;  %v2384_v36 = vsel %vm2383_vm12, %v5672_v28, %v5670_v50  ;;  %s8185_s10 = smov 77   ;;  %vm8113_vm12 = vcmask 146432  }
 0xadd   :  { %v1581_v47 = vmul.f32 %v5652_v8, %v5045_v13 }
 0xadf   :  { %v5926_v44 = vpop.permute.xlu0 %1995  ;;  %v5928_v21 = vpop.permute.xlu1 %1997 }
 0xae0   :  { %8308 = vst [vmem:[#allocation116_spill] sm:$0xff] %v5926_v44  ;;  %8309 = vst [vmem:[#allocation117_spill] sm:$0xff] %v5928_v21  ;;  %1264 = vrot.lane.b32.xlu0 %v1258_v3, %s8187_s17  ;;  %1266 = vrot.lane.b32.xlu1 %v1259_v45, %s8187_s17  ;;  %v1580_v3 = vmul.f32 %v5652_v8, %v5042_v2  ;;  %v2389_v45 = vmul.f32 %v5435_v51, %v2384_v36 }
 0xae1   :  { %v2398_v2 = vmul.f32 %v5650_v61, %v2388_v16  ;;  %v1286_v36 = vmul.f32 %v5662_v7, %v4913_v9  ;;  %v1288_v16 = vmul.f32 %v5662_v7, %v4925_v24  ;;  %v1606_v9 = vmul.f32 %v5660_v35, %v5628_v63 }
 0xae2   :  { %v2399_v28 = vmul.f32 %v5650_v61, %v2389_v45  ;;  %v1312_v24 = vsel %vm8113_vm12, %v5704_v54, %v5715_v32  ;;  %v1608_v63 = vmul.f32 %v5660_v35, %v5634_v17  ;;  %vm8119_vm12 = vcmask 252928  }
 0xae3   :  { %v5936_v59 = vpop.permute.xlu0 %2020  ;;  %v5940_v44 = vpop.permute.xlu1 %2022 }
 0xae4   :  { %8310 = vst [vmem:[#allocation118_spill] sm:$0xff] %v5936_v59  ;;  %1268 = vrot.lane.b32.xlu0 %v1260_v55, %s8187_s17  ;;  %1585 = vrot.lane.b32.xlu1 %v1579_v42, %s4358_s0  ;;  %v2390_v55 = vmul.f32 %v5698_v58, %v5670_v50  ;;  %v1287_v50 = vmul.f32 %v5662_v7, %v4917_v62  ;;  %s8537_s17 = smov 1  }
 0xae5   :  { %v1316_v62 = vmul.f32 %v5420_v19, %v5704_v54 }
 0xae6   :  { %v2400_v8 = vmul.f32 %v5650_v61, %v2390_v55  ;;  %v1607_v55 = vmul.f32 %v5660_v35, %v5620_v30  ;;  %v1317_v30 = vmul.f32 %v5435_v51, %v1312_v24 }
 0xae7   :  { %v5951_v59 = vpop.permute.xlu0 %2024  ;;  %v5953_v21 = vpop.permute.xlu1 %2047 }
 0xae8   :  { %1587 = vrot.lane.b32.xlu0 %v1580_v3, %s4358_s0  ;;  %1589 = vrot.lane.b32.xlu1 %v1581_v47, %s4358_s0 }
 0xaeb   :  { %v5961_v42 = vpop.permute.xlu0 %2049  ;;  %v5963_v13 = vpop.permute.xlu1 %2051 }
 0xaec   :  { %2404 = vrot.lane.b32.xlu0 %v2398_v2, %s4391_s28  ;;  %2406 = vrot.lane.b32.xlu1 %v2399_v28, %s4391_s28  ;;  %v1326_v28 = vmul.f32 %v5689_v49, %v1316_v62  ;;  %v8313_v62 = vld [vmem:[#allocation92_spill] sm:$0xff] }
 0xaed   :  { %v2435_v24 = vmul.f32 %v5420_v19, %v8313_v62  ;;  %v8317_v62 = vld [vmem:[#allocation105_spill] sm:$0xff] }
 0xaef   :  { %v5968_v3 = vpop.permute.xlu0 %2087  ;;  %v5970_v47 = vpop.permute.xlu1 %2089 }
 0xaf0   :  { %2408 = vrot.lane.b32.xlu0 %v2400_v8, %s4391_s28  ;;  %1292 = vrot.lane.b32.xlu1 %v1286_v36, %s8185_s10  ;;  %v1318_v8 = vmul.f32 %v5698_v58, %v5715_v32  ;;  %s8116_s28 = smov 76   ;;  %v1633_v32 = vmul.f32 %v5420_v19, %v5687_v48 }
 0xaf2   :  { %v1328_v17 = vmul.f32 %v5689_v49, %v1318_v8 }
 0xaf3   :  { %v5977_v45 = vpop.permute.xlu0 %2091  ;;  %v5979_v61 = vpop.permute.xlu1 %2126 }
 0xaf4   :  { %1294 = vrot.lane.b32.xlu0 %v1287_v50, %s8185_s10  ;;  %1296 = vrot.lane.b32.xlu1 %v1288_v16, %s8185_s10  ;;  %v1327_v50 = vmul.f32 %v5689_v49, %v1317_v30  ;;  %s8566_s10 = smov 80  }
 0xaf7   :  { %v5992_v7 = vpop.permute.xlu0 %2128  ;;  %v5994_v2 = vpop.permute.xlu1 %2130 }
 0xaf8   :  { %1612 = vrot.lane.b32.xlu0 %v1606_v9, %s4353_s22  ;;  %1614 = vrot.lane.b32.xlu1 %v1607_v55, %s4353_s22  ;;  %v1634_v9 = vmul.f32 %v5435_v51, %v5687_v48  ;;  %v8316_v48 = vld [vmem:[#allocation93_spill] sm:$0xff] }
 0xafb   :  { %v6004_v36 = vpop.permute.xlu0 %2153  ;;  %v6006_v54 = vpop.permute.xlu1 %2155 }
 0xafc   :  { %1616 = vrot.lane.b32.xlu0 %v1608_v63, %s4353_s22  ;;  %1332 = vrot.lane.b32.xlu1 %v1326_v28, %s8116_s28  ;;  %v8314_v63 = vld [vmem:[#allocation98_spill] sm:$0xff]  ;;  %v8315_v28 = vld [vmem:[#allocation104_spill] sm:$0xff] }
 0xafd   :  { %v2436_v30 = vmul.f32 %v5435_v51, %v8314_v63  ;;  %v2445_v8 = vmul.f32 %v8315_v28, %v2435_v24 }
 0xaff   :  { %v6012_v35 = vpop.permute.xlu0 %2157  ;;  %v6014_v16 = vpop.permute.xlu1 %1052 }
 0xb00   :  { %8311 = vst [vmem:[#allocation119_spill] sm:$0xff] %v6014_v16  ;;  %1334 = vrot.lane.b32.xlu0 %v1327_v50, %s8116_s28  ;;  %1336 = vrot.lane.b32.xlu1 %v1328_v17, %s8116_s28  ;;  %v2446_v50 = vmul.f32 %v8315_v28, %v2436_v30  ;;  %v2437_v16 = vmul.f32 %v5698_v58, %v8316_v48  ;;  %s8181_s28 = smov 63  }
 0xb01   :  { %v1367_v30 = vmul.f32 %v8317_v62, %v5802_v60  ;;  %v1656_v48 = vmul.f32 %v5728_v18, %v5696_v46 }
 0xb03   :  { %v6022_v55 = vpop.permute.xlu0 %1054  ;;  %v6026_v49 = vpop.permute.xlu1 %1056 }
 0xb04   :  { %8312 = vst [vmem:[#allocation120_spill] sm:$0xff] %v6022_v55  ;;  %1637 = vrot.lane.b32.xlu0 %v1633_v32, %s4354_s23  ;;  %1639 = vrot.lane.b32.xlu1 %v1634_v9, %s4354_s23  ;;  %v2447_v32 = vmul.f32 %v8315_v28, %v2437_v16  ;;  %v1366_v9 = vmul.f32 %v8317_v62, %v5788_v56 }
 0xb05   :  { %v1655_v28 = vmul.f32 %v5728_v18, %v5682_v15  ;;  %v1392_v15 = vsel %vm8119_vm12, %v5747_v33, %v5759_v41  ;;  %vm8136_vm12 = vcmask 269312  }
 0xb07   :  { %v6034_v17 = vpop.permute.xlu0 %2178  ;;  %v6038_v55 = vpop.permute.xlu1 %2180 }
 0xb08   :  { %2451 = vrot.lane.b32.xlu0 %v2445_v8, %s4351_s1  ;;  %2453 = vrot.lane.b32.xlu1 %v2446_v50, %s4351_s1  ;;  %v1368_v8 = vmul.f32 %v8317_v62, %v5806_v40  ;;  %v1657_v62 = vmul.f32 %v5728_v18, %v5702_v27  ;;  %v1396_v18 = vmul.f32 %v5420_v19, %v5747_v33 }
 0xb09   :  { %v2474_v27 = vmul.f32 %v5698_v58, %v5730_v39 }
 0xb0b   :  { %v6045_v63 = vpop.permute.xlu0 %1079  ;;  %v6047_v24 = vpop.permute.xlu1 %1081 }
 0xb0c   :  { %2455 = vrot.lane.b32.xlu0 %v2447_v32, %s4351_s1  ;;  %1372 = vrot.lane.b32.xlu1 %v1366_v9, %s8183_s26 }
 0xb0f   :  { %v6055_v50 = vpop.permute.xlu0 %1083  ;;  %v6057_v16 = vpop.permute.xlu1 %2202 }
 0xb10   :  { %1374 = vrot.lane.b32.xlu0 %v1367_v30, %s8183_s26  ;;  %1376 = vrot.lane.b32.xlu1 %v1368_v8, %s8183_s26  ;;  %v2472_v30 = vmul.f32 %v5420_v19, %v5730_v39 }
 0xb13   :  { %v6065_v32 = vpop.permute.xlu0 %2204  ;;  %v6067_v9 = vpop.permute.xlu1 %2206 }
 0xb14   :  { %8318 = vst [vmem:[#allocation92_spill] sm:$0xff] %v6067_v9  ;;  %1661 = vrot.lane.b32.xlu0 %v1655_v28, %s4365_s8  ;;  %1663 = vrot.lane.b32.xlu1 %v1656_v48, %s4365_s8  ;;  %v2473_v28 = vmul.f32 %v5435_v51, %v5730_v39  ;;  %v1397_v48 = vmul.f32 %v5435_v51, %v1392_v15 }
 0xb16   :  { %v1407_v33 = vmul.f32 %v5738_v38, %v1397_v48  ;;  %v1684_v48 = vmul.f32 %v5740_v43, %v5806_v40 }
 0xb17   :  { %v6075_v8 = vpop.permute.xlu0 %1104  ;;  %v6080_v46 = vpop.permute.xlu1 %1106 }
 0xb18   :  { %8319 = vst [vmem:[#allocation98_spill] sm:$0xff] %v6075_v8  ;;  %8320 = vst [vmem:[#allocation104_spill] sm:$0xff] %v6080_v46  ;;  %1665 = vrot.lane.b32.xlu0 %v1657_v62, %s4365_s8  ;;  %2478 = vrot.lane.b32.xlu1 %v2472_v30, %s4358_s0  ;;  %v1406_v62 = vmul.f32 %v5738_v38, %v1396_v18  ;;  %v1398_v30 = vmul.f32 %v5698_v58, %v5759_v41 }
 0xb19   :  { %v1683_v41 = vmul.f32 %v5740_v43, %v5802_v60 }
 0xb1a   :  { %v1408_v15 = vmul.f32 %v5738_v38, %v1398_v30  ;;  %v8325_v38 = vld [vmem:[#allocation94_spill] sm:$0xff] }
 0xb1b   :  { %v6091_v8 = vpop.permute.xlu0 %2242  ;;  %v6093_v9 = vpop.permute.xlu1 %2244  ;;  %v2492_v30 = vmul.f32 %v5420_v19, %v8325_v38 }
 0xb1c   :  { %2480 = vrot.lane.b32.xlu0 %v2473_v28, %s4358_s0  ;;  %2482 = vrot.lane.b32.xlu1 %v2474_v27, %s4358_s0  ;;  %v1682_v28 = vmul.f32 %v5740_v43, %v5788_v56  ;;  %v8329_v43 = vld [vmem:[#allocation95_spill] sm:$0xff] }
 0xb1d   :  { %v2494_v40 = vmul.f32 %v5698_v58, %v8329_v43  ;;  %v1710_v43 = vmul.f32 %v5435_v51, %v5772_v29 }
 0xb1f   :  { %v6101_v46 = vpop.permute.xlu0 %2246  ;;  %v6103_v39 = vpop.permute.xlu1 %1128 }
 0xb20   :  { %8321 = vst [vmem:[#allocation93_spill] sm:$0xff] %v6103_v39  ;;  %1412 = vrot.lane.b32.xlu0 %v1406_v62, %s8181_s28  ;;  %1414 = vrot.lane.b32.xlu1 %v1407_v33, %s8181_s28  ;;  %v8327_v33 = vld [vmem:[#allocation99_spill] sm:$0xff] }
 0xb23   :  { %v6110_v18 = vpop.permute.xlu0 %1130  ;;  %v6112_v27 = vpop.permute.xlu1 %1132 }
 0xb24   :  { %8322 = vst [vmem:[#allocation105_spill] sm:$0xff] %v6110_v18  ;;  %8323 = vst [vmem:[#allocation121_spill] sm:$0xff] %v6112_v27  ;;  %1416 = vrot.lane.b32.xlu0 %v1408_v15, %s8181_s28  ;;  %1688 = vrot.lane.b32.xlu1 %v1682_v28, %s8183_s26  ;;  %v2493_v15 = vmul.f32 %v5435_v51, %v8327_v33  ;;  %v2502_v28 = vmul.f32 %v5745_v4, %v2492_v30  ;;  %s8540_s28 = smov 15  }
 0xb25   :  { %v1435_v33 = vmul.f32 %v5435_v51, %v5761_v20 }
 0xb26   :  { %v2503_v60 = vmul.f32 %v5745_v4, %v2493_v15  ;;  %v1436_v15 = vmul.f32 %v5698_v58, %v5761_v20 }
 0xb27   :  { %v6120_v62 = vpop.permute.xlu0 %1539  ;;  %v6124_v56 = vpop.permute.xlu1 %2282 }
 0xb28   :  { %8324 = vst [vmem:[#allocation122_spill] sm:$0xff] %v6120_v62  ;;  %8326 = vst [vmem:[#allocation94_spill] sm:$0xff] %v6124_v56  ;;  %1690 = vrot.lane.b32.xlu0 %v1683_v41, %s8183_s26  ;;  %1692 = vrot.lane.b32.xlu1 %v1684_v48, %s8183_s26  ;;  %v2504_v41 = vmul.f32 %v5745_v4, %v2494_v40  ;;  %v1434_v48 = vmul.f32 %v5420_v19, %v5761_v20  ;;  %v8337_v20 = vld [vmem:[#allocation97_spill] sm:$0xff]  ;;  %s8549_s26 = smov 33  }
 0xb29   :  { %v8400_v56 = vld [vmem:[#allocation81_spill] sm:$0xff] }
 0xb2b   :  { %v6132_v27 = vpop.permute.xlu0 %2284  ;;  %v6136_v62 = vpop.permute.xlu1 %2286 }
 0xb2c   :  { %8328 = vst [vmem:[#allocation99_spill] sm:$0xff] %v6132_v27  ;;  %8330 = vst [vmem:[#allocation95_spill] sm:$0xff] %v6136_v62  ;;  %2508 = vrot.lane.b32.xlu0 %v2502_v28, %s4378_s11  ;;  %2510 = vrot.lane.b32.xlu1 %v2503_v60, %s4378_s11  ;;  %v1709_v60 = vmul.f32 %v5420_v19, %v5772_v29 }
 0xb2f   :  { %v6143_v38 = vpop.permute.xlu0 %1168  ;;  %v6145_v30 = vpop.permute.xlu1 %1170 }
 0xb30   :  { %8331 = vst [vmem:[#allocation123_spill] sm:$0xff] %v6143_v38  ;;  %8332 = vst [vmem:[#allocation124_spill] sm:$0xff] %v6145_v30  ;;  %2512 = vrot.lane.b32.xlu0 %v2504_v41, %s4378_s11  ;;  %1440 = vrot.lane.b32.xlu1 %v1434_v48, %s8179_s27  ;;  %v2522_v48 = vmul.f32 %v5420_v19, %v8337_v20  ;;  %v8342_v20 = vld [vmem:[#allocation96_spill] sm:$0xff]  ;;  %s8177_s11 = smov 61  }
 0xb33   :  { %v6153_v28 = vpop.permute.xlu0 %1172  ;;  %v6155_v4 = vpop.permute.xlu1 %2310 }
 0xb34   :  { %8333 = vst [vmem:[#allocation125_spill] sm:$0xff] %v6153_v28  ;;  %8334 = vst [vmem:[#allocation126_spill] sm:$0xff] %v6155_v4  ;;  %1442 = vrot.lane.b32.xlu0 %v1435_v33, %s8179_s27  ;;  %1444 = vrot.lane.b32.xlu1 %v1436_v15, %s8179_s27  ;;  %v1711_v33 = vmul.f32 %v5698_v58, %v5772_v29  ;;  %v2532_v15 = vmul.f32 %v5774_v14, %v2522_v48  ;;  %v8339_v4 = vld [vmem:[#allocation100_spill] sm:$0xff] }
 0xb37   :  { %v6163_v40 = vpop.permute.xlu0 %2312  ;;  %v6165_v41 = vpop.permute.xlu1 %2314 }
 0xb38   :  { %8335 = vst [vmem:[#allocation127_spill] sm:$0xff] %v6163_v40  ;;  %8336 = vst [vmem:[#allocation128_spill] sm:$0xff] %v6165_v41  ;;  %1715 = vrot.lane.b32.xlu0 %v1709_v60, %s8179_s27  ;;  %1717 = vrot.lane.b32.xlu1 %v1710_v43, %s8179_s27  ;;  %v2523_v40 = vmul.f32 %v5435_v51, %v8339_v4  ;;  %v8340_v41 = vld [vmem:[#allocation108_spill] sm:$0xff]  ;;  %v2524_v43 = vmul.f32 %v5698_v58, %v8342_v20 }
 0xb39   :  { %v1460_v60 = vsel %vm8136_vm12, %v8340_v41, %v5795_v31  ;;  %v1464_v48 = vmul.f32 %v5420_v19, %v8340_v41  ;;  %v8348_v41 = vld [vmem:[#allocation107_spill] sm:$0xff]  ;;  %vm8152_vm12 = vcmask 1022976  }
 0xb3a   :  { %v2533_v29 = vmul.f32 %v5774_v14, %v2523_v40  ;;  %v2534_v4 = vmul.f32 %v5774_v14, %v2524_v43 }
 0xb3b   :  { %v6174_v28 = vpop.permute.xlu0 %1208  ;;  %v6181_v38 = vpop.permute.xlu1 %1210 }
 0xb3c   :  { %8338 = vst [vmem:[#allocation97_spill] sm:$0xff] %v6174_v28  ;;  %8341 = vst [vmem:[#allocation100_spill] sm:$0xff] %v6181_v38  ;;  %1719 = vrot.lane.b32.xlu0 %v1711_v33, %s8179_s27  ;;  %2538 = vrot.lane.b32.xlu1 %v2532_v15, %s4379_s12  ;;  %v1465_v28 = vmul.f32 %v5435_v51, %v1460_v60  ;;  %v1466_v33 = vmul.f32 %v5698_v58, %v5795_v31  ;;  %v8345_v15 = vld [vmem:[#allocation106_spill] sm:$0xff]  ;;  %v8391_v38 = vld [vmem:[#allocation67_spill] sm:$0xff]  ;;  %s8579_s27 = smov 61  }
 0xb3d   :  { %v1474_v40 = vmul.f32 %v8345_v15, %v1464_v48  ;;  %v1736_v60 = vmul.f32 %v8348_v41, %v5890_v1  ;;  %v1737_v31 = vmul.f32 %v8348_v41, %v5901_v52 }
 0xb3e   :  { %v1475_v20 = vmul.f32 %v8345_v15, %v1465_v28  ;;  %v1476_v51 = vmul.f32 %v8345_v15, %v1466_v33  ;;  %v1738_v28 = vmul.f32 %v8348_v41, %v5905_v0 }
 0xb3f   :  { %v6192_v30 = vpop.permute.xlu0 %1212  ;;  %v6194_v62 = vpop.permute.xlu1 %2337 }
 0xb40   :  { %8343 = vst [vmem:[#allocation108_spill] sm:$0xff] %v6192_v30  ;;  %8344 = vst [vmem:[#allocation96_spill] sm:$0xff] %v6194_v62  ;;  %2540 = vrot.lane.b32.xlu0 %v2533_v29, %s4379_s12  ;;  %2542 = vrot.lane.b32.xlu1 %v2534_v4, %s4379_s12  ;;  %v8353_v4 = vld [vmem:[#allocation109_spill] sm:$0xff]  ;;  %s4396_s12 = smov 51  }
 0xb41   :  { %v1514_v33 = vmul.f32 %v8353_v4, %v5890_v1  ;;  %v1515_v15 = vmul.f32 %v8353_v4, %v5901_v52 }
 0xb43   :  { %v6202_v19 = vpop.permute.xlu0 %2339  ;;  %v6204_v14 = vpop.permute.xlu1 %2341 }
 0xb44   :  { %8346 = vst [vmem:[#allocation106_spill] sm:$0xff] %v6202_v19  ;;  %8347 = vst [vmem:[#allocation129_spill] sm:$0xff] %v6204_v14  ;;  %1480 = vrot.lane.b32.xlu0 %v1474_v40, %s8177_s11  ;;  %1482 = vrot.lane.b32.xlu1 %v1475_v20, %s8177_s11  ;;  %v8390_v19 = vld [vmem:[#allocation69_spill] sm:$0xff] }
 0xb47   :  { %v6211_v43 = vpop.permute.xlu0 %2426  ;;  %v6213_v58 = vpop.permute.xlu1 %1236 }
 0xb48   :  { %8349 = vst [vmem:[#allocation107_spill] sm:$0xff] %v6211_v43  ;;  %8350 = vst [vmem:[#allocation130_spill] sm:$0xff] %v6213_v58  ;;  %1484 = vrot.lane.b32.xlu0 %v1476_v51, %s8177_s11  ;;  %1742 = vrot.lane.b32.xlu1 %v1736_v60, %s8175_s14  ;;  %v1516_v51 = vmul.f32 %v8353_v4, %v5905_v0  ;;  %v8380_v58 = vld [vmem:[#allocation101_spill] sm:$0xff]  ;;  %s8561_s11 = smov 108  }
 0xb4b   :  { %v6221_v29 = vpop.permute.xlu0 %1238  ;;  %v6223_v48 = vpop.permute.xlu1 %1240 }
 0xb4c   :  { %8351 = vst [vmem:[#allocation131_spill] sm:$0xff] %v6221_v29  ;;  %8352 = vst [vmem:[#allocation132_spill] sm:$0xff] %v6223_v48  ;;  %1744 = vrot.lane.b32.xlu0 %v1737_v31, %s8175_s14  ;;  %1746 = vrot.lane.b32.xlu1 %v1738_v28, %s8175_s14  ;;  %v8378_v48 = vld [vmem:[#allocation61_spill] sm:$0xff] }
 0xb4f   :  { %v6231_v40 = vpop.permute.xlu0 %1558  ;;  %v6233_v20 = vpop.permute.xlu1 %1560 }
 0xb50   :  { %8354 = vst [vmem:[#allocation109_spill] sm:$0xff] %v6231_v40  ;;  %8355 = vst [vmem:[#allocation133_spill] sm:$0xff] %v6233_v20  ;;  %1520 = vrot.lane.b32.xlu0 %v1514_v33, %s8175_s14  ;;  %1522 = vrot.lane.b32.xlu1 %v1515_v15, %s8175_s14 }
 0xb53   :  { %v6239_v41 = vpop.permute.xlu0 %1562  ;;  %v6241_v60 = vpop.permute.xlu1 %2364 }
 0xb54   :  { %8356 = vst [vmem:[#allocation134_spill] sm:$0xff] %v6239_v41  ;;  %8357 = vst [vmem:[#allocation135_spill] sm:$0xff] %v6241_v60  ;;  %1524 = vrot.lane.b32.xlu0 %v1516_v51, %s8175_s14 }
 0xb57   :  { %v6244_v1 = vpop.permute.xlu0 %2366  ;;  %v6246_v52 = vpop.permute.xlu1 %2368 }
 0xb58   :  { %8358 = vst [vmem:[#allocation136_spill] sm:$0xff] %v6244_v1  ;;  %8359 = vst [vmem:[#allocation137_spill] sm:$0xff] %v6246_v52  ;;  %v8388_v1 = vld [vmem:[#allocation65_spill] sm:$0xff] }
 0xb5b   :  { %v6248_v31 = vpop.permute.xlu0 %1264  ;;  %v6250_v28 = vpop.permute.xlu1 %1266 }
 0xb5c   :  { %8360 = vst [vmem:[#allocation138_spill] sm:$0xff] %v6248_v31  ;;  %8361 = vst [vmem:[#allocation139_spill] sm:$0xff] %v6250_v28 }
 0xb5f   :  { %v6252_v33 = vpop.permute.xlu0 %1268  ;;  %v6254_v15 = vpop.permute.xlu1 %1585 }
 0xb60   :  { %8362 = vst [vmem:[#allocation140_spill] sm:$0xff] %v6252_v33  ;;  %8363 = vst [vmem:[#allocation141_spill] sm:$0xff] %v6254_v15 }
 0xb63   :  { %v6256_v40 = vpop.permute.xlu0 %1587  ;;  %v6258_v0 = vpop.permute.xlu1 %1589 }
 0xb64   :  { %8364 = vst [vmem:[#allocation142_spill] sm:$0xff] %v6256_v40  ;;  %8365 = vst [vmem:[#allocation143_spill] sm:$0xff] %v6258_v0 }
 0xb67   :  { %v6260_v4 = vpop.permute.xlu0 %2404  ;;  %v6262_v41 = vpop.permute.xlu1 %2406 }
 0xb68   :  { %8366 = vst [vmem:[#allocation144_spill] sm:$0xff] %v6260_v4  ;;  %8367 = vst [vmem:[#allocation145_spill] sm:$0xff] %v6262_v41  ;;  %v8385_v4 = vld [vmem:[#allocation66_spill] sm:$0xff] }
 0xb69   :  { %v770_v14 = vsel %vm264_vm6, %v8385_v4, %v8388_v1 }
 0xb6b   :  { %v6264_v51 = vpop.permute.xlu0 %2408  ;;  %v6266_v20 = vpop.permute.xlu1 %1292 }
 0xb6c   :  { %8368 = vst [vmem:[#allocation146_spill] sm:$0xff] %v6264_v51  ;;  %8369 = vst [vmem:[#allocation147_spill] sm:$0xff] %v6266_v20  ;;  %v8379_v51 = vld [vmem:[#allocation62_spill] sm:$0xff] }
 0xb6d   :  { %v742_v20 = vsel %vm8165_vm11, %v8379_v51, %v8378_v48 }
 0xb6f   :  { %v6268_v43 = vpop.permute.xlu0 %1294  ;;  %v6270_v31 = vpop.permute.xlu1 %1296 }
 0xb70   :  { %8370 = vst [vmem:[#allocation148_spill] sm:$0xff] %v6268_v43  ;;  %8371 = vst [vmem:[#allocation149_spill] sm:$0xff] %v6270_v31  ;;  %v8381_v43 = vld [vmem:[#allocation60_spill] sm:$0xff]  ;;  %v8382_v31 = vld [vmem:[#allocation63_spill] sm:$0xff] }
 0xb71   :  { %v709_v29 = vmul.f32 %v8381_v43, %v8380_v58  ;;  %v8392_v58 = vld [vmem:[#allocation68_spill] sm:$0xff] }
 0xb73   :  { %v6272_v28 = vpop.permute.xlu0 %1612  ;;  %v6274_v33 = vpop.permute.xlu1 %1614  ;;  %v747_v51 = vadd.f32 %v742_v20, %v709_v29 }
 0xb74   :  { %8372 = vst [vmem:[#allocation150_spill] sm:$0xff] %v6272_v28  ;;  %8373 = vst [vmem:[#allocation151_spill] sm:$0xff] %v6274_v33  ;;  %v743_v28 = vsel %vm8165_vm11, %v8378_v48, %v8382_v31  ;;  %v8383_v33 = vld [vmem:[#allocation102_spill] sm:$0xff]  ;;  %vm8167_vm11 = vcmask 523264  }
 0xb77   :  { %v6276_v15 = vpop.permute.xlu0 %1616  ;;  %v6278_v40 = vpop.permute.xlu1 %1332 }
 0xb78   :  { %8374 = vst [vmem:[#allocation152_spill] sm:$0xff] %v6276_v15  ;;  %8375 = vst [vmem:[#allocation153_spill] sm:$0xff] %v6278_v40  ;;  %v710_v15 = vmul.f32 %v8381_v43, %v8383_v33  ;;  %v8384_v40 = vld [vmem:[#allocation103_spill] sm:$0xff] }
 0xb7a   :  { %v748_v30 = vadd.f32 %v743_v28, %v710_v15 }
 0xb7b   :  { %v6280_v0 = vpop.permute.xlu0 %1334  ;;  %v6282_v52 = vpop.permute.xlu1 %1336 }
 0xb7c   :  { %8376 = vst [vmem:[#allocation154_spill] sm:$0xff] %v6280_v0  ;;  %8377 = vst [vmem:[#allocation155_spill] sm:$0xff] %v6282_v52  ;;  %v711_v0 = vmul.f32 %v8381_v43, %v8384_v40  ;;  %v8386_v52 = vld [vmem:[#allocation64_spill] sm:$0xff]  ;;  %v809_v43 = vsel %vm8152_vm12, %v8391_v38, %v8390_v19  ;;  %v775_v29 = vadd.f32 %v770_v14, %v748_v30 }
 0xb7d   :  { %v769_v41 = vsel %vm264_vm6, %v8386_v52, %v8385_v4  ;;  %v810_v52 = vsel %vm8152_vm12, %v8390_v19, %v8392_v58  ;;  %v8394_v4 = vld [vmem:[#allocation70_spill] sm:$0xff]  ;;  %v4331_v19 = vld [vmem:[#allocation2] sm:$0xff]  ;;  %vm362_vm12 = vcmask 785408  }
 0xb7e   :  { %v749_v62 = vadd.f32 %v8382_v31, %v711_v0  ;;  %v774_v40 = vadd.f32 %v769_v41, %v747_v51  ;;  %v6320_v31 = vsel %vm8169_vm3, %v5824_v5, %v5828_v22  ;;  %v8396_v41 = vld [vmem:[#allocation71_spill] sm:$0xff]  ;;  %v1774_v30 = vmul.f32 %v4331_v19, %v5824_v5  ;;  %v8398_v0 = vld [vmem:[#allocation74_spill] sm:$0xff]  ;;  %v8399_v51 = vld [vmem:[#allocation80_spill] sm:$0xff] }
 0xb7f   :  { %v6299_v60 = vpop.permute.xlu0 %1637  ;;  %v6304_v48 = vpop.permute.xlu1 %1639  ;;  %v815_v14 = vadd.f32 %v810_v52, %v775_v29  ;;  %v6341_v19 = vld [vmem:[#allocation2 + $0x8] sm:$0xff] }
 0xb80   :  { %8387 = vst [vmem:[#allocation61_spill] sm:$0xff] %v6299_v60  ;;  %8389 = vst [vmem:[#allocation62_spill] sm:$0xff] %v6304_v48  ;;  %v776_v20 = vadd.f32 %v8388_v1, %v749_v62  ;;  %v8393_v60 = vld [vmem:[#allocation72_spill] sm:$0xff]  ;;  %v814_v38 = vadd.f32 %v809_v43, %v774_v40  ;;  %v899_v40 = vsel %vm8163_vm13, %v8398_v0, %v8400_v56  ;;  %v6337_v43 = vld [vmem:[#allocation2 + $0x10] sm:$0xff] }
 0xb81   :  { %v860_v33 = vsel %vm859_vm8, %v8394_v4, %v8393_v60  ;;  %v861_v15 = vsel %vm859_vm8, %v8393_v60, %v8396_v41  ;;  %v898_v4 = vsel %vm8163_vm13, %v8399_v51, %v8398_v0  ;;  %v1776_v60 = vmul.f32 %v6337_v43, %v5828_v22  ;;  %v8402_v51 = vld [vmem:[#allocation82_spill] sm:$0xff] }
 0xb82   :  { %v816_v1 = vadd.f32 %v8392_v58, %v776_v20  ;;  %v865_v48 = vadd.f32 %v860_v33, %v814_v38  ;;  %v1775_v52 = vmul.f32 %v6341_v19, %v6320_v31  ;;  %v866_v58 = vadd.f32 %v861_v15, %v815_v14  ;;  %v8401_v20 = vld [vmem:[#allocation78_spill] sm:$0xff] }
 0xb83   :  { %v6322_v28 = vpop.permute.xlu0 %2451  ;;  %v6328_v62 = vpop.permute.xlu1 %2453  ;;  %v925_v33 = vsel %vm8159_vm14, %v8402_v51, %v8401_v20  ;;  %v1817_v15 = vsel %vm264_vm6, %v5836_v53, %v5838_v25  ;;  %v1844_v53 = vsel %vm859_vm8, %v5847_v34, %v5855_v23  ;;  %v1884_v34 = vsel %vm1883_vm2, %v5866_v57, %v5868_v26 }
 0xb84   :  { %8395 = vst [vmem:[#allocation60_spill] sm:$0xff] %v6322_v28  ;;  %8397 = vst [vmem:[#allocation63_spill] sm:$0xff] %v6328_v62  ;;  %v867_v29 = vadd.f32 %v8396_v41, %v816_v1  ;;  %v903_v0 = vadd.f32 %v898_v4, %v865_v48  ;;  %v8403_v28 = vld [vmem:[#allocation110_spill] sm:$0xff]  ;;  %v904_v39 = vadd.f32 %v899_v40, %v866_v58  ;;  %v8406_v40 = vld [vmem:[#allocation79_spill] sm:$0xff]  ;;  %vm2053_vm13 = vcmask 736256  }
 0xb85   :  { %v1784_v62 = vmul.f32 %v8403_v28, %v1774_v30  ;;  %v1818_v41 = vsel %vm264_vm6, %v5838_v25, %v5845_v11  ;;  %v1785_v1 = vmul.f32 %v8403_v28, %v1775_v52  ;;  %v1786_v48 = vmul.f32 %v8403_v28, %v1776_v60  ;;  %v8405_v30 = vld [vmem:[#allocation83_spill] sm:$0xff] }
 0xb86   :  { %v905_v18 = vadd.f32 %v8400_v56, %v867_v29  ;;  %v930_v14 = vadd.f32 %v925_v33, %v903_v0  ;;  %v926_v4 = vsel %vm8159_vm14, %v8401_v20, %v8405_v30  ;;  %v8407_v56 = vld [vmem:[#allocation84_spill] sm:$0xff]  ;;  %v8408_v29 = vld [vmem:[#allocation111_spill] sm:$0xff]  ;;  %vm8164_vm14 = vcmask 891904   ;;  %v8411_v0 = vld [vmem:[#allocation85_spill] sm:$0xff] }
 0xb87   :  { %v6349_v38 = vpop.permute.xlu0 %2455  ;;  %v6352_v27 = vpop.permute.xlu1 %1372  ;;  %v952_v58 = vsel %vm8162_vm4, %v8407_v56, %v8406_v40  ;;  %v1845_v25 = vsel %vm859_vm8, %v5855_v23, %v8408_v29  ;;  %v1822_v28 = vadd.f32 %v1817_v15, %v1784_v62  ;;  %v1823_v60 = vadd.f32 %v1818_v41, %v1785_v1  ;;  %v8413_v56 = vld [vmem:[#allocation113_spill] sm:$0xff] }
 0xb88   :  { %8404 = vst [vmem:[#allocation66_spill] sm:$0xff] %v6352_v27  ;;  %v1824_v51 = vadd.f32 %v5845_v11, %v1786_v48  ;;  %v932_v33 = vadd.f32 %v8405_v30, %v905_v18  ;;  %v1885_v23 = vsel %vm1883_vm2, %v5868_v26, %v5875_v6  ;;  %v953_v62 = vsel %vm8162_vm4, %v8406_v40, %v8411_v0  ;;  %v8412_v18 = vld [vmem:[#allocation112_spill] sm:$0xff]  ;;  %v8415_v27 = vld [vmem:[#allocation86_spill] sm:$0xff] }
 0xb89   :  { %v1849_v15 = vadd.f32 %v1844_v53, %v1822_v28  ;;  %v1850_v41 = vadd.f32 %v1845_v25, %v1823_v60  ;;  %v931_v1 = vadd.f32 %v926_v4, %v904_v39  ;;  %v957_v48 = vadd.f32 %v952_v58, %v930_v14  ;;  %v8414_v26 = vld [vmem:[#allocation88_spill] sm:$0xff]  ;;  %v8416_v58 = vld [vmem:[#allocation114_spill] sm:$0xff] }
 0xb8a   :  { %v1851_v11 = vadd.f32 %v8408_v29, %v1824_v51  ;;  %v1934_v30 = vsel %vm1933_vm0, %v8412_v18, %v5892_v37  ;;  %v1935_v57 = vsel %vm1933_vm0, %v5892_v37, %v8413_v56  ;;  %v980_v40 = vsel %vm8164_vm14, %v8415_v27, %v8414_v26  ;;  %v8421_v18 = vld [vmem:[#allocation89_spill] sm:$0xff] }
 0xb8b   :  { %v6375_v52 = vpop.permute.xlu0 %1374  ;;  %v6378_v20 = vpop.permute.xlu1 %1376  ;;  %v1890_v29 = vadd.f32 %v1885_v23, %v1850_v41  ;;  %v958_v14 = vadd.f32 %v953_v62, %v931_v1  ;;  %v959_v4 = vadd.f32 %v8411_v0, %v932_v33  ;;  %v1972_v25 = vsel %vm362_vm12, %v8416_v58, %v5911_v12  ;;  %v8418_v23 = vld [vmem:[#allocation116_spill] sm:$0xff]  ;;  %v8419_v33 = vld [vmem:[#allocation115_spill] sm:$0xff]  ;;  %v8420_v62 = vld [vmem:[#allocation117_spill] sm:$0xff] }
 0xb8c   :  { %8409 = vst [vmem:[#allocation64_spill] sm:$0xff] %v6375_v52  ;;  %8410 = vst [vmem:[#allocation65_spill] sm:$0xff] %v6378_v20  ;;  %v1889_v52 = vadd.f32 %v1884_v34, %v1849_v15  ;;  %v1891_v53 = vadd.f32 %v5875_v6, %v1851_v11  ;;  %v1973_v37 = vsel %vm362_vm12, %v5911_v12, %v5916_v10  ;;  %vm8166_vm4 = vcmask 883712   ;;  %v8417_v6 = vld [vmem:[#allocation87_spill] sm:$0xff] }
 0xb8d   :  { %v1940_v60 = vadd.f32 %v1935_v57, %v1890_v29  ;;  %v985_v51 = vadd.f32 %v980_v40, %v957_v48  ;;  %v981_v34 = vsel %vm8164_vm14, %v8414_v26, %v8417_v6  ;;  %v1999_v0 = vsel %vm407_vm1, %v8419_v33, %v8418_v23  ;;  %v8423_v57 = vld [vmem:[#allocation118_spill] sm:$0xff] }
 0xb8e   :  { %v1941_v27 = vadd.f32 %v8413_v56, %v1891_v53  ;;  %v1939_v28 = vadd.f32 %v1934_v30, %v1889_v52  ;;  %v2000_v11 = vsel %vm407_vm1, %v8418_v23, %v8420_v62  ;;  %v987_v48 = vadd.f32 %v8417_v6, %v959_v4  ;;  %v8422_v30 = vld [vmem:[#allocation90_spill] sm:$0xff] }
 0xb8f   :  { %v6397_v20 = vpop.permute.xlu0 %1661  ;;  %v6403_v39 = vpop.permute.xlu1 %1663  ;;  %v1978_v41 = vadd.f32 %v1973_v37, %v1940_v60  ;;  %v1020_v56 = vsel %vm8166_vm4, %v8422_v30, %v8421_v18  ;;  %v2026_v26 = vsel %vm1174_vm9, %v8423_v57, %v5940_v44  ;;  %v2027_v40 = vsel %vm1174_vm9, %v5940_v44, %v5951_v59  ;;  %v8425_v30 = vld [vmem:[#allocation120_spill] sm:$0xff] }
 0xb90   :  { %v1977_v12 = vadd.f32 %v1972_v25, %v1939_v28  ;;  %v1979_v52 = vadd.f32 %v5916_v10, %v1941_v27  ;;  %vm2093_vm14 = vcmask 719872   ;;  %v986_v58 = vadd.f32 %v981_v34, %v958_v14  ;;  %v8424_v25 = vld [vmem:[#allocation91_spill] sm:$0xff] }
 0xb91   :  { %v2005_v53 = vadd.f32 %v2000_v11, %v1978_v41  ;;  %v1021_v4 = vsel %vm8166_vm4, %v8421_v18, %v8424_v25  ;;  %v2054_v37 = vsel %vm2053_vm13, %v5953_v21, %v5961_v42  ;;  %v2055_v27 = vsel %vm2053_vm13, %v5961_v42, %v5963_v13 }
 0xb92   :  { %v2006_v29 = vadd.f32 %v8420_v62, %v1979_v52  ;;  %v2004_v10 = vadd.f32 %v1999_v0, %v1977_v12  ;;  %v1025_v14 = vadd.f32 %v1020_v56, %v985_v51  ;;  %v1027_v34 = vadd.f32 %v8424_v25, %v987_v48  ;;  %v8426_v56 = vld [vmem:[#allocation119_spill] sm:$0xff] }
 0xb93   :  { %v6422_v15 = vpop.permute.xlu0 %1665  ;;  %v6425_v1 = vpop.permute.xlu1 %2478  ;;  %v2032_v44 = vadd.f32 %v2027_v40, %v2005_v53  ;;  %v2094_v33 = vsel %vm2093_vm14, %v5968_v3, %v5970_v47  ;;  %v2095_v21 = vsel %vm2093_vm14, %v5970_v47, %v5977_v45  ;;  %v1026_v0 = vadd.f32 %v1021_v4, %v986_v58 }
 0xb94   :  { %v2031_v60 = vadd.f32 %v2026_v26, %v2004_v10  ;;  %v2033_v6 = vadd.f32 %v5951_v59, %v2006_v29  ;;  %v2132_v59 = vsel %vm8167_vm11, %v5979_v61, %v5992_v7  ;;  %v2133_v51 = vsel %vm8167_vm11, %v5992_v7, %v5994_v2  ;;  %v4334_v26 = vld [vmem:[#allocation2 + $0x18] sm:$0xff] }
 0xb95   :  { %v2060_v11 = vadd.f32 %v2055_v27, %v2032_v44  ;;  %vm2208_vm13 = vcmask 474112   ;;  %vm2248_vm4 = vcmask 457728   ;;  %vm1134_vm14 = vcmask 760832  }
 0xb96   :  { %v2061_v42 = vadd.f32 %v5963_v13, %v2033_v6  ;;  %v2059_v62 = vadd.f32 %v2054_v37, %v2031_v60  ;;  %v6469_v52 = vmul.f32 %v6341_v19, %v5824_v5  ;;  %v2159_v61 = vsel %vm8168_vm7, %v6004_v36, %v6006_v54  ;;  %v8428_v6 = vld [vmem:[#allocation104_spill] sm:$0xff] }
 0xb97   :  { %v6445_v28 = vpop.permute.xlu0 %2480  ;;  %v6448_v23 = vpop.permute.xlu1 %2482  ;;  %v2100_v41 = vadd.f32 %v2095_v21, %v2060_v11  ;;  %v2160_v7 = vsel %vm8168_vm7, %v6006_v54, %v6012_v35  ;;  %vm2288_vm11 = vcmask 261120   ;;  %v1058_v57 = vsel %vm362_vm12, %v8426_v56, %v8425_v30 }
 0xb98   :  { %v2099_v3 = vadd.f32 %v2094_v33, %v2059_v62  ;;  %v2101_v47 = vadd.f32 %v5977_v45, %v2061_v42  ;;  %v6482_v5 = vmul.f32 %v4334_v26, %v5828_v22  ;;  %v6486_v36 = vmul.f32 %v6337_v43, %v6320_v31  ;;  %v8430_v42 = vld [vmem:[#allocation105_spill] sm:$0xff] }
 0xb99   :  { %v2138_v45 = vadd.f32 %v2133_v51, %v2100_v41  ;;  %v1059_v54 = vsel %vm362_vm12, %v8425_v30, %v6026_v49  ;;  %v1085_v22 = vsel %vm8170_vm15, %v6045_v63, %v6047_v24  ;;  %vm1214_vm7 = vcmask 654336   ;;  %v8431_v62 = vld [vmem:[#allocation93_spill] sm:$0xff] }
 0xb9a   :  { %v2139_v48 = vadd.f32 %v5994_v2, %v2101_v47  ;;  %v2137_v18 = vadd.f32 %v2132_v59, %v2099_v3  ;;  %v2182_v2 = vsel %vm8169_vm3, %v6034_v17, %v6038_v55  ;;  %v1065_v43 = vadd.f32 %v6026_v49, %v1027_v34  ;;  %v8427_v49 = vld [vmem:[#allocation92_spill] sm:$0xff] }
 0xb9b   :  { %v6462_v12 = vpop.permute.xlu0 %1412  ;;  %v6465_v13 = vpop.permute.xlu1 %1414  ;;  %v2165_v29 = vadd.f32 %v2160_v7, %v2138_v45  ;;  %v1063_v53 = vadd.f32 %v1058_v57, %v1025_v14  ;;  %v1086_v58 = vsel %vm8170_vm15, %v6047_v24, %v6055_v50  ;;  %v2209_v25 = vsel %vm2208_vm13, %v6057_v16, %v6065_v32  ;;  %v8429_v24 = vld [vmem:[#allocation98_spill] sm:$0xff] }
 0xb9c   :  { %v2164_v40 = vadd.f32 %v2159_v61, %v2137_v18  ;;  %v2166_v10 = vadd.f32 %v6012_v35, %v2139_v48  ;;  %v1064_v4 = vadd.f32 %v1059_v54, %v1026_v0  ;;  %vm2370_vm3 = vcmask 211968   ;;  %v8433_v48 = vld [vmem:[#allocation99_spill] sm:$0xff]  ;;  %v8436_v54 = vld [vmem:[#allocation102_spill] sm:$0xff] }
 0xb9d   :  { %v2187_v63 = vadd.f32 %v2182_v2, %v2165_v29  ;;  %v1090_v27 = vadd.f32 %v1085_v22, %v1063_v53  ;;  %v1092_v60 = vadd.f32 %v6055_v50, %v1065_v43  ;;  %v2210_v44 = vsel %vm2208_vm13, %v6065_v32, %v8427_v49  ;;  %v8435_v18 = vld [vmem:[#allocation95_spill] sm:$0xff]  ;;  %v8437_v2 = vld [vmem:[#allocation122_spill] sm:$0xff]  ;;  %v8444_v49 = vld [vmem:[#allocation128_spill] sm:$0xff] }
 0xb9e   :  { %v2188_v35 = vadd.f32 %v6038_v55, %v2166_v10  ;;  %v2186_v37 = vadd.f32 %v6034_v17, %v2164_v40  ;;  %v1108_v14 = vsel %vm407_vm1, %v8429_v24, %v8428_v6  ;;  %v1091_v55 = vadd.f32 %v1086_v58, %v1064_v4  ;;  %v8438_v10 = vld [vmem:[#allocation124_spill] sm:$0xff]  ;;  %v8439_v22 = vld [vmem:[#allocation123_spill] sm:$0xff]  ;;  %v8441_v58 = vld [vmem:[#allocation126_spill] sm:$0xff] }
 0xb9f   :  { %v6494_v19 = vpop.permute.xlu0 %1416  ;;  %v6500_v31 = vpop.permute.xlu1 %1688  ;;  %v2215_v21 = vadd.f32 %v2209_v25, %v2187_v63  ;;  %v2249_v17 = vsel %vm2248_vm4, %v6091_v8, %v6093_v9  ;;  %vm2410_vm15 = vcmask 195584   ;;  %v1112_v0 = vadd.f32 %v8429_v24, %v1090_v27  ;;  %v8440_v53 = vld [vmem:[#allocation127_spill] sm:$0xff]  ;;  %v8442_v4 = vld [vmem:[#allocation101_spill] sm:$0xff] }
 0xba0   :  { %v2214_v33 = vadd.f32 %v6057_v16, %v2186_v37  ;;  %v2250_v32 = vsel %vm2248_vm4, %v6093_v9, %v6101_v46  ;;  %v1135_v11 = vsel %vm1134_vm14, %v8431_v62, %v8430_v42  ;;  %v8432_v16 = vld [vmem:[#allocation121_spill] sm:$0xff]  ;;  %vm1242_vm13 = vcmask 646144   ;;  %v8434_v9 = vld [vmem:[#allocation94_spill] sm:$0xff] }
 0xba1   :  { %v1136_v59 = vsel %vm1134_vm14, %v8430_v42, %v8432_v16  ;;  %v2216_v51 = vadd.f32 %v2210_v44, %v2188_v35  ;;  %v1114_v3 = vadd.f32 %v8428_v6, %v1092_v60  ;;  %v1113_v41 = vadd.f32 %v1108_v14, %v1091_v55  ;;  %v8443_v27 = vld [vmem:[#allocation125_spill] sm:$0xff]  ;;  %v8445_v14 = vld [vmem:[#allocation100_spill] sm:$0xff] }
 0xba2   :  { %v2254_v47 = vadd.f32 %v6091_v8, %v2214_v33  ;;  %v2255_v61 = vadd.f32 %v2249_v17, %v2215_v21  ;;  %v1140_v7 = vadd.f32 %v8431_v62, %v1112_v0  ;;  %v2289_v46 = vsel %vm2288_vm11, %v8434_v9, %v8433_v48  ;;  %v8446_v33 = vld [vmem:[#allocation97_spill] sm:$0xff]  ;;  %v8447_v21 = vld [vmem:[#allocation106_spill] sm:$0xff]  ;;  %v8448_v17 = vld [vmem:[#allocation96_spill] sm:$0xff] }
 0xba3   :  { %v6518_v34 = vpop.permute.xlu0 %1690  ;;  %v6524_v50 = vpop.permute.xlu1 %1692  ;;  %v2290_v45 = vsel %vm2288_vm11, %v8433_v48, %v8435_v18  ;;  %v2256_v56 = vadd.f32 %v2250_v32, %v2216_v51  ;;  %v1141_v57 = vadd.f32 %v1135_v11, %v1113_v41  ;;  %v1142_v26 = vadd.f32 %v1136_v59, %v1114_v3  ;;  %v8449_v11 = vld [vmem:[#allocation108_spill] sm:$0xff]  ;;  %v8450_v59 = vld [vmem:[#allocation129_spill] sm:$0xff]  ;;  %v8452_v48 = vld [vmem:[#allocation135_spill] sm:$0xff] }
 0xba4   :  { %v1543_v40 = vmul.f32 %v8437_v2, %v8436_v54  ;;  %v2294_v29 = vadd.f32 %v8434_v9, %v2254_v47  ;;  %v1175_v43 = vsel %vm1174_vm9, %v8439_v22, %v8438_v10  ;;  %v2316_v25 = vsel %vm1351_vm5, %v8441_v58, %v8440_v53 }
 0xba5   :  { %v1542_v35 = vmul.f32 %v8437_v2, %v8442_v4  ;;  %v2295_v37 = vadd.f32 %v2289_v46, %v2255_v61  ;;  %v2296_v63 = vadd.f32 %v2290_v45, %v2256_v56  ;;  %v1176_v60 = vsel %vm1174_vm9, %v8438_v10, %v8443_v27  ;;  %v8453_v56 = vld [vmem:[#allocation103_spill] sm:$0xff]  ;;  %v8459_v27 = vld [vmem:[#allocation137_spill] sm:$0xff] }
 0xba6   :  { %v2317_v44 = vsel %vm1351_vm5, %v8440_v53, %v8444_v49  ;;  %vm1270_vm4 = vcmask 637952   ;;  %v1180_v6 = vadd.f32 %v8439_v22, %v1140_v7  ;;  %v2321_v24 = vadd.f32 %v8441_v58, %v2294_v29  ;;  %v8451_v7 = vld [vmem:[#allocation136_spill] sm:$0xff]  ;;  %v8454_v22 = vld [vmem:[#allocation145_spill] sm:$0xff]  ;;  %v8456_v58 = vld [vmem:[#allocation131_spill] sm:$0xff] }
 0xba7   :  { %v6545_v30 = vpop.permute.xlu0 %2508  ;;  %v6549_v8 = vpop.permute.xlu1 %2510  ;;  %v1215_v55 = vsel %vm1214_vm7, %v8446_v33, %v8445_v14  ;;  %v2343_v0 = vsel %vm2261_vm10, %v8448_v17, %v8447_v21  ;;  %v1181_v42 = vadd.f32 %v1175_v43, %v1141_v57  ;;  %v2322_v62 = vadd.f32 %v2316_v25, %v2295_v37  ;;  %v8457_v25 = vld [vmem:[#allocation130_spill] sm:$0xff]  ;;  %v8458_v37 = vld [vmem:[#allocation132_spill] sm:$0xff] }
 0xba8   :  { %v1216_v16 = vsel %vm1214_vm7, %v8445_v14, %v8449_v11  ;;  %v2344_v51 = vsel %vm2261_vm10, %v8447_v21, %v8450_v59  ;;  %v1182_v41 = vadd.f32 %v1176_v60, %v1142_v26  ;;  %v2323_v47 = vadd.f32 %v2317_v44, %v2296_v63  ;;  %v8455_v26 = vld [vmem:[#allocation144_spill] sm:$0xff]  ;;  %v8460_v44 = vld [vmem:[#allocation107_spill] sm:$0xff]  ;;  %v8462_v14 = vld [vmem:[#allocation109_spill] sm:$0xff] }
 0xba9   :  { %v2348_v61 = vadd.f32 %v8448_v17, %v2321_v24  ;;  %v2371_v9 = vsel %vm2370_vm3, %v8452_v48, %v8451_v7  ;;  %v1220_v46 = vadd.f32 %v8446_v33, %v1180_v6  ;;  %v1221_v18 = vadd.f32 %v1215_v55, %v1181_v42  ;;  %v8461_v24 = vld [vmem:[#allocation133_spill] sm:$0xff]  ;;  %v8463_v55 = vld [vmem:[#allocation134_spill] sm:$0xff] }
 0xbaa   :  { %v2349_v45 = vadd.f32 %v2343_v0, %v2322_v62  ;;  %v1544_v57 = vmul.f32 %v8437_v2, %v8453_v56  ;;  %v1222_v54 = vadd.f32 %v1216_v16, %v1182_v41  ;;  %v2350_v29 = vadd.f32 %v2344_v51, %v2323_v47  ;;  %v8464_v11 = vld [vmem:[#allocation146_spill] sm:$0xff]  ;;  %v8467_v56 = vld [vmem:[#allocation139_spill] sm:$0xff] }
 0xbab   :  { %v6574_v32 = vpop.permute.xlu0 %2512  ;;  %v6582_v3 = vpop.permute.xlu1 %1440  ;;  %v2376_v10 = vadd.f32 %v8452_v48, %v2348_v61  ;;  %v2411_v43 = vsel %vm2410_vm15, %v8455_v26, %v8454_v22  ;;  %v1243_v4 = vsel %vm1242_vm13, %v8457_v25, %v8456_v58  ;;  %v1244_v63 = vsel %vm1242_vm13, %v8456_v58, %v8458_v37  ;;  %v8471_v58 = vld [vmem:[#allocation140_spill] sm:$0xff] }
 0xbac   :  { %v2372_v2 = vsel %vm2370_vm3, %v8451_v7, %v8459_v27  ;;  %v2377_v60 = vadd.f32 %v2371_v9, %v2349_v45  ;;  %vm8171_vm10 = vcmask 629760   ;;  %v2429_v6 = vmul.f32 %v8460_v44, %v6469_v52  ;;  %v8466_v9 = vld [vmem:[#allocation60_spill] sm:$0xff] }
 0xbad   :  { %v1564_v33 = vsel %vm264_vm6, %v8462_v14, %v8461_v24  ;;  %v1565_v21 = vsel %vm264_vm6, %v8461_v24, %v8463_v55  ;;  %v2416_v17 = vadd.f32 %v8455_v26, %v2376_v10  ;;  %v2430_v0 = vmul.f32 %v8460_v44, %v6486_v36  ;;  %v8465_v36 = vld [vmem:[#allocation63_spill] sm:$0xff]  ;;  %v8468_v10 = vld [vmem:[#allocation138_spill] sm:$0xff] }
 0xbae   :  { %v2431_v42 = vmul.f32 %v8460_v44, %v6482_v5  ;;  %v2417_v62 = vadd.f32 %v2411_v43, %v2377_v60  ;;  %v2412_v52 = vsel %vm2410_vm15, %v8454_v22, %v8464_v11  ;;  %v1248_v16 = vadd.f32 %v8457_v25, %v1220_v46  ;;  %v8473_v44 = vld [vmem:[#allocation151_spill] sm:$0xff] }
 0xbaf   :  { %v6595_v53 = vpop.permute.xlu0 %1442  ;;  %v6606_v49 = vpop.permute.xlu1 %1444  ;;  %v1249_v59 = vadd.f32 %v1243_v4, %v1221_v18  ;;  %v1250_v51 = vadd.f32 %v1244_v63, %v1222_v54  ;;  %v2378_v41 = vadd.f32 %v2372_v2, %v2350_v29  ;;  %v1569_v61 = vadd.f32 %v1564_v33, %v1542_v35  ;;  %v8470_v54 = vld [vmem:[#allocation141_spill] sm:$0xff]  ;;  %v8472_v4 = vld [vmem:[#allocation143_spill] sm:$0xff] }
 0xbb0   :  { %v1570_v7 = vadd.f32 %v1565_v21, %v1543_v40  ;;  %v1571_v48 = vadd.f32 %v8463_v55, %v1544_v57  ;;  %v2457_v5 = vsel %vm264_vm6, %v8466_v9, %v8465_v36  ;;  %v1271_v22 = vsel %vm1270_vm4, %v8468_v10, %v8467_v56  ;;  %v8469_v57 = vld [vmem:[#allocation142_spill] sm:$0xff]  ;;  %v8477_v9 = vld [vmem:[#allocation149_spill] sm:$0xff] }
 0xbb1   :  { %v2418_v46 = vadd.f32 %v2412_v52, %v2378_v41  ;;  %vm8172_vm15 = vcmask 621568   ;;  %v2432_v18 = vadd.f32 %v2429_v6, %v2416_v17  ;;  %v2458_v35 = vsel %vm264_vm6, %v8465_v36, %v6349_v38  ;;  %v8474_v6 = vld [vmem:[#allocation150_spill] sm:$0xff] }
 0xbb2   :  { %v1276_v40 = vadd.f32 %v8468_v10, %v1248_v16  ;;  %v1591_v29 = vsel %vm859_vm8, %v8470_v54, %v8469_v57  ;;  %v2433_v26 = vadd.f32 %v2430_v0, %v2417_v62  ;;  %v2484_v43 = vsel %vm859_vm8, %v6425_v1, %v6445_v28  ;;  %v8475_v16 = vld [vmem:[#allocation148_spill] sm:$0xff]  ;;  %v8479_v10 = vld [vmem:[#allocation61_spill] sm:$0xff]  ;;  %v8480_v54 = vld [vmem:[#allocation62_spill] sm:$0xff] }
 0xbb3   :  { %v6625_v47 = vpop.permute.xlu0 %1715  ;;  %v6631_v45 = vpop.permute.xlu1 %1717  ;;  %v1272_v25 = vsel %vm1270_vm4, %v8467_v56, %v8471_v58  ;;  %v1592_v37 = vsel %vm859_vm8, %v8469_v57, %v8472_v4  ;;  %v2462_v63 = vadd.f32 %v2457_v5, %v2432_v18  ;;  %v2485_v27 = vsel %vm859_vm8, %v6445_v28, %v6448_v23  ;;  %v8478_v56 = vld [vmem:[#allocation152_spill] sm:$0xff] }
 0xbb4   :  { %v1277_v60 = vadd.f32 %v1271_v22, %v1249_v59  ;;  %v1618_v1 = vsel %vm362_vm12, %v8474_v6, %v8473_v44  ;;  %v2463_v24 = vadd.f32 %v2458_v35, %v2433_v26  ;;  %v2514_v14 = vsel %vm1883_vm2, %v6545_v30, %v6549_v8  ;;  %v8476_v59 = vld [vmem:[#allocation147_spill] sm:$0xff] }
 0xbb5   :  { %v1596_v55 = vadd.f32 %v1591_v29, %v1569_v61  ;;  %v2434_v21 = vadd.f32 %v2431_v42, %v2418_v46  ;;  %v2489_v17 = vadd.f32 %v2484_v43, %v2462_v63  ;;  %vm8174_vm3 = vcmask 515072  }
 0xbb6   :  { %v2515_v28 = vsel %vm1883_vm2, %v6549_v8, %v6574_v32  ;;  %v1278_v0 = vadd.f32 %v1272_v25, %v1250_v51  ;;  %v1598_v62 = vadd.f32 %v8472_v4, %v1571_v48  ;;  %v1597_v11 = vadd.f32 %v1592_v37, %v1570_v7  ;;  %v8481_v37 = vld [vmem:[#allocation153_spill] sm:$0xff] }
 0xbb7   :  { %v6655_v2 = vpop.permute.xlu0 %1719  ;;  %v2539_v33 = vpop.permute.xlu1 %2538  ;;  %v2490_v52 = vadd.f32 %v2485_v27, %v2463_v24  ;;  %v1299_v41 = vsel %vm8171_vm10, %v8476_v59, %v8475_v16  ;;  %v1623_v36 = vadd.f32 %v1618_v1, %v1596_v55  ;;  %v2464_v30 = vadd.f32 %v6349_v38, %v2434_v21 }
 0xbb8   :  { %v2519_v61 = vadd.f32 %v2514_v14, %v2489_v17  ;;  %v1300_v5 = vsel %vm8171_vm10, %v8475_v16, %v8477_v9  ;;  %v1619_v8 = vsel %vm362_vm12, %v8473_v44, %v8478_v56  ;;  %v1304_v35 = vadd.f32 %v8476_v59, %v1276_v40  ;;  %v8482_v40 = vld [vmem:[#allocation154_spill] sm:$0xff]  ;;  %v8484_v17 = vld [vmem:[#allocation64_spill] sm:$0xff] }
 0xbb9   :  { %v2520_v51 = vadd.f32 %v2515_v28, %v2490_v52  ;;  %v1645_v22 = vadd.f32 %v8479_v10, %v1623_v36  ;;  %v2491_v46 = vadd.f32 %v6448_v23, %v2464_v30  ;;  %v1305_v57 = vadd.f32 %v1299_v41, %v1277_v60  ;;  %v8485_v28 = vld [vmem:[#allocation66_spill] sm:$0xff] }
 0xbba   :  { %v1641_v29 = vsel %vm407_vm1, %v8479_v10, %v8480_v54  ;;  %v1306_v43 = vadd.f32 %v1300_v5, %v1278_v0  ;;  %v1624_v58 = vadd.f32 %v1619_v8, %v1597_v11  ;;  %v1344_v63 = vadd.f32 %v8481_v37, %v1304_v35 }
 0xbbb   :  { %v2541_v42 = vpop.permute.xlu0 %2540  ;;  %v2543_v7 = vpop.permute.xlu1 %2542  ;;  %v1672_v25 = vadd.f32 %v6397_v20, %v1645_v22  ;;  %v2521_v4 = vadd.f32 %v6574_v32, %v2491_v46  ;;  %v1625_v27 = vadd.f32 %v8478_v56, %v1598_v62  ;;  %v1339_v60 = vsel %vm8172_vm15, %v8481_v37, %v8482_v40 }
 0xbbc   :  { %v2544_v48 = vsel %vm1933_vm0, %v2539_v33, %v2541_v42  ;;  %v2545_v38 = vsel %vm1933_vm0, %v2541_v42, %v2543_v7  ;;  %v1667_v44 = vsel %vm1174_vm9, %v6397_v20, %v6403_v39  ;;  %v1646_v1 = vadd.f32 %v1641_v29, %v1624_v58  ;;  %v8483_v33 = vld [vmem:[#allocation155_spill] sm:$0xff]  ;;  %v8491_v42 = vld [vmem:[#allocation65_spill] sm:$0xff] }
 0xbbd   :  { %v2549_v18 = vadd.f32 %v2544_v48, %v2519_v61  ;;  %v2550_v26 = vadd.f32 %v2545_v38, %v2520_v51  ;;  %v1668_v32 = vsel %vm1174_vm9, %v6403_v39, %v6422_v15  ;;  %v1699_v24 = vadd.f32 %v6500_v31, %v1672_v25 }
 0xbbe   :  { %v2551_v14 = vadd.f32 %v2543_v7, %v2521_v4  ;;  %v1340_v55 = vsel %vm8172_vm15, %v8482_v40, %v8483_v33  ;;  %v1647_v21 = vadd.f32 %v8480_v54, %v1625_v27  ;;  %vm8486_vm0 = vcmask 523264   ;;  %v8498_v33 = vld [vmem:[#allocation76_spill] sm:$0xff] }
 0xbbf   :  { %2580 = vrot.lane.b32.xlu1 %v2549_v18, %s4396_s12  ;;  %v1481_v23 = vpop.permute.xlu0 %1480  ;;  %v1483_v6 = vpop.permute.xlu1 %1482  ;;  %2582 = vrot.lane.b32.xlu0 %v2550_v26, %s4396_s12  ;;  %v1379_v20 = vsel %vm8486_vm0, %v8485_v28, %v8484_v17  ;;  %vm8487_vm2 = vmmov %vm8486_vm0  ;;  %v1345_v62 = vadd.f32 %v1339_v60, %v1305_v57  ;;  %v1673_v11 = vadd.f32 %v1667_v44, %v1646_v1  ;;  %vm8173_vm15 = vcmask 498688  }
 0xbc0   :  { %v1694_v0 = vsel %vm8487_vm2, %v6500_v31, %v6518_v34  ;;  %vm8488_vm10 = vmmov %vm8486_vm0  ;;  %v1726_v15 = vadd.f32 %v6625_v47, %v1699_v24  ;;  %v1384_v16 = vadd.f32 %v8485_v28, %v1344_v63  ;;  %v1674_v59 = vadd.f32 %v1668_v32, %v1647_v21  ;;  %v8495_v32 = vld [vmem:[#allocation41_spill] sm:$0xff]  ;;  %v8496_v24 = vld [vmem:[#allocation38_spill] sm:$0xff] }
 0xbc1   :  { %v1695_v39 = vsel %vm8488_vm10, %v6518_v34, %v6524_v50  ;;  %v1419_v41 = vsel %vm8174_vm3, %v6462_v12, %v6465_v13  ;;  %vm8489_vm0 = vcmask 506880   ;;  %v1385_v30 = vadd.f32 %v1379_v20, %v1345_v62  ;;  %v8500_v28 = vld [vmem:[#allocation77_spill] sm:$0xff]  ;;  %v8502_v62 = vld [vmem:[#allocation39_spill] sm:$0xff] }
 0xbc2   :  { %v1721_v31 = vsel %vm8489_vm0, %v6625_v47, %v6631_v45  ;;  %v1700_v61 = vadd.f32 %v1694_v0, %v1673_v11  ;;  %vm8490_vm10 = vmmov %vm8489_vm0  ;;  %v1380_v9 = vsel %vm8487_vm2, %v8484_v17, %v8491_v42  ;;  %v1424_v5 = vadd.f32 %v6462_v12, %v1384_v16  ;;  %v8501_v0 = vld [vmem:[#allocation43_spill] sm:$0xff] }
 0xbc3   :  { %2584 = vrot.lane.b32.xlu1 %v2551_v14, %s4396_s12  ;;  %v1485_v52 = vpop.permute.xlu0 %1484  ;;  %v1743_v36 = vpop.permute.xlu1 %1742  ;;  %v1722_v34 = vsel %vm8490_vm10, %v6631_v45, %v6655_v2  ;;  %v1701_v56 = vadd.f32 %v1695_v39, %v1674_v59  ;;  %v1346_v8 = vadd.f32 %v1340_v55, %v1306_v43  ;;  %v1425_v51 = vadd.f32 %v1419_v41, %v1385_v30  ;;  %v8499_v55 = vld [vmem:[#allocation29_spill] sm:$0xff]  ;;  %v8506_v41 = vld [vmem:[#allocation40_spill] sm:$0xff]  ;;  %s8550_s12 = smov 34  }
 0xbc4   :  { %v1753_v50 = vadd.f32 %v1743_v36, %v1726_v15  ;;  %v1447_v47 = vsel %vm8489_vm0, %v6582_v3, %v6595_v53  ;;  %v1727_v7 = vadd.f32 %v1721_v31, %v1700_v61  ;;  %v1420_v45 = vsel %vm8174_vm3, %v6465_v13, %v6494_v19  ;;  %v8505_v59 = vld [vmem:[#allocation45_spill] sm:$0xff] }
 0xbc5   :  { %v1452_v2 = vadd.f32 %v6582_v3, %v1424_v5  ;;  %v1728_v10 = vadd.f32 %v1722_v34, %v1701_v56  ;;  %vm8492_vm10 = vcmask 490496   ;;  %v1386_v46 = vadd.f32 %v1380_v9, %v1346_v8  ;;  %v8510_v5 = vld [vmem:[#allocation50_spill] sm:$0xff] }
 0xbc6   :  { %2569 = vrot.lane.b32.xlu0 %v1753_v50, %s4341_s25  ;;  %v1487_v38 = vsel %vm8173_vm15, %v1481_v23, %v1483_v6  ;;  %vm8493_vm2 = vmmov %vm8492_vm10  ;;  %v1448_v57 = vsel %vm8489_vm0, %v6595_v53, %v6606_v49  ;;  %v1453_v54 = vadd.f32 %v1447_v47, %v1425_v51  ;;  %v1488_v43 = vsel %vm8173_vm15, %v1483_v6, %v1485_v52  ;;  %v8503_v52 = vld [vmem:[#allocation37_spill] sm:$0xff]  ;;  %v8509_v50 = vld [vmem:[#allocation42_spill] sm:$0xff] }
 0xbc7   :  { %v1745_v48 = vpop.permute.xlu0 %1744  ;;  %v1747_v12 = vpop.permute.xlu1 %1746  ;;  %v1492_v29 = vadd.f32 %v1481_v23, %v1452_v2  ;;  %v1426_v13 = vadd.f32 %v1420_v45, %v1386_v46  ;;  %vm2586_vm0 = vcmask 416768   ;;  %v450_v21 = vmul.f32 %v8499_v55, %v8498_v33  ;;  %v8511_v56 = vld [vmem:[#allocation46_spill] sm:$0xff]  ;;  %v8515_v2 = vld [vmem:[#allocation44_spill] sm:$0xff]  ;;  %v8518_v46 = vld [vmem:[#allocation51_spill] sm:$0xff] }
 0xbc8   :  { %v1748_v22 = vsel %vm8492_vm10, %v1743_v36, %v1745_v48  ;;  %v1749_v18 = vsel %vm8493_vm2, %v1745_v48, %v1747_v12  ;;  %v1493_v3 = vadd.f32 %v1487_v38, %v1453_v54  ;;  %vm8494_vm10 = vmmov %vm8493_vm2  ;;  %v451_v20 = vmul.f32 %v8499_v55, %v8500_v28  ;;  %v8508_v36 = vld [vmem:[#allocation75_spill] sm:$0xff] }
 0xbc9   :  { %v1754_v35 = vadd.f32 %v1748_v22, %v1727_v7  ;;  %v1755_v26 = vadd.f32 %v1749_v18, %v1728_v10  ;;  %v1454_v4 = vadd.f32 %v1448_v57, %v1426_v13  ;;  %v502_v11 = vsel %vm264_vm6, %v8502_v62, %v8501_v0  ;;  %v8517_v22 = vld [vmem:[#allocation47_spill] sm:$0xff]  ;;  %v8520_v57 = vld [vmem:[#allocation52_spill] sm:$0xff] }
 0xbca   :  { %v478_v15 = vadd.f32 %v8495_v32, %v451_v20  ;;  %v449_v30 = vmul.f32 %v8499_v55, %v8508_v36  ;;  %v501_v42 = vsel %vm264_vm6, %v8509_v50, %v8502_v62  ;;  %vm8516_vm15 = vcmask 916480   ;;  %v8522_v13 = vld [vmem:[#allocation48_spill] sm:$0xff]  ;;  %v8533_v28 = vld [vmem:[#allocation59_spill] sm:$0xff]  ;;  %v8535_v36 = vld [vmem:[#allocation5_spill] sm:$0xff] }
 0xbcb   :  { %2571 = vrot.lane.b32.xlu1 %v1754_v35, %s4341_s25  ;;  %v1521_v19 = vpop.permute.xlu0 %1520  ;;  %v1523_v58 = vpop.permute.xlu1 %1522  ;;  %2573 = vrot.lane.b32.xlu0 %v1755_v26, %s4341_s25  ;;  %v1494_v27 = vadd.f32 %v1488_v43, %v1454_v4  ;;  %v531_v10 = vsel %vm8516_vm15, %v8515_v2, %v8506_v41  ;;  %vm8519_vm3 = vcmask 900096   ;;  %v8524_v4 = vld [vmem:[#allocation54_spill] sm:$0xff]  ;;  %v4243_v50 = vld [vmem:[%s7985_s4 + $0xe0] sm:$0xff]  ;;  %v4247_v2 = vld [vmem:[%s7985_s4 + $0xf8] sm:$0xff] }
 0xbcc   :  { %v1532_v25 = vadd.f32 %v1521_v19, %v1492_v29  ;;  %v1527_v37 = vsel %vm8494_vm10, %v1521_v19, %v1523_v58  ;;  %vm8497_vm10 = vcmask 1039360   ;;  %v508_v9 = vadd.f32 %v8501_v0, %v478_v15  ;;  %v8523_v19 = vld [vmem:[#allocation53_spill] sm:$0xff] }
 0xbcd   :  { %v1533_v63 = vadd.f32 %v1527_v37, %v1493_v3  ;;  %v472_v14 = vsel %vm8497_vm10, %v8496_v24, %v8495_v32  ;;  %v586_v38 = vsel %vm8519_vm3, %v8518_v46, %v8517_v22  ;;  %v616_v3 = vsel %vm362_vm12, %v8523_v19, %v8522_v13 }
 0xbce   :  { %v477_v39 = vadd.f32 %v472_v14, %v450_v21  ;;  %v538_v12 = vadd.f32 %v8505_v59, %v508_v9  ;;  %v617_v37 = vsel %vm362_vm12, %v8522_v13, %v8524_v4  ;;  %v8532_v14 = vld [vmem:[#allocation57_spill] sm:$0xff]  ;;  %v4259_v13 = vld [vmem:[%s7985_s4 + $0x158] sm:$0xff] }
 0xbcf   :  { %2558 = vrot.lane.b32.xlu1 %v1532_v25, %s4341_s25  ;;  %v1525_v53 = vpop.permute.xlu0 %1524  ;;  %2560 = vrot.lane.b32.xlu0 %v1533_v63, %s4341_s25 }
 0xbd0   :  { %v1528_v49 = vsel %vm8493_vm2, %v1523_v58, %v1525_v53  ;;  %vm8504_vm2 = vmmov %vm8497_vm10  ;;  %v507_v61 = vadd.f32 %v502_v11, %v477_v39  ;;  %vm8512_vm10 = vcmask 908288   ;;  %v560_v26 = vadd.f32 %v8510_v5, %v538_v12  ;;  %v8526_v53 = vld [vmem:[#allocation49_spill] sm:$0xff]  ;;  %v4249_v12 = vld [vmem:[%s7985_s4 + $0x108] sm:$0xff] }
 0xbd1   :  { %v1534_v23 = vadd.f32 %v1528_v49, %v1494_v27  ;;  %v471_v16 = vsel %vm8504_vm2, %v8503_v52, %v8496_v24  ;;  %v554_v8 = vsel %vm8512_vm10, %v8511_v56, %v8510_v5  ;;  %vm8513_vm2 = vcmask 138240   ;;  %vm8521_vm10 = vmmov %vm8519_vm3  ;;  %v8527_v49 = vld [vmem:[#allocation55_spill] sm:$0xff]  ;;  %v8531_v24 = vld [vmem:[#allocation58_spill] sm:$0xff] }
 0xbd2   :  { %v476_v7 = vadd.f32 %v471_v16, %v449_v30  ;;  %v587_v54 = vsel %vm8521_vm10, %v8517_v22, %v8520_v57  ;;  %vm8528_vm3 = vcmask 777216   ;;  %v673_v33 = vsel %vm407_vm1, %v8532_v14, %v8531_v24  ;;  %v4239_v52 = vld [vmem:[%s7982_s2 + $0x4] sm:$0x3]  ;;  %v4244_v5 = vld [vmem:[%s7982_s2 + $0x8] sm:$0x3]  ;;  %v4250_v22 = vld [vmem:[%s7985_s4 + $0x110] sm:$0xff] }
 0xbd3   :  { %2562 = vrot.lane.b32.xlu1 %v1534_v23, %s4341_s25  ;;  %v593_v27 = vadd.f32 %v587_v54, %v560_v26  ;;  %v643_v23 = vsel %vm8528_vm3, %v8527_v49, %v8526_v53  ;;  %v674_v20 = vsel %vm407_vm1, %v8531_v24, %v8533_v28  ;;  %v6835_v30 = vrot.slane %v4239_v52, %v8535_v36  ;;  %v4255_v57 = vld [vmem:[%s7985_s4 + $0x138] sm:$0xff]  ;;  %v4256_v54 = vld [vmem:[%s7985_s4 + $0x140] sm:$0xff]  ;;  %v4258_v26 = vld [vmem:[%s7985_s4 + $0x150] sm:$0xff] }
 0xbd4   :  { %v506_v18 = vadd.f32 %v501_v42, %v476_v7  ;;  %v4246_v7 = vld [vmem:[%s7985_s4 + $0xf0] sm:$0xff]  ;;  %v4263_v24 = vld [vmem:[%s7985_s4 + $0x178] sm:$0xff]  ;;  %v2552_v28 = vld [vmem:[%s7986_s5] sm:$0xff] }
 0xbd5   :  { %v623_v32 = vadd.f32 %v617_v37, %v593_v27  ;;  %v4261_v37 = vld [vmem:[%s7985_s4 + $0x168] sm:$0xff] }
 0xbd6   :  { %v536_v58 = vadd.f32 %v531_v10, %v506_v18  ;;  %v4248_v10 = vld [vmem:[%s7985_s4 + $0x100] sm:$0xff]  ;;  %v4253_v18 = vld [vmem:[%s7985_s4 + $0x128] sm:$0xff] }
 0xc31   :  { %v2581_v40 = vpop.permute.xlu1 %2580  ;;  %v2583_v60 = vpop.permute.xlu0 %2582 }
 0xc32   :  { %v2587_v44 = vsel %vm2586_vm0, %v2581_v40, %v2583_v60 }
 0xc33   :  { %2612 = vrot.lane.b32.xlu0 %v2587_v44, %s4341_s25  ;;  %v8529_v44 = vld [vmem:[#allocation56_spill] sm:$0xff] }
 0xc35   :  { %v2585_v6 = vpop.permute.xlu1 %2584 }
 0xc36   :  { %v2588_v1 = vsel %vm2586_vm0, %v2583_v60, %v2585_v6  ;;  %vm8507_vm0 = vcmask 916480  }
 0xc37   :  { %2614 = vrot.lane.b32.xlu1 %v2588_v1, %s4341_s25  ;;  %2610 = vrot.lane.b32.xlu0 %v2581_v40, %s4341_s25  ;;  %v532_v31 = vsel %vm8507_vm0, %v8506_v41, %v8505_v59  ;;  %vm8514_vm0 = vmmov %vm8513_vm2  ;;  %v558_v40 = vadd.f32 %v8511_v56, %v536_v58  ;;  %v4240_v59 = vld [vmem:[%s7985_s4 + $0xd0] sm:$0xff]  ;;  %v8534_v41 = vld [vmem:[#allocation6_spill] sm:$0xff] }
 0xc38   :  { %v2570_v17 = vpop.permute.xlu0 %2569  ;;  %v537_v48 = vadd.f32 %v532_v31, %v507_v61  ;;  %vm8525_vm15 = vmmov %vm8514_vm0  ;;  %v6832_v31 = vrot.slane %v4239_v52, %v8534_v41  ;;  %v4241_v61 = vld [vmem:[%s7985_s4 + $0xd8] sm:$0xff]  ;;  %v6864_v56 = vrot.slane %v4244_v5, %v8534_v41 }
 0xc39   :  { %v591_v21 = vadd.f32 %v8518_v46, %v558_v40  ;;  %v4251_v46 = vld [vmem:[%s7985_s4 + $0x118] sm:$0xff]  ;;  %vm8541_vm10 = vmmov %vm8514_vm0 }
 0xc3a   :  { %v559_v35 = vadd.f32 %v554_v8, %v537_v48  ;;  %v4245_v8 = vld [vmem:[%s7985_s4 + $0xe8] sm:$0xff] }
 0xc3b   :  { %v621_v62 = vadd.f32 %v8523_v19, %v591_v21 }
 0xc3c   :  { %v592_v25 = vadd.f32 %v586_v38, %v559_v35  ;;  %v4252_v38 = vld [vmem:[%s7985_s4 + $0x120] sm:$0xff]  ;;  %v4254_v35 = vld [vmem:[%s7985_s4 + $0x130] sm:$0xff] }
 0xc3d   :  { %v2572_v34 = vpop.permute.xlu1 %2571  ;;  %v2574_v51 = vpop.permute.xlu0 %2573  ;;  %v648_v15 = vadd.f32 %v8527_v49, %v621_v62  ;;  %v7017_v62 = vld [vmem:[#allocation2] sm:$0xff] }
 0xc3e   :  { %v2575_v47 = vsel %vm8513_vm2, %v2570_v17, %v2572_v34  ;;  %v2576_v45 = vsel %vm8514_vm0, %v2572_v34, %v2574_v51  ;;  %v622_v60 = vadd.f32 %v616_v3, %v592_v25  ;;  %vm8530_vm2 = vmmov %vm8528_vm3  ;;  %v4242_v34 = vld [vmem:[%s7982_s2 + $0x6] sm:$0x3]  ;;  %v6870_v51 = vrot.slane %v4244_v5, %v8535_v36 }
 0xc3f   :  { %2606 = vrot.lane.b32.xlu1 %v2575_v47, %s4341_s25  ;;  %2608 = vrot.lane.b32.xlu0 %v2576_v45, %s4341_s25  ;;  %v644_v6 = vsel %vm8530_vm2, %v8526_v53, %v8529_v44  ;;  %v678_v16 = vadd.f32 %v8532_v14, %v648_v15  ;;  %v6851_v42 = vrot.slane %v4242_v34, %v8534_v41  ;;  %v4237_v47 = vld [vmem:[%s7982_s2 + $0x2] sm:$0x3]  ;;  %vm8543_vm3 = vmmov %vm8514_vm0 }
 0xc40   :  { %v650_v0 = vadd.f32 %v644_v6, %v623_v32  ;;  %v6854_v9 = vrot.slane %v4242_v34, %v8535_v36  ;;  %v6883_v48 = vrot.slane %v4237_v47, %v8534_v41  ;;  %v6886_v45 = vrot.slane %v4237_v47, %v8535_v36  ;;  %vm8544_vm2 = vmmov %vm8514_vm0 }
 0xc41   :  { %v2559_v29 = vpop.permute.xlu1 %2558  ;;  %v2561_v43 = vpop.permute.xlu0 %2560 }
 0xc42   :  { %v2564_v63 = vsel %vm8525_vm15, %v2559_v29, %v2561_v43  ;;  %v680_v39 = vadd.f32 %v674_v20, %v650_v0  ;;  %vm8542_vm15 = vmmov %vm8514_vm0  ;;  %v4265_v0 = vld [vmem:[%s7985_s4 + $0x188] sm:$0xff] }
 0xc43   :  { %2604 = vrot.lane.b32.xlu1 %v2570_v17, %s4341_s25  ;;  %2600 = vrot.lane.b32.xlu0 %v2564_v63, %s4341_s25  ;;  %v649_v17 = vadd.f32 %v643_v23, %v622_v60  ;;  %v4262_v23 = vld [vmem:[%s7985_s4 + $0x170] sm:$0xff] }
 0xc45   :  { %v2563_v1 = vpop.permute.xlu1 %2562  ;;  %v679_v11 = vadd.f32 %v673_v33, %v649_v17  ;;  %v4264_v33 = vld [vmem:[%s7985_s4 + $0x180] sm:$0xff] }
 0xc46   :  { %v2565_v55 = vsel %vm8514_vm0, %v2561_v43, %v2563_v1  ;;  %v4260_v43 = vld [vmem:[%s7985_s4 + $0x160] sm:$0xff] }
 0xc47   :  { %2602 = vrot.lane.b32.xlu1 %v2565_v55, %s4341_s25  ;;  %2598 = vrot.lane.b32.xlu0 %v2559_v29, %s4341_s25  ;;  %v4257_v29 = vld [vmem:[%s7985_s4 + $0x148] sm:$0xff] }
 0xc4b   :  { %2594 = vrot.lane.b32.xlu1 %v679_v11, %s4341_s25  ;;  %2596 = vrot.lane.b32.xlu0 %v680_v39, %s4341_s25  ;;  %v2553_v11 = vld [vmem:[%s7986_s5 + $0x8] sm:$0xff] }
 0xc4c   :  { %v4238_v39 = vld [vmem:[%s7985_s4 + $0xc8] sm:$0xff]  ;;  %s8554_s4 = smov 125  }
 0xc4f   :  { %2592 = vrot.lane.b32.xlu1 %v678_v16, %s4341_s25  ;;  %3117 = vperm.xlu0 %4326, %v4240_v59  }
 0xc53   :  { %3102 = vrot.lane.b32.xlu1 %v6832_v31, %s4350_s16  ;;  %3104 = vrot.lane.b32.xlu0 %v6835_v30, %s4350_s16 }
 0xc57   :  { %3144 = vperm.xlu1 %4325, %v4241_v61   ;;  %3192 = vperm.xlu0 %4326, %v4243_v50  }
 0xc5b   :  { %3177 = vrot.lane.b32.xlu1 %v6851_v42, %s4355_s19  ;;  %3179 = vrot.lane.b32.xlu0 %v6854_v9, %s4355_s19  ;;  %s8538_s19 = smov 2  }
 0xc5f   :  { %3240 = vperm.xlu1 %4325, %v4245_v8   ;;  %3225 = vrot.lane.b32.xlu0 %v6864_v56, %s4357_s29 }
 0xc63   :  { %3227 = vrot.lane.b32.xlu1 %v6870_v51, %s4357_s29  ;;  %3278 = vperm.xlu0 %4326, %v4246_v7   ;;  %s8536_s29 = smov 127  }
 0xc67   :  { %3263 = vrot.lane.b32.xlu1 %v6883_v48, %s4352_s21  ;;  %3265 = vrot.lane.b32.xlu0 %v6886_v45, %s4352_s21 }
 0xc6b   :  { %3316 = vperm.xlu1 %4325, %v4247_v2   ;;  %3301 = vrot.lane.b32.xlu0 %v6832_v31, %s4349_s15 }
 0xc6f   :  { %3303 = vrot.lane.b32.xlu1 %v6835_v30, %s4349_s15  ;;  %3343 = vperm.xlu0 %4326, %v4248_v10  }
 0xc73   :  { %3381 = vperm.xlu1 %4325, %v4249_v12   ;;  %3366 = vrot.lane.b32.xlu0 %v6851_v42, %s4347_s13 }
 0xc77   :  { %3368 = vrot.lane.b32.xlu1 %v6854_v9, %s4347_s13  ;;  %3419 = vperm.xlu0 %4326, %v4250_v22  }
 0xc7b   :  { %3404 = vrot.lane.b32.xlu1 %v6864_v56, %s4360_s9  ;;  %3406 = vrot.lane.b32.xlu0 %v6870_v51, %s4360_s9  ;;  %s8539_s9 = smov 14  }
 0xc7f   :  { %3457 = vperm.xlu1 %4325, %v4251_v46   ;;  %3442 = vrot.lane.b32.xlu0 %v6883_v48, %s4351_s1 }
 0xc83   :  { %3444 = vrot.lane.b32.xlu1 %v6886_v45, %s4351_s1  ;;  %3495 = vperm.xlu0 %4326, %v4252_v38  }
 0xc87   :  { %3480 = vrot.lane.b32.xlu1 %v6832_v31, %s8536_s29  ;;  %3482 = vrot.lane.b32.xlu0 %v6835_v30, %s8536_s29 }
 0xc8b   :  { %3522 = vperm.xlu1 %4325, %v4253_v18   ;;  %3558 = vperm.xlu0 %4326, %v4254_v35  }
 0xc8f   :  { %3543 = vrot.lane.b32.xlu1 %v6851_v42, %s8537_s17  ;;  %3545 = vrot.lane.b32.xlu0 %v6854_v9, %s8537_s17 }
 0xc93   :  { %3596 = vperm.xlu1 %4325, %v4255_v57   ;;  %3581 = vrot.lane.b32.xlu0 %v6864_v56, %s8538_s19 }
 0xc97   :  { %3583 = vrot.lane.b32.xlu1 %v6870_v51, %s8538_s19  ;;  %3634 = vperm.xlu0 %4326, %v4256_v54  }
 0xc9b   :  { %3619 = vrot.lane.b32.xlu1 %v6883_v48, %s8539_s9  ;;  %3621 = vrot.lane.b32.xlu0 %v6886_v45, %s8539_s9  ;;  %s8557_s9 = smov 112  }
 0xc9f   :  { %3672 = vperm.xlu1 %4325, %v4257_v29   ;;  %3657 = vrot.lane.b32.xlu0 %v6832_v31, %s8540_s28 }
 0xca3   :  { %3659 = vrot.lane.b32.xlu1 %v6835_v30, %s8540_s28  ;;  %3699 = vperm.xlu0 %4326, %v4258_v26  }
 0xca5   :  { %v2613_v19 = vpop.permute.xlu0 %2612 }
 0xca7   :  { %3737 = vperm.xlu1 %4325, %v4259_v13   ;;  %3722 = vrot.lane.b32.xlu0 %v6851_v42, %s4341_s25 }
 0xca9   :  { %v2615_v3 = vpop.permute.xlu1 %2614  ;;  %v2611_v58 = vpop.permute.xlu0 %2610 }
 0xcaa   :  { %v2623_v25 = vsel %vm8541_vm10, %v2613_v19, %v2615_v3  ;;  %v2622_v4 = vsel %vm8542_vm15, %v2611_v58, %v2613_v19  ;;  %vm8546_vm10 = vmmov %vm8514_vm0 }
 0xcab   :  { %2665 = vmatprep.subr.mxu0 %v2623_v25  ;;  %3724 = vrot.lane.b32.xlu1 %v6854_v9, %s4341_s25  ;;  %vm8547_vm15 = vmmov %vm8514_vm0 }
 0xcac   :  { %3775 = vperm.xlu0 %4326, %v4260_v43   ;;  %2666 = vmatpush1.msra.mxu0 %v2622_v4 }
 0xcaf   :  { %3760 = vrot.lane.b32.xlu1 %v6864_v56, %s4374_s20 }
 0xcb0   :  { %3762 = vrot.lane.b32.xlu0 %v6870_v51, %s4374_s20  ;;  %s8545_s20 = smov 31  }
 0xcb1   :  { %v2607_v63 = vpop.permute.xlu1 %2606  ;;  %v2609_v27 = vpop.permute.xlu0 %2608 }
 0xcb2   :  { %v2621_v53 = vsel %vm8543_vm3, %v2607_v63, %v2609_v27  ;;  %vm8548_vm3 = vmmov %vm8514_vm0 }
 0xcb3   :  { %3813 = vperm.xlu1 %4325, %v4261_v37   ;;  %2667 = vmatprep.subr.mxu0 %v2621_v53 }
 0xcb4   :  { %3798 = vrot.lane.b32.xlu0 %v6883_v48, %s4370_s18 }
 0xcb5   :  { %v2605_v49 = vpop.permute.xlu1 %2604  ;;  %v2601_v40 = vpop.permute.xlu0 %2600 }
 0xcb6   :  { %v2620_v60 = vsel %vm8544_vm2, %v2605_v49, %v2607_v63  ;;  %vm8551_vm2 = vcmask 777216  }
 0xcb7   :  { %2668 = vmatpush1.msra.mxu0 %v2620_v60  ;;  %3800 = vrot.lane.b32.xlu1 %v6886_v45, %s4370_s18 }
 0xcb8   :  { %3851 = vperm.xlu0 %4326, %v4262_v23  }
 0xcb9   :  { %v2603_v44 = vpop.permute.xlu1 %2602  ;;  %v2599_v6 = vpop.permute.xlu0 %2598 }
 0xcba   :  { %v2619_v1 = vsel %vm8514_vm0, %v2601_v40, %v2603_v44  ;;  %v2618_v32 = vsel %vm8546_vm10, %v2599_v6, %v2601_v40  ;;  %vm8552_vm0 = vcmask 793600   ;;  %vm8553_vm10 = vcmask 801792  }
 0xcbb   :  { %2669 = vmatprep.subr.mxu0 %v2619_v1  ;;  %3836 = vrot.lane.b32.xlu1 %v6832_v31, %s8545_s20 }
 0xcbc   :  { %3838 = vrot.lane.b32.xlu0 %v6835_v30, %s8545_s20  ;;  %2670 = vmatpush1.msra.mxu0 %v2618_v32  ;;  %s8573_s20 = smov 64  }
 0xcbd   :  { %v2595_v14 = vpop.permute.xlu1 %2594  ;;  %v2597_v55 = vpop.permute.xlu0 %2596 }
 0xcbe   :  { %v2617_v21 = vsel %vm8547_vm15, %v2595_v14, %v2597_v55  ;;  %vm8555_vm15 = vcmask 900096  }
 0xcbf   :  { %3878 = vperm.xlu1 %4325, %v4263_v24   ;;  %2671 = vmatprep.subr.mxu0 %v2617_v21 }
 0xcc0   :  { %3916 = vperm.xlu0 %4326, %v4264_v33  }
 0xcc1   :  { %v2593_v17 = vpop.permute.xlu1 %2592 }
 0xcc2   :  { %v2616_v20 = vsel %vm8548_vm3, %v2593_v17, %v2595_v14  ;;  %vm8556_vm3 = vcmask 908288  }
 0xcc3   :  { %3901 = vrot.lane.b32.xlu1 %v6851_v42, %s8549_s26  ;;  %2672 = vmatpush1.msra.mxu0 %v2616_v20 }
 0xcc4   :  { %3903 = vrot.lane.b32.xlu0 %v6854_v9, %s8549_s26  ;;  %4223 = vmatmul.mubr.msk.f32.vlgmr.msra.gmra.mxu0 %vm2288_vm11, %v2552_v28 }
 0xcc5   :  { %2711 = vmatprep.mubr.f32.mxu0 %v7017_v62  ;;  %v3103_v15 = vpop.permute.xlu1 %3102 }
 0xcc6   :  { %v3110_v52 = vmul.f32 %v7017_v62, %v3103_v15 }
 0xcc7   :  { %3954 = vperm.xlu1 %4325, %v4265_v0  }
 0xcc8   :  { %3939 = vrot.lane.b32.xlu0 %v6864_v56, %s8550_s12  ;;  %4224 = vmatmul.mubr.msk.f32.gmra.mxu0 %vm2288_vm11, %v2553_v11 }
 0xcc9   :  { %2717 = vmatprep.mubr.f32.mxu0 %v7017_v62 }
 0xcca   :  { %v3118_v16 = vpop.permute.xlu0 %3117 }
 0xccb   :  { %3941 = vrot.lane.b32.xlu1 %v6870_v51, %s8550_s12  ;;  %v3120_v59 = vmul.f32 %v3118_v16, %v3110_v52  ;;  %s8575_s12 = smov 63  }
 0xccc   :  { %3086 = vperm.xlu0 %4326, %v4238_v39  }
 0xcce   :  { %v3105_v31 = vpop.permute.xlu0 %3104 }
 0xccf   :  { %3071 = vrot.lane.b32.xlu1 %v6883_v48, %s4354_s23  ;;  %v3106_v19 = vsel %vm8551_vm2, %v3103_v15, %v3105_v31  ;;  %vm8558_vm2 = vcmask 924672  }
 0xcd0   :  { %3073 = vrot.lane.b32.xlu0 %v6886_v45, %s4354_s23 }
 0xcd2   :  { %v3145_v30 = vpop.permute.xlu1 %3144  ;;  %v3193_v61 = vpop.permute.xlu0 %3192 }
 0xcd3   :  { %3126 = vrot.lane.b32.xlu1 %v3120_v59, %s8536_s29  ;;  %v3147_v53 = vmul.f32 %v7017_v62, %v3145_v30 }
 0xcd6   :  { %v3178_v34 = vpop.permute.xlu1 %3177  ;;  %v3180_v50 = vpop.permute.xlu0 %3179 }
 0xcd7   :  { %v3185_v49 = vmul.f32 %v7017_v62, %v3178_v34  ;;  %v3181_v44 = vsel %vm8552_vm0, %v3178_v34, %v3180_v50  ;;  %vm8559_vm0 = vcmask 932864  }
 0xcd9   :  { %v3195_v32 = vmul.f32 %v3193_v61, %v3185_v49 }
 0xcda   :  { %v7038_v42 = vpop.permute.xlu1 %3240  ;;  %v3226_v9 = vpop.permute.xlu0 %3225 }
 0xcdb   :  { %v3233_v33 = vmul.f32 %v7017_v62, %v3226_v9 }
 0xcdd   :  { %v3243_v0 = vmul.f32 %v7038_v42, %v3233_v33 }
 0xcde   :  { %v3228_v5 = vpop.permute.xlu1 %3227  ;;  %v7040_v56 = vpop.permute.xlu0 %3278 }
 0xcdf   :  { %v3229_v14 = vsel %vm8553_vm10, %v3226_v9, %v3228_v5  ;;  %vm8562_vm10 = vcmask 1039360  }
 0xce2   :  { %v3264_v8 = vpop.permute.xlu1 %3263  ;;  %v7042_v51 = vpop.permute.xlu0 %3265 }
 0xce3   :  { %v3267_v39 = vsel %vm8555_vm15, %v3264_v8, %v7042_v51  ;;  %v3271_v15 = vmul.f32 %v7017_v62, %v3264_v8  ;;  %vm8563_vm15 = vcmask 7168  }
 0xce6   :  { %v7044_v47 = vpop.permute.xlu1 %3316  ;;  %v7046_v7 = vpop.permute.xlu0 %3301 }
 0xce7   :  { %v3309_v9 = vmul.f32 %v7017_v62, %v7046_v7 }
 0xcea   :  { %v7048_v48 = vpop.permute.xlu1 %3303  ;;  %v7050_v45 = vpop.permute.xlu0 %3343 }
 0xcee   :  { %v7052_v2 = vpop.permute.xlu1 %3381  ;;  %v7054_v10 = vpop.permute.xlu0 %3366 }
 0xcf2   :  { %v7056_v12 = vpop.permute.xlu1 %3368  ;;  %v7058_v22 = vpop.permute.xlu0 %3419 }
 0xcf6   :  { %v7060_v46 = vpop.permute.xlu1 %3404  ;;  %v7062_v38 = vpop.permute.xlu0 %3406 }
 0xcfa   :  { %v7064_v18 = vpop.permute.xlu1 %3457  ;;  %v7070_v54 = vpop.permute.xlu0 %3442 }
 0xcfe   :  { %v7072_v29 = vpop.permute.xlu1 %3444  ;;  %v7080_v25 = vpop.permute.xlu0 %3495 }
 0xd02   :  { %v7082_v4 = vpop.permute.xlu1 %3480  ;;  %v7089_v23 = vpop.permute.xlu0 %3482 }
 0xd06   :  { %v7091_v40 = vpop.permute.xlu1 %3522  ;;  %v7103_v55 = vpop.permute.xlu0 %3558 }
 0xd0a   :  { %v7105_v21 = vpop.permute.xlu1 %3543  ;;  %v7116_v52 = vpop.permute.xlu0 %3545 }
 0xd84   :  { %v7066_v35 = vpop.f32.mrf.mxu0 }
 0xd86   :  { %v7068_v57 = vpop.f32.mrf.mxu0 }
 0xd88   :  { %v2713_v26 = vpop.f32.mrf.mxu0 }
 0xd89   :  { %v7074_v13 = vmax.f32 %v2713_v26, 0.0 }
 0xd8a   :  { %v2715_v3 = vpop.f32.mrf.mxu0 }
 0xd8b   :  { %v7077_v43 = vmax.f32 %v2715_v3, 0.0  ;;  %v3111_v58 = vmul.f32 %v3106_v19, %v7074_v13  ;;  %v3148_v60 = vmul.f32 %v3145_v30, %v7074_v13  ;;  %v3186_v1 = vmul.f32 %v3181_v44, %v7074_v13 }
 0xd8c   :  { %v3234_v20 = vmul.f32 %v3229_v14, %v7074_v13  ;;  %v3319_v19 = vmul.f32 %v7044_v47, %v3309_v9 }
 0xd8d   :  { %v3121_v37 = vmul.f32 %v3118_v16, %v3111_v58  ;;  %v3112_v63 = vmul.f32 %v3105_v31, %v7077_v43  ;;  %v3149_v6 = vmul.f32 %v3145_v30, %v7077_v43  ;;  %v3187_v24 = vmul.f32 %v3180_v50, %v7077_v43 }
 0xd8e   :  { %v3196_v17 = vmul.f32 %v3193_v61, %v3186_v1  ;;  %v3235_v11 = vmul.f32 %v3228_v5, %v7077_v43  ;;  %v3244_v59 = vmul.f32 %v7038_v42, %v3234_v20  ;;  %v3272_v30 = vmul.f32 %v3267_v39, %v7074_v13  ;;  %v7134_v5 = vpop.permute.xlu0 %3581 }
 0xd8f   :  { %3128 = vrot.lane.b32.xlu0 %v3121_v37, %s8536_s29  ;;  %v3122_v27 = vmul.f32 %v3118_v16, %v3112_v63  ;;  %v3197_v28 = vmul.f32 %v3193_v61, %v3187_v24  ;;  %v7118_v16 = vpop.permute.xlu1 %3596  ;;  %v3281_v61 = vmul.f32 %v7040_v56, %v3271_v15  ;;  %v3273_v34 = vmul.f32 %v7042_v51, %v7077_v43 }
 0xd90   :  { %v3245_v31 = vmul.f32 %v7038_v42, %v3235_v11  ;;  %v3305_v50 = vsel %vm8556_vm3, %v7046_v7, %v7048_v48  ;;  %v3282_v42 = vmul.f32 %v7040_v56, %v3272_v30  ;;  %v3311_v7 = vmul.f32 %v7048_v48, %v7077_v43 }
 0xd91   :  { %3130 = vrot.lane.b32.xlu1 %v3122_v27, %s8536_s29  ;;  %v3283_v26 = vmul.f32 %v7040_v56, %v3273_v34  ;;  %v3310_v51 = vmul.f32 %v3305_v50, %v7074_v13  ;;  %v3346_v63 = vmul.f32 %v7017_v62, %v7050_v45  ;;  %v3370_v48 = vsel %vm8558_vm2, %v7054_v10, %v7056_v12 }
 0xd92   :  { %v7147_v3 = vpop.permute.xlu0 %3634  ;;  %v3321_v56 = vmul.f32 %v7044_v47, %v3311_v7  ;;  %v3374_v27 = vmul.f32 %v7017_v62, %v7054_v10  ;;  %v3375_v44 = vmul.f32 %v3370_v48, %v7074_v13  ;;  %v3376_v10 = vmul.f32 %v7056_v12, %v7077_v43  ;;  %v7248_v7 = vld [vmem:[#allocation3 + $0x18] sm:$0xff] }
 0xd93   :  { %3153 = vrot.lane.b32.xlu0 %v3147_v53, %s4351_s1  ;;  %v7136_v8 = vpop.permute.xlu1 %3583  ;;  %v3320_v37 = vmul.f32 %v7044_v47, %v3310_v51  ;;  %v3347_v47 = vmul.f32 %v7050_v45, %v7074_v13  ;;  %v3408_v1 = vsel %vm8559_vm0, %v7060_v46, %v7062_v38  ;;  %v3450_v20 = vmul.f32 %v7017_v62, %v7070_v54 }
 0xd94   :  { %v3386_v33 = vmul.f32 %v7052_v2, %v3376_v10  ;;  %v3413_v12 = vmul.f32 %v3408_v1, %v7074_v13  ;;  %v3547_v51 = vsel %vm8563_vm15, %v7105_v21, %v7116_v52  ;;  %v3553_v48 = vmul.f32 %v7116_v52, %v7248_v7 }
 0xd95   :  { %3155 = vrot.lane.b32.xlu1 %v3148_v60, %s4351_s1  ;;  %v3348_v60 = vmul.f32 %v7050_v45, %v7077_v43  ;;  %v3385_v45 = vmul.f32 %v7052_v2, %v3375_v44  ;;  %v3460_v15 = vmul.f32 %v7064_v18, %v3450_v20  ;;  %vm8564_vm3 = vcmask 15360  }
 0xd96   :  { %v7163_v53 = vpop.permute.xlu0 %3621  ;;  %v3591_v10 = vmul.f32 %v7136_v8, %v7248_v7  ;;  %vm8565_vm2 = vcmask 113664   ;;  %vm8567_vm0 = vcmask 121856   ;;  %vm8571_vm15 = vcmask 146432  }
 0xd97   :  { %3157 = vrot.lane.b32.xlu0 %v3149_v6, %s4351_s1  ;;  %v7149_v58 = vpop.permute.xlu1 %3619  ;;  %v3384_v6 = vmul.f32 %v7052_v2, %v3374_v27  ;;  %v3423_v2 = vmul.f32 %v7058_v22, %v3413_v12  ;;  %v3585_v27 = vsel %vm8564_vm3, %v7134_v5, %v7136_v8  ;;  %v4228_v12 = vld [vmem:[%s7984_s3 + $0x50] sm:$0xff]  ;;  %vm8577_vm3 = vcmask 269312  }
 0xd98   :  { %v3627_v8 = vmul.f32 %v7149_v58, %v7074_v13 }
 0xd99   :  { %3201 = vrot.lane.b32.xlu1 %v3195_v32, %s8554_s4  ;;  %v3412_v32 = vmul.f32 %v7017_v62, %v7060_v46  ;;  %v3414_v46 = vmul.f32 %v7062_v38, %v7077_v43 }
 0xd9a   :  { %v7183_v24 = vpop.permute.xlu0 %3657 }
 0xd9b   :  { %3203 = vrot.lane.b32.xlu0 %v3196_v17, %s8554_s4  ;;  %v7165_v49 = vpop.permute.xlu1 %3672  ;;  %v3422_v17 = vmul.f32 %v7058_v22, %v3412_v32  ;;  %v3424_v39 = vmul.f32 %v7058_v22, %v3414_v46  ;;  %v3601_v32 = vmul.f32 %v7118_v16, %v3591_v10  ;;  %v3637_v46 = vmul.f32 %v7147_v3, %v3627_v8 }
 0xd9d   :  { %3205 = vrot.lane.b32.xlu1 %v3197_v28, %s8554_s4  ;;  %v3446_v28 = vsel %vm264_vm6, %v7070_v54, %v7072_v29  ;;  %v3452_v54 = vmul.f32 %v7072_v29, %v7077_v43  ;;  %s8568_s4 = smov 78  }
 0xd9e   :  { %v3451_v38 = vmul.f32 %v3446_v28, %v7074_v13 }
 0xd9f   :  { %3249 = vrot.lane.b32.xlu0 %v3243_v0, %s4358_s0  ;;  %v7185_v14 = vpop.permute.xlu1 %3659  ;;  %v7201_v0 = vpop.permute.xlu0 %3699  ;;  %v3462_v34 = vmul.f32 %v7064_v18, %v3452_v54 }
 0xda0   :  { %v3461_v22 = vmul.f32 %v7064_v18, %v3451_v38  ;;  %v4230_v38 = vld [vmem:[%s7984_s3 + $0x58] sm:$0xff]  ;;  %v3667_v54 = vmul.f32 %v7185_v14, %v7248_v7 }
 0xda1   :  { %3251 = vrot.lane.b32.xlu1 %v3244_v59, %s4358_s0  ;;  %v3484_v59 = vsel %vm8562_vm10, %v7082_v4, %v7089_v23  ;;  %vm8569_vm10 = vcmask 138240  }
 0xda2   :  { %v3489_v29 = vmul.f32 %v3484_v59, %v7074_v13 }
 0xda3   :  { %3253 = vrot.lane.b32.xlu0 %v3245_v31, %s4358_s0  ;;  %s8560_s0 = smov 109   ;;  %v7203_v11 = vpop.permute.xlu1 %3737  ;;  %v3488_v31 = vmul.f32 %v7017_v62, %v7082_v4  ;;  %v7219_v30 = vpop.permute.xlu0 %3722  ;;  %v3490_v4 = vmul.f32 %v7089_v23, %v7077_v43  ;;  %v3525_v23 = vmul.f32 %v7091_v40, %v7074_v13 }
 0xda5   :  { %3287 = vrot.lane.b32.xlu1 %v3281_v61, %s8557_s9  ;;  %v3498_v50 = vmul.f32 %v7080_v25, %v3488_v31  ;;  %v3500_v18 = vmul.f32 %v7080_v25, %v3490_v4 }
 0xda7   :  { %3289 = vrot.lane.b32.xlu0 %v3282_v42, %s8557_s9  ;;  %v7221_v61 = vpop.permute.xlu1 %3724  ;;  %v7232_v9 = vpop.permute.xlu0 %3775 }
 0xda9   :  { %3291 = vrot.lane.b32.xlu1 %v3283_v26, %s8557_s9  ;;  %v3499_v26 = vmul.f32 %v7080_v25, %v3489_v29  ;;  %v3526_v25 = vmul.f32 %v7091_v40, %v7077_v43  ;;  %v3589_v40 = vmul.f32 %v7134_v5, %v7074_v13 }
 0xdab   :  { %3325 = vrot.lane.b32.xlu0 %v3319_v19, %s4349_s15  ;;  %v7234_v42 = vpop.permute.xlu1 %3760  ;;  %v3551_v19 = vmul.f32 %v7105_v21, %v7074_v13  ;;  %v3599_v1 = vmul.f32 %v7118_v16, %v3589_v40 }
 0xdac   :  { %v3768_v8 = vmul.f32 %v7234_v42, %v7074_v13 }
 0xdad   :  { %3327 = vrot.lane.b32.xlu1 %v3320_v37, %s4349_s15  ;;  %v7250_v37 = vpop.permute.xlu0 %3762  ;;  %v3561_v21 = vmul.f32 %v7103_v55, %v3551_v19  ;;  %v3703_v19 = vmul.f32 %v7201_v0, %v7077_v43 }
 0xdaf   :  { %3329 = vrot.lane.b32.xlu0 %v3321_v56, %s4349_s15  ;;  %v7252_v56 = vpop.permute.xlu1 %3813 }
 0xdb1   :  { %3352 = vrot.lane.b32.xlu1 %v3346_v63, %s4352_s21  ;;  %v3552_v63 = vmul.f32 %v3547_v51, %v7077_v43  ;;  %v7270_v44 = vpop.permute.xlu0 %3798  ;;  %v3702_v51 = vmul.f32 %v7201_v0, %v7074_v13 }
 0xdb3   :  { %3354 = vrot.lane.b32.xlu0 %v3347_v47, %s4352_s21  ;;  %v3562_v47 = vmul.f32 %v7103_v55, %v3552_v63  ;;  %v7272_v52 = vpop.permute.xlu1 %3800 }
 0xdb5   :  { %3356 = vrot.lane.b32.xlu1 %v3348_v60, %s4352_s21  ;;  %v3563_v60 = vmul.f32 %v7103_v55, %v3553_v48  ;;  %v3623_v55 = vsel %vm8565_vm2, %v7149_v58, %v7163_v53  ;;  %vm8578_vm2 = vcmask 277504  }
 0xdb7   :  { %3390 = vrot.lane.b32.xlu0 %v3384_v6, %s8560_s0  ;;  %v3590_v6 = vmul.f32 %v3585_v27, %v7077_v43 }
 0xdb9   :  { %3392 = vrot.lane.b32.xlu1 %v3385_v45, %s8560_s0  ;;  %v3600_v5 = vmul.f32 %v7118_v16, %v3590_v6  ;;  %v7286_v45 = vpop.permute.xlu0 %3851  ;;  %v3629_v16 = vmul.f32 %v7163_v53, %v7248_v7  ;;  %v3665_v53 = vmul.f32 %v7183_v24, %v7074_v13  ;;  %v3732_v6 = vmul.f32 %v7221_v61, %v7248_v7 }
 0xdbb   :  { %3394 = vrot.lane.b32.xlu0 %v3386_v33, %s8560_s0  ;;  %v7288_v33 = vpop.permute.xlu1 %3836 }
 0xdbd   :  { %3428 = vrot.lane.b32.xlu1 %v3422_v17, %s8561_s11  ;;  %v3628_v17 = vmul.f32 %v3623_v55, %v7077_v43  ;;  %v7301_v28 = vpop.permute.xlu0 %3838  ;;  %v3764_v55 = vsel %vm8571_vm15, %v7234_v42, %v7250_v37  ;;  %vm8583_vm15 = vcmask 916480  }
 0xdbf   :  { %3430 = vrot.lane.b32.xlu0 %v3423_v2, %s8561_s11  ;;  %v7303_v20 = vpop.permute.xlu1 %3878  ;;  %v3638_v58 = vmul.f32 %v7147_v3, %v3628_v17  ;;  %v3661_v2 = vsel %vm8567_vm0, %v7183_v24, %v7185_v14  ;;  %v4229_v24 = vld [vmem:[%s7982_s2 + $0x6] sm:$0x3]  ;;  %vm8581_vm0 = vcmask 1039360  }
 0xdc0   :  { %v7334_v14 = vrot.slane %v4229_v24, %v8534_v41  ;;  %v7342_v4 = vrot.slane %v4229_v24, %v8535_v36 }
 0xdc1   :  { %3432 = vrot.lane.b32.xlu1 %v3424_v39, %s8561_s11  ;;  %v3639_v39 = vmul.f32 %v7147_v3, %v3629_v16  ;;  %v7321_v59 = vpop.permute.xlu0 %3916  ;;  %v3675_v3 = vmul.f32 %v7165_v49, %v3665_v53  ;;  %v3769_v16 = vmul.f32 %v3764_v55, %v7077_v43 }
 0xdc3   :  { %3466 = vrot.lane.b32.xlu0 %v3460_v15, %s4353_s22  ;;  %v3666_v15 = vmul.f32 %v3661_v2, %v7077_v43  ;;  %v7323_v31 = vpop.permute.xlu1 %3901  ;;  %v3779_v42 = vmul.f32 %v7232_v9, %v3769_v16  ;;  %v3881_v16 = vmul.f32 %v7303_v20, %v7074_v13 }
 0xdc5   :  { %3468 = vrot.lane.b32.xlu1 %v3461_v22, %s4353_s22  ;;  %v3676_v22 = vmul.f32 %v7165_v49, %v3666_v15  ;;  %v7336_v29 = vpop.permute.xlu0 %3903 }
 0xdc7   :  { %3470 = vrot.lane.b32.xlu0 %v3462_v34, %s4353_s22  ;;  %v3677_v34 = vmul.f32 %v7165_v49, %v3667_v54  ;;  %v4231_v49 = vld [vmem:[%s7984_s3 + $0x60] sm:$0xff]  ;;  %v4234_v54 = vld [vmem:[%s7984_s3 + $0x78] sm:$0xff] }
 0xdc9   :  { %3504 = vrot.lane.b32.xlu1 %v3498_v50, %s4350_s16  ;;  %v7338_v50 = vpop.permute.xlu1 %3954 }
 0xdcb   :  { %3506 = vrot.lane.b32.xlu0 %v3499_v26, %s4350_s16  ;;  %v7351_v26 = vpop.permute.xlu0 %3939 }
 0xdcd   :  { %3508 = vrot.lane.b32.xlu1 %v3500_v18, %s4350_s16  ;;  %v7353_v18 = vpop.permute.xlu1 %3941 }
 0xdcf   :  { %3529 = vrot.lane.b32.xlu0 %v3525_v23, %s4354_s23  ;;  %v4226_v23 = vld [vmem:[%s7982_s2 + $0x4] sm:$0x3]  ;;  %v7369_v48 = vpop.permute.xlu0 %3086 }
 0xdd0   :  { %v7367_v63 = vrot.slane %v4226_v23, %v8534_v41  ;;  %v7375_v27 = vrot.slane %v4226_v23, %v8535_v36  ;;  %v3730_v41 = vmul.f32 %v7219_v30, %v7074_v13  ;;  %v4232_v36 = vld [vmem:[%s7984_s3 + $0x68] sm:$0xff] }
 0xdd1   :  { %3531 = vrot.lane.b32.xlu1 %v3526_v25, %s4354_s23  ;;  %v3704_v25 = vmul.f32 %v7201_v0, %v7248_v7  ;;  %v2554_v0 = vld [vmem:[%s7986_s5 + $0x10] sm:$0xff]  ;;  %s8570_s5 = smov 77  }
 0xdd2   :  { %4225 = vmatmul.mubr.msk.f32.gmra.mxu0 %vm2288_vm11, %v2554_v0  ;;  %v4235_v0 = vld [vmem:[%s7984_s3 + $0x80] sm:$0xff] }
 0xdd3   :  { %3567 = vrot.lane.b32.xlu0 %v3561_v21, %s4385_s24  ;;  %v7371_v21 = vpop.permute.xlu1 %3071  ;;  %v7391_v40 = vpop.permute.xlu0 %3073 }
 0xdd5   :  { %3569 = vrot.lane.b32.xlu1 %v3562_v47, %s4385_s24  ;;  %v3726_v47 = vsel %vm8569_vm10, %v7219_v30, %v7221_v61  ;;  %v3740_v30 = vmul.f32 %v7203_v11, %v3730_v41  ;;  %vm8582_vm10 = vcmask 1022976  }
 0xdd7   :  { %3571 = vrot.lane.b32.xlu0 %v3563_v60, %s4385_s24  ;;  %v3731_v60 = vmul.f32 %v3726_v47, %v7077_v43  ;;  %v7398_v10 = vpop.permute.xlu1 %3126 }
 0xdd9   :  { %3605 = vrot.lane.b32.xlu1 %v3599_v1, %s4365_s8 }
 0xddb   :  { %3607 = vrot.lane.b32.xlu0 %v3600_v5, %s4365_s8  ;;  %v3741_v5 = vmul.f32 %v7203_v11, %v3731_v60  ;;  %v3846_v60 = vmul.f32 %v7301_v28, %v7248_v7 }
 0xddd   :  { %3609 = vrot.lane.b32.xlu1 %v3601_v32, %s4365_s8  ;;  %v3742_v32 = vmul.f32 %v7203_v11, %v3732_v6  ;;  %v3770_v11 = vmul.f32 %v7250_v37, %v7248_v7  ;;  %v3802_v37 = vsel %vm1351_vm5, %v7270_v44, %v7272_v52  ;;  %vm8574_vm5 = vcmask 252928  }
 0xdde   :  { %v3807_v24 = vmul.f32 %v3802_v37, %v7077_v43  ;;  %v3856_v55 = vmul.f32 %v7286_v45, %v3846_v60 }
 0xddf   :  { %2779 = vperm.xlu0 %4326, %v4228_v12   ;;  %v4233_v12 = vld [vmem:[%s7984_s3 + $0x70] sm:$0xff] }
 0xde1   :  { %3643 = vrot.lane.b32.xlu1 %v3637_v46, %s8566_s10 }
 0xde3   :  { %3645 = vrot.lane.b32.xlu0 %v3638_v58, %s8566_s10  ;;  %v3778_v58 = vmul.f32 %v7232_v9, %v3768_v8 }
 0xde5   :  { %3647 = vrot.lane.b32.xlu1 %v3639_v39, %s8566_s10  ;;  %s8572_s10 = smov 76   ;;  %v3780_v39 = vmul.f32 %v7232_v9, %v3770_v11  ;;  %v3806_v9 = vmul.f32 %v7270_v44, %v7074_v13 }
 0xde7   :  { %2827 = vperm.xlu0 %4326, %v4230_v38  }
 0xde9   :  { %3681 = vrot.lane.b32.xlu1 %v3675_v3, %s4388_s30 }
 0xdeb   :  { %3683 = vrot.lane.b32.xlu0 %v3676_v22, %s4388_s30  ;;  %v3808_v22 = vmul.f32 %v7272_v52, %v7248_v7  ;;  %v3840_v52 = vsel %vm8574_vm5, %v7288_v33, %v7301_v28  ;;  %v4236_v28 = vld [vmem:[%s7984_s3 + $0x88] sm:$0xff]  ;;  %vm8584_vm5 = vcmask 908288  }
 0xded   :  { %3685 = vrot.lane.b32.xlu1 %v3677_v34, %s4388_s30  ;;  %v3818_v23 = vmul.f32 %v7252_v56, %v3808_v22  ;;  %s8576_s30 = smov 62  }
 0xdef   :  { %2812 = vrot.lane.b32.xlu0 %v7334_v14, %s4347_s13 }
 0xdf1   :  { %2814 = vrot.lane.b32.xlu1 %v7342_v4, %s4347_s13 }
 0xdf3   :  { %2865 = vperm.xlu0 %4326, %v4231_v49   ;;  %v3816_v49 = vmul.f32 %v7252_v56, %v3806_v9  ;;  %v3909_v9 = vmul.f32 %v7323_v31, %v7074_v13 }
 0xdf5   :  { %3708 = vrot.lane.b32.xlu1 %v3702_v51, %s8568_s4  ;;  %v3817_v51 = vmul.f32 %v7252_v56, %v3807_v24  ;;  %v3844_v56 = vmul.f32 %v7288_v33, %v7074_v13  ;;  %v3911_v24 = vmul.f32 %v7336_v29, %v7248_v7 }
 0xdf7   :  { %3710 = vrot.lane.b32.xlu0 %v3703_v19, %s8568_s4 }
 0xdf9   :  { %3712 = vrot.lane.b32.xlu1 %v3704_v25, %s8568_s4  ;;  %s8580_s4 = smov 60  }
 0xdfb   :  { %2850 = vrot.lane.b32.xlu0 %v7367_v63, %s8536_s29 }
 0xdfd   :  { %2852 = vrot.lane.b32.xlu1 %v7375_v27, %s8536_s29 }
 0xdff   :  { %2892 = vperm.xlu0 %4326, %v4232_v36   ;;  %v3845_v36 = vmul.f32 %v3840_v52, %v7077_v43 }
 0xe01   :  { %v7401_v1 = vpop.permute.xlu0 %3128  ;;  %3746 = vrot.lane.b32.xlu1 %v3740_v30, %s8570_s5  ;;  %v3854_v30 = vmul.f32 %v7286_v45, %v3844_v56  ;;  %v3949_v56 = vmul.f32 %v7353_v18, %v7248_v7 }
 0xe03   :  { %3748 = vrot.lane.b32.xlu0 %v3741_v5, %s8570_s5  ;;  %v7410_v61 = vpop.permute.xlu1 %3130  ;;  %v3855_v5 = vmul.f32 %v7286_v45, %v3845_v36  ;;  %v3882_v45 = vmul.f32 %v7303_v20, %v7077_v43 }
 0xe05   :  { %v7417_v17 = vpop.permute.xlu0 %3153  ;;  %3750 = vrot.lane.b32.xlu1 %v3742_v32, %s8570_s5 }
 0xe07   :  { %2928 = vperm.xlu0 %4326, %v4233_v12   ;;  %v7423_v46 = vpop.permute.xlu1 %3155 }
 0xe09   :  { %v7426_v2 = vpop.permute.xlu0 %3157  ;;  %3784 = vrot.lane.b32.xlu1 %v3778_v58, %s8572_s10  ;;  %v3883_v58 = vmul.f32 %v7303_v20, %v7248_v7 }
 0xe0b   :  { %3786 = vrot.lane.b32.xlu0 %v3779_v42, %s8572_s10  ;;  %v7432_v53 = vpop.permute.xlu1 %3201 }
 0xe0d   :  { %v7434_v38 = vpop.permute.xlu0 %3203  ;;  %3788 = vrot.lane.b32.xlu1 %v3780_v39, %s8572_s10  ;;  %v3905_v39 = vsel %vm8577_vm3, %v7323_v31, %v7336_v29  ;;  %v3943_v31 = vsel %vm8578_vm2, %v7351_v26, %v7353_v18  ;;  %v3947_v29 = vmul.f32 %v7351_v26, %v7074_v13  ;;  %v3959_v26 = vmul.f32 %v7338_v50, %v3949_v56 }
 0xe0e   :  { %v3910_v20 = vmul.f32 %v3905_v39, %v7077_v43  ;;  %vm8585_vm3 = vcmask 900096   ;;  %vm8586_vm2 = vcmask 891904  }
 0xe0f   :  { %2913 = vrot.lane.b32.xlu0 %v7334_v14, %s8537_s17  ;;  %v7442_v15 = vpop.permute.xlu1 %3205  ;;  %v3957_v36 = vmul.f32 %v7338_v50, %v3947_v29 }
 0xe11   :  { %v7449_v3 = vpop.permute.xlu0 %3249  ;;  %2915 = vrot.lane.b32.xlu1 %v7342_v4, %s8537_s17 }
 0xe13   :  { %2966 = vperm.xlu0 %4326, %v4234_v54   ;;  %v7456_v34 = vpop.permute.xlu1 %3251 }
 0xe15   :  { %v7459_v44 = vpop.permute.xlu0 %3253  ;;  %3822 = vrot.lane.b32.xlu1 %v3816_v49, %s8573_s20  ;;  %v3919_v49 = vmul.f32 %v7321_v59, %v3909_v9 }
 0xe17   :  { %3824 = vrot.lane.b32.xlu0 %v3817_v51, %s8573_s20  ;;  %v7465_v19 = vpop.permute.xlu1 %3287  ;;  %v3920_v51 = vmul.f32 %v7321_v59, %v3910_v20 }
 0xe19   :  { %v7467_v25 = vpop.permute.xlu0 %3289  ;;  %3826 = vrot.lane.b32.xlu1 %v3818_v23, %s8573_s20  ;;  %v3921_v23 = vmul.f32 %v7321_v59, %v3911_v24 }
 0xe1b   :  { %2951 = vrot.lane.b32.xlu0 %v7367_v63, %s8540_s28  ;;  %v7475_v47 = vpop.permute.xlu1 %3291 }
 0xe1d   :  { %v7482_v41 = vpop.permute.xlu0 %3325  ;;  %2953 = vrot.lane.b32.xlu1 %v7375_v27, %s8540_s28 }
 0xe1f   :  { %2993 = vperm.xlu0 %4326, %v4235_v0   ;;  %v7489_v6 = vpop.permute.xlu1 %3327 }
 0xe21   :  { %v7492_v33 = vpop.permute.xlu0 %3329  ;;  %3860 = vrot.lane.b32.xlu1 %v3854_v30, %s8575_s12  ;;  %v3075_v30 = vsel %vm407_vm1, %v7371_v21, %v7391_v40 }
 0xe23   :  { %3862 = vrot.lane.b32.xlu0 %v3855_v5, %s8575_s12  ;;  %v7498_v32 = vpop.permute.xlu1 %3352  ;;  %v4227_v5 = vld [vmem:[%s7984_s3 + $0x48] sm:$0xff] }
 0xe25   :  { %v7503_v8 = vpop.permute.xlu0 %3354  ;;  %3864 = vrot.lane.b32.xlu1 %v3856_v55, %s8575_s12  ;;  %v3080_v55 = vmul.f32 %v3075_v30, %v7074_v13  ;;  %v3160_v13 = vsel %vm264_vm6, %v7423_v46, %v7426_v2 }
 0xe27   :  { %3031 = vperm.xlu0 %4326, %v4236_v28   ;;  %v7506_v12 = vpop.permute.xlu1 %3356  ;;  %v3081_v28 = vmul.f32 %v7391_v40, %v7077_v43 }
 0xe29   :  { %v7510_v11 = vpop.permute.xlu0 %3390  ;;  %3887 = vrot.lane.b32.xlu1 %v3881_v16, %s8576_s30  ;;  %v3091_v39 = vmul.f32 %v7369_v48, %v3081_v28 }
 0xe2b   :  { %3889 = vrot.lane.b32.xlu0 %v3882_v45, %s8576_s30  ;;  %v7518_v42 = vpop.permute.xlu1 %3392  ;;  %v3133_v45 = vsel %vm8581_vm0, %v7401_v1, %v7410_v61  ;;  %v3139_v9 = vadd.f32 %v7410_v61, %v3091_v39  ;;  %v3294_v61 = vsel %vm8583_vm15, %v7467_v25, %v7475_v47  ;;  %vm8587_vm0 = vcmask 883712  }
 0xe2d   :  { %v7523_v37 = vpop.permute.xlu0 %3394  ;;  %3891 = vrot.lane.b32.xlu1 %v3883_v58, %s8576_s30  ;;  %v3090_v58 = vmul.f32 %v7369_v48, %v3080_v55 }
 0xe2f   :  { %3016 = vrot.lane.b32.xlu0 %v7334_v14, %s4341_s25  ;;  %v7530_v54 = vpop.permute.xlu1 %3428  ;;  %v3138_v40 = vadd.f32 %v3133_v45, %v3090_v58 }
 0xe31   :  { %v7535_v22 = vpop.permute.xlu0 %3430  ;;  %3018 = vrot.lane.b32.xlu1 %v7342_v4, %s4341_s25  ;;  %v3948_v4 = vmul.f32 %v3943_v31, %v7077_v43  ;;  %v3165_v24 = vadd.f32 %v3160_v13, %v3138_v40  ;;  %v3256_v31 = vsel %vm859_vm8, %v7456_v34, %v7459_v44 }
 0xe33   :  { %3925 = vrot.lane.b32.xlu0 %v3919_v49, %s8579_s27  ;;  %v7544_v14 = vpop.permute.xlu1 %3432  ;;  %v3958_v59 = vmul.f32 %v7338_v50, %v3948_v4  ;;  %v3166_v49 = vadd.f32 %v7426_v2, %v3139_v9  ;;  %v3332_v2 = vsel %vm8584_vm5, %v7489_v6, %v7492_v33 }
 0xe35   :  { %v7550_v52 = vpop.permute.xlu0 %3466  ;;  %3927 = vrot.lane.b32.xlu1 %v3920_v51, %s8579_s27 }
 0xe37   :  { %3929 = vrot.lane.b32.xlu0 %v3921_v23, %s8579_s27  ;;  %v7557_v0 = vpop.permute.xlu1 %3468 }
 0xe39   :  { %v3471_v60 = vpop.permute.xlu0 %3470  ;;  %3963 = vrot.lane.b32.xlu1 %v3957_v36, %s8580_s4 }
 0xe3a   :  { %v3473_v40 = vsel %vm362_vm12, %v7557_v0, %v3471_v60 }
 0xe3b   :  { %3965 = vrot.lane.b32.xlu0 %v3958_v59, %s8580_s4  ;;  %v7567_v18 = vpop.permute.xlu1 %3504 }
 0xe3d   :  { %3967 = vrot.lane.b32.xlu1 %v3959_v26, %s8580_s4  ;;  %v7576_v50 = vpop.permute.xlu0 %3506 }
 0xe3f   :  { %2769 = vperm.xlu0 %4326, %v4227_v5   ;;  %v3509_v16 = vpop.permute.xlu1 %3508 }
 0xe41   :  { %2754 = vrot.lane.b32.xlu1 %v7367_v63, %s4349_s15  ;;  %v7591_v20 = vpop.permute.xlu0 %3529  ;;  %v3208_v63 = vsel %vm8582_vm10, %v7434_v38, %v7442_v15  ;;  %vm8588_vm10 = vcmask 777216  }
 0xe42   :  { %v3213_v29 = vadd.f32 %v3208_v63, %v3165_v24  ;;  %v3511_v24 = vsel %vm8588_vm10, %v7576_v50, %v3509_v16 }
 0xe43   :  { %v3532_v43 = vpop.permute.xlu1 %3531  ;;  %2756 = vrot.lane.b32.xlu0 %v7375_v27, %s4349_s15  ;;  %v3214_v27 = vadd.f32 %v7442_v15, %v3166_v49  ;;  %v3359_v15 = vsel %vm8585_vm3, %v7503_v8, %v7506_v12 }
 0xe44   :  { %v3261_v23 = vadd.f32 %v3256_v31, %v3213_v29  ;;  %v3533_v29 = vsel %vm407_vm1, %v7591_v20, %v3532_v43 }
 0xe45   :  { %v3262_v4 = vadd.f32 %v7459_v44, %v3214_v27  ;;  %v7605_v56 = vpop.permute.xlu0 %3567  ;;  %v3397_v44 = vsel %vm8586_vm2, %v7518_v42, %v7523_v37 }
 0xe46   :  { %v3299_v59 = vadd.f32 %v3294_v61, %v3261_v23  ;;  %v7635_v23 = vmax.f32 %v7066_v35, 0.0 }
 0xe47   :  { %v3570_v51 = vpop.permute.xlu1 %3569  ;;  %v3300_v26 = vadd.f32 %v7475_v47, %v3262_v4  ;;  %v3435_v47 = vsel %vm8587_vm0, %v7535_v22, %v7544_v14  ;;  %v7638_v4 = vmax.f32 %v7068_v57, 0.0 }
 0xe48   :  { %v3337_v30 = vadd.f32 %v3332_v2, %v3299_v59 }
 0xe49   :  { %v3338_v5 = vadd.f32 %v7492_v33, %v3300_v26  ;;  %v3572_v58 = vpop.permute.xlu0 %3571 }
 0xe4a   :  { %v3364_v28 = vadd.f32 %v3359_v15, %v3337_v30  ;;  %v3574_v2 = vsel %vm1134_vm14, %v3570_v51, %v3572_v58 }
 0xe4b   :  { %v7610_v36 = vpop.permute.xlu1 %3605  ;;  %v3365_v45 = vadd.f32 %v7506_v12, %v3338_v5 }
 0xe4c   :  { %v3402_v39 = vadd.f32 %v3397_v44, %v3364_v28 }
 0xe4d   :  { %v3403_v13 = vadd.f32 %v7523_v37, %v3365_v45  ;;  %v3608_v31 = vpop.permute.xlu0 %3607 }
 0xe4e   :  { %v3440_v9 = vadd.f32 %v3435_v47, %v3402_v39  ;;  %v3611_v15 = vsel %vm1174_vm9, %v7610_v36, %v3608_v31 }
 0xe4f   :  { %v3610_v55 = vpop.permute.xlu1 %3609  ;;  %v3441_v63 = vadd.f32 %v7544_v14, %v3403_v13  ;;  %v3573_v14 = vsel %vm1134_vm14, %v7605_v56, %v3570_v51 }
 0xe50   :  { %v3478_v12 = vadd.f32 %v3473_v40, %v3440_v9  ;;  %v3612_v30 = vsel %vm1174_vm9, %v3608_v31, %v3610_v55  ;;  %vm8590_vm9 = vcmask 1039360  }
 0xe51   :  { %v3479_v49 = vadd.f32 %v3471_v60, %v3441_v63  ;;  %vm8591_vm14 = vmmov %vm8590_vm9 }
 0xe52   :  { %v3516_v61 = vadd.f32 %v3511_v24, %v3478_v12 }
 0xe53   :  { %v7627_v33 = vpop.permute.xlu1 %3643  ;;  %v3517_v37 = vadd.f32 %v3509_v16, %v3479_v49 }
 0xe54   :  { %v3538_v59 = vadd.f32 %v3533_v29, %v3516_v61 }
 0xe55   :  { %v3539_v60 = vadd.f32 %v3532_v43, %v3517_v37 }
 0xe56   :  { %v3579_v57 = vadd.f32 %v3573_v14, %v3538_v59 }
 0xe57   :  { %v3648_v27 = vpop.permute.xlu1 %3647  ;;  %v3580_v44 = vadd.f32 %v3574_v2, %v3539_v60 }
 0xe58   :  { %v3617_v51 = vadd.f32 %v3611_v15, %v3579_v57 }
 0xe59   :  { %v3618_v43 = vadd.f32 %v3612_v30, %v3580_v44 }
 0xe5a   :  { %v2780_v26 = vpop.permute.xlu0 %2779 }
 0xe5b   :  { %v2783_v16 = vmul.f32 %v2780_v26, %v7635_v23  ;;  %v2784_v35 = vmul.f32 %v2780_v26, %v7638_v4  ;;  %v7648_v5 = vpop.permute.xlu1 %3681  ;;  %v2782_v45 = vmul.f32 %v7017_v62, %v2780_v26 }
 0xe5d   :  { %2790 = vrot.lane.b32.xlu1 %v2783_v16, %s8536_s29  ;;  %2792 = vrot.lane.b32.xlu0 %v2784_v35, %s8536_s29 }
 0xe5e   :  { %v3646_v28 = vpop.permute.xlu0 %3645 }
 0xe5f   :  { %v3649_v55 = vsel %vm1214_vm7, %v7627_v33, %v3646_v28  ;;  %v3650_v58 = vsel %vm1214_vm7, %v3646_v28, %v3648_v27  ;;  %v3686_v47 = vpop.permute.xlu1 %3685  ;;  %vm8589_vm7 = vcmask 924672  }
 0xe60   :  { %v3655_v39 = vadd.f32 %v3649_v55, %v3617_v51  ;;  %v3656_v13 = vadd.f32 %v3650_v58, %v3618_v43 }
 0xe61   :  { %2788 = vrot.lane.b32.xlu1 %v2782_v45, %s8536_s29 }
 0xe62   :  { %v2828_v40 = vpop.permute.xlu0 %2827 }
 0xe63   :  { %v2815_v9 = vpop.permute.xlu1 %2814 }
 0xe64   :  { %v2822_v63 = vmul.f32 %v2815_v9, %v7638_v4 }
 0xe66   :  { %v2832_v24 = vmul.f32 %v2828_v40, %v2822_v63  ;;  %v3684_v12 = vpop.permute.xlu0 %3683  ;;  %v3132_v63 = vsel %vm8591_vm14, %v7398_v10, %v7401_v1 }
 0xe67   :  { %v3687_v49 = vsel %vm1242_vm13, %v7648_v5, %v3684_v12  ;;  %v3688_v31 = vsel %vm1242_vm13, %v3684_v12, %v3686_v47  ;;  %v7661_v29 = vpop.permute.xlu1 %3708  ;;  %vm8592_vm13 = vcmask 1022976  }
 0xe68   :  { %v7663_v61 = vadd.f32 %v3687_v49, %v3655_v39  ;;  %v7665_v27 = vadd.f32 %v3688_v31, %v3656_v13  ;;  %2840 = vrot.lane.b32.xlu1 %v2832_v24, %s4351_s1  ;;  %v3079_v13 = vmul.f32 %v7017_v62, %v7371_v21 }
 0xe6a   :  { %v2813_v37 = vpop.permute.xlu0 %2812  ;;  %v3089_v49 = vmul.f32 %v7369_v48, %v3079_v13  ;;  %v3255_v48 = vsel %vm859_vm8, %v7449_v3, %v7456_v34  ;;  %vm8593_vm8 = vmmov %vm8585_vm3  ;;  %vm8594_vm3 = vcmask 7168  }
 0xe6b   :  { %v2816_v14 = vsel %vm8589_vm7, %v2813_v37, %v2815_v9  ;;  %v7669_v2 = vpop.permute.xlu1 %3712  ;;  %v2820_v60 = vmul.f32 %v7017_v62, %v2813_v37  ;;  %v3207_v37 = vsel %vm8592_vm13, %v7432_v53, %v7434_v38  ;;  %v3331_v38 = vsel %vm8584_vm5, %v7482_v41, %v7489_v6 }
 0xe6c   :  { %v2821_v59 = vmul.f32 %v2816_v14, %v7635_v23  ;;  %v3137_v21 = vadd.f32 %v3132_v63, %v3089_v49  ;;  %v3358_v3 = vsel %vm8593_vm8, %v7498_v32, %v7503_v8  ;;  %v3434_v32 = vsel %vm8587_vm0, %v7530_v54, %v7535_v22 }
 0xe6d   :  { %v2830_v16 = vmul.f32 %v2828_v40, %v2820_v60  ;;  %vm8595_vm7 = vcmask 121856   ;;  %vm8603_vm5 = vcmask 523264   ;;  %vm8607_vm0 = vcmask 506880  }
 0xe6e   :  { %v2831_v26 = vmul.f32 %v2828_v40, %v2821_v59  ;;  %v2866_v15 = vpop.permute.xlu0 %2865  ;;  %vm8604_vm8 = vmmov %vm8603_vm5 }
 0xe6f   :  { %v2853_v30 = vpop.permute.xlu1 %2852 }
 0xe70   :  { %2838 = vrot.lane.b32.xlu0 %v2831_v26, %s4351_s1  ;;  %v2860_v35 = vmul.f32 %v2853_v30, %v7638_v4 }
 0xe72   :  { %v7675_v57 = vpop.permute.xlu0 %3710  ;;  %v2870_v51 = vmul.f32 %v2866_v15, %v2860_v35  ;;  %v3396_v35 = vsel %vm8586_vm2, %v7510_v11, %v7518_v42  ;;  %v3472_v11 = vsel %vm362_vm12, %v7550_v52, %v7557_v0 }
 0xe73   :  { %v7677_v44 = vpop.permute.xlu1 %3746 }
 0xe74   :  { %2836 = vrot.lane.b32.xlu0 %v2830_v16, %s4351_s1 }
 0xe76   :  { %v2851_v43 = vpop.permute.xlu0 %2850 }
 0xe77   :  { %v2854_v28 = vsel %vm8590_vm9, %v2851_v43, %v2853_v30  ;;  %v7681_v45 = vpop.permute.xlu1 %3750  ;;  %v2858_v58 = vmul.f32 %v7017_v62, %v2851_v43  ;;  %v3159_v62 = vsel %vm264_vm6, %v7417_v17, %v7423_v46  ;;  %v3293_v17 = vsel %vm8583_vm15, %v7465_v19, %v7467_v25 }
 0xe78   :  { %v2859_v55 = vmul.f32 %v2854_v28, %v7635_v23  ;;  %2878 = vrot.lane.b32.xlu0 %v2870_v51, %s8557_s9  ;;  %v3164_v14 = vadd.f32 %v3159_v62, %v3137_v21  ;;  %vm8598_vm9 = vcmask 629760   ;;  %vm8602_vm15 = vcmask 138240  }
 0xe79   :  { %v2868_v24 = vmul.f32 %v2866_v15, %v2858_v58  ;;  %vm8599_vm14 = vmmov %vm8598_vm9 }
 0xe7a   :  { %v2869_v47 = vmul.f32 %v2866_v15, %v2859_v55  ;;  %v2893_v39 = vpop.permute.xlu0 %2892  ;;  %v3212_v60 = vadd.f32 %v3207_v37, %v3164_v14 }
 0xe7b   :  { %v2895_v40 = vmul.f32 %v2893_v39, %v7635_v23  ;;  %v7689_v9 = vpop.permute.xlu1 %3784  ;;  %v2896_v10 = vmul.f32 %v2893_v39, %v7638_v4  ;;  %v3510_v39 = vsel %vm8588_vm10, %v7567_v18, %v7576_v50  ;;  %vm8608_vm10 = vmmov %vm8607_vm0 }
 0xe7c   :  { %2876 = vrot.lane.b32.xlu1 %v2869_v47, %s8557_s9  ;;  %v3260_v26 = vadd.f32 %v3255_v48, %v3212_v60 }
 0xe7d   :  { %2899 = vrot.lane.b32.xlu0 %v2895_v40, %s4349_s15 }
 0xe7e   :  { %v7696_v12 = vpop.permute.xlu0 %3748  ;;  %v3298_v15 = vadd.f32 %v3293_v17, %v3260_v26  ;;  %v8596_v17 = vld [vmem:[#allocation7_spill] sm:$0xff] }
 0xe7f   :  { %v7699_v31 = vpop.permute.xlu1 %3788 }
 0xe80   :  { %2874 = vrot.lane.b32.xlu1 %v2868_v24, %s8557_s9  ;;  %v3336_v30 = vadd.f32 %v3331_v38, %v3298_v15 }
 0xe82   :  { %v2929_v1 = vpop.permute.xlu0 %2928  ;;  %v3363_v41 = vadd.f32 %v3358_v3, %v3336_v30  ;;  %v8597_v3 = vld [vmem:[#allocation8_spill] sm:$0xff] }
 0xe83   :  { %v2916_v59 = vpop.permute.xlu1 %2915 }
 0xe84   :  { %2901 = vrot.lane.b32.xlu1 %v2896_v10, %s4349_s15  ;;  %v2923_v6 = vmul.f32 %v7248_v7, %v2916_v59  ;;  %v3401_v55 = vadd.f32 %v3396_v35, %v3363_v41  ;;  %v3753_v41 = vsel %vm8599_vm14, %v7696_v12, %v7681_v45  ;;  %vm8611_vm14 = vcmask 490496  }
 0xe86   :  { %v7716_v46 = vpop.permute.xlu0 %3786  ;;  %v3439_v42 = vadd.f32 %v3434_v32, %v3401_v55  ;;  %v2933_v47 = vmul.f32 %v2929_v1, %v2923_v6 }
 0xe87   :  { %v7718_v53 = vpop.permute.xlu1 %3822 }
 0xe88   :  { %v3477_v54 = vadd.f32 %v3472_v11, %v3439_v42 }
 0xe8a   :  { %v2914_v34 = vpop.permute.xlu0 %2913  ;;  %v3515_v40 = vadd.f32 %v3510_v39, %v3477_v54 }
 0xe8b   :  { %v2917_v16 = vsel %vm8594_vm3, %v2914_v34, %v2916_v59  ;;  %v2921_v19 = vmul.f32 %v2914_v34, %v7635_v23  ;;  %v7728_v25 = vpop.permute.xlu1 %3826  ;;  %vm8605_vm3 = vcmask 515072  }
 0xe8c   :  { %v2922_v51 = vmul.f32 %v2917_v16, %v7638_v4  ;;  %v3537_v62 = vadd.f32 %v7591_v20, %v3515_v40  ;;  %vm8606_vm2 = vmmov %vm8605_vm3 }
 0xe8d   :  { %v2931_v43 = vmul.f32 %v2929_v1, %v2921_v19  ;;  %v3715_v19 = vsel %vm1270_vm4, %v7675_v57, %v7669_v2 }
 0xe8e   :  { %v2932_v8 = vmul.f32 %v2929_v1, %v2922_v51  ;;  %v2967_v28 = vpop.permute.xlu0 %2966  ;;  %v3578_v10 = vadd.f32 %v7605_v56, %v3537_v62  ;;  %v3752_v51 = vsel %vm8598_vm9, %v7677_v44, %v7696_v12  ;;  %v3721_v2 = vadd.f32 %v3715_v19, %v7665_v27 }
 0xe8f   :  { %2937 = vrot.lane.b32.xlu0 %v2931_v43, %s4352_s21  ;;  %v2954_v58 = vpop.permute.xlu1 %2953 }
 0xe90   :  { %2939 = vrot.lane.b32.xlu1 %v2932_v8, %s4352_s21  ;;  %v2961_v18 = vmul.f32 %v7248_v7, %v2954_v58  ;;  %v3616_v14 = vadd.f32 %v7610_v36, %v3578_v10  ;;  %v3759_v27 = vadd.f32 %v3753_v41, %v3721_v2 }
 0xe92   :  { %v7746_v13 = vpop.permute.xlu0 %3824  ;;  %v2971_v59 = vmul.f32 %v2967_v28, %v2961_v18  ;;  %v3654_v60 = vadd.f32 %v7627_v33, %v3616_v14 }
 0xe93   :  { %2941 = vrot.lane.b32.xlu0 %v2933_v47, %s4352_s21  ;;  %v7749_v22 = vpop.permute.xlu1 %3860 }
 0xe94   :  { %v3692_v56 = vadd.f32 %v7648_v5, %v3654_v60  ;;  %v3714_v5 = vsel %vm1270_vm4, %v7661_v29, %v7675_v57  ;;  %vm8600_vm4 = vcmask 621568  }
 0xe95   :  { %v3720_v6 = vadd.f32 %v3714_v5, %v7663_v61  ;;  %v3790_v57 = vsel %vm8600_vm4, %v7689_v9, %v7716_v46  ;;  %vm8601_vm13 = vmmov %vm8600_vm4 }
 0xe96   :  { %v2952_v63 = vpop.permute.xlu0 %2951  ;;  %v3719_v15 = vadd.f32 %v7661_v29, %v3692_v56  ;;  %vm8612_vm4 = vmmov %vm8611_vm14 }
 0xe97   :  { %v2955_v24 = vsel %vm8595_vm7, %v2952_v63, %v2954_v58  ;;  %v2959_v52 = vmul.f32 %v2952_v63, %v7635_v23  ;;  %v7753_v0 = vpop.permute.xlu1 %3864  ;;  %v3758_v61 = vadd.f32 %v3752_v51, %v3720_v6  ;;  %vm8609_vm7 = vcmask 498688  }
 0xe98   :  { %v2960_v49 = vmul.f32 %v2955_v24, %v7638_v4  ;;  %v3757_v33 = vadd.f32 %v7677_v44, %v3719_v15  ;;  %v3791_v44 = vsel %vm8601_vm13, %v7716_v46, %v7699_v31  ;;  %v7812_v31 = vld [vmem:[#allocation4 + $0x10] sm:$0xff]  ;;  %v3829_v46 = vsel %vm8604_vm8, %v7746_v13, %v7728_v25  ;;  %vm8610_vm9 = vmmov %vm8609_vm7 }
 0xe99   :  { %v2969_v50 = vmul.f32 %v2967_v28, %v2959_v52  ;;  %v3796_v47 = vadd.f32 %v3790_v57, %v3758_v61  ;;  %v3797_v39 = vadd.f32 %v3791_v44, %v3759_v27  ;;  %vm8613_vm13 = vcmask 908288  }
 0xe9a   :  { %v2970_v21 = vmul.f32 %v2967_v28, %v2960_v49  ;;  %v2994_v37 = vpop.permute.xlu0 %2993  ;;  %v3795_v35 = vadd.f32 %v7689_v9, %v3757_v33  ;;  %v7804_v28 = vld [vmem:[#allocation4 + $0x8] sm:$0xff]  ;;  %v3828_v9 = vsel %vm8603_vm5, %v7718_v53, %v7746_v13  ;;  %vm8615_vm5 = vcmask 1039360   ;;  %vm8616_vm8 = vmmov %vm8613_vm13 }
 0xe9b   :  { %2975 = vrot.lane.b32.xlu1 %v2969_v50, %s4353_s22  ;;  %v7760_v1 = vpop.permute.xlu1 %3887  ;;  %v2996_v26 = vmul.f32 %v2994_v37, %v7635_v23  ;;  %v2997_v34 = vmul.f32 %v2994_v37, %v7638_v4  ;;  %v2998_v30 = vmul.f32 %v7248_v7, %v2994_v37  ;;  %v3834_v52 = vadd.f32 %v3828_v9, %v3796_v47 }
 0xe9c   :  { %2977 = vrot.lane.b32.xlu0 %v2970_v21, %s4353_s22  ;;  %v3833_v29 = vadd.f32 %v7718_v53, %v3795_v35  ;;  %v3835_v25 = vadd.f32 %v3829_v46, %v3797_v39 }
 0xe9e   :  { %v3863_v48 = vpop.permute.xlu0 %3862  ;;  %v3871_v8 = vadd.f32 %v7749_v22, %v3833_v29 }
 0xe9f   :  { %2979 = vrot.lane.b32.xlu1 %v2971_v59, %s4353_s22  ;;  %v3892_v20 = vpop.permute.xlu1 %3891  ;;  %v3866_v40 = vsel %vm8605_vm3, %v7749_v22, %v3863_v48  ;;  %v3867_v63 = vsel %vm8606_vm2, %v3863_v48, %v7753_v0  ;;  %vm8617_vm3 = vmmov %vm8615_vm5  ;;  %vm8618_vm2 = vcmask 916480  }
 0xea0   :  { %3998 = vrot.lane.b32.xlu0 %v8596_v17, %s4349_s15  ;;  %v3898_v58 = vadd.f32 %v7760_v1, %v3871_v8  ;;  %v3872_v50 = vadd.f32 %v3866_v40, %v3834_v52  ;;  %v3873_v22 = vadd.f32 %v3867_v63, %v3835_v25 }
 0xea2   :  { %v3032_v38 = vpop.permute.xlu0 %3031 }
 0xea3   :  { %4000 = vrot.lane.b32.xlu1 %v8597_v3, %s4349_s15  ;;  %v3019_v36 = vpop.permute.xlu1 %3018 }
 0xea4   :  { %3002 = vrot.lane.b32.xlu0 %v2996_v26, %s4350_s16  ;;  %v3026_v11 = vmul.f32 %v7248_v7, %v3019_v36 }
 0xea6   :  { %v3890_v16 = vpop.permute.xlu0 %3889  ;;  %v3036_v7 = vmul.f32 %v3032_v38, %v3026_v11  ;;  %v7850_v11 = vld [vmem:[#allocation2] sm:$0xff] }
 0xea7   :  { %3004 = vrot.lane.b32.xlu1 %v2997_v34, %s4350_s16  ;;  %v3928_v43 = vpop.permute.xlu1 %3927  ;;  %v3893_v49 = vsel %vm8607_vm0, %v7760_v1, %v3890_v16  ;;  %v3894_v62 = vsel %vm8608_vm10, %v3890_v16, %v3892_v20  ;;  %vm8619_vm0 = vmmov %vm8618_vm2 }
 0xea8   :  { %3006 = vrot.lane.b32.xlu0 %v2998_v30, %s4350_s16  ;;  %v3899_v10 = vadd.f32 %v3893_v49, %v3872_v50  ;;  %v3900_v14 = vadd.f32 %v3894_v62, %v3873_v22  ;;  %vm8620_vm10 = vmmov %vm8616_vm8 }
 0xeaa   :  { %v3017_v32 = vpop.permute.xlu0 %3016 }
 0xeab   :  { %v3020_v45 = vsel %vm8602_vm15, %v3017_v32, %v3019_v36  ;;  %v3024_v12 = vmul.f32 %v3017_v32, %v7635_v23  ;;  %3991 = vrot.lane.b32.xlu1 %v7804_v28, %s4349_s15  ;;  %v3964_v13 = vpop.permute.xlu1 %3963  ;;  %vm8614_vm15 = vmmov %vm8613_vm13 }
 0xeac   :  { %v3025_v55 = vmul.f32 %v3020_v45, %v7638_v4  ;;  %3993 = vrot.lane.b32.xlu0 %v7812_v31, %s4349_s15 }
 0xead   :  { %v3034_v42 = vmul.f32 %v3032_v38, %v3024_v12 }
 0xeae   :  { %v3035_v54 = vmul.f32 %v3032_v38, %v3025_v55  ;;  %v3926_v53 = vpop.permute.xlu0 %3925 }
 0xeaf   :  { %v3936_v24 = vadd.f32 %v3926_v53, %v3898_v58  ;;  %3040 = vrot.lane.b32.xlu1 %v3034_v42, %s4354_s23  ;;  %v3931_v0 = vsel %vm8609_vm7, %v3926_v53, %v3928_v43  ;;  %v3968_v48 = vpop.permute.xlu1 %3967  ;;  %vm8621_vm7 = vcmask 900096  }
 0xeb0   :  { %3042 = vrot.lane.b32.xlu0 %v3035_v54, %s4354_s23  ;;  %v3937_v59 = vadd.f32 %v3931_v0, %v3899_v10 }
 0xeb1   :  { %v3974_v18 = vadd.f32 %v3964_v13, %v3936_v24 }
 0xeb2   :  { %v3930_v21 = vpop.permute.xlu0 %3929 }
 0xeb3   :  { %v3932_v37 = vsel %vm8610_vm9, %v3928_v43, %v3930_v21  ;;  %3044 = vrot.lane.b32.xlu1 %v3036_v7, %s4354_s23  ;;  %v2755_v3 = vpop.permute.xlu1 %2754  ;;  %vm8622_vm9 = vmmov %vm8621_vm7 }
 0xeb4   :  { %3981 = vrot.lane.b32.xlu0 %v3974_v18, %s4341_s25  ;;  %v3938_v60 = vadd.f32 %v3932_v37, %v3900_v14  ;;  %v2762_v42 = vmul.f32 %v7850_v11, %v2755_v3 }
 0xeb6   :  { %v3966_v1 = vpop.permute.xlu0 %3965 }
 0xeb7   :  { %v3969_v20 = vsel %vm8611_vm14, %v3964_v13, %v3966_v1  ;;  %v3970_v17 = vsel %vm8612_vm4, %v3966_v1, %v3968_v48  ;;  %vm8623_vm14 = vcmask 777216   ;;  %vm8624_vm4 = vcmask 138240  }
 0xeb8   :  { %v3975_v56 = vadd.f32 %v3969_v20, %v3937_v59  ;;  %v3976_v26 = vadd.f32 %v3970_v17, %v3938_v60 }
 0xeba   :  { %3983 = vrot.lane.b32.xlu1 %v3975_v56, %s4341_s25  ;;  %3985 = vrot.lane.b32.xlu0 %v3976_v26, %s4341_s25  ;;  %v2770_v38 = vpop.permute.xlu0 %2769 }
 0xebb   :  { %v2772_v24 = vmul.f32 %v2770_v38, %v2762_v42 }
 0xebe   :  { %v2757_v15 = vpop.permute.xlu0 %2756 }
 0xebf   :  { %v2758_v27 = vsel %vm8614_vm15, %v2755_v3, %v2757_v15  ;;  %v2764_v53 = vmul.f32 %v2757_v15, %v7638_v4  ;;  %vm8626_vm15 = vmmov %vm8623_vm14 }
 0xec0   :  { %v2763_v46 = vmul.f32 %v2758_v27, %v7635_v23 }
 0xec1   :  { %v2774_v62 = vmul.f32 %v2770_v38, %v2764_v53 }
 0xec2   :  { %v2773_v40 = vmul.f32 %v2770_v38, %v2763_v46 }
 0xecf   :  { %v2793_v36 = vpop.permute.xlu0 %2792  ;;  %v2791_v33 = vpop.permute.xlu1 %2790 }
 0xed0   :  { %v2795_v39 = vsel %vm8615_vm5, %v2791_v33, %v2793_v36  ;;  %v2801_v21 = vadd.f32 %v2793_v36, %v2774_v62  ;;  %vm8627_vm5 = vmmov %vm8624_vm4 }
 0xed1   :  { %v2800_v52 = vadd.f32 %v2795_v39, %v2773_v40 }
 0xed3   :  { %v2789_v30 = vpop.permute.xlu1 %2788 }
 0xed4   :  { %v2794_v63 = vsel %vm8617_vm3, %v2789_v30, %v2791_v33  ;;  %vm8629_vm3 = vmmov %vm8624_vm4 }
 0xed5   :  { %v2799_v18 = vadd.f32 %v2794_v63, %v2772_v24 }
 0xeda   :  { %v2841_v5 = vpop.permute.xlu1 %2840 }
 0xedb   :  { %v2849_v14 = vadd.f32 %v2841_v5, %v2801_v21  ;;  %v8636_v21 = vld [vmem:[#allocation11_spill] sm:$0xff] }
 0xee2   :  { %v2839_v34 = vpop.permute.xlu0 %2838 }
 0xee3   :  { %v2843_v23 = vsel %vm264_vm6, %v2839_v34, %v2841_v5 }
 0xee4   :  { %v2848_v50 = vadd.f32 %v2843_v23, %v2800_v52 }
 0xee6   :  { %v2837_v16 = vpop.permute.xlu0 %2836 }
 0xee7   :  { %v2842_v7 = vsel %vm264_vm6, %v2837_v16, %v2839_v34 }
 0xee8   :  { %v2847_v0 = vadd.f32 %v2842_v7, %v2799_v18  ;;  %v3977_v18 = vld [vmem:[%s7987_s6] sm:$0xff] }
 0xeea   :  { %v2879_v35 = vpop.permute.xlu0 %2878 }
 0xeeb   :  { %v2887_v17 = vadd.f32 %v2879_v35, %v2849_v14  ;;  %v8639_v14 = vld [vmem:[#allocation26_spill] sm:$0xff] }
 0xeee   :  { %v2877_v19 = vpop.permute.xlu1 %2876 }
 0xeef   :  { %v2900_v41 = vpop.permute.xlu0 %2899  ;;  %v2881_v49 = vsel %vm8618_vm2, %v2877_v19, %v2879_v35  ;;  %vm8630_vm2 = vmmov %vm8629_vm3 }
 0xef0   :  { %v2886_v37 = vadd.f32 %v2881_v49, %v2848_v50 }
 0xef2   :  { %v2875_v51 = vpop.permute.xlu1 %2874 }
 0xef3   :  { %v2880_v4 = vsel %vm8619_vm0, %v2875_v51, %v2877_v19  ;;  %vm8631_vm0 = vmmov %vm8630_vm2 }
 0xef4   :  { %v2885_v59 = vadd.f32 %v2880_v4, %v2847_v0 }
 0xef6   :  { %v2902_v6 = vpop.permute.xlu1 %2901  ;;  %v2907_v3 = vadd.f32 %v2900_v41, %v2885_v59  ;;  %v8640_v59 = vld [vmem:[#allocation30_spill] sm:$0xff] }
 0xef7   :  { %v2903_v22 = vsel %vm8620_vm10, %v2900_v41, %v2902_v6  ;;  %v2909_v15 = vadd.f32 %v2902_v6, %v2887_v17  ;;  %vm8632_vm10 = vmmov %vm8631_vm0  ;;  %v8643_v17 = vld [vmem:[#allocation73_spill] sm:$0xff] }
 0xef8   :  { %v2908_v48 = vadd.f32 %v2903_v22, %v2886_v37  ;;  %v8635_v22 = vld [vmem:[#allocation12_spill] sm:$0xff]  ;;  %v8638_v37 = vld [vmem:[#allocation10_spill] sm:$0xff] }
 0xf01   :  { %v7838_v29 = vpop.permute.xlu0 %2937 }
 0xf02   :  { %v2940_v2 = vpop.permute.xlu1 %2939  ;;  %v2948_v35 = vadd.f32 %v7838_v29, %v2907_v3 }
 0xf03   :  { %v2943_v10 = vsel %vm8621_vm7, %v7838_v29, %v2940_v2  ;;  %v2719_v29 = vpop.f32.mrf.mxu0  ;;  %vm8633_vm7 = vmmov %vm8631_vm0 }
 0xf04   :  { %v2949_v56 = vadd.f32 %v2943_v10, %v2908_v48  ;;  %v215_v10 = vmul.f32 %v7850_v11, %v8638_v37  ;;  %v265_v48 = vsel %vm264_vm6, %v8640_v59, %v8639_v14  ;;  %v8646_v11 = vld [vmem:[#allocation20_spill] sm:$0xff] }
 0xf05   :  { %v2942_v57 = vpop.permute.xlu0 %2941  ;;  %v8670_v59 = vld [vmem:[#allocation28_spill] sm:$0xff] }
 0xf06   :  { %v2944_v26 = vsel %vm8622_vm9, %v2940_v2, %v2942_v57  ;;  %vm8634_vm9 = vmmov %vm8631_vm0 }
 0xf07   :  { %v2950_v51 = vadd.f32 %v2944_v26, %v2909_v15  ;;  %v8644_v26 = vld [vmem:[#allocation31_spill] sm:$0xff] }
 0xf0d   :  { %v7840_v43 = vpop.permute.xlu1 %2975 }
 0xf0e   :  { %v2978_v32 = vpop.permute.xlu0 %2977  ;;  %v2986_v6 = vadd.f32 %v7840_v43, %v2948_v35  ;;  %v8649_v35 = vld [vmem:[#allocation21_spill] sm:$0xff] }
 0xf0f   :  { %v2981_v20 = vsel %vm362_vm12, %v7840_v43, %v2978_v32 }
 0xf10   :  { %v2987_v36 = vadd.f32 %v2981_v20, %v2949_v56  ;;  %v216_v56 = vmul.f32 %v7804_v28, %v8643_v17 }
 0xf11   :  { %v2980_v44 = vpop.permute.xlu1 %2979 }
 0xf12   :  { %v3999_v8 = vpop.permute.xlu0 %3998  ;;  %v2982_v30 = vsel %vm362_vm12, %v2978_v32, %v2980_v44 }
 0xf13   :  { %v2988_v57 = vadd.f32 %v2982_v30, %v2950_v51  ;;  %v8648_v30 = vld [vmem:[#allocation9_spill] sm:$0xff] }
 0xf15   :  { %v4001_v45 = vpop.permute.xlu1 %4000 }
 0xf16   :  { %v4002_v12 = vsel %vm8613_vm13, %v3999_v8, %v4001_v45  ;;  %v7843_v61 = vpop.permute.xlu0 %3002  ;;  %4028 = vrot.lane.b32.xlu0 %v4001_v45, %s4341_s25  ;;  %vm8625_vm13 = vmmov %vm8624_vm4 }
 0xf17   :  { %4026 = vrot.lane.b32.xlu1 %v4002_v12, %s4341_s25 }
 0xf19   :  { %v3005_v9 = vpop.permute.xlu1 %3004 }
 0xf1a   :  { %v3007_v55 = vpop.permute.xlu0 %3006  ;;  %v3008_v38 = vsel %vm8623_vm14, %v7843_v61, %v3005_v9  ;;  %vm8637_vm14 = vcmask 1039360  }
 0xf1b   :  { %4024 = vrot.lane.b32.xlu1 %v3999_v8, %s4341_s25  ;;  %v3014_v2 = vadd.f32 %v3008_v38, %v2987_v36  ;;  %v3009_v41 = vsel %vm8626_vm15, %v3005_v9, %v3007_v55  ;;  %v3013_v8 = vadd.f32 %v7843_v61, %v2986_v6  ;;  %v2721_v9 = vpop.f32.mrf.mxu0  ;;  %v227_v0 = vsel %vm8637_vm14, %v8636_v21, %v8635_v22  ;;  %v8645_v36 = vld [vmem:[#allocation34_spill] sm:$0xff] }
 0xf1c   :  { %v3015_v45 = vadd.f32 %v3009_v41, %v2988_v57  ;;  %v266_v38 = vsel %vm264_vm6, %v8639_v14, %v8644_v26  ;;  %v8651_v41 = vld [vmem:[#allocation14_spill] sm:$0xff]  ;;  %v8652_v57 = vld [vmem:[#allocation15_spill] sm:$0xff]  ;;  %vm8653_vm6 = vcmask 908288   ;;  %vm8657_vm15 = vcmask 900096  }
 0xf1d   :  { %v3992_v58 = vpop.permute.xlu1 %3991 }
 0xf1e   :  { %v3994_v47 = vpop.permute.xlu0 %3993 }
 0xf1f   :  { %v3995_v54 = vsel %vm8616_vm8, %v3992_v58, %v3994_v47  ;;  %4022 = vrot.lane.b32.xlu1 %v3994_v47, %s4341_s25  ;;  %vm8628_vm8 = vmmov %vm8624_vm4 }
 0xf20   :  { %4020 = vrot.lane.b32.xlu0 %v3995_v54, %s4341_s25 }
 0xf21   :  { %v3041_v25 = vpop.permute.xlu1 %3040 }
 0xf22   :  { %v3043_v13 = vpop.permute.xlu0 %3042  ;;  %v3051_v12 = vadd.f32 %v3041_v25, %v3013_v8 }
 0xf23   :  { %v3046_v16 = vsel %vm407_vm1, %v3041_v25, %v3043_v13 }
 0xf24   :  { %4018 = vrot.lane.b32.xlu0 %v3992_v58, %s4341_s25  ;;  %v3052_v32 = vadd.f32 %v3046_v16, %v3014_v2  ;;  %v217_v16 = vmul.f32 %v7812_v31, %v8648_v30  ;;  %v8654_v31 = vld [vmem:[#allocation32_spill] sm:$0xff] }
 0xf25   :  { %v3045_v60 = vpop.permute.xlu1 %3044 }
 0xf26   :  { %v3982_v1 = vpop.permute.xlu0 %3981  ;;  %v3047_v44 = vsel %vm407_vm1, %v3043_v13, %v3045_v60  ;;  %v232_v60 = vadd.f32 %v227_v0, %v215_v10 }
 0xf27   :  { %v3053_v27 = vadd.f32 %v3047_v44, %v3015_v45 }
 0xf28   :  { %v270_v15 = vadd.f32 %v265_v48, %v232_v60  ;;  %v8671_v60 = vld [vmem:[#allocation19_spill] sm:$0xff] }
 0xf2c   :  { %v3986_v33 = vpop.permute.xlu0 %3985  ;;  %v3984_v34 = vpop.permute.xlu1 %3983 }
 0xf2d   :  { %v3987_v5 = vsel %vm8624_vm4, %v3982_v1, %v3984_v34  ;;  %v3988_v19 = vsel %vm8625_vm13, %v3984_v34, %v3986_v33  ;;  %vm8647_vm4 = vcmask 916480  }
 0xf2e   :  { %4016 = vrot.lane.b32.xlu0 %v3988_v19, %s4341_s25  ;;  %4014 = vrot.lane.b32.xlu1 %v3987_v5, %s4341_s25  ;;  %v293_v33 = vsel %vm8647_vm4, %v8646_v11, %v8645_v36  ;;  %vm8650_vm13 = vmmov %vm8647_vm4 }
 0xf2f   :  { %v298_v5 = vadd.f32 %v293_v33, %v270_v15  ;;  %v294_v28 = vsel %vm8650_vm13, %v8645_v36, %v8649_v35 }
 0xf31   :  { %v309_v6 = vadd.f32 %v8651_v41, %v298_v5 }
 0xf32   :  { %4008 = vrot.lane.b32.xlu0 %v3052_v32, %s4341_s25  ;;  %4012 = vrot.lane.b32.xlu1 %v3982_v1, %s4341_s25  ;;  %v8641_v1 = vld [vmem:[#allocation13_spill] sm:$0xff]  ;;  %v305_v32 = vsel %vm8653_vm6, %v8651_v41, %v8652_v57 }
 0xf33   :  { %v234_v19 = vadd.f32 %v8641_v1, %v217_v16  ;;  %v339_v45 = vadd.f32 %v8654_v31, %v309_v6 }
 0xf35   :  { %v272_v2 = vadd.f32 %v8644_v26, %v234_v19 }
 0xf36   :  { %4006 = vrot.lane.b32.xlu0 %v3051_v12, %s4341_s25  ;;  %4010 = vrot.lane.b32.xlu1 %v3053_v27, %s4341_s25  ;;  %v8656_v12 = vld [vmem:[#allocation27_spill] sm:$0xff] }
 0xf37   :  { %v300_v44 = vadd.f32 %v8649_v35, %v272_v2 }
 0xf3a   :  { %2728 = vrot.lane.b32.xlu0 %v2721_v9, %s4349_s15  ;;  %2726 = vrot.lane.b32.xlu1 %v2719_v29, %s4349_s15  ;;  %v8655_v29 = vld [vmem:[#allocation33_spill] sm:$0xff]  ;;  %v311_v9 = vadd.f32 %v8652_v57, %v300_v44 }
 0xf3b   :  { %v335_v27 = vsel %vm8657_vm15, %v8656_v12, %v8655_v29 }
 0xf88   :  { %v4029_v43 = vpop.permute.xlu0 %4028 }
 0xf89   :  { %v4027_v55 = vpop.permute.xlu1 %4026 }
 0xf8a   :  { %v4037_v61 = vsel %vm8627_vm5, %v4027_v55, %v4029_v43  ;;  %vm8658_vm5 = vmmov %vm8657_vm15 }
 0xf8b   :  { %4073 = vmatprep.subr.mxu1 %v4037_v61  ;;  %v334_v43 = vsel %vm8658_vm5, %v8654_v31, %v8656_v12  ;;  %v341_v61 = vadd.f32 %v335_v27, %v311_v9 }
 0xf8d   :  { %v4025_v46 = vpop.permute.xlu1 %4024 }
 0xf8e   :  { %v4036_v58 = vsel %vm8628_vm8, %v4025_v46, %v4027_v55  ;;  %v8659_v46 = vld [vmem:[#allocation22_spill] sm:$0xff]  ;;  %vm8664_vm8 = vcmask 777216  }
 0xf8f   :  { %4074 = vmatpush1.msra.mxu1 %v4036_v58  ;;  %v368_v58 = vadd.f32 %v8659_v46, %v339_v45 }
 0xf91   :  { %v4023_v42 = vpop.permute.xlu1 %4022 }
 0xf92   :  { %v4021_v47 = vpop.permute.xlu0 %4020 }
 0xf93   :  { %v4035_v39 = vsel %vm8629_vm3, %v4021_v47, %v4023_v42  ;;  %v8660_v42 = vld [vmem:[#allocation35_spill] sm:$0xff]  ;;  %vm8666_vm3 = vmmov %vm8664_vm8 }
 0xf94   :  { %4075 = vmatprep.subr.mxu1 %v4035_v39  ;;  %v8661_v39 = vld [vmem:[#allocation23_spill] sm:$0xff] }
 0xf96   :  { %v4019_v54 = vpop.permute.xlu0 %4018 }
 0xf97   :  { %v4034_v53 = vsel %vm8630_vm2, %v4019_v54, %v4021_v47  ;;  %v363_v47 = vsel %vm362_vm12, %v8659_v46, %v8660_v42  ;;  %v364_v54 = vsel %vm362_vm12, %v8660_v42, %v8661_v39  ;;  %vm8672_vm12 = vmmov %vm8653_vm6 }
 0xf98   :  { %4076 = vmatpush1.msra.mxu1 %v4034_v53  ;;  %vm8673_vm2 = vmmov %vm8653_vm6 }
 0xfa0   :  { %v4017_v40 = vpop.permute.xlu0 %4016  ;;  %v4015_v63 = vpop.permute.xlu1 %4014 }
 0xfa1   :  { %v4033_v23 = vsel %vm8631_vm0, %v4015_v63, %v4017_v40  ;;  %v370_v40 = vadd.f32 %v364_v54, %v341_v61 }
 0xfa2   :  { %4077 = vmatprep.subr.mxu1 %v4033_v23 }
 0xfa4   :  { %v4009_v24 = vpop.permute.xlu0 %4008  ;;  %v4013_v52 = vpop.permute.xlu1 %4012 }
 0xfa5   :  { %v4032_v25 = vsel %vm8632_vm10, %v4013_v52, %v4015_v63  ;;  %v8662_v63 = vld [vmem:[#allocation16_spill] sm:$0xff]  ;;  %vm8675_vm10 = vmmov %vm8631_vm0 }
 0xfa6   :  { %4078 = vmatpush1.msra.mxu1 %v4032_v25  ;;  %v384_v23 = vadd.f32 %v8662_v63, %v368_v58  ;;  %v8665_v25 = vld [vmem:[#allocation18_spill] sm:$0xff] }
 0xfa8   :  { %v4007_v13 = vpop.permute.xlu0 %4006  ;;  %v4011_v7 = vpop.permute.xlu1 %4010 }
 0xfa9   :  { %v4031_v49 = vsel %vm8633_vm7, %v4009_v24, %v4011_v7  ;;  %v4030_v62 = vsel %vm8634_vm9, %v4007_v13, %v4009_v24  ;;  %v8663_v24 = vld [vmem:[#allocation17_spill] sm:$0xff] }
 0xfaa   :  { %4079 = vmatprep.subr.mxu1 %v4031_v49  ;;  %v379_v52 = vsel %vm8664_vm8, %v8662_v63, %v8663_v24  ;;  %v380_v13 = vsel %vm8666_vm3, %v8663_v24, %v8665_v25 }
 0xfab   :  { %4080 = vmatpush1.msra.mxu1 %v4030_v62  ;;  %v386_v49 = vadd.f32 %v380_v13, %v370_v40  ;;  %v8667_v62 = vld [vmem:[#allocation24_spill] sm:$0xff] }
 0xfac   :  { %4266 = vmatmul.mubr.msk.f32.vlgmr.msra.gmra.mxu1 %vm2288_vm11, %v3977_v18  ;;  %vm8642_vm11 = vmmov %vm8637_vm14  ;;  %v413_v18 = vadd.f32 %v8667_v62, %v384_v23  ;;  %v2729_v0 = vpop.permute.xlu0 %2728  ;;  %v2727_v10 = vpop.permute.xlu1 %2726 }
 0xfad   :  { %v228_v20 = vsel %vm8642_vm11, %v8635_v22, %v8641_v1  ;;  %v8669_v22 = vld [vmem:[#allocation25_spill] sm:$0xff]  ;;  %v430_v1 = vsel %vm8672_vm12, %v8670_v59, %v8671_v60 }
 0xfae   :  { %v233_v3 = vadd.f32 %v228_v20, %v216_v56  ;;  %v434_v48 = vmul.f32 %v8670_v59, %v413_v18  ;;  %v2730_v20 = vsel %vm8673_vm2, %v2727_v10, %v2729_v0 }
 0xfb0   :  { %v271_v34 = vadd.f32 %v266_v38, %v233_v3  ;;  %v2734_v17 = vadd.f32 %v2727_v10, %v434_v48 }
 0xfb2   :  { %v299_v51 = vadd.f32 %v294_v28, %v271_v34 }
 0xfb4   :  { %v310_v8 = vadd.f32 %v305_v32, %v299_v51 }
 0xfb6   :  { %v340_v55 = vadd.f32 %v334_v43, %v310_v8 }
 0xfb8   :  { %v369_v53 = vadd.f32 %v363_v47, %v340_v55 }
 0xfba   :  { %v385_v7 = vadd.f32 %v379_v52, %v369_v53 }
0x106c   :  { %v4115_v50 = vpop.f32.mrf.mxu1 }
0x106d   :  { %4122 = vrot.lane.b32.xlu1 %v4115_v50, %s4349_s15  ;;  %v8668_v50 = vld [vmem:[#allocation36_spill] sm:$0xff] }
0x106e   :  { %v4117_v4 = vpop.f32.mrf.mxu1  ;;  %v409_v21 = vsel %vm407_vm1, %v8668_v50, %v8669_v22 }
0x106f   :  { %4124 = vrot.lane.b32.xlu0 %v4117_v4, %s4349_s15  ;;  %v408_v4 = vsel %vm407_vm1, %v8667_v62, %v8668_v50  ;;  %v415_v14 = vadd.f32 %v409_v21, %v386_v49  ;;  %vm8674_vm1 = vmmov %vm8673_vm2 }
0x1070   :  { %v414_v37 = vadd.f32 %v408_v4, %v385_v7 }
0x1071   :  { %v436_v38 = vmul.f32 %v8671_v60, %v415_v14 }
0x1072   :  { %v435_v56 = vmul.f32 %v430_v1, %v414_v37 }
0x1073   :  { %v2736_v11 = vadd.f32 %v2729_v0, %v436_v38 }
0x1074   :  { %v2735_v3 = vadd.f32 %v2730_v20, %v435_v56 }
0x10df   :  { %v4123_v26 = vpop.permute.xlu1 %4122 }
0x10e0   :  { %v4130_v15 = vadd.f32 %v4123_v26, %v2734_v17 }
0x10e1   :  { %v4125_v36 = vpop.permute.xlu0 %4124 }
0x10e2   :  { %v4126_v33 = vsel %vm8674_vm1, %v4123_v26, %v4125_v36  ;;  %4136 = vrot.lane.b32.xlu1 %v4130_v15, %s4341_s25  ;;  %v4132_v30 = vadd.f32 %v4125_v36, %v2736_v11 }
0x10e3   :  { %v4131_v34 = vadd.f32 %v4126_v33, %v2735_v3 }
0x10e5   :  { %4138 = vrot.lane.b32.xlu0 %v4131_v34, %s4341_s25 }
0x10e6   :  { %4140 = vrot.lane.b32.xlu1 %v4132_v30, %s4341_s25 }
0x1154   :  { %v4137_v16 = vpop.permute.xlu1 %4136 }
0x1157   :  { %v4139_v5 = vpop.permute.xlu0 %4138 }
0x1158   :  { %v4142_v19 = vsel %vm8631_vm0, %v4137_v16, %v4139_v5  ;;  %v4141_v35 = vpop.permute.xlu1 %4140 }
0x1159   :  { %4146 = vst [vmem:[%s7988_s7] sm:$0xff] %v4142_v19  ;;  %v4143_v28 = vsel %vm8675_vm10, %v4139_v5, %v4141_v35 }
0x115a   :  { %4147 = vst [vmem:[%s7988_s7 + $0x8] sm:$0xff] %v4143_v28 }

</bundles_post_ra>
